<compile_context>
chip_gen: v6e
topology: v6e:2x2x1
jax: 0.10.0
libtpu: 0.0.40
codegen_flags: <defaults>
</compile_context>

<pallas_src>
import jax
import jax.numpy as jnp
from jax.experimental import pallas as pl
from jax.experimental.pallas import tpu as pltpu


def attention_kernel(enc_ref, dec_ref, wet_ref, be_ref, wdt_ref, bd_ref,
                     wf_ref, bf_ref, awe_ref, alpha_ref):
    Bt, P, E = enc_ref.shape
    A = wet_ref.shape[1]

    enc = enc_ref[...]                                        # (Bt, P, E)

    # att1 = encoder_att(encoder_out): one big (Bt*P, E) @ (E, A) GEMM (MXU).
    att1 = jnp.dot(enc.reshape(Bt * P, E), wet_ref[...],
                   preferred_element_type=jnp.float32)        # (Bt*P, A)
    att1 = att1.reshape(Bt, P, A) + be_ref[...]               # + bias (1, A)

    # att2 = decoder_att(decoder_hidden): (Bt, D) @ (D, A).
    att2 = jnp.dot(dec_ref[...], wdt_ref[...],
                   preferred_element_type=jnp.float32) + bd_ref[...]   # (Bt, A)

    # relu(att1 + att2.unsqueeze(1))
    h = jnp.maximum(att1 + att2[:, None, :], 0.0)             # (Bt, P, A)

    # full_att(h).squeeze(-1): VPU multiply + lane reduce over A
    # (avoids an N=1 MXU matmul and keeps the pixel axis on lanes).
    att = jnp.sum(h * wf_ref[...][None, :, :], axis=-1) + bf_ref[0]    # (Bt, P)

    # softmax over pixels (lane axis).
    m = jnp.max(att, axis=-1, keepdims=True)
    e = jnp.exp(att - m)
    alpha = e / jnp.sum(e, axis=-1, keepdims=True)            # (Bt, P)

    # attention_weighted_encoding = sum_p alpha[b,p] * enc[b,p,:]
    # VPU multiply + sublane reduce over P -> (Bt, E).
    awe = jnp.sum(enc.astype(jnp.float32) * alpha[:, :, None], axis=1)

    awe_ref[...] = awe.astype(awe_ref.dtype)
    alpha_ref[...] = alpha.astype(alpha_ref.dtype)


def attention_forward(encoder_out, decoder_hidden, we, be, wd, bd, wf, bf,
                      *, bt=8):
    B, P, E = encoder_out.shape
    D = decoder_hidden.shape[1]
    A = we.shape[0]

    # Pre-transpose / reshape parameters once in the wrapper.
    we_t = jnp.asarray(we).T                  # (E, A)
    wd_t = jnp.asarray(wd).T                  # (D, A)
    wf_row = jnp.asarray(wf).reshape(1, A)    # (1, A)
    be2 = jnp.asarray(be).reshape(1, A)
    bd2 = jnp.asarray(bd).reshape(1, A)
    bf1 = jnp.asarray(bf).reshape(1)          # SMEM scalar

    # Pick a sublane-friendly batch tile and pad B up to a multiple of it.
    bt = min(bt, B)
    if bt < B and bt % 8 != 0:
        bt = max(8, (bt // 8) * 8)
    num_tiles = -(-B // bt)
    b_pad = num_tiles * bt
    if b_pad != B:
        pad = b_pad - B
        enc_in = jnp.pad(encoder_out, ((0, pad), (0, 0), (0, 0)))
        dec_in = jnp.pad(decoder_hidden, ((0, pad), (0, 0)))
    else:
        enc_in, dec_in = encoder_out, decoder_hidden

    grid_spec = pltpu.PrefetchScalarGridSpec(
        num_scalar_prefetch=0,
        grid=(num_tiles,),
        in_specs=[
            pl.BlockSpec((bt, P, E), lambda b: (b, 0, 0)),     # encoder_out tile
            pl.BlockSpec((bt, D), lambda b: (b, 0)),           # decoder_hidden tile
            pl.BlockSpec((E, A), lambda b: (0, 0)),            # W_enc^T (resident)
            pl.BlockSpec((1, A), lambda b: (0, 0)),            # b_enc
            pl.BlockSpec((D, A), lambda b: (0, 0)),            # W_dec^T (resident)
            pl.BlockSpec((1, A), lambda b: (0, 0)),            # b_dec
            pl.BlockSpec((1, A), lambda b: (0, 0)),            # W_full row
            pl.BlockSpec(memory_space=pltpu.MemorySpace.SMEM), # b_full scalar
        ],
        out_specs=[
            pl.BlockSpec((bt, E), lambda b: (b, 0)),           # weighted encoding
            pl.BlockSpec((bt, P), lambda b: (b, 0)),           # alpha
        ],
    )

    flops = (2 * b_pad * P * E * A      # encoder_att GEMM
             + 2 * b_pad * D * A        # decoder_att GEMM
             + 2 * b_pad * P * A        # full_att reduce
             + 2 * b_pad * P * E)       # weighted sum
    bytes_accessed = 4 * (enc_in.size + dec_in.size + we_t.size + wd_t.size
                          + wf_row.size + be2.size + bd2.size + bf1.size
                          + b_pad * E + b_pad * P)
    cost = pl.CostEstimate(flops=flops, transcendentals=b_pad * P,
                           bytes_accessed=bytes_accessed)

    awe, alpha = pl.pallas_call(
        attention_kernel,
        out_shape=(
            jax.ShapeDtypeStruct((b_pad, E), encoder_out.dtype),
            jax.ShapeDtypeStruct((b_pad, P), encoder_out.dtype),
        ),
        grid_spec=grid_spec,
        compiler_params=pltpu.CompilerParams(
            dimension_semantics=("parallel",),
            vmem_limit_bytes=32 * 1024 * 1024,
        ),
        cost_estimate=cost,
    )(enc_in, dec_in, we_t, be2, wd_t, bd2, wf_row, bf1)

    if b_pad != B:
        awe = awe[:B]
        alpha = alpha[:B]
    return awe, alpha


def attention_reference(encoder_out, decoder_hidden, we, be, wd, bd, wf, bf):
    att1 = encoder_out @ we.T + be                           # (B, P, A)
    att2 = decoder_hidden @ wd.T + bd                        # (B, A)
    h = jnp.maximum(att1 + att2[:, None, :], 0.0)            # (B, P, A)
    att = (h @ wf.T + bf)[..., 0]                            # (B, P)
    alpha = jax.nn.softmax(att, axis=1)                      # (B, P)
    awe = jnp.sum(encoder_out * alpha[:, :, None], axis=1)   # (B, E)
    return awe, alpha


if __name__ == "__main__":
    # batch, num_pixels, encoder_dim, decoder_dim, attention_dim
    B, P, E, D, A = 16, 128, 128, 64, 128

    key = jax.random.PRNGKey(0)
    k1, k2, k3, k4, k5, k6, k7, k8 = jax.random.split(key, 8)

    encoder_out = jax.random.normal(k1, (B, P, E), jnp.float32)
    decoder_hidden = jax.random.normal(k2, (B, D), jnp.float32)

    # Synthetic parameters in PyTorch Linear layout (out_features, in_features).
    we = 0.1 * jax.random.normal(k3, (A, E), jnp.float32)
    be = 0.1 * jax.random.normal(k4, (A,), jnp.float32)
    wd = 0.1 * jax.random.normal(k5, (A, D), jnp.float32)
    bd = 0.1 * jax.random.normal(k6, (A,), jnp.float32)
    wf = 0.1 * jax.random.normal(k7, (1, A), jnp.float32)
    bf = 0.1 * jax.random.normal(k8, (1,), jnp.float32)

    awe, alpha = attention_forward(encoder_out, decoder_hidden,
                                   we, be, wd, bd, wf, bf, bt=8)
    jax.block_until_ready((awe, alpha))

    awe_ref, alpha_ref = attention_reference(encoder_out, decoder_hidden,
                                             we, be, wd, bd, wf, bf)

    assert jnp.allclose(awe, awe_ref, atol=1e-4, rtol=1e-4)
    assert jnp.allclose(alpha, alpha_ref, atol=1e-4, rtol=1e-4)

    print("KERNEL_OK")
</pallas_src>

<mosaic_0001>
module attributes {stable_mosaic.version = 11 : i64} {
  func.func @attention_kernel(%arg0: i32, %arg1: memref<8x128x128xf32, #tpu.memory_space<vmem>>, %arg2: memref<8x64xf32, #tpu.memory_space<vmem>>, %arg3: memref<128x128xf32, #tpu.memory_space<vmem>>, %arg4: memref<1x128xf32, #tpu.memory_space<vmem>>, %arg5: memref<64x128xf32, #tpu.memory_space<vmem>>, %arg6: memref<1x128xf32, #tpu.memory_space<vmem>>, %arg7: memref<1x128xf32, #tpu.memory_space<vmem>>, %arg8: memref<1xf32, #tpu.memory_space<smem>>, %arg9: memref<8x128xf32, #tpu.memory_space<vmem>>, %arg10: memref<8x128xf32, #tpu.memory_space<vmem>>) attributes {dimension_semantics = [#tpu.dimension_semantics<parallel>], iteration_bounds = array<i64: 2>, scalar_prefetch = 0 : i64, scratch_operands = 0 : i64, tpu.core_type = #tpu.core_type<tc>, window_params = [{transform_indices = @transform_0, window_bounds = array<i64: 8, 128, 128>}, {transform_indices = @transform_1, window_bounds = array<i64: 8, 64>}, {pipeline_mode = #tpu.pipeline_mode<synchronous>, transform_indices = @transform_2, window_bounds = array<i64: 128, 128>}, {pipeline_mode = #tpu.pipeline_mode<synchronous>, transform_indices = @transform_3, window_bounds = array<i64: 1, 128>}, {pipeline_mode = #tpu.pipeline_mode<synchronous>, transform_indices = @transform_4, window_bounds = array<i64: 64, 128>}, {pipeline_mode = #tpu.pipeline_mode<synchronous>, transform_indices = @transform_5, window_bounds = array<i64: 1, 128>}, {pipeline_mode = #tpu.pipeline_mode<synchronous>, transform_indices = @transform_6, window_bounds = array<i64: 1, 128>}, {transform_indices = @transform_7, window_bounds = array<i64: 1>}, {transform_indices = @transform_8, window_bounds = array<i64: 8, 128>}, {transform_indices = @transform_9, window_bounds = array<i64: 8, 128>}]} {
    %c0 = arith.constant 0 : index
    %c0_0 = arith.constant 0 : index
    %c0_1 = arith.constant 0 : index
    %0 = vector.load %arg1[%c0, %c0_0, %c0_1] : memref<8x128x128xf32, #tpu.memory_space<vmem>>, vector<8x128x128xf32>
    %1 = vector.shape_cast %0 : vector<8x128x128xf32> to vector<1024x128xf32>
    %c0_2 = arith.constant 0 : index
    %c0_3 = arith.constant 0 : index
    %2 = vector.load %arg3[%c0_2, %c0_3] : memref<128x128xf32, #tpu.memory_space<vmem>>, vector<128x128xf32>
    %cst = arith.constant dense<0.000000e+00> : vector<1024x128xf32>
    %3 = tpu.matmul %1, %2, %cst {dimension_numbers = #tpu.dot_dimension_numbers<[1], [0], [0], [1], [0, 0, 1, 1], [], []>} : vector<1024x128xf32>, vector<128x128xf32>, vector<1024x128xf32> -> vector<1024x128xf32>
    %4 = vector.shape_cast %3 : vector<1024x128xf32> to vector<8x128x128xf32>
    %c0_4 = arith.constant 0 : index
    %c0_5 = arith.constant 0 : index
    %5 = vector.load %arg4[%c0_4, %c0_5] : memref<1x128xf32, #tpu.memory_space<vmem>>, vector<1x128xf32>
    %6 = vector.shape_cast %5 : vector<1x128xf32> to vector<1x1x128xf32>
    %7 = vector.broadcast %6 : vector<1x1x128xf32> to vector<8x128x128xf32>
    %8 = arith.addf %4, %7 : vector<8x128x128xf32>
    %c0_6 = arith.constant 0 : index
    %c0_7 = arith.constant 0 : index
    %9 = vector.load %arg2[%c0_6, %c0_7] : memref<8x64xf32, #tpu.memory_space<vmem>>, vector<8x64xf32>
    %c0_8 = arith.constant 0 : index
    %c0_9 = arith.constant 0 : index
    %10 = vector.load %arg5[%c0_8, %c0_9] : memref<64x128xf32, #tpu.memory_space<vmem>>, vector<64x128xf32>
    %cst_10 = arith.constant dense<0.000000e+00> : vector<8x128xf32>
    %11 = tpu.matmul %9, %10, %cst_10 {dimension_numbers = #tpu.dot_dimension_numbers<[1], [0], [0], [1], [0, 0, 1, 1], [], []>} : vector<8x64xf32>, vector<64x128xf32>, vector<8x128xf32> -> vector<8x128xf32>
    %c0_11 = arith.constant 0 : index
    %c0_12 = arith.constant 0 : index
    %12 = vector.load %arg6[%c0_11, %c0_12] : memref<1x128xf32, #tpu.memory_space<vmem>>, vector<1x128xf32>
    %13 = vector.broadcast %12 : vector<1x128xf32> to vector<8x128xf32>
    %14 = arith.addf %11, %13 : vector<8x128xf32>
    %15 = vector.shape_cast %14 : vector<8x128xf32> to vector<8x1x128xf32>
    %16 = vector.broadcast %15 : vector<8x1x128xf32> to vector<8x128x128xf32>
    %17 = arith.addf %8, %16 : vector<8x128x128xf32>
    %cst_13 = arith.constant 0.000000e+00 : f32
    %18 = vector.broadcast %cst_13 : f32 to vector<8x128x128xf32>
    %19 = arith.maximumf %17, %18 : vector<8x128x128xf32>
    %c0_14 = arith.constant 0 : index
    %c0_15 = arith.constant 0 : index
    %20 = vector.load %arg7[%c0_14, %c0_15] : memref<1x128xf32, #tpu.memory_space<vmem>>, vector<1x128xf32>
    %21 = vector.shape_cast %20 : vector<1x128xf32> to vector<1x1x128xf32>
    %22 = vector.broadcast %21 : vector<1x1x128xf32> to vector<8x128x128xf32>
    %23 = arith.mulf %19, %22 : vector<8x128x128xf32>
    %cst_16 = arith.constant dense<0.000000e+00> : vector<8x128xf32>
    %24 = vector.multi_reduction <add>, %23, %cst_16 [2] : vector<8x128x128xf32> to vector<8x128xf32>
    %c0_17 = arith.constant 0 : index
    %25 = memref.load %arg8[%c0_17] : memref<1xf32, #tpu.memory_space<smem>>
    %26 = vector.broadcast %25 : f32 to vector<8x128xf32>
    %27 = arith.addf %24, %26 : vector<8x128xf32>
    %cst_18 = arith.constant dense<0xFF800000> : vector<8xf32>
    %28 = vector.multi_reduction <maximumf>, %27, %cst_18 [1] : vector<8x128xf32> to vector<8xf32>
    %29 = vector.shape_cast %28 : vector<8xf32> to vector<8x1xf32>
    %30 = vector.broadcast %29 : vector<8x1xf32> to vector<8x128xf32>
    %31 = arith.subf %27, %30 : vector<8x128xf32>
    %32 = math.exp %31 : vector<8x128xf32>
    %cst_19 = arith.constant dense<0.000000e+00> : vector<8xf32>
    %33 = vector.multi_reduction <add>, %32, %cst_19 [1] : vector<8x128xf32> to vector<8xf32>
    %34 = vector.shape_cast %33 : vector<8xf32> to vector<8x1xf32>
    %35 = vector.broadcast %34 : vector<8x1xf32> to vector<8x128xf32>
    %36 = arith.divf %32, %35 : vector<8x128xf32>
    %37 = vector.shape_cast %36 : vector<8x128xf32> to vector<8x128x1xf32>
    %38 = vector.broadcast %37 : vector<8x128x1xf32> to vector<8x128x128xf32>
    %39 = arith.mulf %0, %38 : vector<8x128x128xf32>
    %cst_20 = arith.constant dense<0.000000e+00> : vector<8x128xf32>
    %40 = vector.multi_reduction <add>, %39, %cst_20 [1] : vector<8x128x128xf32> to vector<8x128xf32>
    %c0_21 = arith.constant 0 : index
    %c0_22 = arith.constant 0 : index
    %41 = vector.load %arg9[%c0_21, %c0_22] : memref<8x128xf32, #tpu.memory_space<vmem>>, vector<8x128xf32>
    tpu.vector_store %arg9[%c0_21, %c0_22], %40 {strides = array<i32>} : memref<8x128xf32, #tpu.memory_space<vmem>>, vector<8x128xf32>,
    %c0_23 = arith.constant 0 : index
    %c0_24 = arith.constant 0 : index
    %42 = vector.load %arg10[%c0_23, %c0_24] : memref<8x128xf32, #tpu.memory_space<vmem>>, vector<8x128xf32>
    tpu.vector_store %arg10[%c0_23, %c0_24], %36 {strides = array<i32>} : memref<8x128xf32, #tpu.memory_space<vmem>>, vector<8x128xf32>,
    return
  }
  func.func @transform_0(%arg0: i32) -> (i32, i32, i32) {
    %c0_i32 = arith.constant 0 : i32
    %c0_i32_0 = arith.constant 0 : i32
    %c0_i32_1 = arith.constant 0 : i32
    return %arg0, %c0_i32, %c0_i32_0 : i32, i32, i32
  }
  func.func @transform_1(%arg0: i32) -> (i32, i32) {
    %c0_i32 = arith.constant 0 : i32
    %c0_i32_0 = arith.constant 0 : i32
    return %arg0, %c0_i32 : i32, i32
  }
  func.func @transform_2(%arg0: i32) -> (i32, i32) {
    %c0_i32 = arith.constant 0 : i32
    %c0_i32_0 = arith.constant 0 : i32
    %c0_i32_1 = arith.constant 0 : i32
    return %c0_i32, %c0_i32_0 : i32, i32
  }
  func.func @transform_3(%arg0: i32) -> (i32, i32) {
    %c0_i32 = arith.constant 0 : i32
    %c0_i32_0 = arith.constant 0 : i32
    %c0_i32_1 = arith.constant 0 : i32
    return %c0_i32, %c0_i32_0 : i32, i32
  }
  func.func @transform_4(%arg0: i32) -> (i32, i32) {
    %c0_i32 = arith.constant 0 : i32
    %c0_i32_0 = arith.constant 0 : i32
    %c0_i32_1 = arith.constant 0 : i32
    return %c0_i32, %c0_i32_0 : i32, i32
  }
  func.func @transform_5(%arg0: i32) -> (i32, i32) {
    %c0_i32 = arith.constant 0 : i32
    %c0_i32_0 = arith.constant 0 : i32
    %c0_i32_1 = arith.constant 0 : i32
    return %c0_i32, %c0_i32_0 : i32, i32
  }
  func.func @transform_6(%arg0: i32) -> (i32, i32) {
    %c0_i32 = arith.constant 0 : i32
    %c0_i32_0 = arith.constant 0 : i32
    %c0_i32_1 = arith.constant 0 : i32
    return %c0_i32, %c0_i32_0 : i32, i32
  }
  func.func @transform_7(%arg0: i32) -> i32 {
    %c0_i32 = arith.constant 0 : i32
    %c0_i32_0 = arith.constant 0 : i32
    return %c0_i32 : i32
  }
  func.func @transform_8(%arg0: i32) -> (i32, i32) {
    %c0_i32 = arith.constant 0 : i32
    %c0_i32_0 = arith.constant 0 : i32
    return %arg0, %c0_i32 : i32, i32
  }
  func.func @transform_9(%arg0: i32) -> (i32, i32) {
    %c0_i32 = arith.constant 0 : i32
    %c0_i32_0 = arith.constant 0 : i32
    return %arg0, %c0_i32 : i32, i32
  }
}

</mosaic_0001>

<bundles_post_ra>
// kernel: tpu_custom_call.1
= control target key start
LH: loop header
LB: loop body
LE: loop exit
PB: predicated region body
PF: predicated region fallthrough
CT: control target
= control target key end

     0   :  { %s13008_s0 = inlined_call_operand.hbm [shape: f32[16,128,128], index: 0, kind: input, shape index: {}]   ;;  %s13009_s1 = inlined_call_operand.hbm [shape: f32[16,64], index: 1, kind: input, shape index: {}]   ;;  %s13010_s2 = inlined_call_operand.hbm [shape: f32[128,128], index: 2, kind: input, shape index: {}]   ;;  %s13011_s3 = inlined_call_operand.vmem [shape: f32[1,128], index: 3, kind: input, shape index: {}]   ;;  %s13012_s4 = inlined_call_operand.hbm [shape: f32[64,128], index: 4, kind: input, shape index: {}]   ;;  %s13013_s5 = inlined_call_operand.vmem [shape: f32[1,128], index: 5, kind: input, shape index: {}]   ;;  %s13014_s6 = inlined_call_operand.vmem [shape: f32[1,128], index: 6, kind: input, shape index: {}]   ;;  %s13015_s7 = inlined_call_operand.<no memory space> [shape: f32[1], index: 7, kind: input, shape index: {}]   ;;  %s13016_s8 = inlined_call_operand.hbm [shape: f32[16,128], index: 8, kind: output, shape index: {0}]   ;;  %s13017_s9 = inlined_call_operand.hbm [shape: f32[16,128], index: 9, kind: output, shape index: {1}]  }
   0x1   :  { %13315 = sst [smem:[#allocation219_spill]] %s13008_s0 }
   0x2   :  { %13316 = sst [smem:[#allocation220_spill]] %s13010_s2 }
   0x3   :  { %13317 = sst [smem:[#allocation221_spill]] %s13012_s4 }
   0x4   :  { %15 = sst [smem:[#allocation2]] %s13015_s7 }
   0x5   :  { %16 = vsyncpa [#allocation4], 0 }
   0x6   :  { %18 = vsyncpa [#allocation4 + $0x1], 0 }
   0x7   :  { %19 = vsyncpa [#allocation7], 0 }
   0x8   :  { %21 = vsyncpa [#allocation7 + $0x1], 0 }
   0x9   :  { %22 = vsyncpa [#allocation10], 0 }
   0xa   :  { %23 = vsyncpa [#allocation5], 0 }
   0xb   :  { %25 = vsyncpa [#allocation5 + $0x1], 0 }
   0xc   :  { %26 = vsyncpa [#allocation13], 0 }
   0xd   :  { %28 = vsyncpa [#allocation13 + $0x1], 0  ;;  %s7932_s11 = smov 0   ;;  %s7934_s12 = smov 0  }
   0xe   :  { %s7936_s13 = smov 0   ;;  %s7938_s14 = smov 0  }
   0xf LB: > { %13318 = sst [smem:[#allocation20_spill]] %s7861_s13  ;;  %s7953_s7 = sadd.s32 4294967295, %s7865_s14   ;;  %s7865_s14 = sphi %s7938_s14, %s14312_s14   ;;  %s7861_s13 = sphi %s7936_s13, %s14314_s13   ;;  %s7857_s12 = sphi %s7934_s12, %s14316_s12   ;;  %s7853_s11 = sphi %s7932_s11, %s14315_s11  }
  0x10   : > { %s6707_s15 = sadd.s32 4294967294, %s7865_s14   ;;  %p54_p0 = scmp.ne.s32.totalorder %s7857_s12, %s7853_s11 }
  0x11   : > { %p13020_p1 = scmp.eq.s32.totalorder %s7953_s7, 0  ;;  %p230_p2 = scmp.eq.s32.totalorder %s7953_s7, 1 }
  0x12   : > { %p236_p3 = scmp.eq.s32.totalorder %s6707_s15, 1  ;;  %p6708_p5 = scmp.ge.s32.totalorder %s7865_s14, 1 }
  0x13   : > { %p7962_p4 = por %p13020_p1, %p54_p0  ;;  %p269_p7 = scmp.lt.s32.totalorder %s7865_s14, 3 }
  0x14   : > { %p7967_p6 = por %p236_p3, %p54_p0  ;;  %s7867_s19 = smov [#allocation8]  }
  0x15   : > { %s13319_s16 = scalar_select %p7962_p4, 1, 0 }
  0x16   : > { %s13320_s17 = scalar_select %p7967_p6, 1, 0 }
  0x17   : > { %p7972_p8 = pnand %p6708_p5, %p269_p7  ;;  %s281_s20 = sshll.u32 %s7867_s19, 4  ;;  %s282_s20 = int_to_ptr.vmem [resolvable:$true] %s281_s20 }
  0x18   : > { %s7868_s22 = smov [#allocation9]   ;;  %s7662_s24 = scalar_lea.vmem %s282_s20, 2048 }
  0x19   : > { %s13321_s18 = scalar_select %p7972_p8, 1, 0 }
  0x1a   : > { %p7181_p9 = pneg %p7972_p8  ;;  %s297_s23 = sshll.u32 %s7868_s22, 4  ;;  %s298_s23 = int_to_ptr.vmem [resolvable:$true] %s297_s23 }
  0x1b   : > { %p7663_p13 = scmp.ne.s32.totalorder %s282_s20, %s7662_s24  ;;  %p7670_p5 = scmp.lt.s32.totalorder %s282_s20, %s282_s20 }
  0x1c   : > { %p7981_p11 = pnand %p7181_p9, %p13020_p1  ;;  %p7671_p7 = scmp.lt.s32.totalorder %s7662_s24, %s7662_s24 }
  0x1e   : > { %p7653_p12 = pneg %p7981_p11  ;;  %p7672_p10 = por %p7671_p7, %p7670_p5 }
  0x20   : > { %p7665_p0 = pnand %p7663_p13, %p7653_p12 }
  0x22   : > { %p7666_p3 = pneg %p7665_p0 }
  0x24   : > { %p7673_p9 = pnand %p7672_p10, %p7666_p3 }
  0x26   : > { %7676 = shalt.err (!%p7673_p9)
}
  0x27   : > { %s13018_s25 = smov 128   ;;  %s13019_s26 = smov 8  }
  0x28   : > { %s13323_s2 = sld [smem:[#allocation220_spill]]  ;;  %s7688_s29 = scalar_lea.vmem %s298_s23, 1024 }
  0x29   : > { %p7689_p13 = scmp.ne.s32.totalorder %s298_s23, %s7688_s29  ;;  %p7696_p10 = scmp.lt.s32.totalorder %s298_s23, %s298_s23 }
  0x2a   : > { %p7697_p3 = scmp.lt.s32.totalorder %s7688_s29, %s7688_s29 }
  0x2b   : > { %p7691_p0 = pnand %p7689_p13, %p7653_p12 }
  0x2c   : > { %p7698_p7 = por %p7697_p3, %p7696_p10 }
  0x2d   : > { %p7692_p5 = pneg %p7691_p0 }
  0x2e   : > { %7184 = dma.hbm_to_vmem [thread:$0]  (!%p7981_p11), %s13323_s2, 2048, %s282_s20, [#allocation7], %s13018_s25, %s13018_s25, %s13019_s26  }
  0x2f   : > { %p7699_p9 = pnand %p7698_p7, %p7692_p5 }
  0x31   : > { %7702 = shalt.err (!%p7699_p9)
}
  0x32   : > { %s13324_s4 = sld [smem:[#allocation221_spill]]  ;;  %s8010_s15 = sadd.s32 1, %s7865_s14  }
  0x33   : > { %13325 = sst [smem:[#allocation21_spill]] %s8010_s15  ;;  %s41_s19 = sadd.s32 1, %s7861_s13 }
  0x34   : > { %s38_s20 = ssub.s32 %s7865_s14, %s8010_s15  ;;  %p48_p12 = scmp.ne.s32.totalorder %s7861_s13, %s7857_s12 }
  0x35   : > { %p39_p13 = scmp.eq.s32.totalorder %s38_s20, 0  ;;  %p49_p0 = scmp.eq.s32.totalorder %s7865_s14, 0 }
  0x36   : > { %p8020_p5 = por %p230_p2, %p48_p12  ;;  %p7204_p10 = scmp.lt.s32.totalorder %s7865_s14, 2 }
  0x37   : > { %s8026_s22 = scalar_select %p39_p13, %s7861_s13, %s41_s19  }
  0x38   : > { %7187 = dma.hbm_to_vmem [thread:$0]  (!%p7981_p11), %s13324_s4, 1024, %s298_s23, [#allocation10], %s13018_s25, %s13018_s25, %s13019_s26  }
  0x39   : > { %s13326_s21 = scalar_select %p8020_p5, 1, 0 }
  0x3a   : > { %13327 = sst [smem:[#allocation22_spill]] %s8026_s22  ;;  %p50_p3 = por %p49_p0, %p48_p12 }
  0x3b   : > { %s8029_s24 = sand.u32 1, %s7861_s13   ;;  %s6736_s27 = sshll.u32 %s7865_s14, 14 }
  0x3c   : > { %s6712_s23 = sshll.u32 %s8029_s24, 10  ;;  %s13328_s0 = sld [smem:[#allocation219_spill]] }
  0x3d   : > { %s324_s10 = scalar_lea.vmem [#allocation3], %s6712_s23  ;;  %p8040_p2 = pnand %p7204_p10, %p50_p3 }
  0x3e   : > { %s332_s20 = sshll.u32 %s324_s10, 4  ;;  %s321_s2 = scalar_lea.sflag [#allocation4], %s8029_s24  ;;  %s8038_s20 = int_to_ptr.vmem [resolvable:$true] %s332_s20 }
  0x3f   : > { %p7705_p7 = pneg %p8040_p2 }
  0x42   : > { %s8036_s30 = scalar_lea.hbm %s13328_s0, %s6736_s27  ;;  %s7708_s28 = scalar_lea.hbm %s13328_s0, 32768 }
  0x43   : > { %s7703_s4 = scalar_lea.hbm %s8036_s30, 16384  ;;  %p7709_p13 = scmp.lt.s32.totalorder %s8036_s30, %s13328_s0 }
  0x44   : > { %p7704_p11 = scmp.ne.s32.totalorder %s8036_s30, %s7703_s4  ;;  %p7710_p0 = scmp.lt.s32.totalorder %s7708_s28, %s7703_s4 }
  0x46   : > { %p7706_p9 = pnand %p7705_p7, %p7704_p11  ;;  %p7711_p10 = por %p7710_p0, %p7709_p13 }
  0x48   : > { %p7707_p12 = pneg %p7706_p9 }
  0x4a   : > { %p7712_p3 = pnand %p7711_p10, %p7707_p12 }
  0x4c   : > { %7715 = shalt.err (!%p7712_p3)
}
  0x4d   : > { %s7716_s25 = scalar_lea.vmem %s8038_s20, 16384  ;;  %s7871_s23 = smov [#allocation3]  }
  0x4e   : > { %p7717_p1 = scmp.ne.s32.totalorder %s8038_s20, %s7716_s25  ;;  %s7721_s27 = sshll.u32 %s7871_s23, 4  ;;  %s7722_s27 = int_to_ptr.vmem [resolvable:$false] %s7721_s27 }
  0x4f   : > { %s7723_s26 = scalar_lea.vmem %s7722_s27, 32768  ;;  %p7724_p6 = scmp.lt.s32.totalorder %s8038_s20, %s7722_s27 }
  0x50   : > { %p7719_p11 = pnand %p7717_p1, %p7705_p7  ;;  %p7725_p5 = scmp.lt.s32.totalorder %s7723_s26, %s7716_s25 }
  0x52   : > { %p7720_p9 = pneg %p7719_p11  ;;  %p7726_p4 = por %p7725_p5, %p7724_p6 }
  0x54   : > { %p7727_p13 = pnand %p7726_p4, %p7720_p9 }
  0x56   : > { %7730 = shalt.err (!%p7727_p13)
}
  0x57   : > { %s13330_s4 = smov 8   ;;  %s13331_s28 = smov 128  }
  0x58   : > { %7191 = dma.hbm_to_vmem [thread:$0]  (!%p8040_p2), %s8036_s30, 16384, %s8038_s20, %s321_s2, %s13331_s28, %s13331_s28, %s13330_s4  }
  0x59   : > { %s6717_s29 = sshll.u32 %s7865_s14, 7  ;;  %s13332_s23 = sshll.u32 %s8029_s24, 3 }
  0x5a   : > { %s8080_s26 = scalar_lea.hbm %s13009_s1, %s6717_s29  ;;  %s346_s27 = scalar_lea.vmem [#allocation6], %s13332_s23 }
  0x5b   : > { %s353_s0 = sshll.u32 %s346_s27, 4  ;;  %s13333_s22 = sand.u32 1, %s7865_s14   ;;  %s354_s0 = int_to_ptr.vmem [resolvable:$true] %s353_s0 }
  0x5c   : > { %s343_s13 = scalar_lea.sflag [#allocation7], %s13333_s22  ;;  %s7731_s15 = scalar_lea.hbm %s8080_s26, 128 }
  0x5d   : > { %p7732_p1 = scmp.ne.s32.totalorder %s8080_s26, %s7731_s15  ;;  %s7736_s20 = scalar_lea.hbm %s13009_s1, 256 }
  0x5e   : > { %p7737_p5 = scmp.lt.s32.totalorder %s8080_s26, %s13009_s1  ;;  %p7738_p12 = scmp.lt.s32.totalorder %s7736_s20, %s7731_s15 }
  0x5f   : > { %p7734_p4 = pnand %p7732_p1, %p7705_p7 }
  0x60   : > { %p7739_p0 = por %p7738_p12, %p7737_p5 }
  0x61   : > { %p7735_p6 = pneg %p7734_p4 }
  0x63   : > { %p7740_p10 = pnand %p7739_p0, %p7735_p6 }
  0x65   : > { %7743 = shalt.err (!%p7740_p10)
}
  0x66   : > { %s7744_s28 = scalar_lea.vmem %s354_s0, 128  ;;  %s7872_s22 = smov [#allocation6]  }
  0x67   : > { %p7745_p3 = scmp.ne.s32.totalorder %s354_s0, %s7744_s28  ;;  %s7749_s29 = sshll.u32 %s7872_s22, 4  ;;  %s7750_s29 = int_to_ptr.vmem [resolvable:$false] %s7749_s29 }
  0x68   : > { %s7751_s10 = scalar_lea.vmem %s7750_s29, 256  ;;  %p7752_p13 = scmp.lt.s32.totalorder %s354_s0, %s7750_s29 }
  0x69   : > { %p7747_p11 = pnand %p7745_p3, %p7705_p7  ;;  %p7753_p1 = scmp.lt.s32.totalorder %s7751_s10, %s7744_s28 }
  0x6b   : > { %p7748_p9 = pneg %p7747_p11  ;;  %p7754_p4 = por %p7753_p1, %p7752_p13 }
  0x6d   : > { %p7755_p8 = pnand %p7754_p4, %p7748_p9 }
  0x6f   : > { %7758 = shalt.err (!%p7755_p8)
}
  0x70   : > { %7194 = dma.hbm_to_vmem [thread:$0]  (!%p8040_p2), %s8080_s26, 128, %s354_s0, %s343_s13  }
  0x71   : > { %p13334_p6 = scmp.ne.s32.totalorder %s13321_s18, 0 }
  0x73   : > { %362 = sbr.rel (%p13334_p6) target bundleno = 2048 (0x800), region = 52 }
  0x78   : > { %s8107_s15 = sand.u32 1, %s7857_s12   ;;  %p13335_p7 = scmp.ne.s32.totalorder %s13319_s16, 0 }
  0x79   : > { %s6719_s25 = sshll.u32 %s8107_s15, 10  ;;  %s365_s23 = scalar_lea.sflag [#allocation4], %s8107_s15 }
  0x7a   : > { %s8111_s27 = scalar_lea.vmem [#allocation3], %s6719_s25 }
  0x7b   : > { %7828 = dma.done.wait (%p13335_p7), %s365_s23, 16384  }
  0x7c   : > { %7830 = vsyncadd (%p13335_p7), %s365_s23, 4294950912  ;;  %s373_s0 = sand.u32 1, %s7953_s7   ;;  %s8119_s13 = sshll.u32 %s8107_s15, 3 }
  0x7d   : > { %s374_s18 = scalar_lea.sflag [#allocation7], %s373_s0  ;;  %s377_s19 = scalar_lea.vmem [#allocation6], %s8119_s13 }
  0x7e   : > { %7832 = dma.done.wait (%p13335_p7), %s374_s18, 128  }
  0x7f   : > { %7834 = vsyncadd (%p13335_p7), %s374_s18, 4294967168  ;;  %p13336_p8 = scmp.eq.s32.totalorder %s7953_s7, 0 }
  0x81   : > { %7836 = dma.done.wait (%p13336_p8), [#allocation7], 2048   ;;  %p13337_p2 = pmov %p13336_p8 }
  0x83   : > { %7838 = vsyncadd (%p13337_p2), [#allocation7], 4294965248  ;;  %p13338_p5 = pmov %p13337_p2 }
  0x84   : > { %p13339_p12 = pmov %p13337_p2 }
  0x85   : > { %7840 = dma.done.wait (%p13338_p5), [#allocation10], 1024  }
  0x86   : > { %7842 = vsyncadd (%p13339_p12), [#allocation10], 4294966272  ;;  %v574_v0 = vld [vmem:[#allocation8 + $0x78] sm:$0xff]  ;;  %v573_v1 = vld [vmem:[#allocation8 + $0x70] sm:$0xff]  ;;  %v7873_v21 = vmov 0.0   ;;  %vm7874_vm0 = vmmov 0  }
  0x87   : > { %7133 = vmatprep.subr.mxu1 %v574_v0  ;;  %6890 = vmatprep.subr.mxu0 %v574_v0  ;;  %v572_v2 = vld [vmem:[#allocation8 + $0x68] sm:$0xff]  ;;  %v571_v3 = vld [vmem:[#allocation8 + $0x60] sm:$0xff]  ;;  %v570_v4 = vld [vmem:[#allocation8 + $0x58] sm:$0xff]  ;;  %vm1431_vm1 = vcmask 523264   ;;  %s2242_s22 = sld [smem:[#allocation2]]  ;;  %vm2511_vm2 = vcmask 130112  }
  0x88   : > { %7149 = vmatpush3.msra.mxu1 %v574_v0  ;;  %6891 = vmatpush3.msra.mxu0 %v574_v0  ;;  %v569_v5 = vld [vmem:[#allocation8 + $0x50] sm:$0xff]  ;;  %v568_v6 = vld [vmem:[#allocation8 + $0x48] sm:$0xff]  ;;  %v567_v7 = vld [vmem:[#allocation8 + $0x40] sm:$0xff]  ;;  %vm2518_vm3 = vcmask 195712   ;;  %vm2525_vm4 = vcmask 261312   ;;  %vm13097_vm5 = vcmask 326912  }
  0x89   : > { %7134 = vmatprep.subr.mxu1 %v573_v1  ;;  %6892 = vmatprep.subr.mxu0 %v573_v1  ;;  %v566_v8 = vld [vmem:[#allocation8 + $0x38] sm:$0xff]  ;;  %v565_v9 = vld [vmem:[#allocation8 + $0x30] sm:$0xff]  ;;  %v564_v10 = vld [vmem:[#allocation8 + $0x28] sm:$0xff]  ;;  %vm2539_vm6 = vcmask 392512   ;;  %vm2546_vm7 = vcmask 458112   ;;  %vm2553_vm8 = vcmask 523712  }
  0x8a   : > { %7150 = vmatpush3.msra.mxu1 %v573_v1  ;;  %6893 = vmatpush3.msra.mxu0 %v573_v1  ;;  %v563_v11 = vld [vmem:[#allocation8 + $0x20] sm:$0xff]  ;;  %v562_v12 = vld [vmem:[#allocation8 + $0x18] sm:$0xff]  ;;  %v561_v13 = vld [vmem:[#allocation8 + $0x10] sm:$0xff]  ;;  %vm2560_vm9 = vcmask 589312   ;;  %vm2567_vm10 = vcmask 654912   ;;  %vm13152_vm11 = vcmask 720512  }
  0x8b   : > { %7135 = vmatprep.subr.mxu1 %v572_v2  ;;  %6894 = vmatprep.subr.mxu0 %v572_v2  ;;  %v560_v14 = vld [vmem:[#allocation8 + $0x8] sm:$0xff]  ;;  %v497_v15 = vld [vmem:[%s8111_s27 + $0x210] sm:$0xff]  ;;  %v1423_v18 = vld [vmem:[#allocation9 + $0x38] sm:$0xff]  ;;  %vm2581_vm12 = vcmask 786112   ;;  %vm13153_vm13 = vcmask 851712   ;;  %vm13305_vm14 = vcmask 917312  }
  0x8c   : > { %7151 = vmatpush3.msra.mxu1 %v572_v2  ;;  %6895 = vmatpush3.msra.mxu0 %v572_v2  ;;  %v559_v16 = vld [vmem:[#allocation8] sm:$0xff]  ;;  %v498_v17 = vld [vmem:[%s8111_s27 + $0x218] sm:$0xff]  ;;  %v431_v19 = vld [vmem:[%s8111_s27] sm:$0xff]  ;;  %vm2602_vm15 = vcmask 982912   ;;  %s6731_s29 = sshll.u32 %s7953_s7, 7  ;;  %s429_s10 = scalar_lea.vmem [#allocation12], %s8119_s13 }
  0x8d   : > { %7136 = vmatprep.subr.mxu1 %v571_v3  ;;  %6896 = vmatprep.subr.mxu0 %v571_v3  ;;  %v499_v20 = vld [vmem:[%s8111_s27 + $0x220] sm:$0xff]  ;;  %v432_v22 = vld [vmem:[%s8111_s27 + $0x8] sm:$0xff]  ;;  %v433_v24 = vld [vmem:[%s8111_s27 + $0x10] sm:$0xff]  ;;  %s6563_s25 = sshll.u32 %s429_s10, 4  ;;  %s12935_s18 = scalar_lea.hbm %s13017_s9, %s6731_s29  ;;  %s12937_s25 = int_to_ptr.vmem [resolvable:$true] %s6563_s25 }
  0x8e   : > { %7152 = vmatpush3.msra.mxu1 %v571_v3  ;;  %6897 = vmatpush3.msra.mxu0 %v571_v3  ;;  %v500_v23 = vld [vmem:[%s8111_s27 + $0x228] sm:$0xff]  ;;  %v501_v25 = vld [vmem:[%s8111_s27 + $0x230] sm:$0xff]  ;;  %v1422_v26 = vld [vmem:[#allocation9 + $0x30] sm:$0xff]  ;;  %p14306_p10 = scmp.ne.s32.totalorder %s13326_s21, 0  ;;  %s7877_s16 = smov [#allocation12]  }
  0x8f   : > { %7137 = vmatprep.subr.mxu1 %v570_v4  ;;  %6898 = vmatprep.subr.mxu0 %v570_v4  ;;  %v434_v27 = vld [vmem:[%s8111_s27 + $0x18] sm:$0xff]  ;;  %v435_v30 = vld [vmem:[%s8111_s27 + $0x20] sm:$0xff]  ;;  %v1420_v32 = vld [vmem:[#allocation9 + $0x20] sm:$0xff]  ;;  %s7763_s26 = sshll.u32 %s7877_s16, 4  ;;  %s7764_s26 = int_to_ptr.vmem [resolvable:$false] %s7763_s26 }
  0x90   : > { %7153 = vmatpush3.msra.mxu1 %v570_v4  ;;  %6899 = vmatpush3.msra.mxu0 %v570_v4  ;;  %v1421_v28 = vld [vmem:[#allocation9 + $0x28] sm:$0xff]  ;;  %v503_v31 = vld [vmem:[%s8111_s27 + $0x240] sm:$0xff]  ;;  %v436_v33 = vld [vmem:[%s8111_s27 + $0x28] sm:$0xff]  ;;  %s7765_s2 = scalar_lea.vmem %s7764_s26, 256  ;;  %p7766_p9 = scmp.lt.s32.totalorder %s12937_s25, %s7764_s26 }
  0x91   : > { %7138 = vmatprep.subr.mxu1 %v569_v5  ;;  %6900 = vmatprep.subr.mxu0 %v569_v5  ;;  %v502_v29 = vld [vmem:[%s8111_s27 + $0x238] sm:$0xff]  ;;  %v504_v34 = vld [vmem:[%s8111_s27 + $0x248] sm:$0xff]  ;;  %v437_v35 = vld [vmem:[%s8111_s27 + $0x30] sm:$0xff] }
  0x92   : > { %7154 = vmatpush3.msra.mxu1 %v569_v5  ;;  %6901 = vmatpush3.msra.mxu0 %v569_v5  ;;  %v505_v36 = vld [vmem:[%s8111_s27 + $0x250] sm:$0xff]  ;;  %v1419_v37 = vld [vmem:[#allocation9 + $0x18] sm:$0xff]  ;;  %v438_v38 = vld [vmem:[%s8111_s27 + $0x38] sm:$0xff] }
  0x93   : > { %7139 = vmatprep.subr.mxu1 %v568_v6  ;;  %6902 = vmatprep.subr.mxu0 %v568_v6  ;;  %v1418_v39 = vld [vmem:[#allocation9 + $0x10] sm:$0xff]  ;;  %v506_v40 = vld [vmem:[%s8111_s27 + $0x258] sm:$0xff]  ;;  %v440_v44 = vld [vmem:[%s8111_s27 + $0x48] sm:$0xff] }
  0x94   : > { %7155 = vmatpush3.msra.mxu1 %v568_v6  ;;  %6903 = vmatpush3.msra.mxu0 %v568_v6  ;;  %v439_v41 = vld [vmem:[%s8111_s27 + $0x40] sm:$0xff]  ;;  %v1417_v43 = vld [vmem:[#allocation9 + $0x8] sm:$0xff]  ;;  %v508_v45 = vld [vmem:[%s8111_s27 + $0x268] sm:$0xff] }
  0x95   : > { %7140 = vmatprep.subr.mxu1 %v567_v7  ;;  %6904 = vmatprep.subr.mxu0 %v567_v7  ;;  %v507_v42 = vld [vmem:[%s8111_s27 + $0x260] sm:$0xff]  ;;  %v441_v46 = vld [vmem:[%s8111_s27 + $0x50] sm:$0xff]  ;;  %v442_v49 = vld [vmem:[%s8111_s27 + $0x58] sm:$0xff] }
  0x96   : > { %7156 = vmatpush3.msra.mxu1 %v567_v7  ;;  %6905 = vmatpush3.msra.mxu0 %v567_v7  ;;  %v509_v47 = vld [vmem:[%s8111_s27 + $0x270] sm:$0xff]  ;;  %v510_v50 = vld [vmem:[%s8111_s27 + $0x278] sm:$0xff]  ;;  %v443_v51 = vld [vmem:[%s8111_s27 + $0x60] sm:$0xff] }
  0x97   : > { %7141 = vmatprep.subr.mxu1 %v566_v8  ;;  %6906 = vmatprep.subr.mxu0 %v566_v8  ;;  %v1416_v48 = vld [vmem:[#allocation9] sm:$0xff]  ;;  %v511_v52 = vld [vmem:[%s8111_s27 + $0x280] sm:$0xff]  ;;  %v444_v53 = vld [vmem:[%s8111_s27 + $0x68] sm:$0xff] }
  0x98   : > { %7157 = vmatpush3.msra.mxu1 %v566_v8  ;;  %6907 = vmatpush3.msra.mxu0 %v566_v8  ;;  %v512_v54 = vld [vmem:[%s8111_s27 + $0x288] sm:$0xff]  ;;  %v445_v55 = vld [vmem:[%s8111_s27 + $0x70] sm:$0xff]  ;;  %v446_v57 = vld [vmem:[%s8111_s27 + $0x78] sm:$0xff] }
  0x99   : > { %7142 = vmatprep.subr.mxu1 %v565_v9  ;;  %6908 = vmatprep.subr.mxu0 %v565_v9  ;;  %v513_v56 = vld [vmem:[%s8111_s27 + $0x290] sm:$0xff]  ;;  %v514_v58 = vld [vmem:[%s8111_s27 + $0x298] sm:$0xff]  ;;  %v447_v59 = vld [vmem:[%s8111_s27 + $0x80] sm:$0xff] }
  0x9a   : > { %7158 = vmatpush3.msra.mxu1 %v565_v9  ;;  %6909 = vmatpush3.msra.mxu0 %v565_v9  ;;  %v515_v60 = vld [vmem:[%s8111_s27 + $0x2a0] sm:$0xff]  ;;  %v448_v61 = vld [vmem:[%s8111_s27 + $0x88] sm:$0xff]  ;;  %v449_v63 = vld [vmem:[%s8111_s27 + $0x90] sm:$0xff] }
  0x9b   : > { %7143 = vmatprep.subr.mxu1 %v564_v10  ;;  %6910 = vmatprep.subr.mxu0 %v564_v10  ;;  %v516_v62 = vld [vmem:[%s8111_s27 + $0x2a8] sm:$0xff]  ;;  %v517_v0 = vld [vmem:[%s8111_s27 + $0x2b0] sm:$0xff]  ;;  %v450_v1 = vld [vmem:[%s8111_s27 + $0x98] sm:$0xff] }
  0x9c   : > { %7159 = vmatpush3.msra.mxu1 %v564_v10  ;;  %6911 = vmatpush3.msra.mxu0 %v564_v10  ;;  %v518_v2 = vld [vmem:[%s8111_s27 + $0x2b8] sm:$0xff]  ;;  %v451_v3 = vld [vmem:[%s8111_s27 + $0xa0] sm:$0xff]  ;;  %v452_v5 = vld [vmem:[%s8111_s27 + $0xa8] sm:$0xff] }
  0x9d   : > { %7144 = vmatprep.subr.mxu1 %v563_v11  ;;  %6912 = vmatprep.subr.mxu0 %v563_v11  ;;  %v519_v4 = vld [vmem:[%s8111_s27 + $0x2c0] sm:$0xff]  ;;  %v520_v6 = vld [vmem:[%s8111_s27 + $0x2c8] sm:$0xff]  ;;  %v453_v7 = vld [vmem:[%s8111_s27 + $0xb0] sm:$0xff] }
  0x9e   : > { %7160 = vmatpush3.msra.mxu1 %v563_v11  ;;  %6913 = vmatpush3.msra.mxu0 %v563_v11  ;;  %v521_v8 = vld [vmem:[%s8111_s27 + $0x2d0] sm:$0xff]  ;;  %v454_v9 = vld [vmem:[%s8111_s27 + $0xb8] sm:$0xff]  ;;  %v455_v11 = vld [vmem:[%s8111_s27 + $0xc0] sm:$0xff] }
  0x9f   : > { %7145 = vmatprep.subr.mxu1 %v562_v12  ;;  %6914 = vmatprep.subr.mxu0 %v562_v12  ;;  %v522_v10 = vld [vmem:[%s8111_s27 + $0x2d8] sm:$0xff] }
  0xa0   : > { %7161 = vmatpush3.msra.mxu1 %v562_v12  ;;  %6915 = vmatpush3.msra.mxu0 %v562_v12  ;;  %v523_v12 = vld [vmem:[%s8111_s27 + $0x2e0] sm:$0xff] }
  0xa1   : > { %7146 = vmatprep.subr.mxu1 %v561_v13  ;;  %6916 = vmatprep.subr.mxu0 %v561_v13 }
  0xa2   : > { %7162 = vmatpush3.msra.mxu1 %v561_v13  ;;  %6917 = vmatpush3.msra.mxu0 %v561_v13  ;;  %v456_v13 = vld [vmem:[%s8111_s27 + $0xc8] sm:$0xff] }
  0xa3   : > { %7147 = vmatprep.subr.mxu1 %v560_v14  ;;  %6918 = vmatprep.subr.mxu0 %v560_v14 }
  0xa4   : > { %7163 = vmatpush3.msra.mxu1 %v560_v14  ;;  %7021 = vmatprep.mubr.f32.mxu1 %v497_v15  ;;  %v457_v15 = vld [vmem:[%s8111_s27 + $0xd0] sm:$0xff] }
  0xa5   : > { %7148 = vmatprep.subr.mxu1 %v559_v16  ;;  %6919 = vmatpush3.msra.mxu0 %v560_v14  ;;  %v524_v14 = vld [vmem:[%s8111_s27 + $0x2e8] sm:$0xff] }
  0xa6   : > { %7164 = vmatpush3.msra.mxu1 %v559_v16  ;;  %6920 = vmatprep.subr.mxu0 %v559_v16 }
  0xa7   : > { %7022 = vmatmul.mubr.f32.vlgmr.msra.gmra.mxu1 %v498_v17  ;;  %7114 = vmatprep.subr.mxu1 %v7873_v21  ;;  %v458_v17 = vld [vmem:[%s8111_s27 + $0xd8] sm:$0xff] }
  0xa8   : > { %7115 = vmatpush3.msra.mxu1 %v1423_v18  ;;  %6921 = vmatpush3.msra.mxu0 %v559_v16  ;;  %v525_v16 = vld [vmem:[%s8111_s27 + $0x2f0] sm:$0xff]  ;;  %v526_v18 = vld [vmem:[%s8111_s27 + $0x2f8] sm:$0xff] }
  0xa9   : > { %6922 = vmatprep.mubr.f32.mxu0 %v431_v19  ;;  %7024 = vmatprep.mubr.f32.mxu1 %v499_v20  ;;  %v459_v19 = vld [vmem:[%s8111_s27 + $0xe0] sm:$0xff] }
  0xaa   : > { %6923 = vmatmul.mubr.f32.vlgmr.msra.gmra.mxu0 %v432_v22  ;;  %7116 = vmatprep.subr.mxu1 %v7873_v21  ;;  %v527_v20 = vld [vmem:[%s8111_s27 + $0x300] sm:$0xff]  ;;  %v460_v22 = vld [vmem:[%s8111_s27 + $0xe8] sm:$0xff] }
  0xab   : > { %7025 = vmatmul.mubr.f32.gmra.mxu1 %v500_v23  ;;  %6925 = vmatprep.mubr.f32.mxu0 %v433_v24  ;;  %v528_v23 = vld [vmem:[%s8111_s27 + $0x308] sm:$0xff]  ;;  %v461_v24 = vld [vmem:[%s8111_s27 + $0xf0] sm:$0xff] }
  0xac   : > { %7027 = vmatprep.mubr.f32.mxu1 %v501_v25  ;;  %7117 = vmatpush3.msra.mxu1 %v1422_v26  ;;  %v529_v25 = vld [vmem:[%s8111_s27 + $0x310] sm:$0xff]  ;;  %v462_v26 = vld [vmem:[%s8111_s27 + $0xf8] sm:$0xff] }
  0xad   : > { %7118 = vmatprep.subr.mxu1 %v7873_v21 }
  0xae   : > { %6926 = vmatmul.mubr.f32.gmra.mxu0 %v434_v27  ;;  %7119 = vmatpush3.msra.mxu1 %v1421_v28  ;;  %v530_v27 = vld [vmem:[%s8111_s27 + $0x318] sm:$0xff]  ;;  %v463_v28 = vld [vmem:[%s8111_s27 + $0x100] sm:$0xff] }
  0xaf   : > { %7028 = vmatmul.mubr.f32.gmra.mxu1 %v502_v29  ;;  %6928 = vmatprep.mubr.f32.mxu0 %v435_v30  ;;  %v531_v29 = vld [vmem:[%s8111_s27 + $0x320] sm:$0xff]  ;;  %v464_v30 = vld [vmem:[%s8111_s27 + $0x108] sm:$0xff] }
  0xb0   : > { %7030 = vmatprep.mubr.f32.mxu1 %v503_v31  ;;  %7120 = vmatprep.subr.mxu1 %v7873_v21  ;;  %v532_v31 = vld [vmem:[%s8111_s27 + $0x328] sm:$0xff] }
  0xb1   : > { %7121 = vmatpush3.msra.mxu1 %v1420_v32  ;;  %v465_v32 = vld [vmem:[%s8111_s27 + $0x110] sm:$0xff] }
  0xb2   : > { %6929 = vmatmul.mubr.f32.gmra.mxu0 %v436_v33  ;;  %7122 = vmatprep.subr.mxu1 %v7873_v21  ;;  %v533_v33 = vld [vmem:[%s8111_s27 + $0x330] sm:$0xff] }
  0xb3   : > { %7031 = vmatmul.mubr.f32.gmra.mxu1 %v504_v34  ;;  %6931 = vmatprep.mubr.f32.mxu0 %v437_v35  ;;  %v466_v34 = vld [vmem:[%s8111_s27 + $0x118] sm:$0xff] }
  0xb4   : > { %7033 = vmatprep.mubr.f32.mxu1 %v505_v36  ;;  %7123 = vmatpush3.msra.mxu1 %v1419_v37  ;;  %v534_v35 = vld [vmem:[%s8111_s27 + $0x338] sm:$0xff]  ;;  %v467_v36 = vld [vmem:[%s8111_s27 + $0x120] sm:$0xff] }
  0xb5   : > { %7124 = vmatprep.subr.mxu1 %v7873_v21  ;;  %v535_v37 = vld [vmem:[%s8111_s27 + $0x340] sm:$0xff] }
  0xb6   : > { %6932 = vmatmul.mubr.f32.gmra.mxu0 %v438_v38  ;;  %7125 = vmatpush3.msra.mxu1 %v1418_v39  ;;  %v468_v38 = vld [vmem:[%s8111_s27 + $0x128] sm:$0xff] }
  0xb7   : > { %7034 = vmatmul.mubr.f32.gmra.mxu1 %v506_v40  ;;  %6934 = vmatprep.mubr.f32.mxu0 %v439_v41  ;;  %v536_v39 = vld [vmem:[%s8111_s27 + $0x348] sm:$0xff]  ;;  %v469_v40 = vld [vmem:[%s8111_s27 + $0x130] sm:$0xff] }
  0xb8   : > { %7036 = vmatprep.mubr.f32.mxu1 %v507_v42  ;;  %7126 = vmatprep.subr.mxu1 %v7873_v21  ;;  %v537_v41 = vld [vmem:[%s8111_s27 + $0x350] sm:$0xff]  ;;  %v470_v42 = vld [vmem:[%s8111_s27 + $0x138] sm:$0xff] }
  0xb9   : > { %7127 = vmatpush3.msra.mxu1 %v1417_v43  ;;  %v538_v43 = vld [vmem:[%s8111_s27 + $0x358] sm:$0xff] }
  0xba   : > { %6935 = vmatmul.mubr.f32.gmra.mxu0 %v440_v44  ;;  %7128 = vmatprep.subr.mxu1 %v7873_v21  ;;  %v471_v44 = vld [vmem:[%s8111_s27 + $0x140] sm:$0xff] }
  0xbb   : > { %7037 = vmatmul.mubr.f32.gmra.mxu1 %v508_v45  ;;  %6937 = vmatprep.mubr.f32.mxu0 %v441_v46  ;;  %v539_v45 = vld [vmem:[%s8111_s27 + $0x360] sm:$0xff]  ;;  %v472_v46 = vld [vmem:[%s8111_s27 + $0x148] sm:$0xff] }
  0xbc   : > { %7039 = vmatprep.mubr.f32.mxu1 %v509_v47  ;;  %7129 = vmatpush3.msra.mxu1 %v1416_v48  ;;  %v540_v47 = vld [vmem:[%s8111_s27 + $0x368] sm:$0xff]  ;;  %v473_v48 = vld [vmem:[%s8111_s27 + $0x150] sm:$0xff] }
  0xbe   : > { %6938 = vmatmul.mubr.f32.gmra.mxu0 %v442_v49  ;;  %v541_v49 = vld [vmem:[%s8111_s27 + $0x370] sm:$0xff] }
  0xbf   : > { %7040 = vmatmul.mubr.f32.gmra.mxu1 %v510_v50  ;;  %6940 = vmatprep.mubr.f32.mxu0 %v443_v51  ;;  %v474_v50 = vld [vmem:[%s8111_s27 + $0x158] sm:$0xff] }
  0xc0   : > { %7042 = vmatprep.mubr.f32.mxu1 %v511_v52  ;;  %v542_v51 = vld [vmem:[%s8111_s27 + $0x378] sm:$0xff]  ;;  %v475_v52 = vld [vmem:[%s8111_s27 + $0x160] sm:$0xff] }
  0xc2   : > { %6941 = vmatmul.mubr.f32.gmra.mxu0 %v444_v53  ;;  %v543_v53 = vld [vmem:[%s8111_s27 + $0x380] sm:$0xff] }
  0xc3   : > { %7043 = vmatmul.mubr.f32.gmra.mxu1 %v512_v54  ;;  %6943 = vmatprep.mubr.f32.mxu0 %v445_v55  ;;  %v476_v54 = vld [vmem:[%s8111_s27 + $0x168] sm:$0xff] }
  0xc4   : > { %7045 = vmatprep.mubr.f32.mxu1 %v513_v56  ;;  %v544_v55 = vld [vmem:[%s8111_s27 + $0x388] sm:$0xff]  ;;  %v477_v56 = vld [vmem:[%s8111_s27 + $0x170] sm:$0xff] }
  0xc6   : > { %6944 = vmatmul.mubr.f32.gmra.mxu0 %v446_v57  ;;  %v545_v57 = vld [vmem:[%s8111_s27 + $0x390] sm:$0xff] }
  0xc7   : > { %7046 = vmatmul.mubr.f32.gmra.mxu1 %v514_v58  ;;  %6946 = vmatprep.mubr.f32.mxu0 %v447_v59  ;;  %v478_v58 = vld [vmem:[%s8111_s27 + $0x178] sm:$0xff] }
  0xc8   : > { %7048 = vmatprep.mubr.f32.mxu1 %v515_v60  ;;  %v546_v59 = vld [vmem:[%s8111_s27 + $0x398] sm:$0xff]  ;;  %v479_v60 = vld [vmem:[%s8111_s27 + $0x180] sm:$0xff] }
  0xca   : > { %6947 = vmatmul.mubr.f32.gmra.mxu0 %v448_v61  ;;  %v547_v61 = vld [vmem:[%s8111_s27 + $0x3a0] sm:$0xff] }
  0xcb   : > { %7049 = vmatmul.mubr.f32.gmra.mxu1 %v516_v62  ;;  %6949 = vmatprep.mubr.f32.mxu0 %v449_v63  ;;  %v480_v62 = vld [vmem:[%s8111_s27 + $0x188] sm:$0xff] }
  0xcc   : > { %7051 = vmatprep.mubr.f32.mxu1 %v517_v0  ;;  %v548_v63 = vld [vmem:[%s8111_s27 + $0x3a8] sm:$0xff]  ;;  %v481_v0 = vld [vmem:[%s8111_s27 + $0x190] sm:$0xff] }
  0xce   : > { %6950 = vmatmul.mubr.f32.gmra.mxu0 %v450_v1  ;;  %v549_v1 = vld [vmem:[%s8111_s27 + $0x3b0] sm:$0xff] }
  0xcf   : > { %7052 = vmatmul.mubr.f32.gmra.mxu1 %v518_v2  ;;  %6952 = vmatprep.mubr.f32.mxu0 %v451_v3  ;;  %v482_v2 = vld [vmem:[%s8111_s27 + $0x198] sm:$0xff] }
  0xd0   : > { %7054 = vmatprep.mubr.f32.mxu1 %v519_v4  ;;  %v550_v3 = vld [vmem:[%s8111_s27 + $0x3b8] sm:$0xff]  ;;  %v483_v4 = vld [vmem:[%s8111_s27 + $0x1a0] sm:$0xff] }
  0xd2   : > { %6953 = vmatmul.mubr.f32.gmra.mxu0 %v452_v5  ;;  %v551_v5 = vld [vmem:[%s8111_s27 + $0x3c0] sm:$0xff] }
  0xd3   : > { %7055 = vmatmul.mubr.f32.gmra.mxu1 %v520_v6  ;;  %6955 = vmatprep.mubr.f32.mxu0 %v453_v7  ;;  %v484_v6 = vld [vmem:[%s8111_s27 + $0x1a8] sm:$0xff] }
  0xd4   : > { %7057 = vmatprep.mubr.f32.mxu1 %v521_v8  ;;  %v552_v7 = vld [vmem:[%s8111_s27 + $0x3c8] sm:$0xff]  ;;  %v485_v8 = vld [vmem:[%s8111_s27 + $0x1b0] sm:$0xff] }
  0xd6   : > { %6956 = vmatmul.mubr.f32.gmra.mxu0 %v454_v9  ;;  %v553_v9 = vld [vmem:[%s8111_s27 + $0x3d0] sm:$0xff] }
  0xd7   : > { %7058 = vmatmul.mubr.f32.gmra.mxu1 %v522_v10  ;;  %6958 = vmatprep.mubr.f32.mxu0 %v455_v11  ;;  %v486_v10 = vld [vmem:[%s8111_s27 + $0x1b8] sm:$0xff] }
  0xd8   : > { %7060 = vmatprep.mubr.f32.mxu1 %v523_v12  ;;  %v554_v11 = vld [vmem:[%s8111_s27 + $0x3d8] sm:$0xff]  ;;  %v487_v12 = vld [vmem:[%s8111_s27 + $0x1c0] sm:$0xff] }
  0xda   : > { %6959 = vmatmul.mubr.f32.gmra.mxu0 %v456_v13  ;;  %v555_v13 = vld [vmem:[%s8111_s27 + $0x3e0] sm:$0xff] }
  0xdb   : > { %7061 = vmatmul.mubr.f32.gmra.mxu1 %v524_v14  ;;  %6961 = vmatprep.mubr.f32.mxu0 %v457_v15  ;;  %v488_v14 = vld [vmem:[%s8111_s27 + $0x1c8] sm:$0xff] }
  0xdc   : > { %7063 = vmatprep.mubr.f32.mxu1 %v525_v16  ;;  %v556_v15 = vld [vmem:[%s8111_s27 + $0x3e8] sm:$0xff]  ;;  %v489_v16 = vld [vmem:[%s8111_s27 + $0x1d0] sm:$0xff] }
  0xde   : > { %6962 = vmatmul.mubr.f32.gmra.mxu0 %v458_v17  ;;  %v557_v17 = vld [vmem:[%s8111_s27 + $0x3f0] sm:$0xff] }
  0xdf   : > { %7064 = vmatmul.mubr.f32.gmra.mxu1 %v526_v18  ;;  %6964 = vmatprep.mubr.f32.mxu0 %v459_v19  ;;  %v490_v18 = vld [vmem:[%s8111_s27 + $0x1d8] sm:$0xff] }
  0xe0   : > { %7066 = vmatprep.mubr.f32.mxu1 %v527_v20  ;;  %v558_v19 = vld [vmem:[%s8111_s27 + $0x3f8] sm:$0xff]  ;;  %v491_v20 = vld [vmem:[%s8111_s27 + $0x1e0] sm:$0xff] }
  0xe2   : > { %6965 = vmatmul.mubr.f32.gmra.mxu0 %v460_v22  ;;  %v492_v22 = vld [vmem:[%s8111_s27 + $0x1e8] sm:$0xff] }
  0xe3   : > { %7067 = vmatmul.mubr.f32.gmra.mxu1 %v528_v23  ;;  %6967 = vmatprep.mubr.f32.mxu0 %v461_v24  ;;  %v1415_v23 = vld [vmem:[%s377_s19] sm:$0xff]  ;;  %v493_v24 = vld [vmem:[%s8111_s27 + $0x1f0] sm:$0xff]  ;;  %s7759_s19 = scalar_lea.vmem %s12937_s25, 128 }
  0xe4   : > { %7069 = vmatprep.mubr.f32.mxu1 %v529_v25  ;;  %v494_v25 = vld [vmem:[%s8111_s27 + $0x1f8] sm:$0xff]  ;;  %p7760_p0 = scmp.ne.s32.totalorder %s12937_s25, %s7759_s19  ;;  %p7767_p13 = scmp.lt.s32.totalorder %s7765_s2, %s7759_s19 }
  0xe6   : > { %6968 = vmatmul.mubr.f32.gmra.mxu0 %v462_v26  ;;  %v495_v26 = vld [vmem:[%s8111_s27 + $0x200] sm:$0xff]  ;;  %p7761_p3 = pnand %p7760_p0, %p14306_p10  ;;  %p7768_p1 = por %p7767_p13, %p7766_p9 }
  0xe7   : > { %7070 = vmatmul.mubr.f32.gmra.mxu1 %v530_v27  ;;  %6970 = vmatprep.mubr.f32.mxu0 %v463_v28  ;;  %v496_v27 = vld [vmem:[%s8111_s27 + $0x208] sm:$0xff] }
  0xe8   : > { %7072 = vmatprep.mubr.f32.mxu1 %v531_v29  ;;  %p7762_p11 = pneg %p7761_p3 }
  0xea   : > { %6971 = vmatmul.mubr.f32.gmra.mxu0 %v464_v30  ;;  %p7769_p4 = pnand %p7768_p1, %p7762_p11 }
  0xeb   : > { %7073 = vmatmul.mubr.f32.gmra.mxu1 %v532_v31  ;;  %6973 = vmatprep.mubr.f32.mxu0 %v465_v32 }
  0xec   : > { %7075 = vmatprep.mubr.f32.mxu1 %v533_v33 }
  0xee   : > { %6974 = vmatmul.mubr.f32.gmra.mxu0 %v466_v34 }
  0xef   : > { %7076 = vmatmul.mubr.f32.gmra.mxu1 %v534_v35  ;;  %6976 = vmatprep.mubr.f32.mxu0 %v467_v36 }
  0xf0   : > { %7078 = vmatprep.mubr.f32.mxu1 %v535_v37 }
  0xf2   : > { %6977 = vmatmul.mubr.f32.gmra.mxu0 %v468_v38 }
  0xf3   : > { %7079 = vmatmul.mubr.f32.gmra.mxu1 %v536_v39  ;;  %6979 = vmatprep.mubr.f32.mxu0 %v469_v40 }
  0xf4   : > { %7081 = vmatprep.mubr.f32.mxu1 %v537_v41 }
  0xf6   : > { %6980 = vmatmul.mubr.f32.gmra.mxu0 %v470_v42 }
  0xf7   : > { %7082 = vmatmul.mubr.f32.gmra.mxu1 %v538_v43  ;;  %6982 = vmatprep.mubr.f32.mxu0 %v471_v44 }
  0xf8   : > { %7084 = vmatprep.mubr.f32.mxu1 %v539_v45 }
  0xfa   : > { %6983 = vmatmul.mubr.f32.gmra.mxu0 %v472_v46 }
  0xfb   : > { %7085 = vmatmul.mubr.f32.gmra.mxu1 %v540_v47  ;;  %6985 = vmatprep.mubr.f32.mxu0 %v473_v48 }
  0xfc   : > { %7087 = vmatprep.mubr.f32.mxu1 %v541_v49 }
  0xfe   : > { %6986 = vmatmul.mubr.f32.gmra.mxu0 %v474_v50 }
  0xff   : > { %7088 = vmatmul.mubr.f32.gmra.mxu1 %v542_v51  ;;  %6988 = vmatprep.mubr.f32.mxu0 %v475_v52 }
 0x100   : > { %7090 = vmatprep.mubr.f32.mxu1 %v543_v53 }
 0x102   : > { %6989 = vmatmul.mubr.f32.gmra.mxu0 %v476_v54 }
 0x103   : > { %7091 = vmatmul.mubr.f32.gmra.mxu1 %v544_v55  ;;  %6991 = vmatprep.mubr.f32.mxu0 %v477_v56 }
 0x104   : > { %7093 = vmatprep.mubr.f32.mxu1 %v545_v57 }
 0x106   : > { %6992 = vmatmul.mubr.f32.gmra.mxu0 %v478_v58 }
 0x107   : > { %7094 = vmatmul.mubr.f32.gmra.mxu1 %v546_v59  ;;  %6994 = vmatprep.mubr.f32.mxu0 %v479_v60 }
 0x108   : > { %7096 = vmatprep.mubr.f32.mxu1 %v547_v61 }
 0x10a   : > { %6995 = vmatmul.mubr.f32.gmra.mxu0 %v480_v62 }
 0x10b   : > { %7097 = vmatmul.mubr.f32.gmra.mxu1 %v548_v63  ;;  %6997 = vmatprep.mubr.f32.mxu0 %v481_v0 }
 0x10c   : > { %7099 = vmatprep.mubr.f32.mxu1 %v549_v1 }
 0x10e   : > { %6998 = vmatmul.mubr.f32.gmra.mxu0 %v482_v2 }
 0x10f   : > { %7100 = vmatmul.mubr.f32.gmra.mxu1 %v550_v3  ;;  %7000 = vmatprep.mubr.f32.mxu0 %v483_v4 }
 0x110   : > { %7102 = vmatprep.mubr.f32.mxu1 %v551_v5 }
 0x112   : > { %7001 = vmatmul.mubr.f32.gmra.mxu0 %v484_v6 }
 0x113   : > { %7103 = vmatmul.mubr.f32.gmra.mxu1 %v552_v7  ;;  %7003 = vmatprep.mubr.f32.mxu0 %v485_v8 }
 0x114   : > { %7105 = vmatprep.mubr.f32.mxu1 %v553_v9 }
 0x116   : > { %7004 = vmatmul.mubr.f32.gmra.mxu0 %v486_v10 }
 0x117   : > { %7106 = vmatmul.mubr.f32.gmra.mxu1 %v554_v11  ;;  %7006 = vmatprep.mubr.f32.mxu0 %v487_v12 }
 0x118   : > { %7108 = vmatprep.mubr.f32.mxu1 %v555_v13 }
 0x11a   : > { %7007 = vmatmul.mubr.f32.gmra.mxu0 %v488_v14 }
 0x11b   : > { %7109 = vmatmul.mubr.f32.gmra.mxu1 %v556_v15  ;;  %7009 = vmatprep.mubr.f32.mxu0 %v489_v16 }
 0x11c   : > { %7111 = vmatprep.mubr.f32.mxu1 %v557_v17 }
 0x11e   : > { %7010 = vmatmul.mubr.f32.gmra.mxu0 %v490_v18 }
 0x11f   : > { %7112 = vmatmul.mubr.f32.gmra.mxu1 %v558_v19  ;;  %7012 = vmatprep.mubr.f32.mxu0 %v491_v20 }
 0x120   : > { %7130 = vmatprep.mubr.msk.f32.mxu1 %vm7874_vm0, %v7873_v21  ;;  %vm2609_vm0 = vcmask 1048512  }
 0x122   : > { %7013 = vmatmul.mubr.f32.gmra.mxu0 %v492_v22 }
 0x123   : > { %7131 = vmatmul.mubr.msk.f32.vlgmr.msra.gmra.mxu1 %vm1431_vm1, %v1415_v23  ;;  %7015 = vmatprep.mubr.f32.mxu0 %v493_v24  ;;  %vm13151_vm1 = vcmask 1041409  }
 0x126   : > { %7016 = vmatmul.mubr.f32.gmra.mxu0 %v494_v25 }
 0x127   : > { %7018 = vmatprep.mubr.f32.mxu0 %v495_v26 }
 0x12a   : > { %7019 = vmatmul.mubr.f32.gmra.mxu0 %v496_v27 }
 0x167   : > { %v8273_v28 = vpop.f32.mrf.mxu1 }
 0x169   : > { %v8275_v29 = vpop.f32.mrf.mxu1 }
 0x16a   : > { %v8277_v30 = vpop.f32.mrf.mxu0 }
 0x16b   : > { %v8279_v21 = vpop.f32.mrf.mxu1 }
 0x16c   : > { %v8281_v31 = vpop.f32.mrf.mxu0 }
 0x16d   : > { %v8283_v32 = vpop.f32.mrf.mxu1 }
 0x16e   : > { %v8285_v33 = vpop.f32.mrf.mxu0 }
 0x16f   : > { %v8287_v34 = vpop.f32.mrf.mxu1 }
 0x170   : > { %v8289_v35 = vpop.f32.mrf.mxu0 }
 0x171   : > { %v8291_v36 = vpop.f32.mrf.mxu1 }
 0x172   : > { %v8293_v37 = vpop.f32.mrf.mxu0 }
 0x173   : > { %v8295_v38 = vpop.f32.mrf.mxu1 }
 0x174   : > { %v8297_v39 = vpop.f32.mrf.mxu0 }
 0x175   : > { %v8299_v40 = vpop.f32.mrf.mxu1 }
 0x176   : > { %v8301_v41 = vpop.f32.mrf.mxu0 }
 0x177   : > { %v8303_v42 = vpop.f32.mrf.mxu1 }
 0x178   : > { %v8305_v43 = vpop.f32.mrf.mxu0 }
 0x179   : > { %v8307_v44 = vpop.f32.mrf.mxu1 }
 0x17a   : > { %v8309_v45 = vpop.f32.mrf.mxu0 }
 0x17b   : > { %v8311_v46 = vpop.f32.mrf.mxu1 }
 0x17c   : > { %v8313_v47 = vpop.f32.mrf.mxu0 }
 0x17d   : > { %v8315_v48 = vpop.f32.mrf.mxu1 }
 0x17e   : > { %v8317_v49 = vpop.f32.mrf.mxu0 }
 0x17f   : > { %v8319_v50 = vpop.f32.mrf.mxu1 }
 0x180   : > { %v8321_v51 = vpop.f32.mrf.mxu0 }
 0x181   : > { %v8323_v52 = vpop.f32.mrf.mxu1 }
 0x182   : > { %v8325_v53 = vpop.f32.mrf.mxu0 }
 0x183   : > { %v8327_v54 = vpop.f32.mrf.mxu1 }
 0x184   : > { %13340 = vst [vmem:[#allocation23_spill] sm:$0xff] %v8327_v54  ;;  %v8329_v55 = vpop.f32.mrf.mxu0 }
 0x185   : > { %v8331_v56 = vpop.f32.mrf.mxu1 }
 0x186   : > { %13341 = vst [vmem:[#allocation24_spill] sm:$0xff] %v8331_v56  ;;  %v8333_v57 = vpop.f32.mrf.mxu0 }
 0x187   : > { %v8335_v58 = vpop.f32.mrf.mxu1 }
 0x188   : > { %13342 = vst [vmem:[#allocation25_spill] sm:$0xff] %v8335_v58  ;;  %v8337_v59 = vpop.f32.mrf.mxu0 }
 0x189   : > { %v8339_v60 = vpop.f32.mrf.mxu1 }
 0x18a   : > { %13343 = vst [vmem:[#allocation26_spill] sm:$0xff] %v8339_v60  ;;  %v8341_v61 = vpop.f32.mrf.mxu0 }
 0x18b   : > { %v8343_v62 = vpop.f32.mrf.mxu1 }
 0x18c   : > { %13344 = vst [vmem:[#allocation27_spill] sm:$0xff] %v8343_v62  ;;  %v8345_v63 = vpop.f32.mrf.mxu0 }
 0x18d   : > { %v8347_v0 = vpop.f32.mrf.mxu1 }
 0x18e   : > { %13345 = vst [vmem:[#allocation28_spill] sm:$0xff] %v8347_v0  ;;  %v8349_v1 = vpop.f32.mrf.mxu0 }
 0x18f   : > { %v8351_v2 = vpop.f32.mrf.mxu1 }
 0x190   : > { %13346 = vst [vmem:[#allocation29_spill] sm:$0xff] %v8351_v2  ;;  %v8353_v3 = vpop.f32.mrf.mxu0 }
 0x191   : > { %v8355_v4 = vpop.f32.mrf.mxu1 }
 0x192   : > { %13347 = vst [vmem:[#allocation30_spill] sm:$0xff] %v8355_v4  ;;  %v8357_v5 = vpop.f32.mrf.mxu0 }
 0x193   : > { %v8359_v6 = vpop.f32.mrf.mxu1 }
 0x194   : > { %13348 = vst [vmem:[#allocation31_spill] sm:$0xff] %v8359_v6  ;;  %v8361_v7 = vpop.f32.mrf.mxu0 }
 0x195   : > { %v8363_v8 = vpop.f32.mrf.mxu1 }
 0x196   : > { %13349 = vst [vmem:[#allocation32_spill] sm:$0xff] %v8363_v8  ;;  %v8365_v9 = vpop.f32.mrf.mxu0 }
 0x197   : > { %v8367_v10 = vpop.f32.mrf.mxu1 }
 0x198   : > { %13350 = vst [vmem:[#allocation33_spill] sm:$0xff] %v8367_v10  ;;  %v8369_v11 = vpop.f32.mrf.mxu0 }
 0x199   : > { %v8371_v12 = vpop.f32.mrf.mxu1 }
 0x19a   : > { %13351 = vst [vmem:[#allocation34_spill] sm:$0xff] %v8371_v12  ;;  %v8373_v13 = vpop.f32.mrf.mxu0 }
 0x19b   : > { %v8375_v14 = vpop.f32.mrf.mxu1 }
 0x19c   : > { %13352 = vst [vmem:[#allocation35_spill] sm:$0xff] %v8375_v14  ;;  %v8377_v15 = vpop.f32.mrf.mxu0 }
 0x19d   : > { %v8379_v16 = vpop.f32.mrf.mxu1 }
 0x19e   : > { %13353 = vst [vmem:[#allocation36_spill] sm:$0xff] %v8379_v16  ;;  %v8381_v17 = vpop.f32.mrf.mxu0 }
 0x19f   : > { %v8383_v18 = vpop.f32.mrf.mxu1 }
 0x1a0   : > { %13354 = vst [vmem:[#allocation37_spill] sm:$0xff] %v8383_v18  ;;  %v8385_v19 = vpop.f32.mrf.mxu0 }
 0x1a1   : > { %v8387_v20 = vpop.f32.mrf.mxu1 }
 0x1a2   : > { %13355 = vst [vmem:[#allocation38_spill] sm:$0xff] %v8387_v20  ;;  %v8389_v22 = vpop.f32.mrf.mxu0 }
 0x1a3   : > { %v8391_v23 = vpop.f32.mrf.mxu1 }
 0x1a4   : > { %13356 = vst [vmem:[#allocation39_spill] sm:$0xff] %v8391_v23  ;;  %v8393_v24 = vpop.f32.mrf.mxu0 }
 0x1a5   : > { %v8395_v25 = vpop.f32.mrf.mxu1 }
 0x1a6   : > { %13357 = vst [vmem:[#allocation40_spill] sm:$0xff] %v8395_v25  ;;  %v8397_v26 = vpop.f32.mrf.mxu0 }
 0x1a7   : > { %13358 = vst [vmem:[#allocation41_spill] sm:$0xff] %v8397_v26  ;;  %v8399_v27 = vpop.f32.mrf.mxu1 }
 0x1a8   : > { %13359 = vst [vmem:[#allocation42_spill] sm:$0xff] %v8399_v27  ;;  %v8401_v16 = vpop.f32.mrf.mxu0 }
 0x1a9   : > { %13360 = vst [vmem:[#allocation43_spill] sm:$0xff] %v8401_v16  ;;  %v8403_v14 = vpop.f32.mrf.mxu1 }
 0x1aa   : > { %13361 = vst [vmem:[#allocation44_spill] sm:$0xff] %v8403_v14  ;;  %v8405_v18 = vpop.f32.mrf.mxu0 }
 0x1ab   : > { %13362 = vst [vmem:[#allocation45_spill] sm:$0xff] %v8405_v18  ;;  %v8407_v12 = vpop.f32.mrf.mxu1  ;;  %v13027_v18 = vlaneseq }
 0x1ac   : > { %13363 = vst [vmem:[#allocation46_spill] sm:$0xff] %v8407_v12  ;;  %v8409_v20 = vpop.f32.mrf.mxu0 }
 0x1ad   : > { %13364 = vst [vmem:[#allocation47_spill] sm:$0xff] %v8409_v20  ;;  %v8411_v10 = vpop.f32.mrf.mxu1  ;;  %v7875_v20 = vmov 1966171168  }
 0x1ae   : > { %13365 = vst [vmem:[#allocation48_spill] sm:$0xff] %v8411_v10  ;;  %v8413_v23 = vpop.f32.mrf.mxu0 }
 0x1af   : > { %13366 = vst [vmem:[#allocation49_spill] sm:$0xff] %v8413_v23  ;;  %v8415_v8 = vpop.f32.mrf.mxu1 }
 0x1b0   : > { %13367 = vst [vmem:[#allocation50_spill] sm:$0xff] %v8415_v8  ;;  %v8417_v25 = vpop.f32.mrf.mxu0 }
 0x1b1   : > { %13368 = vst [vmem:[#allocation51_spill] sm:$0xff] %v8417_v25  ;;  %v8419_v6 = vpop.f32.mrf.mxu1 }
 0x1b2   : > { %13369 = vst [vmem:[#allocation52_spill] sm:$0xff] %v8419_v6  ;;  %v8421_v27 = vpop.f32.mrf.mxu0 }
 0x1b3   : > { %13370 = vst [vmem:[#allocation53_spill] sm:$0xff] %v8421_v27  ;;  %v8423_v4 = vpop.f32.mrf.mxu1 }
 0x1b4   : > { %13371 = vst [vmem:[#allocation54_spill] sm:$0xff] %v8423_v4  ;;  %v8425_v14 = vpop.f32.mrf.mxu0 }
 0x1b5   : > { %13372 = vst [vmem:[#allocation55_spill] sm:$0xff] %v8425_v14  ;;  %v8427_v2 = vpop.f32.mrf.mxu1 }
 0x1b6   : > { %13373 = vst [vmem:[#allocation56_spill] sm:$0xff] %v8427_v2  ;;  %v8429_v12 = vpop.f32.mrf.mxu0 }
 0x1b7   : > { %13374 = vst [vmem:[#allocation57_spill] sm:$0xff] %v8429_v12  ;;  %v8431_v0 = vpop.f32.mrf.mxu1 }
 0x1b8   : > { %13375 = vst [vmem:[#allocation58_spill] sm:$0xff] %v8431_v0  ;;  %v8433_v10 = vpop.f32.mrf.mxu0 }
 0x1b9   : > { %13376 = vst [vmem:[#allocation59_spill] sm:$0xff] %v8433_v10  ;;  %v8435_v23 = vpop.f32.mrf.mxu1 }
 0x1ba   : > { %13377 = vst [vmem:[#allocation60_spill] sm:$0xff] %v8435_v23  ;;  %v8437_v8 = vpop.f32.mrf.mxu0 }
 0x1bb   : > { %13378 = vst [vmem:[#allocation61_spill] sm:$0xff] %v8437_v8  ;;  %v8439_v25 = vpop.f32.mrf.mxu1 }
 0x1bc   : > { %13379 = vst [vmem:[#allocation62_spill] sm:$0xff] %v8439_v25  ;;  %v8441_v6 = vpop.f32.mrf.mxu0 }
 0x1bd   : > { %13380 = vst [vmem:[#allocation63_spill] sm:$0xff] %v8441_v6  ;;  %v8443_v27 = vpop.f32.mrf.mxu1 }
 0x1be   : > { %13381 = vst [vmem:[#allocation64_spill] sm:$0xff] %v8443_v27  ;;  %v8445_v4 = vpop.f32.mrf.mxu0 }
 0x1bf   : > { %13382 = vst [vmem:[#allocation65_spill] sm:$0xff] %v8445_v4  ;;  %v8447_v14 = vpop.f32.mrf.mxu1 }
 0x1c0   : > { %13383 = vst [vmem:[#allocation66_spill] sm:$0xff] %v8447_v14  ;;  %v8449_v2 = vpop.f32.mrf.mxu0 }
 0x1c1   : > { %13384 = vst [vmem:[#allocation67_spill] sm:$0xff] %v8449_v2  ;;  %v8451_v12 = vpop.f32.mrf.mxu1 }
 0x1c2   : > { %13385 = vst [vmem:[#allocation68_spill] sm:$0xff] %v8451_v12  ;;  %v8453_v0 = vpop.f32.mrf.mxu0 }
 0x1c3   : > { %13386 = vst [vmem:[#allocation69_spill] sm:$0xff] %v8453_v0  ;;  %v8455_v10 = vpop.f32.mrf.mxu1 }
 0x1c4   : > { %13387 = vst [vmem:[#allocation70_spill] sm:$0xff] %v8455_v10  ;;  %v8457_v23 = vpop.f32.mrf.mxu0 }
 0x1c5   : > { %13388 = vst [vmem:[#allocation71_spill] sm:$0xff] %v8457_v23  ;;  %v8459_v8 = vpop.f32.mrf.mxu1 }
 0x1c6   : > { %13389 = vst [vmem:[#allocation72_spill] sm:$0xff] %v8459_v8  ;;  %v8461_v25 = vpop.f32.mrf.mxu0 }
 0x1c7   : > { %13390 = vst [vmem:[#allocation73_spill] sm:$0xff] %v8461_v25  ;;  %v8463_v6 = vpop.f32.mrf.mxu1 }
 0x1c8   : > { %13391 = vst [vmem:[#allocation74_spill] sm:$0xff] %v8463_v6  ;;  %v8465_v27 = vpop.f32.mrf.mxu0 }
 0x1c9   : > { %13392 = vst [vmem:[#allocation75_spill] sm:$0xff] %v8465_v27  ;;  %v8467_v4 = vpop.f32.mrf.mxu1 }
 0x1ca   : > { %13393 = vst [vmem:[#allocation76_spill] sm:$0xff] %v8467_v4  ;;  %v8469_v14 = vpop.f32.mrf.mxu0 }
 0x1cb   : > { %v8471_v2 = vpop.f32.mrf.mxu1 }
 0x1cc   : > { %13394 = vst [vmem:[#allocation77_spill] sm:$0xff] %v8471_v2  ;;  %v8473_v12 = vpop.f32.mrf.mxu0 }
 0x1cd   : > { %v8475_v0 = vpop.f32.mrf.mxu1 }
 0x1ce   : > { %13395 = vst [vmem:[#allocation78_spill] sm:$0xff] %v8475_v0  ;;  %v8477_v10 = vpop.f32.mrf.mxu0 }
 0x1cf   : > { %13396 = vst [vmem:[#allocation79_spill] sm:$0xff] %v8477_v10  ;;  %v8479_v23 = vpop.f32.mrf.mxu1 }
 0x1d0   : > { %13397 = vst [vmem:[#allocation80_spill] sm:$0xff] %v8479_v23  ;;  %v8481_v8 = vpop.f32.mrf.mxu0 }
 0x1d1   : > { %13398 = vst [vmem:[#allocation81_spill] sm:$0xff] %v8481_v8  ;;  %v8483_v25 = vpop.f32.mrf.mxu1 }
 0x1d2   : > { %13399 = vst [vmem:[#allocation82_spill] sm:$0xff] %v8483_v25  ;;  %v8485_v6 = vpop.f32.mrf.mxu0  ;;  %v1508_v25 = vunpack.c.l.s4 %v7875_v20  ;;  %v6726_v20 = vld [vmem:[%s13013_s5] ss:$0 sm:$0xff] }
 0x1d3   : > { %13400 = vst [vmem:[#allocation83_spill] sm:$0xff] %v8485_v6  ;;  %v8487_v27 = vpop.f32.mrf.mxu1 }
 0x1d4   : > { %13401 = vst [vmem:[#allocation84_spill] sm:$0xff] %v8487_v27  ;;  %v8489_v4 = vpop.f32.mrf.mxu0 }
 0x1d5   : > { %13402 = vst [vmem:[#allocation85_spill] sm:$0xff] %v8489_v4  ;;  %v8491_v62 = vpop.f32.mrf.mxu1 }
 0x1d6   : > { %13403 = vst [vmem:[#allocation86_spill] sm:$0xff] %v8491_v62  ;;  %v8493_v2 = vpop.f32.mrf.mxu0 }
 0x1d7   : > { %13404 = vst [vmem:[#allocation87_spill] sm:$0xff] %v8493_v2  ;;  %v8495_v60 = vpop.f32.mrf.mxu1  ;;  %v1509_v2 = vunpack.c.0.s8 %v1508_v25 }
 0x1d8   : > { %13405 = vst [vmem:[#allocation88_spill] sm:$0xff] %v8495_v60  ;;  %v8497_v0 = vpop.f32.mrf.mxu0  ;;  %v8512_v60 = vshrl.u32 %v13027_v18, 7 }
 0x1d9   : > { %13406 = vst [vmem:[#allocation89_spill] sm:$0xff] %v8497_v0  ;;  %v8499_v58 = vpop.f32.mrf.mxu1 }
 0x1da   : > { %13407 = vst [vmem:[#allocation90_spill] sm:$0xff] %v8499_v58  ;;  %v8501_v23 = vpop.f32.mrf.mxu0  ;;  %13413 = vst [vmem:[#allocation96_spill] sm:$0xff] %v8512_v60 }
 0x1db   : > { %13408 = vst [vmem:[#allocation91_spill] sm:$0xff] %v8501_v23  ;;  %v8503_v56 = vpop.f32.mrf.mxu1 }
 0x1dc   : > { %13409 = vst [vmem:[#allocation92_spill] sm:$0xff] %v8503_v56  ;;  %v8505_v27 = vpop.f32.mrf.mxu0 }
 0x1dd   : > { %13410 = vst [vmem:[#allocation93_spill] sm:$0xff] %v8505_v27  ;;  %v8507_v16 = vpop.f32.mrf.mxu1 }
 0x1de   : > { %13411 = vst [vmem:[#allocation94_spill] sm:$0xff] %v8507_v16  ;;  %v8509_v62 = vpop.f32.mrf.mxu0  ;;  %v1512_v16 = vsub.s32 %v1509_v2, %v8512_v60 }
 0x1df   : > { %13412 = vst [vmem:[#allocation95_spill] sm:$0xff] %v8509_v62  ;;  %v8514_v0 = vpop.f32.mrf.mxu1 }
 0x1e0   : > { %13414 = vst [vmem:[#allocation97_spill] sm:$0xff] %v8514_v0  ;;  %v8516_v58 = vpop.f32.mrf.mxu0  ;;  %v8527_v0 = vsub.s32 0, %v8512_v60 }
 0x1e1   : > { %13415 = vst [vmem:[#allocation98_spill] sm:$0xff] %v8516_v58  ;;  %v8518_v23 = vpop.f32.mrf.mxu1 }
 0x1e2   : > { %13416 = vst [vmem:[#allocation99_spill] sm:$0xff] %v8518_v23  ;;  %v8523_v56 = vpop.f32.mrf.mxu0  ;;  %13418 = vst [vmem:[#allocation101_spill] sm:$0xff] %v8527_v0 }
 0x1e3   : > { %13417 = vst [vmem:[#allocation100_spill] sm:$0xff] %v8523_v56  ;;  %v1501_v27 = vpop.f32.mrf.mxu1  ;;  %v8534_v56 = vld [vmem:[%s13011_s3] ss:$0 sm:$0xff] }
 0x1e4   : > { %v1502_v62 = vadd.f32 %v6726_v20, %v1501_v27  ;;  %v941_v25 = vpop.f32.mrf.mxu0  ;;  %v1289_v10 = vadd.f32 %v8534_v56, %v8289_v35 }
 0x1e5   : > { %v7132_v26 = vpop.f32.mrf.mxu1 }
 0x1e6   : > { %v1506_v18 = vcombine.high %v1502_v62, %v1502_v62  ;;  %v1513_v54 = vrot.slane %v1502_v62, %v1512_v16  ;;  %v7017_v58 = vpop.f32.mrf.mxu0  ;;  %v1287_v62 = vadd.f32 %v8534_v56, %v8281_v31 }
 0x1e8   : > { %v1520_v4 = vrot.slane %v1506_v18, %v1512_v16  ;;  %v1521_v23 = vcombine.high %v1513_v54, %v1513_v54  ;;  %v8529_v6 = vrot.slane %v1513_v54, %v1512_v16  ;;  %v1347_v54 = vadd.f32 %v8534_v56, %v941_v25  ;;  %v951_v18 = vpop.f32.mrf.mxu0 }
 0x1e9   : > { %v1288_v25 = vadd.f32 %v8277_v30, %v8534_v56  ;;  %v1291_v30 = vadd.f32 %v8534_v56, %v8297_v39  ;;  %v1294_v39 = vadd.f32 %v8301_v41, %v8534_v56 }
 0x1ea   : > { %13419 = vst [vmem:[#allocation102_spill] sm:$0xff] %v8529_v6  ;;  %v1522_v2 = vcombine.high %v1520_v4, %v1520_v4  ;;  %v8536_v8 = vrot.slane %v1520_v4, %v1512_v16  ;;  %v8538_v27 = vrot.slane %v1521_v23, %v1512_v16  ;;  %v8544_v26 = vrot.slane %v8529_v6, %v8527_v0 }
 0x1eb   : > { %v1350_v4 = vadd.f32 %v7017_v58, %v8534_v56  ;;  %v1349_v23 = vadd.f32 %v8534_v56, %v951_v18  ;;  %v1290_v18 = vadd.f32 %v8285_v33, %v8534_v56 }
 0x1ec   : > { %v8547_v20 = vrot.slane %v1522_v2, %v1512_v16  ;;  %v1553_v60 = vcombine.high %v8538_v27, %v8538_v27  ;;  %v1595_v31 = vadd.f32 %v8544_v26, %v1287_v62  ;;  %v8562_v16 = vld [vmem:[%s13014_s6] ss:$0 sm:$0xff]  ;;  %v1597_v58 = vadd.f32 %v8544_v26, %v1289_v10 }
 0x1ed   : > { %v1596_v33 = vadd.f32 %v8544_v26, %v1288_v25 }
 0x1ee   : > { %13420 = vst [vmem:[#allocation103_spill] sm:$0xff] %v8547_v20  ;;  %v8557_v6 = vrot.slane %v1553_v60, %v8527_v0  ;;  %v1723_v2 = vmax.f32 %v1595_v31, 0.0  ;;  %v1292_v20 = vadd.f32 %v8293_v37, %v8534_v56  ;;  %v1725_v31 = vmax.f32 %v1597_v58, 0.0 }
 0x1ef   : > { %v1293_v37 = vadd.f32 %v8534_v56, %v8305_v43  ;;  %v1296_v43 = vadd.f32 %v8309_v45, %v8534_v56 }
 0x1f0   : > { %v8570_v35 = vadd.f32 %v8557_v6, %v1347_v54  ;;  %v8573_v60 = vadd.f32 %v8557_v6, %v1350_v4  ;;  %v8576_v62 = vadd.f32 %v8557_v6, %v1349_v23  ;;  %v1858_v10 = vmul.f32 %v8562_v16, %v1723_v2 }
 0x1f1   : > { %v1860_v54 = vmul.f32 %v8562_v16, %v1725_v31  ;;  %v1598_v4 = vadd.f32 %v8544_v26, %v1290_v18  ;;  %v1599_v23 = vadd.f32 %v8544_v26, %v1291_v30  ;;  %v1295_v30 = vadd.f32 %v8534_v56, %v8313_v47 }
 0x1f2   : > { %13421 = vst [vmem:[#allocation104_spill] sm:$0xff] %v8570_v35  ;;  %13422 = vst [vmem:[#allocation105_spill] sm:$0xff] %v8573_v60  ;;  %1986 = vadd.xlane.f32.xlu0 %v1858_v10  ;;  %v1600_v60 = vadd.f32 %v8544_v26, %v1292_v20  ;;  %v1601_v10 = vadd.f32 %v8544_v26, %v1293_v37  ;;  %v1602_v20 = vadd.f32 %v8544_v26, %v1294_v39 }
 0x1f3   : > { %13423 = vst [vmem:[#allocation106_spill] sm:$0xff] %v8576_v62  ;;  %v1724_v62 = vmax.f32 %v1596_v33, 0.0  ;;  %1990 = vadd.xlane.f32.xlu1 %v1860_v54  ;;  %v1726_v2 = vmax.f32 %v1598_v4, 0.0  ;;  %v1727_v58 = vmax.f32 %v1599_v23, 0.0  ;;  %v1297_v23 = vadd.f32 %v8534_v56, %v8321_v51 }
 0x1f4   : > { %v1728_v31 = vmax.f32 %v1600_v60, 0.0  ;;  %v1729_v33 = vmax.f32 %v1601_v10, 0.0  ;;  %v1730_v4 = vmax.f32 %v1602_v20, 0.0  ;;  %v1604_v60 = vadd.f32 %v8544_v26, %v1296_v43 }
 0x1f5   : > { %v1859_v25 = vmul.f32 %v8562_v16, %v1724_v62  ;;  %v1861_v18 = vmul.f32 %v8562_v16, %v1726_v2  ;;  %v1862_v41 = vmul.f32 %v8562_v16, %v1727_v58  ;;  %v1603_v62 = vadd.f32 %v8544_v26, %v1295_v30 }
 0x1f6   : > { %v1863_v54 = vmul.f32 %v8562_v16, %v1728_v31  ;;  %v1298_v47 = vadd.f32 %v8317_v49, %v8534_v56  ;;  %v1864_v45 = vmul.f32 %v8562_v16, %v1729_v33  ;;  %v1605_v39 = vadd.f32 %v8544_v26, %v1297_v23 }
 0x1f7   : > { %1988 = vadd.xlane.f32.xlu0 %v1859_v25  ;;  %1992 = vadd.xlane.f32.xlu1 %v1861_v18  ;;  %v1731_v37 = vmax.f32 %v1603_v62, 0.0  ;;  %v1865_v2 = vmul.f32 %v8562_v16, %v1730_v4  ;;  %v1732_v25 = vmax.f32 %v1604_v60, 0.0  ;;  %v1299_v10 = vadd.f32 %v8534_v56, %v8329_v55 }
 0x1f8   : > { %v1606_v58 = vadd.f32 %v8544_v26, %v1298_v47  ;;  %v1300_v51 = vadd.f32 %v8325_v53, %v8534_v56  ;;  %v1733_v18 = vmax.f32 %v1605_v39, 0.0  ;;  %v1302_v55 = vadd.f32 %v8333_v57, %v8534_v56 }
 0x1f9   : > { %v1866_v49 = vmul.f32 %v8562_v16, %v1731_v37  ;;  %v1607_v31 = vadd.f32 %v8544_v26, %v1299_v10  ;;  %v1867_v20 = vmul.f32 %v8562_v16, %v1732_v25  ;;  %v8626_v53 = vrot.slane %v8538_v27, %v8527_v0 }
 0x1fa   : > { %v1734_v30 = vmax.f32 %v1606_v58, 0.0  ;;  %v1608_v43 = vadd.f32 %v8544_v26, %v1300_v51  ;;  %v1868_v33 = vmul.f32 %v8562_v16, %v1733_v18  ;;  %v1610_v23 = vadd.f32 %v8544_v26, %v1302_v55 }
 0x1fb   : > { %1994 = vadd.xlane.f32.xlu0 %v1862_v41  ;;  %1996 = vadd.xlane.f32.xlu1 %v1863_v54  ;;  %v1301_v41 = vadd.f32 %v8534_v56, %v8337_v59  ;;  %v1735_v62 = vmax.f32 %v1607_v31, 0.0  ;;  %v1303_v59 = vadd.f32 %v8534_v56, %v8345_v63  ;;  %v1304_v57 = vadd.f32 %v8341_v61, %v8534_v56 }
 0x1fc   : > { %v1869_v4 = vmul.f32 %v8562_v16, %v1734_v30  ;;  %v1736_v60 = vmax.f32 %v1608_v43, 0.0  ;;  %v1305_v27 = vadd.f32 %v8534_v56, %v8353_v3  ;;  %v1306_v39 = vadd.f32 %v8349_v1, %v8534_v56 }
 0x1fd   : > { %v1609_v54 = vadd.f32 %v8544_v26, %v1301_v41  ;;  %v1870_v47 = vmul.f32 %v8562_v16, %v1735_v62  ;;  %v1611_v37 = vadd.f32 %v8626_v53, %v1303_v59  ;;  %v1612_v63 = vadd.f32 %v8626_v53, %v1304_v57 }
 0x1fe   : > { %v1871_v26 = vmul.f32 %v8562_v16, %v1736_v60  ;;  %v1354_v61 = vadd.f32 %v8273_v28, %v8534_v56  ;;  %v1353_v3 = vadd.f32 %v8534_v56, %v8275_v29  ;;  %v1356_v25 = vadd.f32 %v8279_v21, %v8534_v56 }
 0x1ff   : > { %1998 = vadd.xlane.f32.xlu0 %v1864_v45  ;;  %2000 = vadd.xlane.f32.xlu1 %v1865_v2  ;;  %v1737_v45 = vmax.f32 %v1609_v54, 0.0  ;;  %v1738_v2 = vmax.f32 %v1610_v23, 0.0  ;;  %v1355_v58 = vadd.f32 %v8534_v56, %v8283_v32  ;;  %v1308_v1 = vadd.f32 %v8357_v5, %v8534_v56 }
 0x200   : > { %v1307_v10 = vadd.f32 %v8534_v56, %v8361_v7  ;;  %v1739_v28 = vmax.f32 %v1611_v37, 0.0  ;;  %v1358_v29 = vadd.f32 %v8287_v34, %v8534_v56  ;;  %v1740_v18 = vmax.f32 %v1612_v63, 0.0 }
 0x201   : > { %v1872_v51 = vmul.f32 %v8562_v16, %v1737_v45  ;;  %v1873_v21 = vmul.f32 %v8562_v16, %v1738_v2  ;;  %v1614_v32 = vadd.f32 %v8626_v53, %v1306_v39  ;;  %v1357_v5 = vadd.f32 %v8534_v56, %v8291_v36 }
 0x202   : > { %v1360_v31 = vadd.f32 %v8295_v38, %v8534_v56  ;;  %v1359_v7 = vadd.f32 %v8534_v56, %v8299_v40  ;;  %v1362_v34 = vadd.f32 %v8303_v42, %v8534_v56  ;;  %v1361_v30 = vadd.f32 %v8534_v56, %v8307_v44 }
 0x203   : > { %2002 = vadd.xlane.f32.xlu0 %v1866_v49  ;;  %2004 = vadd.xlane.f32.xlu1 %v1867_v20  ;;  %v1613_v49 = vadd.f32 %v8626_v53, %v1305_v27  ;;  %v8670_v20 = vrot.slane %v8536_v8, %v8527_v0  ;;  %v1310_v36 = vadd.f32 %v8365_v9, %v8534_v56  ;;  %v1742_v9 = vmax.f32 %v1614_v32, 0.0 }
 0x204   : > { %v1309_v38 = vadd.f32 %v8534_v56, %v8369_v11  ;;  %v1874_v40 = vmul.f32 %v8562_v16, %v1739_v28  ;;  %v1616_v41 = vadd.f32 %v8626_v53, %v1308_v1  ;;  %v1615_v55 = vadd.f32 %v8626_v53, %v1307_v10  ;;  %v13425_v28 = vld [vmem:[#allocation81_spill] sm:$0xff] }
 0x205   : > { %v1741_v43 = vmax.f32 %v1613_v49, 0.0  ;;  %v1364_v42 = vadd.f32 %v8311_v46, %v8534_v56  ;;  %v1363_v44 = vadd.f32 %v8534_v56, %v8315_v48  ;;  %v1366_v11 = vadd.f32 %v8319_v50, %v8534_v56  ;;  %v13426_v49 = vld [vmem:[#allocation83_spill] sm:$0xff] }
 0x206   : > { %v1365_v62 = vadd.f32 %v8534_v56, %v8323_v52  ;;  %v1312_v54 = vadd.f32 %v8373_v13, %v8534_v56  ;;  %v1311_v46 = vadd.f32 %v8534_v56, %v8377_v15  ;;  %v1618_v48 = vadd.f32 %v8626_v53, %v1310_v36 }
 0x207   : > { %2006 = vadd.xlane.f32.xlu0 %v1868_v33  ;;  %2008 = vadd.xlane.f32.xlu1 %v1869_v4  ;;  %v1875_v33 = vmul.f32 %v8562_v16, %v1740_v18  ;;  %v8695_v4 = vadd.f32 %v8670_v20, %v1354_v61  ;;  %v1617_v60 = vadd.f32 %v8626_v53, %v1309_v38  ;;  %v1744_v23 = vmax.f32 %v1616_v41, 0.0  ;;  %v13427_v38 = vld [vmem:[#allocation85_spill] sm:$0xff] }
 0x208   : > { %v8702_v50 = vadd.f32 %v8670_v20, %v1353_v3  ;;  %v1876_v52 = vmul.f32 %v8562_v16, %v1741_v43  ;;  %v1743_v59 = vmax.f32 %v1615_v55, 0.0  ;;  %v8706_v13 = vadd.f32 %v8670_v20, %v1356_v25 }
 0x209   : > { %v1877_v57 = vmul.f32 %v8562_v16, %v1742_v9  ;;  %v8710_v27 = vadd.f32 %v8670_v20, %v1355_v58  ;;  %v8713_v15 = vadd.f32 %v8670_v20, %v1358_v29  ;;  %v1314_v45 = vadd.f32 %v8381_v17, %v8534_v56 }
 0x20a   : > { %v1313_v37 = vadd.f32 %v8534_v56, %v8385_v19  ;;  %v8723_v39 = vadd.f32 %v8670_v20, %v1360_v31  ;;  %v1316_v2 = vadd.f32 %v8389_v22, %v8534_v56  ;;  %v1315_v63 = vadd.f32 %v8534_v56, %v8393_v24 }
 0x20b   : > { %2010 = vadd.xlane.f32.xlu0 %v1870_v47  ;;  %2012 = vadd.xlane.f32.xlu1 %v1871_v26  ;;  %v8716_v47 = vadd.f32 %v8670_v20, %v1357_v5  ;;  %v8726_v26 = vadd.f32 %v8670_v20, %v1359_v7  ;;  %v1336_v61 = vadd.f32 %v8469_v14, %v8534_v56  ;;  %v1745_v25 = vmax.f32 %v1617_v60, 0.0  ;;  %v13424_v14 = vld [vmem:[#allocation79_spill] sm:$0xff]  ;;  %v13432_v60 = vld [vmem:[#allocation89_spill] sm:$0xff] }
 0x20c   : > { %v1619_v17 = vadd.f32 %v8626_v53, %v1311_v46  ;;  %v1335_v19 = vadd.f32 %v8534_v56, %v8473_v12  ;;  %v1878_v3 = vmul.f32 %v8562_v16, %v1743_v59  ;;  %v8739_v58 = vadd.f32 %v8670_v20, %v1362_v34  ;;  %v13431_v46 = vld [vmem:[#allocation43_spill] sm:$0xff] }
 0x20d   : > { %v1879_v22 = vmul.f32 %v8562_v16, %v1744_v23  ;;  %v1746_v1 = vmax.f32 %v1618_v48, 0.0  ;;  %v1620_v24 = vadd.f32 %v8626_v53, %v1312_v54  ;;  %v8744_v10 = vadd.f32 %v8670_v20, %v1361_v30  ;;  %v13433_v23 = vld [vmem:[#allocation102_spill] sm:$0xff] }
 0x20e   : > { %v1337_v12 = vadd.f32 %v8534_v56, %v13425_v28  ;;  %v1340_v29 = vadd.f32 %v13426_v49, %v8534_v56  ;;  %v1747_v18 = vmax.f32 %v1619_v17, 0.0  ;;  %v8756_v32 = vadd.f32 %v8670_v20, %v1363_v44  ;;  %v13440_v49 = vld [vmem:[#allocation47_spill] sm:$0xff] }
 0x20f   : > { %2014 = vadd.xlane.f32.xlu0 %v1872_v51  ;;  %2016 = vadd.xlane.f32.xlu1 %v1873_v21  ;;  %v1338_v51 = vadd.f32 %v13424_v14, %v8534_v56  ;;  %v8753_v21 = vadd.f32 %v8670_v20, %v1364_v42  ;;  %v8759_v5 = vadd.f32 %v8670_v20, %v1366_v11  ;;  %v1748_v41 = vmax.f32 %v1620_v24, 0.0  ;;  %v13428_v42 = vld [vmem:[#allocation23_spill] sm:$0xff]  ;;  %v13437_v14 = vld [vmem:[#allocation45_spill] sm:$0xff] }
 0x210   : > { %v8762_v31 = vadd.f32 %v8670_v20, %v1365_v62  ;;  %v1880_v7 = vmul.f32 %v8562_v16, %v1745_v25  ;;  %v1621_v34 = vadd.f32 %v8626_v53, %v1313_v37  ;;  %v8767_v30 = vadd.f32 %v8557_v6, %v1336_v61  ;;  %v13430_v11 = vld [vmem:[#allocation87_spill] sm:$0xff] }
 0x211   : > { %v8770_v36 = vadd.f32 %v8557_v6, %v1335_v19  ;;  %v1881_v43 = vmul.f32 %v8562_v16, %v1746_v1  ;;  %v1622_v55 = vadd.f32 %v8626_v53, %v1314_v45  ;;  %v8778_v44 = vadd.f32 %v13428_v42, %v8534_v56  ;;  %v13436_v1 = vld [vmem:[#allocation24_spill] sm:$0xff]  ;;  %v13444_v42 = vld [vmem:[#allocation98_spill] sm:$0xff] }
 0x212   : > { %v1342_v62 = vadd.f32 %v13430_v11, %v8534_v56  ;;  %v8785_v54 = vadd.f32 %v8557_v6, %v1338_v51  ;;  %v1317_v48 = vadd.f32 %v8534_v56, %v13431_v46  ;;  %v1551_v59 = vcombine.high %v13433_v23, %v13433_v23  ;;  %v13446_v23 = vld [vmem:[#allocation26_spill] sm:$0xff] }
 0x213   : > { %2018 = vadd.xlane.f32.xlu0 %v1874_v40  ;;  %2020 = vadd.xlane.f32.xlu1 %v1875_v33  ;;  %v1339_v40 = vadd.f32 %v8534_v56, %v13427_v38  ;;  %v13429_v33 = vld [vmem:[#allocation41_spill] sm:$0xff]  ;;  %v1882_v45 = vmul.f32 %v8562_v16, %v1747_v18  ;;  %v1749_v37 = vmax.f32 %v1621_v34, 0.0  ;;  %v1623_v61 = vadd.f32 %v8626_v53, %v1315_v63  ;;  %v13438_v63 = vld [vmem:[#allocation91_spill] sm:$0xff] }
 0x214   : > { %v1318_v9 = vadd.f32 %v13429_v33, %v8534_v56  ;;  %v8799_v17 = vadd.f32 %v8557_v6, %v1340_v29  ;;  %v1883_v19 = vmul.f32 %v8562_v16, %v1748_v41  ;;  %v1624_v25 = vadd.f32 %v8626_v53, %v1316_v2  ;;  %v13441_v29 = vld [vmem:[#allocation93_spill] sm:$0xff]  ;;  %v13443_v38 = vld [vmem:[#allocation95_spill] sm:$0xff] }
 0x215   : > { %v8808_v24 = vadd.f32 %v8534_v56, %v13436_v1  ;;  %v1320_v51 = vadd.f32 %v13437_v14, %v8534_v56  ;;  %v1344_v28 = vadd.f32 %v13438_v63, %v8534_v56  ;;  %v1319_v2 = vadd.f32 %v8534_v56, %v13440_v49  ;;  %v13453_v49 = vld [vmem:[#allocation49_spill] sm:$0xff] }
 0x216   : > { %13434 = vst [vmem:[#allocation79_spill] sm:$0xff] %v8799_v17  ;;  %v1343_v18 = vadd.f32 %v8534_v56, %v13441_v29  ;;  %v1751_v41 = vmax.f32 %v1623_v61, 0.0  ;;  %v1345_v33 = vadd.f32 %v8534_v56, %v13444_v42  ;;  %v1626_v46 = vadd.f32 %v8626_v53, %v1318_v9  ;;  %v13449_v61 = vld [vmem:[#allocation51_spill] sm:$0xff] }
 0x217   : > { %2022 = vadd.xlane.f32.xlu0 %v1876_v52  ;;  %2024 = vadd.xlane.f32.xlu1 %v1877_v57  ;;  %v1341_v52 = vadd.f32 %v8534_v56, %v13432_v60  ;;  %v8794_v57 = vadd.f32 %v8557_v6, %v1337_v12  ;;  %v8815_v12 = vadd.f32 %v8557_v6, %v1342_v62  ;;  %v1752_v62 = vmax.f32 %v1624_v25, 0.0  ;;  %v13445_v60 = vld [vmem:[#allocation25_spill] sm:$0xff] }
 0x218   : > { %v8856_v25 = vadd.f32 %v8557_v6, %v1343_v18  ;;  %v1886_v1 = vmul.f32 %v8562_v16, %v1751_v41  ;;  %v1322_v29 = vadd.f32 %v13453_v49, %v8534_v56  ;;  %v8867_v42 = vadd.f32 %v8557_v6, %v1345_v33  ;;  %v13456_v41 = vld [vmem:[#allocation29_spill] sm:$0xff] }
 0x219   : > { %13439 = vst [vmem:[#allocation83_spill] sm:$0xff] %v8815_v12  ;;  %v8825_v34 = vadd.f32 %v8557_v6, %v1341_v52  ;;  %v8837_v52 = vadd.f32 %v13445_v60, %v8534_v56 }
 0x21a   : > { %13451 = vst [vmem:[#allocation41_spill] sm:$0xff] %v8856_v25  ;;  %13454 = vst [vmem:[#allocation43_spill] sm:$0xff] %v8867_v42  ;;  %v13472_v42 = vld [vmem:[#allocation59_spill] sm:$0xff] }
 0x21b   : > { %2026 = vadd.xlane.f32.xlu0 %v1878_v3  ;;  %2028 = vadd.xlane.f32.xlu1 %v1879_v22  ;;  %v1750_v3 = vmax.f32 %v1622_v55, 0.0  ;;  %v8804_v22 = vadd.f32 %v8557_v6, %v1339_v40  ;;  %13442 = vst [vmem:[#allocation85_spill] sm:$0xff] %v8825_v34  ;;  %v1346_v40 = vadd.f32 %v13443_v38, %v8534_v56 }
 0x21c   : > { %v1625_v55 = vadd.f32 %v8626_v53, %v1317_v48  ;;  %v8848_v48 = vadd.f32 %v8557_v6, %v1344_v28  ;;  %v13450_v53 = vld [vmem:[#allocation100_spill] sm:$0xff]  ;;  %v1887_v38 = vmul.f32 %v8562_v16, %v1752_v62 }
 0x21d   : > { %13435 = vst [vmem:[#allocation81_spill] sm:$0xff] %v8804_v22  ;;  %v1885_v11 = vmul.f32 %v8562_v16, %v1750_v3  ;;  %v1348_v9 = vadd.f32 %v13450_v53, %v8534_v56  ;;  %v8861_v28 = vadd.f32 %v8557_v6, %v1346_v40  ;;  %v13459_v62 = vld [vmem:[#allocation32_spill] sm:$0xff]  ;;  %v13486_v22 = vld [vmem:[#allocation67_spill] sm:$0xff] }
 0x21e   : > { %13448 = vst [vmem:[#allocation23_spill] sm:$0xff] %v8848_v48  ;;  %v1753_v14 = vmax.f32 %v1625_v55, 0.0  ;;  %v8875_v55 = vadd.f32 %v13456_v41, %v8534_v56  ;;  %v8887_v33 = vadd.f32 %v8534_v56, %v13459_v62  ;;  %v13464_v62 = vld [vmem:[#allocation103_spill] sm:$0xff] }
 0x21f   : > { %2030 = vadd.xlane.f32.xlu0 %v1880_v7  ;;  %2032 = vadd.xlane.f32.xlu1 %v1881_v43  ;;  %v8822_v7 = vrot.slane %v1551_v59, %v8527_v0  ;;  %v1884_v43 = vmul.f32 %v8562_v16, %v1749_v37  ;;  %v8841_v59 = vadd.f32 %v8534_v56, %v13446_v23 }
 0x220   : > { %13452 = vst [vmem:[#allocation87_spill] sm:$0xff] %v8861_v28  ;;  %v1888_v49 = vmul.f32 %v8562_v16, %v1753_v14 }
 0x221   : > { %v1628_v3 = vadd.f32 %v8822_v7, %v1320_v51  ;;  %v1627_v63 = vadd.f32 %v8822_v7, %v1319_v2  ;;  %v13455_v51 = vld [vmem:[#allocation28_spill] sm:$0xff]  ;;  %v13457_v2 = vld [vmem:[#allocation30_spill] sm:$0xff] }
 0x222   : > { %v8871_v18 = vadd.f32 %v8534_v56, %v13455_v51  ;;  %v8879_v40 = vadd.f32 %v8534_v56, %v13457_v2  ;;  %v13463_v2 = vld [vmem:[#allocation53_spill] sm:$0xff] }
 0x223   : > { %2034 = vadd.xlane.f32.xlu0 %v1882_v45  ;;  %2036 = vadd.xlane.f32.xlu1 %v1883_v19  ;;  %v13447_v45 = vld [vmem:[#allocation27_spill] sm:$0xff]  ;;  %v1321_v19 = vadd.f32 %v8534_v56, %v13449_v61  ;;  %v1756_v53 = vmax.f32 %v1628_v3, 0.0  ;;  %v1755_v51 = vmax.f32 %v1627_v63, 0.0  ;;  %v13465_v3 = vld [vmem:[#allocation34_spill] sm:$0xff] }
 0x224   : > { %v8845_v37 = vadd.f32 %v13447_v45, %v8534_v56  ;;  %v13461_v45 = vld [vmem:[#allocation55_spill] sm:$0xff]  ;;  %v1377_v14 = vadd.f32 %v8534_v56, %v13465_v3 }
 0x225   : > { %v1323_v61 = vadd.f32 %v8534_v56, %v13461_v45  ;;  %v1629_v41 = vadd.f32 %v8822_v7, %v1321_v19  ;;  %v13466_v63 = vld [vmem:[#allocation35_spill] sm:$0xff]  ;;  %v13468_v45 = vld [vmem:[#allocation37_spill] sm:$0xff]  ;;  %v1891_v48 = vmul.f32 %v8562_v16, %v1756_v53  ;;  %v13476_v53 = vld [vmem:[#allocation42_spill] sm:$0xff] }
 0x226   : > { %v8912_v19 = vadd.f32 %v13466_v63, %v8534_v56  ;;  %v13471_v63 = vld [vmem:[#allocation57_spill] sm:$0xff] }
 0x227   : > { %2038 = vadd.xlane.f32.xlu0 %v1884_v43  ;;  %2040 = vadd.xlane.f32.xlu1 %v1885_v11  ;;  %v1754_v43 = vmax.f32 %v1626_v46, 0.0  ;;  %v13458_v11 = vld [vmem:[#allocation31_spill] sm:$0xff]  ;;  %v13460_v46 = vld [vmem:[#allocation33_spill] sm:$0xff]  ;;  %v1326_v28 = vadd.f32 %v13471_v63, %v8534_v56  ;;  %v1631_v25 = vadd.f32 %v8822_v7, %v1323_v61  ;;  %v13477_v61 = vld [vmem:[#allocation44_spill] sm:$0xff] }
 0x228   : > { %v8883_v60 = vadd.f32 %v13458_v11, %v8534_v56  ;;  %v8891_v23 = vadd.f32 %v13460_v46, %v8534_v56  ;;  %v1324_v11 = vadd.f32 %v13463_v2, %v8534_v56  ;;  %v8904_v46 = vrot.slane %v13464_v62, %v8527_v0 }
 0x229   : > { %v1889_v35 = vmul.f32 %v8562_v16, %v1754_v43  ;;  %v8920_v2 = vadd.f32 %v13468_v45, %v8534_v56  ;;  %v1890_v45 = vmul.f32 %v8562_v16, %v1755_v51  ;;  %v8952_v51 = vadd.f32 %v13476_v53, %v8534_v56 }
 0x22a   : > { %v1632_v12 = vadd.f32 %v8822_v7, %v1324_v11  ;;  %v8944_v63 = vadd.f32 %v8904_v46, %v8808_v24  ;;  %v13478_v11 = vld [vmem:[#allocation61_spill] sm:$0xff]  ;;  %v8969_v53 = vadd.f32 %v8904_v46, %v8837_v52  ;;  %v1634_v52 = vadd.f32 %v8822_v7, %v1326_v28 }
 0x22b   : > { %2042 = vadd.xlane.f32.xlu0 %v1886_v1  ;;  %2044 = vadd.xlane.f32.xlu1 %v1887_v38  ;;  %v8898_v1 = vadd.f32 %v8557_v6, %v1348_v9  ;;  %v1630_v38 = vadd.f32 %v8822_v7, %v1322_v29  ;;  %v13467_v6 = vld [vmem:[#allocation36_spill] sm:$0xff]  ;;  %v13470_v29 = vld [vmem:[#allocation39_spill] sm:$0xff]  ;;  %v9000_v28 = vadd.f32 %v8904_v46, %v8871_v18 }
 0x22c   : > { %v8916_v9 = vadd.f32 %v8534_v56, %v13467_v6  ;;  %v8928_v3 = vadd.f32 %v13470_v29, %v8534_v56  ;;  %v1325_v6 = vadd.f32 %v8534_v56, %v13472_v42  ;;  %v8940_v29 = vadd.f32 %v8904_v46, %v8778_v44  ;;  %13474 = vst [vmem:[#allocation24_spill] sm:$0xff] %v8944_v63  ;;  %v13475_v42 = vld [vmem:[#allocation40_spill] sm:$0xff] }
 0x22d   : > { %13462 = vst [vmem:[#allocation89_spill] sm:$0xff] %v8898_v1  ;;  %v13469_v1 = vld [vmem:[#allocation38_spill] sm:$0xff]  ;;  %v1328_v44 = vadd.f32 %v13478_v11, %v8534_v56  ;;  %13481 = vst [vmem:[#allocation45_spill] sm:$0xff] %v8969_v53  ;;  %v1759_v11 = vmax.f32 %v1631_v25, 0.0  ;;  %v1760_v17 = vmax.f32 %v1632_v12, 0.0  ;;  %v13485_v53 = vld [vmem:[#allocation65_spill] sm:$0xff]  ;;  %v1552_v25 = vcombine.high %v8536_v8, %v8536_v8 }
 0x22e   : > { %v8924_v43 = vadd.f32 %v8534_v56, %v13469_v1  ;;  %v1758_v1 = vmax.f32 %v1630_v38, 0.0  ;;  %13473 = vst [vmem:[#allocation102_spill] sm:$0xff] %v8940_v29  ;;  %v13479_v38 = vld [vmem:[#allocation46_spill] sm:$0xff]  ;;  %v13480_v29 = vld [vmem:[#allocation63_spill] sm:$0xff]  ;;  %v1633_v63 = vadd.f32 %v8822_v7, %v1325_v6  ;;  %v8996_v12 = vadd.f32 %v8904_v46, %v8845_v37 }
 0x22f   : > { %2046 = vadd.xlane.f32.xlu0 %v1888_v49  ;;  %2048 = vadd.xlane.f32.xlu1 %v1889_v35  ;;  %v1757_v49 = vmax.f32 %v1629_v41, 0.0  ;;  %v8948_v35 = vadd.f32 %v8534_v56, %v13475_v42  ;;  %v8956_v41 = vadd.f32 %v8534_v56, %v13477_v61  ;;  %v8962_v24 = vadd.f32 %v13479_v38, %v8534_v56  ;;  %v13482_v61 = vld [vmem:[#allocation48_spill] sm:$0xff] }
 0x230   : > { %v1327_v42 = vadd.f32 %v8534_v56, %v13480_v29  ;;  %v8973_v34 = vadd.f32 %v8534_v56, %v13482_v61  ;;  %v8978_v38 = vadd.f32 %v8904_v46, %v8841_v59  ;;  %v13484_v29 = vld [vmem:[#allocation50_spill] sm:$0xff]  ;;  %v1893_v6 = vmul.f32 %v8562_v16, %v1758_v1 }
 0x231   : > { %v1330_v61 = vadd.f32 %v13485_v53, %v8534_v56  ;;  %v1636_v59 = vadd.f32 %v8822_v7, %v1328_v44  ;;  %v9005_v8 = vadd.f32 %v8904_v46, %v8875_v55  ;;  %v9009_v1 = vadd.f32 %v8904_v46, %v8879_v40  ;;  %v13490_v55 = vld [vmem:[#allocation52_spill] sm:$0xff]  ;;  %v13491_v40 = vld [vmem:[#allocation54_spill] sm:$0xff] }
 0x232   : > { %13483 = vst [vmem:[#allocation91_spill] sm:$0xff] %v8978_v38  ;;  %v1635_v38 = vadd.f32 %v8822_v7, %v1327_v42  ;;  %v1895_v37 = vmul.f32 %v8562_v16, %v1760_v17  ;;  %v1762_v44 = vmax.f32 %v1634_v52, 0.0  ;;  %v9018_v18 = vadd.f32 %v8904_v46, %v8887_v33  ;;  %v13495_v52 = vld [vmem:[#allocation71_spill] sm:$0xff] }
 0x233   : > { %2050 = vadd.xlane.f32.xlu0 %v1890_v45  ;;  %2052 = vadd.xlane.f32.xlu1 %v1891_v48  ;;  %v1892_v45 = vmul.f32 %v8562_v16, %v1757_v49  ;;  %v8982_v48 = vadd.f32 %v13484_v29, %v8534_v56  ;;  %v1329_v49 = vadd.f32 %v8534_v56, %v13486_v22  ;;  %v1761_v29 = vmax.f32 %v1633_v63, 0.0 }
 0x234   : > { %v1894_v22 = vmul.f32 %v8562_v16, %v1759_v11  ;;  %v9013_v63 = vadd.f32 %v8904_v46, %v8883_v60  ;;  %13488 = vst [vmem:[#allocation93_spill] sm:$0xff] %v9018_v18  ;;  %v9022_v42 = vadd.f32 %v8904_v46, %v8891_v23  ;;  %v1389_v53 = vadd.f32 %v8534_v56, %v13490_v55  ;;  %v13493_v11 = vld [vmem:[#allocation56_spill] sm:$0xff]  ;;  %v13496_v55 = vld [vmem:[#allocation73_spill] sm:$0xff] }
 0x235   : > { %v9029_v60 = vrot.slane %v1552_v25, %v8527_v0  ;;  %v9032_v17 = vadd.f32 %v8904_v46, %v1377_v14  ;;  %v1391_v33 = vadd.f32 %v8534_v56, %v13493_v11  ;;  %v1896_v25 = vmul.f32 %v8562_v16, %v1761_v29 }
 0x236   : > { %13487 = vst [vmem:[#allocation47_spill] sm:$0xff] %v9013_v63  ;;  %13489 = vst [vmem:[#allocation95_spill] sm:$0xff] %v9022_v42  ;;  %v1331_v42 = vadd.f32 %v8534_v56, %v13495_v52  ;;  %v1334_v63 = vadd.f32 %v13496_v55, %v8534_v56  ;;  %v1763_v18 = vmax.f32 %v1635_v38, 0.0  ;;  %v1637_v14 = vadd.f32 %v8822_v7, %v1329_v49  ;;  %v13497_v55 = vld [vmem:[#allocation75_spill] sm:$0xff] }
 0x237   : > { %2054 = vadd.xlane.f32.xlu0 %v1892_v45  ;;  %2056 = vadd.xlane.f32.xlu1 %v1893_v6  ;;  %v1392_v45 = vadd.f32 %v13491_v40, %v8534_v56  ;;  %13492 = vst [vmem:[#allocation98_spill] sm:$0xff] %v9032_v17  ;;  %v13494_v6 = vld [vmem:[#allocation69_spill] sm:$0xff]  ;;  %v7020_v40 = vpop.f32.mrf.mxu0  ;;  %v1897_v17 = vmul.f32 %v8562_v16, %v1762_v44 }
 0x238   : > { %v1332_v23 = vadd.f32 %v13494_v6, %v8534_v56  ;;  %v1638_v11 = vadd.f32 %v8822_v7, %v1330_v61  ;;  %v9048_v6 = vadd.f32 %v8904_v46, %v8912_v19  ;;  %v9052_v52 = vadd.f32 %v8904_v46, %v8916_v9 }
 0x239   : > { %v9058_v38 = vadd.f32 %v8904_v46, %v8920_v2  ;;  %v9062_v49 = vadd.f32 %v8904_v46, %v8924_v43  ;;  %v9066_v19 = vadd.f32 %v9029_v60, %v8928_v3  ;;  %v961_v61 = vpop.f32.mrf.mxu0  ;;  %v9072_v29 = vadd.f32 %v9029_v60, %v8948_v35  ;;  %v13499_v46 = vld [vmem:[#allocation58_spill] sm:$0xff] }
 0x23a   : > { %v1640_v9 = vadd.f32 %v8822_v7, %v1332_v23  ;;  %v9076_v2 = vadd.f32 %v9029_v60, %v8952_v51  ;;  %v1394_v43 = vadd.f32 %v13499_v46, %v8534_v56  ;;  %v1898_v3 = vmul.f32 %v8562_v16, %v1763_v18  ;;  %v13501_v23 = vld [vmem:[#allocation60_spill] sm:$0xff]  ;;  %v13502_v35 = vld [vmem:[#allocation62_spill] sm:$0xff] }
 0x23b   : > { %2058 = vadd.xlane.f32.xlu0 %v1894_v22  ;;  %2060 = vadd.xlane.f32.xlu1 %v1895_v37  ;;  %v1764_v22 = vmax.f32 %v1636_v59, 0.0  ;;  %v1333_v37 = vadd.f32 %v8534_v56, %v13497_v55  ;;  %v1639_v59 = vadd.f32 %v8822_v7, %v1331_v42  ;;  %v1765_v44 = vmax.f32 %v1637_v14, 0.0 }
 0x23c   : > { %13498 = vst [vmem:[#allocation25_spill] sm:$0xff] %v9076_v2  ;;  %v1393_v42 = vadd.f32 %v8534_v56, %v13501_v23  ;;  %v1766_v51 = vmax.f32 %v1638_v11, 0.0  ;;  %v1554_v2 = vcombine.high %v13464_v62, %v13464_v62  ;;  %v1352_v46 = vadd.f32 %v7020_v40, %v8534_v56 }
 0x23d   : > { %v1899_v55 = vmul.f32 %v8562_v16, %v1764_v22  ;;  %v1351_v18 = vadd.f32 %v8534_v56, %v961_v61  ;;  %v1768_v14 = vmax.f32 %v1640_v9, 0.0  ;;  %v1641_v23 = vadd.f32 %v8822_v7, %v1333_v37 }
 0x23e   : > { %v1900_v22 = vmul.f32 %v8562_v16, %v1765_v44  ;;  %v9103_v62 = vadd.f32 %v9029_v60, %v8973_v34  ;;  %v9107_v40 = vadd.f32 %v9029_v60, %v8982_v48  ;;  %v1901_v11 = vmul.f32 %v8562_v16, %v1766_v51  ;;  %v13504_v34 = vld [vmem:[#allocation64_spill] sm:$0xff]  ;;  %v13505_v48 = vld [vmem:[#allocation66_spill] sm:$0xff] }
 0x23f   : > { %2062 = vadd.xlane.f32.xlu0 %v1896_v25  ;;  %2064 = vadd.xlane.f32.xlu1 %v1897_v17  ;;  %v9083_v17 = vadd.f32 %v9029_v60, %v8956_v41  ;;  %v1396_v25 = vadd.f32 %v13502_v35, %v8534_v56  ;;  %v1642_v41 = vadd.f32 %v8822_v7, %v1334_v63  ;;  %v13509_v51 = vld [vmem:[#allocation72_spill] sm:$0xff] }
 0x240   : > { %v9098_v35 = vadd.f32 %v9029_v60, %v8962_v24  ;;  %v9110_v63 = vadd.f32 %v9029_v60, %v1389_v53  ;;  %v9114_v7 = vadd.f32 %v9029_v60, %v1392_v45  ;;  %v9117_v24 = vadd.f32 %v9029_v60, %v1391_v33  ;;  %v13507_v45 = vld [vmem:[#allocation68_spill] sm:$0xff]  ;;  %v13508_v33 = vld [vmem:[#allocation70_spill] sm:$0xff] }
 0x241   : > { %13500 = vst [vmem:[#allocation26_spill] sm:$0xff] %v9083_v17  ;;  %v1767_v17 = vmax.f32 %v1639_v59, 0.0  ;;  %v9120_v37 = vadd.f32 %v9029_v60, %v1394_v43  ;;  %v1395_v61 = vadd.f32 %v8534_v56, %v13504_v34  ;;  %v1398_v9 = vadd.f32 %v13505_v48, %v8534_v56 }
 0x242   : > { %v1660_v53 = vadd.f32 %v8670_v20, %v1352_v46  ;;  %v9128_v59 = vadd.f32 %v9029_v60, %v1393_v42  ;;  %v1400_v44 = vadd.f32 %v13508_v33, %v8534_v56  ;;  %v1586_v43 = vrot.slane %v1554_v2, %v8527_v0  ;;  %v13510_v46 = vld [vmem:[#allocation74_spill] sm:$0xff] }
 0x243   : > { %2066 = vadd.xlane.f32.xlu0 %v1898_v3  ;;  %2068 = vadd.xlane.f32.xlu1 %v1899_v55  ;;  %13503 = vst [vmem:[#allocation27_spill] sm:$0xff] %v9120_v37  ;;  %v1397_v3 = vadd.f32 %v8534_v56, %v13507_v45  ;;  %v1659_v55 = vadd.f32 %v8670_v20, %v1351_v18  ;;  %v1769_v48 = vmax.f32 %v1641_v23, 0.0  ;;  %v13511_v37 = vld [vmem:[#allocation76_spill] sm:$0xff]  ;;  %v1770_v33 = vmax.f32 %v1642_v41, 0.0  ;;  %v13521_v0 = vld [vmem:[#allocation90_spill] sm:$0xff] }
 0x244   : > { %13506 = vst [vmem:[#allocation51_spill] sm:$0xff] %v9128_v59  ;;  %v1399_v34 = vadd.f32 %v8534_v56, %v13509_v51  ;;  %v1902_v42 = vmul.f32 %v8562_v16, %v1767_v17  ;;  %v1401_v45 = vadd.f32 %v8534_v56, %v13511_v37  ;;  %v1903_v59 = vmul.f32 %v8562_v16, %v1768_v14 }
 0x245   : > { %v9145_v2 = vadd.f32 %v9029_v60, %v1396_v25  ;;  %v1788_v20 = vmax.f32 %v1660_v53, 0.0  ;;  %v9148_v18 = vadd.f32 %v9029_v60, %v1395_v61  ;;  %v9154_v17 = vadd.f32 %v9029_v60, %v1397_v3  ;;  %v13514_v61 = vld [vmem:[#allocation77_spill] sm:$0xff] }
 0x246   : > { %v1787_v23 = vmax.f32 %v1659_v55, 0.0  ;;  %v9156_v37 = vadd.f32 %v1586_v43, %v1400_v44  ;;  %v9158_v14 = vadd.f32 %v1586_v43, %v1399_v34  ;;  %v1904_v25 = vmul.f32 %v8562_v16, %v1769_v48  ;;  %v13517_v44 = vld [vmem:[#allocation82_spill] sm:$0xff]  ;;  %v13518_v34 = vld [vmem:[#allocation84_spill] sm:$0xff] }
 0x247   : > { %2070 = vadd.xlane.f32.xlu0 %v1900_v22  ;;  %2072 = vadd.xlane.f32.xlu1 %v1901_v11  ;;  %v1402_v22 = vadd.f32 %v13510_v46, %v8534_v56  ;;  %v9151_v11 = vadd.f32 %v9029_v60, %v1398_v9  ;;  %v9163_v53 = vadd.f32 %v1586_v43, %v1401_v45  ;;  %v13515_v9 = vld [vmem:[#allocation78_spill] sm:$0xff]  ;;  %v13516_v60 = vld [vmem:[#allocation80_spill] sm:$0xff] }
 0x248   : > { %v1404_v51 = vadd.f32 %v13514_v61, %v8534_v56  ;;  %v1403_v46 = vadd.f32 %v8534_v56, %v13515_v9  ;;  %v1406_v3 = vadd.f32 %v13516_v60, %v8534_v56  ;;  %v1405_v55 = vadd.f32 %v8534_v56, %v13517_v44  ;;  %v13520_v45 = vld [vmem:[#allocation88_spill] sm:$0xff] }
 0x249   : > { %v9160_v41 = vadd.f32 %v1586_v43, %v1402_v22  ;;  %13513 = vst [vmem:[#allocation49_spill] sm:$0xff] %v9163_v53  ;;  %v1408_v22 = vadd.f32 %v13518_v34, %v8534_v56  ;;  %v1410_v61 = vadd.f32 %v13520_v45, %v8534_v56  ;;  %v1409_v9 = vadd.f32 %v8534_v56, %v13521_v0 }
 0x24a   : > { %v1923_v60 = vmul.f32 %v8562_v16, %v1788_v20  ;;  %v1789_v44 = vmax.f32 %v8702_v50, 0.0  ;;  %v9187_v34 = vadd.f32 %v1586_v43, %v1403_v46  ;;  %v9189_v53 = vadd.f32 %v1586_v43, %v1406_v3  ;;  %v13525_v3 = vld [vmem:[#allocation97_spill] sm:$0xff] }
 0x24b   : > { %2074 = vadd.xlane.f32.xlu0 %v1902_v42  ;;  %2076 = vadd.xlane.f32.xlu1 %v1903_v59  ;;  %13512 = vst [vmem:[#allocation100_spill] sm:$0xff] %v9160_v41  ;;  %v1905_v59 = vmul.f32 %v8562_v16, %v1770_v33  ;;  %v13519_v42 = vld [vmem:[#allocation86_spill] sm:$0xff]  ;;  %v1922_v33 = vmul.f32 %v8562_v16, %v1787_v23  ;;  %v13523_v23 = vld [vmem:[#allocation92_spill] sm:$0xff] }
 0x24c   : > { %v1407_v48 = vadd.f32 %v8534_v56, %v13519_v42  ;;  %v9184_v41 = vadd.f32 %v1586_v43, %v1404_v51  ;;  %v9191_v42 = vadd.f32 %v1586_v43, %v1405_v55  ;;  %v9194_v45 = vadd.f32 %v1586_v43, %v1408_v22  ;;  %v13524_v51 = vld [vmem:[#allocation94_spill] sm:$0xff] }
 0x24d   : > { %v9200_v20 = vadd.f32 %v1586_v43, %v1409_v9  ;;  %v1412_v50 = vadd.f32 %v13523_v23, %v8534_v56  ;;  %v1411_v46 = vadd.f32 %v8534_v56, %v13524_v51  ;;  %v1414_v55 = vadd.f32 %v13525_v3, %v8534_v56 }
 0x24e   : > { %v9196_v0 = vadd.f32 %v1586_v43, %v1407_v48  ;;  %v1924_v48 = vmul.f32 %v8562_v16, %v1789_v44  ;;  %v1793_v44 = vmax.f32 %v8716_v47, 0.0  ;;  %v1797_v47 = vmax.f32 %v8744_v10, 0.0 }
 0x24f   : > { %2078 = vadd.xlane.f32.xlu0 %v1904_v25  ;;  %2080 = vadd.xlane.f32.xlu1 %v1905_v59  ;;  %v1790_v25 = vmax.f32 %v8695_v4, 0.0  ;;  %v9198_v59 = vadd.f32 %v1586_v43, %v1410_v61  ;;  %v13526_v4 = vld [vmem:[#allocation99_spill] sm:$0xff]  ;;  %v1791_v61 = vmax.f32 %v8710_v27, 0.0  ;;  %v9216_v23 = vadd.f32 %v1586_v43, %v1411_v46 }
 0x250   : > { %v1413_v22 = vadd.f32 %v8534_v56, %v13526_v4  ;;  %v1932_v4 = vmul.f32 %v8562_v16, %v1797_v47  ;;  %v1801_v10 = vmax.f32 %v8762_v31, 0.0  ;;  %v1773_v31 = vmax.f32 %v8794_v57, 0.0  ;;  %v13530_v47 = vld [vmem:[#allocation83_spill] sm:$0xff] }
 0x251   : > { %13522 = vst [vmem:[#allocation28_spill] sm:$0xff] %v9198_v59  ;;  %v1925_v9 = vmul.f32 %v8562_v16, %v1790_v25  ;;  %v9214_v59 = vadd.f32 %v1586_v43, %v1412_v50  ;;  %v1926_v56 = vmul.f32 %v8562_v16, %v1791_v61  ;;  %v1794_v25 = vmax.f32 %v8713_v15, 0.0 }
 0x252   : > { %v9220_v51 = vadd.f32 %v1586_v43, %v1413_v22  ;;  %v1795_v50 = vmax.f32 %v8726_v26, 0.0  ;;  %v1798_v15 = vmax.f32 %v8739_v58, 0.0  ;;  %v1799_v26 = vmax.f32 %v8756_v32, 0.0 }
 0x253   : > { %2114 = vadd.xlane.f32.xlu0 %v1922_v33  ;;  %2116 = vadd.xlane.f32.xlu1 %v1923_v60  ;;  %v1792_v33 = vmax.f32 %v8706_v13, 0.0  ;;  %v9218_v60 = vadd.f32 %v1586_v43, %v1414_v55  ;;  %v1928_v13 = vmul.f32 %v8562_v16, %v1793_v44  ;;  %v1929_v46 = vmul.f32 %v8562_v16, %v1794_v25  ;;  %v13527_v25 = vld [vmem:[#allocation81_spill] sm:$0xff] }
 0x254   : > { %v1796_v43 = vmax.f32 %v8723_v39, 0.0  ;;  %v1930_v3 = vmul.f32 %v8562_v16, %v1795_v50  ;;  %v1933_v22 = vmul.f32 %v8562_v16, %v1798_v15  ;;  %v1800_v39 = vmax.f32 %v8753_v21, 0.0  ;;  %v13528_v50 = vld [vmem:[#allocation79_spill] sm:$0xff] }
 0x255   : > { %v1927_v27 = vmul.f32 %v8562_v16, %v1792_v33  ;;  %v1802_v58 = vmax.f32 %v8759_v5, 0.0  ;;  %v1771_v32 = vmax.f32 %v8770_v36, 0.0  ;;  %v1772_v21 = vmax.f32 %v8767_v30, 0.0 }
 0x256   : > { %v1931_v55 = vmul.f32 %v8562_v16, %v1796_v43  ;;  %v1935_v61 = vmul.f32 %v8562_v16, %v1800_v39  ;;  %v1774_v5 = vmax.f32 %v8785_v54, 0.0  ;;  %v1775_v36 = vmax.f32 %v13527_v25, 0.0  ;;  %v13529_v43 = vld [vmem:[#allocation85_spill] sm:$0xff] }
 0x257   : > { %2118 = vadd.xlane.f32.xlu0 %v1924_v48  ;;  %2120 = vadd.xlane.f32.xlu1 %v1925_v9  ;;  %v1934_v48 = vmul.f32 %v8562_v16, %v1799_v26  ;;  %v1936_v9 = vmul.f32 %v8562_v16, %v1801_v10  ;;  %v1937_v33 = vmul.f32 %v8562_v16, %v1802_v58  ;;  %v1776_v30 = vmax.f32 %v13528_v50, 0.0  ;;  %v13531_v26 = vld [vmem:[#allocation41_spill] sm:$0xff] }
 0x258   : > { %v1907_v44 = vmul.f32 %v8562_v16, %v1772_v21  ;;  %v1777_v57 = vmax.f32 %v13529_v43, 0.0  ;;  %v1778_v54 = vmax.f32 %v13530_v47, 0.0  ;;  %v13536_v50 = vld [vmem:[#allocation89_spill] sm:$0xff]  ;;  %v13537_v43 = vld [vmem:[#allocation106_spill] sm:$0xff] }
 0x25a   : > { %v1913_v39 = vmul.f32 %v8562_v16, %v1778_v54  ;;  %v13538_v54 = vld [vmem:[#allocation105_spill] sm:$0xff] }
 0x25b   : > { %2122 = vadd.xlane.f32.xlu0 %v1926_v56  ;;  %2124 = vadd.xlane.f32.xlu1 %v1927_v27  ;;  %v1906_v56 = vmul.f32 %v8562_v16, %v1771_v32  ;;  %v1908_v27 = vmul.f32 %v8562_v16, %v1773_v31  ;;  %v13533_v32 = vld [vmem:[#allocation43_spill] sm:$0xff] }
 0x25f   : > { %2126 = vadd.xlane.f32.xlu0 %v1928_v13  ;;  %2128 = vadd.xlane.f32.xlu1 %v1929_v46  ;;  %v1909_v13 = vmul.f32 %v8562_v16, %v1774_v5  ;;  %v1910_v46 = vmul.f32 %v8562_v16, %v1775_v36  ;;  %v13535_v5 = vld [vmem:[#allocation104_spill] sm:$0xff] }
 0x263   : > { %2130 = vadd.xlane.f32.xlu0 %v1930_v3  ;;  %2132 = vadd.xlane.f32.xlu1 %v1931_v55  ;;  %v1911_v3 = vmul.f32 %v8562_v16, %v1776_v30  ;;  %v1784_v30 = vmax.f32 %v13536_v50, 0.0 }
 0x267   : > { %2134 = vadd.xlane.f32.xlu0 %v1932_v4  ;;  %2136 = vadd.xlane.f32.xlu1 %v1933_v22  ;;  %v1912_v4 = vmul.f32 %v8562_v16, %v1777_v57  ;;  %v1779_v22 = vmax.f32 %v13531_v26, 0.0  ;;  %v1785_v57 = vmax.f32 %v13537_v43, 0.0  ;;  %v1919_v26 = vmul.f32 %v8562_v16, %v1784_v30 }
 0x26b   : > { %2138 = vadd.xlane.f32.xlu0 %v1934_v48  ;;  %2140 = vadd.xlane.f32.xlu1 %v1935_v61  ;;  %v13532_v48 = vld [vmem:[#allocation23_spill] sm:$0xff] }
 0x26c   : > { %v1780_v10 = vmax.f32 %v13532_v48, 0.0  ;;  %v1920_v48 = vmul.f32 %v8562_v16, %v1785_v57 }
 0x26e   : > { %v1915_v21 = vmul.f32 %v8562_v16, %v1780_v10  ;;  %v13539_v10 = vld [vmem:[#allocation24_spill] sm:$0xff] }
 0x26f   : > { %2142 = vadd.xlane.f32.xlu0 %v1936_v9  ;;  %2144 = vadd.xlane.f32.xlu1 %v1937_v33  ;;  %v1914_v9 = vmul.f32 %v8562_v16, %v1779_v22  ;;  %v1781_v33 = vmax.f32 %v13533_v32, 0.0 }
 0x271   : > { %v1916_v36 = vmul.f32 %v8562_v16, %v1781_v33  ;;  %v13540_v33 = vld [vmem:[#allocation102_spill] sm:$0xff] }
 0x273   : > { %2082 = vadd.xlane.f32.xlu0 %v1906_v56  ;;  %2084 = vadd.xlane.f32.xlu1 %v1907_v44  ;;  %v13534_v56 = vld [vmem:[#allocation87_spill] sm:$0xff] }
 0x274   : > { %v1782_v31 = vmax.f32 %v13534_v56, 0.0 }
 0x277   : > { %2086 = vadd.xlane.f32.xlu0 %v1908_v27  ;;  %2088 = vadd.xlane.f32.xlu1 %v1909_v13  ;;  %v1783_v27 = vmax.f32 %v13535_v5, 0.0  ;;  %v1917_v13 = vmul.f32 %v8562_v16, %v1782_v31  ;;  %v9305_v5 = vld [vmem:[%s13014_s6] ss:$0 sm:$0xff] }
 0x279   : > { %v1918_v47 = vmul.f32 %v8562_v16, %v1783_v27 }
 0x27b   : > { %2090 = vadd.xlane.f32.xlu0 %v1910_v46  ;;  %v9258_v55 = vpop.xlane.xlu0 %1986  ;;  %2092 = vadd.xlane.f32.xlu1 %v1911_v3 }
 0x27c   : > { %v9260_v15 = vpop.xlane.xlu1 %1990 }
 0x27f   : > { %2094 = vadd.xlane.f32.xlu0 %v1912_v4  ;;  %2096 = vadd.xlane.f32.xlu1 %v1913_v39  ;;  %v1786_v4 = vmax.f32 %v13538_v54, 0.0  ;;  %v1807_v54 = vmax.f32 %v9000_v28, 0.0 }
 0x280   : > { %v9266_v61 = vpop.xlane.xlu0 %1988  ;;  %v9268_v58 = vpop.xlane.xlu1 %1992 }
 0x281   : > { %v1921_v32 = vmul.f32 %v8562_v16, %v1786_v4  ;;  %v13542_v16 = vld [vmem:[#allocation45_spill] sm:$0xff] }
 0x282   : > { %v1806_v30 = vmax.f32 %v13542_v16, 0.0  ;;  %v13545_v16 = vld [vmem:[#allocation47_spill] sm:$0xff] }
 0x283   : > { %2098 = vadd.xlane.f32.xlu0 %v1914_v9  ;;  %2100 = vadd.xlane.f32.xlu1 %v1915_v21  ;;  %v1803_v9 = vmax.f32 %v13539_v10, 0.0  ;;  %v1804_v21 = vmax.f32 %v13540_v33, 0.0 }
 0x284   : > { %v9274_v44 = vpop.xlane.xlu0 %1994  ;;  %v9277_v25 = vpop.xlane.xlu1 %1996  ;;  %v1941_v4 = vmul.f32 %v9305_v5, %v1806_v30  ;;  %v1812_v30 = vmax.f32 %v13545_v16, 0.0 }
 0x285   : > { %v1938_v27 = vmul.f32 %v9305_v5, %v1803_v9  ;;  %v1939_v50 = vmul.f32 %v9305_v5, %v1804_v21  ;;  %v1942_v9 = vmul.f32 %v9305_v5, %v1807_v54  ;;  %v1810_v21 = vmax.f32 %v9005_v8, 0.0  ;;  %v13546_v54 = vld [vmem:[#allocation98_spill] sm:$0xff] }
 0x287   : > { %2102 = vadd.xlane.f32.xlu0 %v1916_v36  ;;  %2104 = vadd.xlane.f32.xlu1 %v1917_v13  ;;  %v13541_v36 = vld [vmem:[#allocation91_spill] sm:$0xff] }
 0x288   : > { %v9282_v46 = vpop.xlane.xlu0 %1998  ;;  %v9285_v3 = vpop.xlane.xlu1 %2000  ;;  %v1805_v13 = vmax.f32 %v13541_v36, 0.0  ;;  %v13544_v36 = vld [vmem:[#allocation93_spill] sm:$0xff] }
 0x28b   : > { %2106 = vadd.xlane.f32.xlu0 %v1918_v47  ;;  %2108 = vadd.xlane.f32.xlu1 %v1919_v26  ;;  %v1940_v47 = vmul.f32 %v9305_v5, %v1805_v13  ;;  %v1808_v26 = vmax.f32 %v8996_v12, 0.0  ;;  %v1811_v13 = vmax.f32 %v13544_v36, 0.0  ;;  %v1815_v36 = vmax.f32 %v9052_v52, 0.0 }
 0x28c   : > { %v9290_v22 = vpop.xlane.xlu0 %2002  ;;  %v9292_v39 = vpop.xlane.xlu1 %2004 }
 0x28d   : > { %v1943_v33 = vmul.f32 %v9305_v5, %v1808_v26  ;;  %v1946_v8 = vmul.f32 %v9305_v5, %v1811_v13  ;;  %v1947_v26 = vmul.f32 %v9305_v5, %v1812_v30  ;;  %v1816_v13 = vmax.f32 %v9048_v6, 0.0 }
 0x28f   : > { %2110 = vadd.xlane.f32.xlu0 %v1920_v48  ;;  %2112 = vadd.xlane.f32.xlu1 %v1921_v32  ;;  %v1809_v32 = vmax.f32 %v9009_v1, 0.0 }
 0x290   : > { %v9298_v56 = vpop.xlane.xlu0 %2006  ;;  %v9300_v31 = vpop.xlane.xlu1 %2008 }
 0x291   : > { %v1944_v12 = vmul.f32 %v9305_v5, %v1809_v32 }
 0x293   : > { %2146 = vadd.xlane.f32.xlu0 %v1938_v27  ;;  %2148 = vadd.xlane.f32.xlu1 %v1939_v50  ;;  %v1945_v50 = vmul.f32 %v9305_v5, %v1810_v21 }
 0x294   : > { %v9311_v43 = vpop.xlane.xlu0 %2010  ;;  %v9313_v57 = vpop.xlane.xlu1 %2012 }
 0x297   : > { %2150 = vadd.xlane.f32.xlu0 %v1940_v47  ;;  %2152 = vadd.xlane.f32.xlu1 %v1941_v4  ;;  %v1813_v4 = vmax.f32 %v13546_v54, 0.0  ;;  %v1817_v54 = vmax.f32 %v9062_v49, 0.0 }
 0x298   : > { %v9319_v48 = vpop.xlane.xlu0 %2014  ;;  %v9321_v10 = vpop.xlane.xlu1 %2016 }
 0x299   : > { %13543 = vst [vmem:[#allocation29_spill] sm:$0xff] %v9321_v10  ;;  %v1952_v6 = vmul.f32 %v9305_v5, %v1817_v54  ;;  %v13549_v10 = vld [vmem:[#allocation25_spill] sm:$0xff] }
 0x29a   : > { %v1822_v54 = vmax.f32 %v13549_v10, 0.0 }
 0x29b   : > { %2154 = vadd.xlane.f32.xlu0 %v1942_v9  ;;  %2156 = vadd.xlane.f32.xlu1 %v1943_v33  ;;  %v13547_v9 = vld [vmem:[#allocation95_spill] sm:$0xff] }
 0x29c   : > { %v9327_v28 = vpop.xlane.xlu0 %2018  ;;  %v9329_v27 = vpop.xlane.xlu1 %2020  ;;  %v1814_v32 = vmax.f32 %v13547_v9, 0.0 }
 0x29f   : > { %2158 = vadd.xlane.f32.xlu0 %v1944_v12  ;;  %2160 = vadd.xlane.f32.xlu1 %v1945_v50  ;;  %v1948_v12 = vmul.f32 %v9305_v5, %v1813_v4  ;;  %v1949_v50 = vmul.f32 %v9305_v5, %v1814_v32  ;;  %v1818_v4 = vmax.f32 %v9058_v38, 0.0  ;;  %v1819_v32 = vmax.f32 %v9072_v29, 0.0 }
 0x2a0   : > { %v9335_v1 = vpop.xlane.xlu0 %2022  ;;  %v9337_v47 = vpop.xlane.xlu1 %2024 }
 0x2a1   : > { %v1954_v38 = vmul.f32 %v9305_v5, %v1819_v32  ;;  %v1824_v32 = vmax.f32 %v9098_v35, 0.0 }
 0x2a3   : > { %2162 = vadd.xlane.f32.xlu0 %v1946_v8  ;;  %2164 = vadd.xlane.f32.xlu1 %v1947_v26  ;;  %v1950_v8 = vmul.f32 %v9305_v5, %v1815_v36  ;;  %v1951_v26 = vmul.f32 %v9305_v5, %v1816_v13  ;;  %v1820_v36 = vmax.f32 %v9066_v19, 0.0  ;;  %v13548_v13 = vld [vmem:[#allocation26_spill] sm:$0xff] }
 0x2a4   : > { %v9343_v33 = vpop.xlane.xlu0 %2026  ;;  %v9345_v21 = vpop.xlane.xlu1 %2028 }
 0x2a7   : > { %2166 = vadd.xlane.f32.xlu0 %v1948_v12  ;;  %2168 = vadd.xlane.f32.xlu1 %v1949_v50  ;;  %v1953_v12 = vmul.f32 %v9305_v5, %v1818_v4 }
 0x2a8   : > { %v9351_v16 = vpop.xlane.xlu0 %2030  ;;  %v9353_v30 = vpop.xlane.xlu1 %2032 }
 0x2ab   : > { %2170 = vadd.xlane.f32.xlu0 %v1950_v8  ;;  %2172 = vadd.xlane.f32.xlu1 %v1951_v26  ;;  %v1821_v8 = vmax.f32 %v13548_v13, 0.0  ;;  %v1955_v26 = vmul.f32 %v9305_v5, %v1820_v36 }
 0x2ac   : > { %v9359_v52 = vpop.xlane.xlu0 %2034  ;;  %v9361_v9 = vpop.xlane.xlu1 %2036 }
 0x2ad   : > { %v1956_v19 = vmul.f32 %v9305_v5, %v1821_v8  ;;  %v1826_v8 = vmax.f32 %v9107_v40, 0.0 }
 0x2af   : > { %2174 = vadd.xlane.f32.xlu0 %v1952_v6  ;;  %2176 = vadd.xlane.f32.xlu1 %v1953_v12  ;;  %v1823_v6 = vmax.f32 %v9103_v62, 0.0  ;;  %v1957_v12 = vmul.f32 %v9305_v5, %v1822_v54 }
 0x2b0   : > { %v9367_v49 = vpop.xlane.xlu0 %2038  ;;  %v9369_v50 = vpop.xlane.xlu1 %2040 }
 0x2b1   : > { %v1958_v10 = vmul.f32 %v9305_v5, %v1823_v6  ;;  %v1828_v6 = vmax.f32 %v9114_v7, 0.0 }
 0x2b3   : > { %2178 = vadd.xlane.f32.xlu0 %v1954_v38  ;;  %2180 = vadd.xlane.f32.xlu1 %v1955_v26  ;;  %v1825_v38 = vmax.f32 %v9110_v63, 0.0  ;;  %v1959_v26 = vmul.f32 %v9305_v5, %v1824_v32 }
 0x2b4   : > { %v9375_v29 = vpop.xlane.xlu0 %2042  ;;  %v9377_v4 = vpop.xlane.xlu1 %2044 }
 0x2b5   : > { %13550 = vst [vmem:[#allocation30_spill] sm:$0xff] %v9377_v4  ;;  %v1960_v35 = vmul.f32 %v9305_v5, %v1825_v38  ;;  %v13557_v4 = vld [vmem:[#allocation100_spill] sm:$0xff] }
 0x2b7   : > { %2182 = vadd.xlane.f32.xlu0 %v1956_v19  ;;  %2184 = vadd.xlane.f32.xlu1 %v1957_v12  ;;  %v1827_v19 = vmax.f32 %v9117_v24, 0.0  ;;  %v1961_v12 = vmul.f32 %v9305_v5, %v1826_v8 }
 0x2b8   : > { %v9383_v13 = vpop.xlane.xlu0 %2046  ;;  %v9385_v36 = vpop.xlane.xlu1 %2048 }
 0x2b9   : > { %13551 = vst [vmem:[#allocation31_spill] sm:$0xff] %v9383_v13  ;;  %13552 = vst [vmem:[#allocation32_spill] sm:$0xff] %v9385_v36  ;;  %v1962_v40 = vmul.f32 %v9305_v5, %v1827_v19  ;;  %v1963_v36 = vmul.f32 %v9305_v5, %v1828_v6  ;;  %v13554_v13 = vld [vmem:[#allocation27_spill] sm:$0xff]  ;;  %v1832_v19 = vmax.f32 %v9145_v2, 0.0 }
 0x2ba   : > { %v1830_v38 = vmax.f32 %v13554_v13, 0.0 }
 0x2bb   : > { %2186 = vadd.xlane.f32.xlu0 %v1958_v10  ;;  %2188 = vadd.xlane.f32.xlu1 %v1959_v26  ;;  %v13553_v10 = vld [vmem:[#allocation51_spill] sm:$0xff] }
 0x2bc   : > { %v9391_v62 = vpop.xlane.xlu0 %2050  ;;  %v9393_v54 = vpop.xlane.xlu1 %2052  ;;  %v1829_v26 = vmax.f32 %v13553_v10, 0.0 }
 0x2be   : > { %v1964_v7 = vmul.f32 %v9305_v5, %v1829_v26  ;;  %v1834_v26 = vmax.f32 %v9151_v11, 0.0 }
 0x2bf   : > { %2190 = vadd.xlane.f32.xlu0 %v1960_v35  ;;  %2192 = vadd.xlane.f32.xlu1 %v1961_v12  ;;  %v1831_v35 = vmax.f32 %v9148_v18, 0.0  ;;  %v1965_v12 = vmul.f32 %v9305_v5, %v1830_v38 }
 0x2c0   : > { %v9399_v63 = vpop.xlane.xlu0 %2054  ;;  %v9401_v32 = vpop.xlane.xlu1 %2056 }
 0x2c1   : > { %v1966_v13 = vmul.f32 %v9305_v5, %v1831_v35  ;;  %v1836_v35 = vmax.f32 %v9156_v37, 0.0 }
 0x2c3   : > { %2194 = vadd.xlane.f32.xlu0 %v1962_v40  ;;  %2196 = vadd.xlane.f32.xlu1 %v1963_v36  ;;  %v1833_v36 = vmax.f32 %v9154_v17, 0.0  ;;  %v1967_v40 = vmul.f32 %v9305_v5, %v1832_v19 }
 0x2c4   : > { %v9407_v24 = vpop.xlane.xlu0 %2058  ;;  %v9409_v8 = vpop.xlane.xlu1 %2060 }
 0x2c5   : > { %v1968_v2 = vmul.f32 %v9305_v5, %v1833_v36  ;;  %v1838_v36 = vmax.f32 %v13557_v4, 0.0 }
 0x2c7   : > { %2198 = vadd.xlane.f32.xlu0 %v1964_v7  ;;  %2200 = vadd.xlane.f32.xlu1 %v1965_v12  ;;  %v1835_v7 = vmax.f32 %v9158_v14, 0.0  ;;  %v1969_v12 = vmul.f32 %v9305_v5, %v1834_v26 }
 0x2c8   : > { %v9415_v10 = vpop.xlane.xlu0 %2062  ;;  %v9417_v6 = vpop.xlane.xlu1 %2064 }
 0x2c9   : > { %v1970_v11 = vmul.f32 %v9305_v5, %v1835_v7  ;;  %v1840_v7 = vmax.f32 %v9184_v41, 0.0 }
 0x2cb   : > { %2202 = vadd.xlane.f32.xlu0 %v1966_v13  ;;  %2204 = vadd.xlane.f32.xlu1 %v1967_v40  ;;  %v13556_v13 = vld [vmem:[#allocation49_spill] sm:$0xff] }
 0x2cc   : > { %v9423_v18 = vpop.xlane.xlu0 %2066  ;;  %v9425_v38 = vpop.xlane.xlu1 %2068  ;;  %v1837_v40 = vmax.f32 %v13556_v13, 0.0 }
 0x2cd   : > { %13555 = vst [vmem:[#allocation33_spill] sm:$0xff] %v9425_v38  ;;  %v1971_v38 = vmul.f32 %v9305_v5, %v1836_v35 }
 0x2ce   : > { %v1972_v37 = vmul.f32 %v9305_v5, %v1837_v40  ;;  %v1842_v40 = vmax.f32 %v9189_v53, 0.0 }
 0x2cf   : > { %2206 = vadd.xlane.f32.xlu0 %v1968_v2  ;;  %2208 = vadd.xlane.f32.xlu1 %v1969_v12  ;;  %v1839_v2 = vmax.f32 %v9187_v34, 0.0  ;;  %v1973_v12 = vmul.f32 %v9305_v5, %v1838_v36 }
 0x2d0   : > { %v9431_v17 = vpop.xlane.xlu0 %2070  ;;  %v9433_v19 = vpop.xlane.xlu1 %2072 }
 0x2d1   : > { %v1974_v4 = vmul.f32 %v9305_v5, %v1839_v2  ;;  %v1844_v2 = vmax.f32 %v9194_v45, 0.0 }
 0x2d3   : > { %2210 = vadd.xlane.f32.xlu0 %v1970_v11  ;;  %2212 = vadd.xlane.f32.xlu1 %v1971_v38  ;;  %v1841_v38 = vmax.f32 %v9191_v42, 0.0  ;;  %v1975_v11 = vmul.f32 %v9305_v5, %v1840_v7 }
 0x2d4   : > { %v9439_v14 = vpop.xlane.xlu0 %2074  ;;  %v9441_v26 = vpop.xlane.xlu1 %2076 }
 0x2d5   : > { %13558 = vst [vmem:[#allocation55_spill] sm:$0xff] %v9439_v14  ;;  %13559 = vst [vmem:[#allocation53_spill] sm:$0xff] %v9441_v26  ;;  %v1976_v41 = vmul.f32 %v9305_v5, %v1841_v38 }
 0x2d7   : > { %2214 = vadd.xlane.f32.xlu0 %v1972_v37  ;;  %2216 = vadd.xlane.f32.xlu1 %v1973_v12  ;;  %v1843_v37 = vmax.f32 %v9196_v0, 0.0  ;;  %v1977_v12 = vmul.f32 %v9305_v5, %v1842_v40 }
 0x2d8   : > { %v9447_v13 = vpop.xlane.xlu0 %2078  ;;  %v9449_v35 = vpop.xlane.xlu1 %2080 }
 0x2d9   : > { %13560 = vst [vmem:[#allocation103_spill] sm:$0xff] %v9447_v13  ;;  %13561 = vst [vmem:[#allocation34_spill] sm:$0xff] %v9449_v35  ;;  %v1978_v53 = vmul.f32 %v9305_v5, %v1843_v37  ;;  %v13562_v35 = vld [vmem:[#allocation28_spill] sm:$0xff]  ;;  %v1848_v37 = vmax.f32 %v9214_v59, 0.0 }
 0x2da   : > { %v1846_v38 = vmax.f32 %v13562_v35, 0.0 }
 0x2db   : > { %2218 = vadd.xlane.f32.xlu0 %v1974_v4  ;;  %2220 = vadd.xlane.f32.xlu1 %v1975_v11  ;;  %v1845_v4 = vmax.f32 %v9200_v20, 0.0  ;;  %v1979_v11 = vmul.f32 %v9305_v5, %v1844_v2 }
 0x2dc   : > { %v9455_v34 = vpop.xlane.xlu0 %2114  ;;  %v9457_v36 = vpop.xlane.xlu1 %2116 }
 0x2dd   : > { %v1980_v45 = vmul.f32 %v9305_v5, %v1845_v4  ;;  %v1850_v4 = vmax.f32 %v9218_v60, 0.0 }
 0x2df   : > { %2222 = vadd.xlane.f32.xlu0 %v1976_v41  ;;  %2224 = vadd.xlane.f32.xlu1 %v1977_v12  ;;  %v1847_v41 = vmax.f32 %v9216_v23, 0.0  ;;  %v1981_v12 = vmul.f32 %v9305_v5, %v1846_v38 }
 0x2e0   : > { %v9463_v42 = vpop.xlane.xlu0 %2118  ;;  %v9465_v7 = vpop.xlane.xlu1 %2120 }
 0x2e1   : > { %v1982_v35 = vmul.f32 %v9305_v5, %v1847_v41 }
 0x2e3   : > { %2226 = vadd.xlane.f32.xlu0 %v1978_v53  ;;  %2228 = vadd.xlane.f32.xlu1 %v1979_v11  ;;  %v1849_v53 = vmax.f32 %v9220_v51, 0.0  ;;  %v1983_v11 = vmul.f32 %v9305_v5, %v1848_v37 }
 0x2e4   : > { %v9471_v0 = vpop.xlane.xlu0 %2122  ;;  %v9473_v40 = vpop.xlane.xlu1 %2124 }
 0x2e5   : > { %13563 = vst [vmem:[#allocation35_spill] sm:$0xff] %v9473_v40  ;;  %v1984_v59 = vmul.f32 %v9305_v5, %v1849_v53 }
 0x2e7   : > { %2230 = vadd.xlane.f32.xlu0 %v1980_v45  ;;  %2232 = vadd.xlane.f32.xlu1 %v1981_v12  ;;  %v1985_v45 = vmul.f32 %v9305_v5, %v1850_v4 }
 0x2e8   : > { %v9479_v20 = vpop.xlane.xlu0 %2126  ;;  %v9481_v2 = vpop.xlane.xlu1 %2128 }
 0x2e9   : > { %13564 = vst [vmem:[#allocation36_spill] sm:$0xff] %v9479_v20  ;;  %13565 = vst [vmem:[#allocation37_spill] sm:$0xff] %v9481_v2 }
 0x2eb   : > { %2234 = vadd.xlane.f32.xlu0 %v1982_v35  ;;  %2236 = vadd.xlane.f32.xlu1 %v1983_v11 }
 0x2ec   : > { %v9487_v23 = vpop.xlane.xlu0 %2130  ;;  %v9489_v38 = vpop.xlane.xlu1 %2132 }
 0x2ed   : > { %13566 = vst [vmem:[#allocation38_spill] sm:$0xff] %v9487_v23  ;;  %13567 = vst [vmem:[#allocation39_spill] sm:$0xff] %v9489_v38 }
 0x2ef   : > { %2238 = vadd.xlane.f32.xlu0 %v1984_v59  ;;  %2240 = vadd.xlane.f32.xlu1 %v1985_v45  ;;  %v13580_v45 = vlaneseq }
 0x2f0   : > { %v9493_v12 = vpop.xlane.xlu0 %2134  ;;  %v9495_v41 = vpop.xlane.xlu1 %2136 }
 0x2f1   : > { %13568 = vst [vmem:[#allocation57_spill] sm:$0xff] %v9493_v12  ;;  %13569 = vst [vmem:[#allocation59_spill] sm:$0xff] %v9495_v41  ;;  %v9525_v41 = vstv %s2242_s22  ;;  %v13583_v12 = vld [vmem:[#allocation96_spill] sm:$0xff] }
 0x2f2   : > { %v9532_v23 = vadd.f32 %v9525_v41, %v9266_v61  ;;  %v9638_v14 = vadd.f32 %v9525_v41, %v9285_v3  ;;  %v9654_v3 = vadd.f32 %v9525_v41, %v9337_v47 }
 0x2f4   : > { %v9497_v51 = vpop.xlane.xlu0 %2138  ;;  %v9499_v37 = vpop.xlane.xlu1 %2140  ;;  %13585 = vst [vmem:[#allocation69_spill] sm:$0xff] %v9532_v23  ;;  %13611 = vst [vmem:[#allocation81_spill] sm:$0xff] %v9638_v14 }
 0x2f5   : > { %13570 = vst [vmem:[#allocation40_spill] sm:$0xff] %v9497_v51  ;;  %13571 = vst [vmem:[#allocation42_spill] sm:$0xff] %v9499_v37  ;;  %v9518_v51 = vand.u32 127, %v13580_v45 }
 0x2f6   : > { %13614 = vst [vmem:[#allocation83_spill] sm:$0xff] %v9654_v3 }
 0x2f7   : > { %v2513_v45 = vadd.s32 4294967280, %v9518_v51  ;;  %v2520_v61 = vadd.s32 4294967272, %v9518_v51  ;;  %v2527_v26 = vadd.s32 4294967264, %v9518_v51  ;;  %v2583_v47 = vadd.s32 4294967200, %v9518_v51 }
 0x2f8   : > { %v9501_v60 = vpop.xlane.xlu0 %2142  ;;  %v9503_v35 = vpop.xlane.xlu1 %2144 }
 0x2f9   : > { %13572 = vst [vmem:[#allocation44_spill] sm:$0xff] %v9501_v60  ;;  %13573 = vst [vmem:[#allocation61_spill] sm:$0xff] %v9503_v35  ;;  %v2506_v60 = vadd.s32 4294967288, %v9518_v51  ;;  %v9578_v40 = vsub.s32 %v2527_v26, %v13583_v12 }
 0x2fb   : > { %v9528_v13 = vsub.s32 %v2506_v60, %v13583_v12  ;;  %13597 = vst [vmem:[#allocation74_spill] sm:$0xff] %v9578_v40 }
 0x2fc   : > { %v9505_v11 = vpop.xlane.xlu0 %2082  ;;  %v9507_v38 = vpop.xlane.xlu1 %2084 }
 0x2fd   : > { %13574 = vst [vmem:[#allocation46_spill] sm:$0xff] %v9505_v11  ;;  %13575 = vst [vmem:[#allocation63_spill] sm:$0xff] %v9507_v38  ;;  %v2510_v60 = vrot.slane %v9532_v23, %v9528_v13 }
 0x2fe   : > { %13584 = vst [vmem:[#allocation56_spill] sm:$0xff] %v9528_v13 }
 0x300   : > { %v9509_v53 = vpop.xlane.xlu0 %2086  ;;  %v9511_v5 = vpop.xlane.xlu1 %2088 }
 0x301   : > { %13576 = vst [vmem:[#allocation48_spill] sm:$0xff] %v9509_v53  ;;  %13577 = vst [vmem:[#allocation50_spill] sm:$0xff] %v9511_v5  ;;  %v2590_v53 = vadd.s32 4294967192, %v9518_v51 }
 0x304   : > { %v9513_v4 = vpop.xlane.xlu0 %2090  ;;  %v9515_v59 = vpop.xlane.xlu1 %2092 }
 0x305   : > { %13578 = vst [vmem:[#allocation65_spill] sm:$0xff] %v9513_v4  ;;  %13579 = vst [vmem:[#allocation67_spill] sm:$0xff] %v9515_v59 }
 0x308   : > { %v9521_v37 = vpop.xlane.xlu0 %2094  ;;  %v9523_v35 = vpop.xlane.xlu1 %2096 }
 0x309   : > { %13581 = vst [vmem:[#allocation52_spill] sm:$0xff] %v9521_v37  ;;  %13582 = vst [vmem:[#allocation54_spill] sm:$0xff] %v9523_v35  ;;  %v9541_v37 = vsub.s32 %v9518_v51, %v13583_v12  ;;  %v9545_v35 = vadd.f32 %v9525_v41, %v9258_v55 }
 0x30b   : > { %13588 = vst [vmem:[#allocation75_spill] sm:$0xff] %v9541_v37  ;;  %13589 = vst [vmem:[#allocation58_spill] sm:$0xff] %v9545_v35  ;;  %v2505_v55 = vrot.slane %v9545_v35, %v9541_v37  ;;  %v2548_v35 = vadd.s32 4294967240, %v9518_v51 }
 0x30c   : > { %v9534_v2 = vpop.xlane.xlu0 %2098  ;;  %v9537_v59 = vpop.xlane.xlu1 %2100 }
 0x30d   : > { %13586 = vst [vmem:[#allocation71_spill] sm:$0xff] %v9534_v2  ;;  %13587 = vst [vmem:[#allocation73_spill] sm:$0xff] %v9537_v59  ;;  %v9553_v2 = vsub.s32 %v2513_v45, %v13583_v12  ;;  %v9557_v59 = vadd.f32 %v9525_v41, %v9260_v15  ;;  %v2512_v23 = vsel %vm2511_vm2, %v2510_v60, %v2505_v55  ;;  %v2534_v15 = vadd.s32 4294967256, %v9518_v51 }
 0x30e   : > { %v9570_v45 = vadd.f32 %v9525_v41, %v9268_v58  ;;  %v9582_v60 = vadd.f32 %v9525_v41, %v9274_v44  ;;  %v9596_v44 = vadd.f32 %v9525_v41, %v9277_v25  ;;  %v2562_v25 = vadd.s32 4294967224, %v9518_v51 }
 0x30f   : > { %13591 = vst [vmem:[#allocation62_spill] sm:$0xff] %v9553_v2  ;;  %13592 = vst [vmem:[#allocation64_spill] sm:$0xff] %v9557_v59  ;;  %v9592_v26 = vsub.s32 %v2534_v15, %v13583_v12 }
 0x310   : > { %v9550_v4 = vpop.xlane.xlu0 %2102  ;;  %v9560_v5 = vpop.xlane.xlu1 %2104  ;;  %13595 = vst [vmem:[#allocation70_spill] sm:$0xff] %v9570_v45  ;;  %13598 = vst [vmem:[#allocation76_spill] sm:$0xff] %v9582_v60 }
 0x311   : > { %13590 = vst [vmem:[#allocation60_spill] sm:$0xff] %v9550_v4  ;;  %13593 = vst [vmem:[#allocation66_spill] sm:$0xff] %v9560_v5  ;;  %v9566_v4 = vsub.s32 %v2520_v61, %v13583_v12  ;;  %v2517_v5 = vrot.slane %v9557_v59, %v9553_v2  ;;  %v2541_v61 = vadd.s32 4294967248, %v9518_v51 }
 0x312   : > { %13600 = vst [vmem:[#allocation78_spill] sm:$0xff] %v9592_v26  ;;  %13601 = vst [vmem:[#allocation80_spill] sm:$0xff] %v9596_v44 }
 0x313   : > { %13594 = vst [vmem:[#allocation68_spill] sm:$0xff] %v9566_v4  ;;  %v2519_v58 = vsel %vm2518_vm3, %v2517_v5, %v2512_v23  ;;  %v2524_v59 = vrot.slane %v9570_v45, %v9566_v4  ;;  %v2531_v23 = vrot.slane %v9582_v60, %v9578_v40  ;;  %v9603_v5 = vsub.s32 %v2541_v61, %v13583_v12 }
 0x314   : > { %v9573_v20 = vpop.xlane.xlu0 %2106  ;;  %v9585_v55 = vpop.xlane.xlu1 %2108  ;;  %v9607_v45 = vadd.f32 %v9525_v41, %v9282_v46  ;;  %v9619_v60 = vadd.f32 %v9525_v41, %v9327_v28  ;;  %v9622_v61 = vsub.s32 %v2548_v35, %v13583_v12  ;;  %v2555_v46 = vadd.s32 4294967232, %v9518_v51 }
 0x315   : > { %13596 = vst [vmem:[#allocation72_spill] sm:$0xff] %v9573_v20  ;;  %13599 = vst [vmem:[#allocation77_spill] sm:$0xff] %v9585_v55  ;;  %v2526_v55 = vsel %vm2525_vm4, %v2524_v59, %v2519_v58  ;;  %v2538_v59 = vrot.slane %v9596_v44, %v9592_v26  ;;  %v2569_v58 = vadd.s32 4294967216, %v9518_v51  ;;  %v9646_v44 = vsub.s32 %v2562_v25, %v13583_v12 }
 0x316   : > { %13603 = vst [vmem:[#allocation84_spill] sm:$0xff] %v9603_v5  ;;  %13604 = vst [vmem:[#allocation86_spill] sm:$0xff] %v9607_v45  ;;  %v2533_v35 = vsel %vm13097_vm5, %v2531_v23, %v2526_v55  ;;  %v2614_v55 = vrot.slane %v9619_v60, %v9541_v37  ;;  %v9657_v23 = vsub.s32 %v2555_v46, %v13583_v12 }
 0x317   : > { %13607 = vst [vmem:[#allocation92_spill] sm:$0xff] %v9619_v60  ;;  %13608 = vst [vmem:[#allocation94_spill] sm:$0xff] %v9622_v61  ;;  %v2540_v60 = vsel %vm2539_vm6, %v2538_v59, %v2533_v35 }
 0x318   : > { %v9598_v20 = vpop.xlane.xlu0 %2110  ;;  %v9609_v15 = vpop.xlane.xlu1 %2112  ;;  %13613 = vst [vmem:[#allocation85_spill] sm:$0xff] %v9646_v44  ;;  %13615 = vst [vmem:[#allocation41_spill] sm:$0xff] %v9657_v23 }
 0x319   : > { %13602 = vst [vmem:[#allocation82_spill] sm:$0xff] %v9598_v20  ;;  %13605 = vst [vmem:[#allocation88_spill] sm:$0xff] %v9609_v15  ;;  %v9615_v20 = vadd.f32 %v9525_v41, %v9329_v27  ;;  %v9627_v15 = vadd.f32 %v9525_v41, %v9335_v1  ;;  %v2576_v27 = vadd.s32 4294967208, %v9518_v51  ;;  %v2545_v1 = vrot.slane %v9607_v45, %v9603_v5 }
 0x31a   : > { %v9661_v45 = vadd.f32 %v9525_v41, %v9290_v22  ;;  %v2552_v22 = vrot.slane %v9638_v14, %v9622_v61  ;;  %v2628_v14 = vrot.slane %v9654_v3, %v9566_v4  ;;  %v9717_v3 = vadd.f32 %v9525_v41, %v9391_v62 }
 0x31b   : > { %13606 = vst [vmem:[#allocation90_spill] sm:$0xff] %v9615_v20  ;;  %13609 = vst [vmem:[#allocation97_spill] sm:$0xff] %v9627_v15  ;;  %v2618_v38 = vrot.slane %v9615_v20, %v9528_v13  ;;  %v2623_v25 = vrot.slane %v9627_v15, %v9553_v2  ;;  %v9667_v20 = vadd.f32 %v9525_v41, %v9343_v33 }
 0x31c   : > { %v9633_v28 = vpop.xlane.xlu0 %2146  ;;  %v9643_v11 = vpop.xlane.xlu1 %2148  ;;  %13616 = vst [vmem:[#allocation23_spill] sm:$0xff] %v9661_v45  ;;  %v9680_v15 = vsub.s32 %v2569_v58, %v13583_v12  ;;  %v9683_v33 = vsub.s32 %v2590_v53, %v13583_v12  ;;  %v2559_v53 = vrot.slane %v9661_v45, %v9657_v23  ;;  %13626 = vst [vmem:[#allocation45_spill] sm:$0xff] %v9717_v3 }
 0x31d   : > { %13610 = vst [vmem:[#allocation99_spill] sm:$0xff] %v9633_v28  ;;  %13612 = vst [vmem:[#allocation79_spill] sm:$0xff] %v9643_v11  ;;  %v9671_v28 = vsub.s32 %v2576_v27, %v13583_v12  ;;  %v2547_v11 = vsel %vm2546_vm7, %v2545_v1, %v2540_v60  ;;  %v9689_v27 = vadd.f32 %v9525_v41, %v9292_v39 }
 0x31e   : > { %13617 = vst [vmem:[#allocation43_spill] sm:$0xff] %v9667_v20  ;;  %13619 = vst [vmem:[#allocation104_spill] sm:$0xff] %v9680_v15  ;;  %v2619_v35 = vsel %vm2511_vm2, %v2618_v38, %v2614_v55  ;;  %v9696_v60 = vadd.f32 %v9525_v41, %v9345_v21  ;;  %v2633_v1 = vrot.slane %v9667_v20, %v9578_v40  ;;  %v2604_v55 = vadd.s32 4294967176, %v9518_v51 }
 0x31f   : > { %13618 = vst [vmem:[#allocation87_spill] sm:$0xff] %v9671_v28  ;;  %13620 = vst [vmem:[#allocation89_spill] sm:$0xff] %v9683_v33  ;;  %v2624_v58 = vsel %vm2518_vm3, %v2623_v25, %v2619_v35  ;;  %v9705_v39 = vadd.f32 %v9525_v41, %v9351_v16  ;;  %v9708_v38 = vsub.s32 %v2583_v47, %v13583_v12  ;;  %v2597_v47 = vadd.s32 4294967184, %v9518_v51 }
 0x320   : > { %v9674_v46 = vpop.xlane.xlu0 %2150  ;;  %v9685_v59 = vpop.xlane.xlu1 %2152  ;;  %13621 = vst [vmem:[#allocation106_spill] sm:$0xff] %v9689_v27  ;;  %13622 = vst [vmem:[#allocation105_spill] sm:$0xff] %v9696_v60  ;;  %v9713_v21 = vadd.f32 %v9525_v41, %v9393_v54  ;;  %v2554_v35 = vsel %vm2553_vm8, %v2552_v22, %v2547_v11  ;;  %v9724_v16 = vadd.f32 %v9525_v41, %v9298_v56 }
 0x321   : > { %13623 = vst [vmem:[#allocation24_spill] sm:$0xff] %v9705_v39  ;;  %13624 = vst [vmem:[#allocation102_spill] sm:$0xff] %v9708_v38  ;;  %v9729_v45 = vadd.f32 %v9525_v41, %v9399_v63  ;;  %v2566_v62 = vrot.slane %v9689_v27, %v9646_v44  ;;  %v2638_v20 = vrot.slane %v9696_v60, %v9592_v26 }
 0x322   : > { %13625 = vst [vmem:[#allocation91_spill] sm:$0xff] %v9713_v21  ;;  %13627 = vst [vmem:[#allocation93_spill] sm:$0xff] %v9724_v16  ;;  %v2629_v11 = vsel %vm2525_vm4, %v2628_v14, %v2624_v58  ;;  %v9740_v56 = vadd.f32 %v9525_v41, %v9353_v30  ;;  %v2561_v51 = vsel %vm2560_vm9, %v2559_v53, %v2554_v35 }
 0x323   : > { %13628 = vst [vmem:[#allocation47_spill] sm:$0xff] %v9729_v45  ;;  %v2634_v63 = vsel %vm13097_vm5, %v2633_v1, %v2629_v11  ;;  %v2643_v22 = vrot.slane %v9705_v39, %v9603_v5  ;;  %v9748_v27 = vadd.f32 %v9525_v41, %v9359_v52  ;;  %v9752_v60 = vadd.f32 %v9525_v41, %v9300_v31 }
 0x324   : > { %v9719_v25 = vpop.xlane.xlu0 %2154  ;;  %v9731_v54 = vpop.xlane.xlu1 %2156  ;;  %13629 = vst [vmem:[#allocation98_spill] sm:$0xff] %v9740_v56  ;;  %v2697_v30 = vrot.slane %v9713_v21, %v9528_v13  ;;  %v2693_v14 = vrot.slane %v9717_v3, %v9541_v37  ;;  %v9760_v53 = vadd.f32 %v9525_v41, %v9401_v32  ;;  %v2573_v52 = vrot.slane %v9724_v16, %v9680_v15  ;;  %v13693_v16 = vld [vmem:[#allocation39_spill] sm:$0xff] }
 0x325   : > { %13630 = vst [vmem:[#allocation95_spill] sm:$0xff] %v9748_v27  ;;  %13631 = vst [vmem:[#allocation26_spill] sm:$0xff] %v9752_v60  ;;  %v9767_v1 = vsub.s32 %v2604_v55, %v13583_v12  ;;  %v2702_v31 = vrot.slane %v9729_v45, %v9553_v2  ;;  %v9773_v35 = vadd.f32 %v9525_v41, %v9407_v24 }
 0x326   : > { %13632 = vst [vmem:[#allocation25_spill] sm:$0xff] %v9760_v53  ;;  %v9779_v32 = vadd.f32 %v9525_v41, %v9311_v43  ;;  %v2648_v21 = vrot.slane %v9740_v56, %v9622_v61  ;;  %v2639_v3 = vsel %vm2539_vm6, %v2638_v20, %v2634_v63  ;;  %v9786_v55 = vadd.f32 %v9525_v41, %v9361_v9 }
 0x327   : > { %13633 = vst [vmem:[#allocation51_spill] sm:$0xff] %v9767_v1  ;;  %13634 = vst [vmem:[#allocation27_spill] sm:$0xff] %v9773_v35  ;;  %v2568_v45 = vsel %vm2567_vm10, %v2566_v62, %v2561_v51  ;;  %v2644_v24 = vsel %vm2546_vm7, %v2643_v22, %v2639_v3  ;;  %v2653_v39 = vrot.slane %v9748_v27, %v9657_v23  ;;  %v13683_v27 = vld [vmem:[#allocation37_spill] sm:$0xff] }
 0x328   : > { %v9762_v58 = vpop.xlane.xlu0 %2158  ;;  %v9775_v11 = vpop.xlane.xlu1 %2160  ;;  %13635 = vst [vmem:[#allocation49_spill] sm:$0xff] %v9779_v32  ;;  %13636 = vst [vmem:[#allocation100_spill] sm:$0xff] %v9786_v55  ;;  %v9794_v43 = vadd.f32 %v9525_v41, %v9367_v49  ;;  %v2580_v56 = vrot.slane %v9752_v60, %v9671_v28  ;;  %v2698_v20 = vsel %vm2511_vm2, %v2697_v30, %v2693_v14  ;;  %v13673_v60 = vld [vmem:[#allocation35_spill] sm:$0xff] }
 0x329   : > { %v2707_v9 = vrot.slane %v9760_v53, %v9566_v4  ;;  %v9803_v62 = vadd.f32 %v9525_v41, %v9409_v8  ;;  %v2575_v51 = vsel %vm13152_vm11, %v2573_v52, %v2568_v45  ;;  %v2703_v49 = vsel %vm2518_vm3, %v2702_v31, %v2698_v20 }
 0x32a   : > { %13637 = vst [vmem:[#allocation28_spill] sm:$0xff] %v9794_v43  ;;  %v2712_v63 = vrot.slane %v9773_v35, %v9578_v40  ;;  %v9813_v22 = vadd.f32 %v9525_v41, %v9415_v10  ;;  %v9819_v14 = vadd.f32 %v9525_v41, %v9313_v57  ;;  %v2587_v8 = vrot.slane %v9779_v32, %v9708_v38 }
 0x32b   : > { %13638 = vst [vmem:[#allocation107_spill] sm:$0xff] %v9803_v62  ;;  %v2658_v45 = vrot.slane %v9786_v55, %v9646_v44  ;;  %v2649_v52 = vsel %vm2553_vm8, %v2648_v21, %v2644_v24  ;;  %v9827_v31 = vsub.s32 %v2597_v47, %v13583_v12  ;;  %v9832_v20 = vadd.f32 %v9525_v41, %v9369_v50  ;;  %v13685_v12 = vld [vmem:[#allocation38_spill] sm:$0xff] }
 0x32c   : > { %v9805_v3 = vpop.xlane.xlu0 %2162  ;;  %13639 = vst [vmem:[#allocation108_spill] sm:$0xff] %v9813_v22  ;;  %v9815_v30 = vpop.xlane.xlu1 %2164  ;;  %13640 = vst [vmem:[#allocation109_spill] sm:$0xff] %v9819_v14  ;;  %v2654_v10 = vsel %vm2560_vm9, %v2653_v39, %v2649_v52  ;;  %v2663_v57 = vrot.slane %v9794_v43, %v9680_v15  ;;  %v9838_v53 = vadd.f32 %v9525_v41, %v9375_v29  ;;  %v13677_v43 = vld [vmem:[#allocation50_spill] sm:$0xff] }
 0x32d   : > { %13641 = vst [vmem:[#allocation110_spill] sm:$0xff] %v9827_v31  ;;  %13642 = vst [vmem:[#allocation111_spill] sm:$0xff] %v9832_v20  ;;  %v2717_v55 = vrot.slane %v9803_v62, %v9592_v26  ;;  %v2708_v21 = vsel %vm2525_vm4, %v2707_v9, %v2703_v49  ;;  %v9845_v47 = vadd.f32 %v9525_v41, %v9417_v6 }
 0x32e   : > { %13643 = vst [vmem:[#allocation112_spill] sm:$0xff] %v9838_v53  ;;  %v2582_v50 = vsel %vm2581_vm12, %v2580_v56, %v2575_v51  ;;  %v2713_v24 = vsel %vm13097_vm5, %v2712_v63, %v2708_v21  ;;  %v2722_v52 = vrot.slane %v9813_v22, %v9603_v5  ;;  %v9855_v29 = vadd.f32 %v9525_v41, %v9423_v18  ;;  %v13647_v51 = vld [vmem:[#allocation29_spill] sm:$0xff]  ;;  %v13648_v22 = vld [vmem:[#allocation30_spill] sm:$0xff] }
 0x32f   : > { %13644 = vst [vmem:[#allocation113_spill] sm:$0xff] %v9845_v47  ;;  %v2594_v9 = vrot.slane %v9819_v14, %v9683_v33  ;;  %v2589_v6 = vsel %vm13153_vm13, %v2587_v8, %v2582_v50  ;;  %v9864_v49 = vadd.f32 %v9525_v41, %v9319_v48  ;;  %v2659_v56 = vsel %vm2567_vm10, %v2658_v45, %v2654_v10  ;;  %v13650_v10 = vld [vmem:[#allocation33_spill] sm:$0xff] }
 0x330   : > { %v9847_v39 = vpop.xlane.xlu0 %2166  ;;  %13645 = vst [vmem:[#allocation114_spill] sm:$0xff] %v9855_v29  ;;  %v9857_v62 = vpop.xlane.xlu1 %2168  ;;  %v9869_v63 = vadd.f32 %v9525_v41, %v13647_v51  ;;  %v2668_v18 = vrot.slane %v9832_v20, %v9671_v28  ;;  %v2664_v21 = vsel %vm13152_vm11, %v2663_v57, %v2659_v56  ;;  %v9876_v35 = vadd.f32 %v9525_v41, %v13648_v22 }
 0x331   : > { %13646 = vst [vmem:[#allocation115_spill] sm:$0xff] %v9864_v49  ;;  %v2673_v8 = vrot.slane %v9838_v53, %v9708_v38  ;;  %v2727_v48 = vrot.slane %v9845_v47, %v9622_v61  ;;  %v2718_v45 = vsel %vm2539_vm6, %v2717_v55, %v2713_v24  ;;  %v9885_v50 = vadd.f32 %v9525_v41, %v13650_v10 }
 0x332   : > { %13649 = vst [vmem:[#allocation29_spill] sm:$0xff] %v9876_v35  ;;  %v2723_v57 = vsel %vm2546_vm7, %v2722_v52, %v2718_v45  ;;  %v2732_v22 = vrot.slane %v9855_v29, %v9657_v23  ;;  %v9894_v56 = vadd.f32 %v9525_v41, %v9457_v36  ;;  %v9898_v47 = vadd.f32 %v9525_v41, %v9455_v34 }
 0x333   : > { %13651 = vst [vmem:[#allocation30_spill] sm:$0xff] %v9885_v50  ;;  %v2601_v24 = vrot.slane %v9864_v49, %v9827_v31  ;;  %v9906_v52 = vadd.f32 %v9525_v41, %v9463_v42  ;;  %v2596_v36 = vsel %vm13305_vm14, %v2594_v9, %v2589_v6  ;;  %v2669_v10 = vsel %vm2581_vm12, %v2668_v18, %v2664_v21 }
 0x334   : > { %v9887_v51 = vpop.xlane.xlu0 %2170  ;;  %13652 = vst [vmem:[#allocation33_spill] sm:$0xff] %v9894_v56  ;;  %13653 = vst [vmem:[#allocation116_spill] sm:$0xff] %v9898_v47  ;;  %v9900_v55 = vpop.xlane.xlu1 %2172  ;;  %v9914_v34 = vadd.f32 %v9525_v41, %v9431_v17  ;;  %v2678_v20 = vrot.slane %v9876_v35, %v9683_v33  ;;  %v2674_v29 = vsel %vm13153_vm13, %v2673_v8, %v2669_v10 }
 0x335   : > { %13654 = vst [vmem:[#allocation117_spill] sm:$0xff] %v9906_v52  ;;  %v2737_v42 = vrot.slane %v9885_v50, %v9646_v44  ;;  %v2728_v14 = vsel %vm2553_vm8, %v2727_v48, %v2723_v57  ;;  %v2855_v6 = vrot.slane %v9894_v56, %v9528_v13  ;;  %v2851_v17 = vrot.slane %v9898_v47, %v9541_v37  ;;  %v13667_v56 = vld [vmem:[#allocation32_spill] sm:$0xff] }
 0x336   : > { %13655 = vst [vmem:[#allocation118_spill] sm:$0xff] %v9914_v34  ;;  %v2733_v9 = vsel %vm2560_vm9, %v2732_v22, %v2728_v14  ;;  %v9931_v18 = vadd.f32 %v9525_v41, %v9465_v7  ;;  %v9936_v8 = vsel %vm2602_vm15, %v2601_v24, %v2596_v36  ;;  %v9940_v48 = vadd.f32 %v9525_v41, %v9433_v19  ;;  %v13661_v22 = vld [vmem:[#allocation31_spill] sm:$0xff]  ;;  %v13665_v19 = vld [vmem:[#allocation46_spill] sm:$0xff]  ;;  %v13669_v47 = vld [vmem:[#allocation48_spill] sm:$0xff] }
 0x337   : > { %v2860_v14 = vrot.slane %v9906_v52, %v9553_v2  ;;  %v9946_v57 = vadd.f32 %v9525_v41, %v9471_v0  ;;  %v9950_v7 = vadd.f32 %v9525_v41, %v13661_v22  ;;  %v2742_v10 = vrot.slane %v9914_v34, %v9680_v15  ;;  %v13663_v24 = vld [vmem:[#allocation63_spill] sm:$0xff] }
 0x338   : > { %v9922_v53 = vpop.xlane.xlu0 %2174  ;;  %13657 = vst [vmem:[#allocation120_spill] sm:$0xff] %v9931_v18  ;;  %v9933_v21 = vpop.xlane.xlu1 %2176  ;;  %13659 = vst [vmem:[#allocation122_spill] sm:$0xff] %v9940_v48  ;;  %v9956_v36 = vadd.f32 %v9525_v41, %v13663_v24  ;;  %v9960_v45 = vadd.f32 %v9525_v41, %v13665_v19  ;;  %v9964_v52 = vadd.f32 %v9525_v41, %v13667_v56  ;;  %v13671_v24 = vld [vmem:[#allocation55_spill] sm:$0xff] }
 0x339   : > { %13656 = vst [vmem:[#allocation119_spill] sm:$0xff] %v9922_v53  ;;  %13658 = vst [vmem:[#allocation121_spill] sm:$0xff] %v9933_v21  ;;  %v2679_v0 = vsel %vm13305_vm14, %v2678_v20, %v2674_v29  ;;  %v2738_v22 = vsel %vm2567_vm10, %v2737_v42, %v2733_v9  ;;  %v9970_v50 = vadd.f32 %v9525_v41, %v13669_v47  ;;  %v13699_v21 = vld [vmem:[#allocation54_spill] sm:$0xff] }
 0x33a   : > { %13660 = vst [vmem:[#allocation123_spill] sm:$0xff] %v9946_v57  ;;  %13662 = vst [vmem:[#allocation31_spill] sm:$0xff] %v9950_v7  ;;  %v9976_v34 = vadd.f32 %v9525_v41, %v13671_v24  ;;  %v2856_v19 = vsel %vm2511_vm2, %v2855_v6, %v2851_v17  ;;  %v2865_v56 = vrot.slane %v9931_v18, %v9566_v4  ;;  %v13675_v24 = vld [vmem:[#allocation36_spill] sm:$0xff] }
 0x33b   : > { %13664 = vst [vmem:[#allocation63_spill] sm:$0xff] %v9956_v36  ;;  %13666 = vst [vmem:[#allocation46_spill] sm:$0xff] %v9960_v45  ;;  %v9983_v20 = vadd.f32 %v9525_v41, %v13673_v60  ;;  %v2747_v47 = vrot.slane %v9940_v48, %v9671_v28  ;;  %v2861_v42 = vsel %vm2518_vm3, %v2860_v14, %v2856_v19  ;;  %v13679_v19 = vld [vmem:[#allocation53_spill] sm:$0xff] }
 0x33c   : > { %13668 = vst [vmem:[#allocation32_spill] sm:$0xff] %v9964_v52  ;;  %13670 = vst [vmem:[#allocation48_spill] sm:$0xff] %v9970_v50  ;;  %v9972_v35 = vpop.xlane.xlu0 %2178  ;;  %v9985_v29 = vpop.xlane.xlu1 %2180  ;;  %v2870_v9 = vrot.slane %v9946_v57, %v9578_v40  ;;  %v9994_v6 = vadd.f32 %v9525_v41, %v13675_v24  ;;  %v2743_v17 = vsel %vm13152_vm11, %v2742_v10, %v2738_v22  ;;  %v13681_v22 = vld [vmem:[#allocation65_spill] sm:$0xff] }
 0x33d   : > { %13672 = vst [vmem:[#allocation55_spill] sm:$0xff] %v9976_v34  ;;  %13674 = vst [vmem:[#allocation35_spill] sm:$0xff] %v9983_v20  ;;  %v2776_v60 = vrot.slane %v9956_v36, %v9528_v13  ;;  %v2772_v18 = vrot.slane %v9960_v45, %v9541_v37  ;;  %v10003_v48 = vadd.f32 %v9525_v41, %v13677_v43 }
 0x33e   : > { %13676 = vst [vmem:[#allocation36_spill] sm:$0xff] %v9994_v6  ;;  %v2683_v14 = vrot.slane %v9950_v7, %v9827_v31  ;;  %v10009_v57 = vadd.f32 %v9525_v41, %v13679_v19  ;;  %v2781_v10 = vrot.slane %v9970_v50, %v9553_v2  ;;  %v10015_v24 = vadd.f32 %v9525_v41, %v13681_v22 }
 0x33f   : > { %13678 = vst [vmem:[#allocation50_spill] sm:$0xff] %v10003_v48  ;;  %v2752_v43 = vrot.slane %v9976_v34, %v9708_v38  ;;  %v2875_v45 = vrot.slane %v9983_v20, %v9592_v26  ;;  %v2866_v7 = vsel %vm2525_vm4, %v2865_v56, %v2861_v42  ;;  %v10026_v19 = vadd.f32 %v9525_v41, %v13683_v27  ;;  %v13687_v20 = vld [vmem:[#allocation103_spill] sm:$0xff] }
 0x340   : > { %13680 = vst [vmem:[#allocation53_spill] sm:$0xff] %v10009_v57  ;;  %13682 = vst [vmem:[#allocation65_spill] sm:$0xff] %v10015_v24  ;;  %v10017_v36 = vpop.xlane.xlu0 %2182  ;;  %v10028_v49 = vpop.xlane.xlu1 %2184  ;;  %v2748_v50 = vsel %vm2581_vm12, %v2747_v47, %v2743_v17  ;;  %v2871_v22 = vsel %vm13097_vm5, %v2870_v9, %v2866_v7  ;;  %v2880_v32 = vrot.slane %v9994_v6, %v9603_v5  ;;  %v13689_v47 = vld [vmem:[#allocation67_spill] sm:$0xff]  ;;  %v13691_v6 = vld [vmem:[#allocation52_spill] sm:$0xff] }
 0x341   : > { %13684 = vst [vmem:[#allocation37_spill] sm:$0xff] %v10026_v19  ;;  %v10036_v34 = vadd.f32 %v9525_v41, %v13685_v12  ;;  %v10040_v56 = vadd.f32 %v9525_v41, %v13687_v20  ;;  %v2777_v27 = vsel %vm2511_vm2, %v2776_v60, %v2772_v18  ;;  %v2786_v42 = vrot.slane %v10003_v48, %v9566_v4 }
 0x342   : > { %v10047_v7 = vadd.f32 %v9525_v41, %v13689_v47  ;;  %v2757_v9 = vrot.slane %v10009_v57, %v9683_v33  ;;  %v2782_v12 = vsel %vm2518_vm3, %v2781_v10, %v2777_v27  ;;  %v2791_v17 = vrot.slane %v10015_v24, %v9578_v40  ;;  %v13695_v27 = vld [vmem:[#allocation34_spill] sm:$0xff] }
 0x343   : > { %13686 = vst [vmem:[#allocation38_spill] sm:$0xff] %v10036_v34  ;;  %13688 = vst [vmem:[#allocation103_spill] sm:$0xff] %v10040_v56  ;;  %v10056_v20 = vadd.f32 %v9525_v41, %v13691_v6  ;;  %v2753_v60 = vsel %vm13153_vm13, %v2752_v43, %v2748_v50  ;;  %v2885_v47 = vrot.slane %v10026_v19, %v9622_v61  ;;  %v13697_v43 = vld [vmem:[#allocation57_spill] sm:$0xff] }
 0x344   : > { %13690 = vst [vmem:[#allocation67_spill] sm:$0xff] %v10047_v7  ;;  %v10058_v18 = vpop.xlane.xlu0 %2186  ;;  %v2876_v48 = vsel %vm2539_vm6, %v2875_v45, %v2871_v22  ;;  %v10066_v57 = vadd.f32 %v9525_v41, %v13693_v16  ;;  %v10068_v10 = vpop.xlane.xlu1 %2188  ;;  %v10072_v24 = vadd.f32 %v9525_v41, %v13695_v27  ;;  %v2890_v50 = vrot.slane %v10036_v34, %v9657_v23  ;;  %v13701_v34 = vld [vmem:[#allocation71_spill] sm:$0xff] }
 0x345   : > { %13692 = vst [vmem:[#allocation52_spill] sm:$0xff] %v10056_v20  ;;  %v2881_v6 = vsel %vm2546_vm7, %v2880_v32, %v2876_v48  ;;  %v10079_v19 = vadd.f32 %v9525_v41, %v13697_v43  ;;  %v2762_v45 = vrot.slane %v10040_v56, %v9827_v31  ;;  %v2796_v16 = vrot.slane %v10047_v7, %v9592_v26 }
 0x346   : > { %13694 = vst [vmem:[#allocation39_spill] sm:$0xff] %v10066_v57  ;;  %13696 = vst [vmem:[#allocation34_spill] sm:$0xff] %v10072_v24  ;;  %v2787_v22 = vsel %vm2525_vm4, %v2786_v42, %v2782_v12  ;;  %v10088_v27 = vadd.f32 %v9525_v41, %v13699_v21  ;;  %v2688_v32 = vrot.slane %v9964_v52, %v9767_v1 }
 0x347   : > { %13698 = vst [vmem:[#allocation57_spill] sm:$0xff] %v10079_v19  ;;  %v2792_v48 = vsel %vm13097_vm5, %v2791_v17, %v2787_v22  ;;  %v2801_v43 = vrot.slane %v10056_v20, %v9603_v5  ;;  %v10097_v56 = vadd.f32 %v9525_v41, %v13701_v34  ;;  %v2684_v42 = vsel %vm2602_vm15, %v2683_v14, %v2679_v0  ;;  %v13703_v34 = vld [vmem:[#allocation59_spill] sm:$0xff] }
 0x348   : > { %13700 = vst [vmem:[#allocation54_spill] sm:$0xff] %v10088_v27  ;;  %v10099_v53 = vpop.xlane.xlu0 %2190  ;;  %v2758_v12 = vsel %vm13305_vm14, %v2757_v9, %v2753_v60  ;;  %v2895_v21 = vrot.slane %v10066_v57, %v9646_v44  ;;  %v2886_v7 = vsel %vm2553_vm8, %v2885_v47, %v2881_v6  ;;  %v10106_v52 = vpop.xlane.xlu1 %2192  ;;  %v2767_v17 = vrot.slane %v10072_v24, %v9767_v1  ;;  %v13705_v47 = vld [vmem:[#allocation73_spill] sm:$0xff]  ;;  %v13707_v57 = vld [vmem:[#allocation40_spill] sm:$0xff]  ;;  %v13713_v24 = vld [vmem:[#allocation99_spill] sm:$0xff] }
 0x349   : > { %13702 = vst [vmem:[#allocation71_spill] sm:$0xff] %v10097_v56  ;;  %v2891_v22 = vsel %vm2560_vm9, %v2890_v50, %v2886_v7  ;;  %v10113_v20 = vadd.f32 %v9525_v41, %v13703_v34  ;;  %v2900_v0 = vrot.slane %v10079_v19, %v9680_v15  ;;  %v2763_v14 = vsel %vm2602_vm15, %v2762_v45, %v2758_v12 }
 0x34a   : > { %v2806_v9 = vrot.slane %v10088_v27, %v9622_v61  ;;  %v2797_v60 = vsel %vm2539_vm6, %v2796_v16, %v2792_v48  ;;  %v10123_v6 = vadd.f32 %v9525_v41, %v13705_v47  ;;  %vm13115_vm5 = vcmask 1042434   ;;  %v13709_v48 = vld [vmem:[#allocation60_spill] sm:$0xff] }
 0x34b   : > { %13704 = vst [vmem:[#allocation59_spill] sm:$0xff] %v10113_v20  ;;  %v2802_v7 = vsel %vm2546_vm7, %v2801_v43, %v2797_v60  ;;  %v2811_v50 = vrot.slane %v10097_v56, %v9657_v23  ;;  %v2689_v45 = vsel %vm2609_vm0, %v2688_v32, %v2684_v42  ;;  %v2896_v12 = vsel %vm2567_vm10, %v2895_v21, %v2891_v22 }
 0x34c   : > { %13706 = vst [vmem:[#allocation73_spill] sm:$0xff] %v10123_v6  ;;  %v10128_v34 = vpop.xlane.xlu0 %2194  ;;  %v10134_v16 = vadd.f32 %v9525_v41, %v13707_v57  ;;  %v10138_v47 = vadd.f32 %v9525_v41, %v13709_v48  ;;  %v10140_v19 = vpop.xlane.xlu1 %2196  ;;  %v13710_v43 = vrot.slane %v9869_v63, %v9767_v1  ;;  %v2768_v32 = vsel %vm2609_vm0, %v2767_v17, %v2763_v14  ;;  %v13711_v48 = vld [vmem:[#allocation79_spill] sm:$0xff]  ;;  %v13715_v14 = vld [vmem:[#allocation66_spill] sm:$0xff] }
 0x34d   : > { %v2905_v42 = vrot.slane %v10113_v20, %v9671_v28  ;;  %v2901_v57 = vsel %vm13152_vm11, %v2900_v0, %v2896_v12  ;;  %v2816_v21 = vrot.slane %v10123_v6, %v9646_v44  ;;  %v2807_v22 = vsel %vm2553_vm8, %v2806_v9, %v2802_v7  ;;  %v13718_v7 = vld [vmem:[#allocation42_spill] sm:$0xff]  ;;  %v13723_v6 = vld [vmem:[#allocation77_spill] sm:$0xff] }
 0x34e   : > { %13708 = vst [vmem:[#allocation40_spill] sm:$0xff] %v10134_v16  ;;  %v2610_v60 = vsel %vm2609_vm0, %v13710_v43, %v9936_v8  ;;  %v10156_v27 = vadd.f32 %v9525_v41, %v13711_v48  ;;  %v10160_v56 = vadd.f32 %v9525_v41, %v13713_v24  ;;  %v2812_v17 = vsel %vm2560_vm9, %v2811_v50, %v2807_v22 }
 0x34f   : > { %v3165_v8 = vsel %vm13151_vm1, %v2689_v45, %v2610_v60  ;;  %v10166_v0 = vadd.f32 %v9525_v41, %v13715_v14  ;;  %v10170_v12 = vadd.f32 %v9525_v41, %v9674_v46  ;;  %v10176_v43 = vadd.f32 %v9525_v41, %v13718_v7  ;;  %v13720_v45 = vld [vmem:[#allocation72_spill] sm:$0xff] }
 0x350   : > { %13712 = vst [vmem:[#allocation60_spill] sm:$0xff] %v10156_v27  ;;  %13714 = vst [vmem:[#allocation79_spill] sm:$0xff] %v10160_v56  ;;  %v10172_v9 = vpop.xlane.xlu0 %2198  ;;  %v2910_v24 = vrot.slane %v10134_v16, %v9708_v38  ;;  %v2821_v50 = vrot.slane %v10138_v47, %v9680_v15  ;;  %v10184_v60 = vadd.f32 %v9525_v41, %v13720_v45  ;;  %v10186_v22 = vpop.xlane.xlu1 %2200  ;;  %vm13304_vm1 = vcmask 1044484  }
 0x351   : > { %13716 = vst [vmem:[#allocation99_spill] sm:$0xff] %v10166_v0  ;;  %13717 = vst [vmem:[#allocation66_spill] sm:$0xff] %v10170_v12  ;;  %v10189_v46 = vsel %vm13115_vm5, %v2768_v32, %v3165_v8  ;;  %v2906_v48 = vsel %vm2581_vm12, %v2905_v42, %v2901_v57  ;;  %v2817_v14 = vsel %vm2567_vm10, %v2816_v21, %v2812_v17  ;;  %vm13734_vm5 = vcmask 326912  }
 0x352   : > { %13719 = vst [vmem:[#allocation42_spill] sm:$0xff] %v10176_v43  ;;  %13721 = vst [vmem:[#allocation72_spill] sm:$0xff] %v10184_v60  ;;  %v2934_v7 = vrot.slane %v10156_v27, %v9528_v13  ;;  %v2930_v20 = vrot.slane %v10160_v56, %v9541_v37  ;;  %v10199_v16 = vadd.f32 %v9525_v41, %v9685_v59  ;;  %v13725_v56 = vld [vmem:[#allocation61_spill] sm:$0xff] }
 0x353   : > { %v2826_v45 = vrot.slane %v10166_v0, %v9671_v28  ;;  %v10205_v32 = vadd.f32 %v9525_v41, %v13723_v6  ;;  %v2939_v42 = vrot.slane %v10170_v12, %v9553_v2  ;;  %v10211_v57 = vadd.f32 %v9525_v41, %v9719_v25  ;;  %v13726_v25 = vld [vmem:[#allocation44_spill] sm:$0xff] }
 0x354   : > { %13722 = vst [vmem:[#allocation124_spill] sm:$0xff] %v10199_v16  ;;  %v10213_v21 = vpop.xlane.xlu0 %2202  ;;  %v2915_v59 = vrot.slane %v10176_v43, %v9683_v33  ;;  %v2911_v8 = vsel %vm13153_vm13, %v2910_v24, %v2906_v48  ;;  %v2822_v17 = vsel %vm13152_vm11, %v2821_v50, %v2817_v14  ;;  %v2831_v6 = vrot.slane %v10184_v60, %v9708_v38  ;;  %v10221_v27 = vpop.xlane.xlu1 %2204  ;;  %v13731_v60 = vld [vmem:[#allocation82_spill] sm:$0xff] }
 0x355   : > { %13724 = vst [vmem:[#allocation77_spill] sm:$0xff] %v10205_v32  ;;  %v10225_v12 = vadd.f32 %v9525_v41, %v13725_v56  ;;  %v10229_v0 = vadd.f32 %v9525_v41, %v13726_v25  ;;  %v10233_v43 = vadd.f32 %v9525_v41, %v9985_v29  ;;  %v10237_v24 = vadd.f32 %v9525_v41, %v9972_v35 }
 0x356   : > { %v2935_v50 = vsel %vm2511_vm2, %v2934_v7, %v2930_v20  ;;  %v2944_v48 = vrot.slane %v10199_v16, %v9566_v4  ;;  %v10244_v56 = vadd.f32 %v9525_v41, %v9731_v54  ;;  %v10248_v14 = vadd.f32 %v9525_v41, %v10017_v36 }
 0x357   : > { %13727 = vst [vmem:[#allocation61_spill] sm:$0xff] %v10233_v43  ;;  %13728 = vst [vmem:[#allocation44_spill] sm:$0xff] %v10237_v24  ;;  %v2836_v29 = vrot.slane %v10205_v32, %v9683_v33  ;;  %v2827_v25 = vsel %vm2581_vm12, %v2826_v45, %v2822_v17  ;;  %v2940_v35 = vsel %vm2518_vm3, %v2939_v42, %v2935_v50 }
 0x358   : > { %13729 = vst [vmem:[#allocation125_spill] sm:$0xff] %v10244_v56  ;;  %13730 = vst [vmem:[#allocation126_spill] sm:$0xff] %v10248_v14  ;;  %v2949_v20 = vrot.slane %v10211_v57, %v9578_v40  ;;  %v10256_v7 = vpop.xlane.xlu0 %2206  ;;  %v10259_v16 = vsel %vm13305_vm14, %v2915_v59, %v2911_v8  ;;  %v2832_v54 = vsel %vm13153_vm13, %v2831_v6, %v2827_v25  ;;  %v10270_v45 = vpop.xlane.xlu1 %2208  ;;  %v13733_v25 = vld [vmem:[#allocation88_spill] sm:$0xff] }
 0x359   : > { %v10264_v36 = vadd.f32 %v9525_v41, %v13731_v60  ;;  %v10268_v32 = vadd.f32 %v9525_v41, %v9762_v58  ;;  %v3013_v17 = vrot.slane %v10233_v43, %v9528_v13  ;;  %v3009_v59 = vrot.slane %v10237_v24, %v9541_v37 }
 0x35a   : > { %v10280_v8 = vadd.f32 %v9525_v41, %v10028_v49  ;;  %v2954_v60 = vrot.slane %v10244_v56, %v9592_v26  ;;  %v2945_v58 = vsel %vm2525_vm4, %v2944_v48, %v2940_v35  ;;  %v3018_v6 = vrot.slane %v10248_v14, %v9553_v2 }
 0x35b   : > { %v10289_v50 = vadd.f32 %v9525_v41, %v10058_v18  ;;  %v10293_v42 = vadd.f32 %v9525_v41, %v13733_v25  ;;  %v2837_v43 = vsel %vm13305_vm14, %v2836_v29, %v2832_v54  ;;  %v2950_v49 = vsel %vm13734_vm5, %v2949_v20, %v2945_v58 }
 0x35c   : > { %13732 = vst [vmem:[#allocation82_spill] sm:$0xff] %v10280_v8  ;;  %v10299_v56 = vadd.f32 %v9525_v41, %v9775_v11  ;;  %v2211_v48 = vpop.xlane.xlu0 %2210  ;;  %v2841_v35 = vrot.slane %v10264_v36, %v9827_v31  ;;  %v2959_v18 = vrot.slane %v10268_v32, %v9603_v5  ;;  %v10307_v14 = vadd.f32 %v9525_v41, %v9805_v3  ;;  %v2213_v25 = vpop.xlane.xlu1 %2212 }
 0x35d   : > { %v10310_v29 = vadd.f32 %v9525_v41, %v2211_v48  ;;  %v3014_v20 = vsel %vm2511_vm2, %v3013_v17, %v3009_v59  ;;  %v3023_v11 = vrot.slane %v10280_v8, %v9566_v4  ;;  %v10317_v54 = vadd.f32 %v9525_v41, %v10068_v10 }
 0x35e   : > { %13735 = vst [vmem:[#allocation88_spill] sm:$0xff] %v10299_v56  ;;  %v10320_v58 = vadd.f32 %v9525_v41, %v2213_v25  ;;  %v2955_v24 = vsel %vm2539_vm6, %v2954_v60, %v2950_v49  ;;  %v3019_v3 = vsel %vm2518_vm3, %v3018_v6, %v3014_v20  ;;  %v3028_v48 = vrot.slane %v10289_v50, %v9578_v40 }
 0x35f   : > { %13736 = vst [vmem:[#allocation127_spill] sm:$0xff] %v10317_v54  ;;  %v10328_v17 = vadd.f32 %v9525_v41, %v10099_v53  ;;  %v2964_v59 = vrot.slane %v10299_v56, %v9622_v61  ;;  %v10334_v10 = vadd.f32 %v9525_v41, %v9815_v30  ;;  %v3088_v60 = vrot.slane %v10310_v29, %v9541_v37 }
 0x360   : > { %13737 = vst [vmem:[#allocation128_spill] sm:$0xff] %v10320_v58  ;;  %v3092_v25 = vrot.slane %v10320_v58, %v9528_v13  ;;  %v2215_v6 = vpop.xlane.xlu0 %2214  ;;  %v2960_v53 = vsel %vm2546_vm7, %v2959_v18, %v2955_v24  ;;  %v2969_v20 = vrot.slane %v10307_v14, %v9657_v23  ;;  %v2217_v8 = vpop.xlane.xlu1 %2216  ;;  %v3033_v30 = vrot.slane %v10317_v54, %v9592_v26 }
 0x361   : > { %v10346_v56 = vadd.f32 %v9525_v41, %v2215_v6  ;;  %v3024_v13 = vsel %vm2525_vm4, %v3023_v11, %v3019_v3  ;;  %v10353_v37 = vadd.f32 %v9525_v41, %v10106_v52  ;;  %v10356_v49 = vadd.f32 %v9525_v41, %v2217_v8 }
 0x362   : > { %v3029_v24 = vsel %vm13734_vm5, %v3028_v48, %v3024_v13  ;;  %v3038_v18 = vrot.slane %v10328_v17, %v9603_v5  ;;  %v10363_v6 = vadd.f32 %v9525_v41, %v10128_v34  ;;  %v2974_v11 = vrot.slane %v10334_v10, %v9646_v44 }
 0x363   : > { %13738 = vst [vmem:[#allocation129_spill] sm:$0xff] %v10346_v56  ;;  %v3097_v58 = vrot.slane %v10346_v56, %v9553_v2  ;;  %v2965_v52 = vsel %vm2553_vm8, %v2964_v59, %v2960_v53  ;;  %v3093_v8 = vsel %vm2511_vm2, %v3092_v25, %v3088_v60  ;;  %v3102_v13 = vrot.slane %v10356_v49, %v9566_v4  ;;  %v13741_v4 = vld [vmem:[#allocation121_spill] sm:$0xff] }
 0x364   : > { %v2219_v3 = vpop.xlane.xlu0 %2218  ;;  %v2970_v48 = vsel %vm2560_vm9, %v2969_v20, %v2965_v52  ;;  %v10376_v34 = vadd.f32 %v9525_v41, %v9847_v39  ;;  %v2221_v2 = vpop.xlane.xlu1 %2220  ;;  %v3043_v59 = vrot.slane %v10353_v37, %v9622_v61  ;;  %v3034_v25 = vsel %vm2539_vm6, %v3033_v30, %v3029_v24 }
 0x365   : > { %v3098_v54 = vsel %vm2518_vm3, %v3097_v58, %v3093_v8  ;;  %v10380_v56 = vadd.f32 %v9525_v41, %v2219_v3  ;;  %v10387_v60 = vadd.f32 %v9525_v41, %v10140_v19  ;;  %v10390_v53 = vadd.f32 %v9525_v41, %v2221_v2 }
 0x366   : > { %v3039_v39 = vsel %vm2546_vm7, %v3038_v18, %v3034_v25  ;;  %v3048_v58 = vrot.slane %v10363_v6, %v9657_v23  ;;  %v10397_v20 = vadd.f32 %v9525_v41, %v10172_v9  ;;  %v10402_v30 = vsel %vm2602_vm15, %v2841_v35, %v2837_v43 }
 0x367   : > { %v3107_v52 = vrot.slane %v10380_v56, %v9578_v40  ;;  %v10406_v19 = vadd.f32 %v9525_v41, %v9857_v62  ;;  %v3112_v2 = vrot.slane %v10390_v53, %v9592_v26  ;;  %v3103_v24 = vsel %vm2525_vm4, %v3102_v13, %v3098_v54  ;;  %v13740_v40 = vld [vmem:[#allocation119_spill] sm:$0xff] }
 0x368   : > { %v2223_v18 = vpop.xlane.xlu0 %2222  ;;  %v2975_v8 = vsel %vm2567_vm10, %v2974_v11, %v2970_v48  ;;  %v2979_v9 = vrot.slane %v10376_v34, %v9680_v15  ;;  %v2225_v25 = vpop.xlane.xlu1 %2224  ;;  %v10420_v62 = vadd.f32 %v9525_v41, %v9887_v51  ;;  %v3053_v35 = vrot.slane %v10387_v60, %v9646_v44 }
 0x369   : > { %v3108_v3 = vsel %vm13734_vm5, %v3107_v52, %v3103_v24  ;;  %v10416_v43 = vadd.f32 %v9525_v41, %v2223_v18  ;;  %v3044_v54 = vsel %vm2553_vm8, %v3043_v59, %v3039_v39  ;;  %v10426_v11 = vadd.f32 %v9525_v41, %v2225_v25 }
 0x36a   : > { %v3049_v13 = vsel %vm2560_vm9, %v3048_v58, %v3044_v54  ;;  %v10431_v48 = vadd.f32 %v9525_v41, %v10186_v22  ;;  %v3058_v52 = vrot.slane %v10397_v20, %v9680_v15  ;;  %v2984_v24 = vrot.slane %v10406_v19, %v9671_v28 }
 0x36b   : > { %13739 = vst [vmem:[#allocation130_spill] sm:$0xff] %v10426_v11  ;;  %v3117_v51 = vrot.slane %v10416_v43, %v9603_v5  ;;  %v10441_v59 = vadd.f32 %v9525_v41, %v10213_v21  ;;  %v3122_v39 = vrot.slane %v10426_v11, %v9622_v61  ;;  %v3113_v58 = vsel %vm2539_vm6, %v3112_v2, %v3108_v3 }
 0x36c   : > { %v2227_v22 = vpop.xlane.xlu0 %2226  ;;  %v2980_v18 = vsel %vm13152_vm11, %v2979_v9, %v2975_v8  ;;  %v10449_v25 = vadd.f32 %v9525_v41, %v9900_v55  ;;  %v2229_v5 = vpop.xlane.xlu1 %2228  ;;  %v2989_v21 = vrot.slane %v10420_v62, %v9708_v38  ;;  %v10459_v61 = vadd.f32 %v9525_v41, %v13740_v40 }
 0x36d   : > { %v3118_v54 = vsel %vm2546_vm7, %v3117_v51, %v3113_v58  ;;  %v10453_v26 = vadd.f32 %v9525_v41, %v2227_v22  ;;  %v3054_v2 = vsel %vm2567_vm10, %v3053_v35, %v3049_v13  ;;  %v10463_v8 = vadd.f32 %v9525_v41, %v2229_v5 }
 0x36e   : > { %v3063_v55 = vrot.slane %v10431_v48, %v9671_v28  ;;  %v3059_v9 = vsel %vm13152_vm11, %v3058_v52, %v3054_v2  ;;  %v10470_v3 = vadd.f32 %v9525_v41, %v10221_v27  ;;  %v3068_v40 = vrot.slane %v10441_v59, %v9708_v38 }
 0x36f   : > { %v3127_v51 = vrot.slane %v10453_v26, %v9657_v23  ;;  %v10478_v35 = vadd.f32 %v9525_v41, %v10256_v7  ;;  %v3132_v5 = vrot.slane %v10463_v8, %v9646_v44  ;;  %v3123_v13 = vsel %vm2553_vm8, %v3122_v39, %v3118_v54 }
 0x370   : > { %v2231_v52 = vpop.xlane.xlu0 %2230  ;;  %v2994_v27 = vrot.slane %v10449_v25, %v9683_v33  ;;  %v2985_v58 = vsel %vm2581_vm12, %v2984_v24, %v2980_v18  ;;  %v2233_v2 = vpop.xlane.xlu1 %2232  ;;  %v10493_v11 = vadd.f32 %v9525_v41, %v13741_v4  ;;  %v2999_v39 = vrot.slane %v10459_v61, %v9827_v31 }
 0x371   : > { %v3128_v22 = vsel %vm2560_vm9, %v3127_v51, %v3123_v13  ;;  %v10488_v23 = vadd.f32 %v9525_v41, %v2231_v52  ;;  %v2990_v7 = vsel %vm13153_vm13, %v2989_v21, %v2985_v58  ;;  %v10498_v54 = vadd.f32 %v9525_v41, %v2233_v2 }
 0x372   : > { %v3073_v24 = vrot.slane %v10470_v3, %v9683_v33  ;;  %v3064_v18 = vsel %vm2581_vm12, %v3063_v55, %v3059_v9  ;;  %v10505_v51 = vadd.f32 %v9525_v41, %v10270_v45  ;;  %v3078_v13 = vrot.slane %v10478_v35, %v9827_v31 }
 0x373   : > { %v3137_v21 = vrot.slane %v10488_v23, %v9680_v15  ;;  %v3069_v4 = vsel %vm13153_vm13, %v3068_v40, %v3064_v18  ;;  %v3142_v52 = vrot.slane %v10498_v54, %v9671_v28  ;;  %v3133_v58 = vsel %vm2567_vm10, %v3132_v5, %v3128_v22 }
 0x374   : > { %v2235_v2 = vpop.xlane.xlu0 %2234  ;;  %v2925_v55 = vrot.slane %v10225_v12, %v9767_v1  ;;  %v2237_v9 = vpop.xlane.xlu1 %2236  ;;  %vm13154_vm5 = vcmask 1043459   ;;  %v13742_v40 = vrot.slane %v10293_v42, %v9767_v1  ;;  %v3004_v5 = vrot.slane %v10493_v11, %v9767_v1 }
 0x375   : > { %v3138_v45 = vsel %vm13152_vm11, %v3137_v21, %v3133_v58  ;;  %v10519_v44 = vadd.f32 %v9525_v41, %v2235_v2  ;;  %v2995_v22 = vsel %vm13305_vm14, %v2994_v27, %v2990_v7  ;;  %v10530_v15 = vadd.f32 %v9525_v41, %v2237_v9 }
 0x376   : > { %v2847_v18 = vsel %vm2609_vm0, %v13742_v40, %v10402_v30  ;;  %v3000_v21 = vsel %vm2602_vm15, %v2999_v39, %v2995_v22  ;;  %v3083_v58 = vrot.slane %v10505_v51, %v9767_v1  ;;  %v3074_v2 = vsel %vm13305_vm14, %v3073_v24, %v3069_v4 }
 0x377   : > { %v3147_v28 = vrot.slane %v10519_v44, %v9708_v38  ;;  %v13743_v30 = vrot.slane %v10229_v0, %v9827_v31  ;;  %v3079_v27 = vsel %vm2602_vm15, %v3078_v13, %v3074_v2  ;;  %v3152_v7 = vrot.slane %v10530_v15, %v9683_v33 }
 0x378   : > { %v3143_v39 = vsel %vm2581_vm12, %v3142_v52, %v3138_v45  ;;  %v2239_v9 = vpop.xlane.xlu0 %2238  ;;  %v2241_v24 = vpop.xlane.xlu1 %2240  ;;  %v3169_v38 = vsel %vm13154_vm5, %v2847_v18, %v10189_v46  ;;  %v3005_v13 = vsel %vm2609_vm0, %v3004_v5, %v3000_v21  ;;  %vm13303_vm11 = vcmask 1045509  }
 0x379   : > { %v2921_v40 = vsel %vm2602_vm15, %v13743_v30, %v10259_v16  ;;  %v3148_v22 = vsel %vm13153_vm13, %v3147_v28, %v3143_v39  ;;  %v10549_v4 = vadd.f32 %v9525_v41, %v2239_v9  ;;  %v10554_v16 = vadd.f32 %v9525_v41, %v2241_v24  ;;  %v13746_v9 = vld [vmem:[#allocation58_spill] sm:$0xff]  ;;  %v13747_v24 = vld [vmem:[#allocation93_spill] sm:$0xff] }
 0x37a   : > { %v2926_v2 = vsel %vm2609_vm0, %v2925_v55, %v2921_v40  ;;  %v3084_v28 = vsel %vm2609_vm0, %v3083_v58, %v3079_v27  ;;  %vm13302_vm13 = vcmask 1046534   ;;  %v3153_v46 = vsel %vm13305_vm14, %v3152_v7, %v3148_v22  ;;  %v13744_v27 = vld [vmem:[#allocation101_spill] sm:$0xff] }
 0x37b   : > { %v3157_v52 = vrot.slane %v10549_v4, %v9827_v31  ;;  %v3162_v45 = vrot.slane %v10554_v16, %v9767_v1  ;;  %v3171_v18 = vsel %vm13304_vm1, %v2926_v2, %v3169_v38  ;;  %vm13301_vm5 = vcmask 1047559   ;;  %v13745_v7 = vld [vmem:[#allocation69_spill] sm:$0xff]  ;;  %v13748_v2 = vld [vmem:[#allocation64_spill] sm:$0xff] }
 0x37c   : > { %v3173_v5 = vsel %vm13303_vm11, %v3005_v13, %v3171_v18  ;;  %v7876_v58 = vmov 0   ;;  %vm14040_vm11 = vcmask 720512  }
 0x37d   : > { %v3158_v41 = vsel %vm2602_vm15, %v3157_v52, %v3153_v46  ;;  %v3175_v21 = vsel %vm13302_vm13, %v3084_v28, %v3173_v5  ;;  %7249 = vset.pattern.permute.xlu0 %v7876_v58  ;;  %7248 = vset.pattern.permute.xlu1 %v7876_v58  ;;  %v13749_v46 = vld [vmem:[#allocation96_spill] sm:$0xff]  ;;  %v13750_v5 = vld [vmem:[#allocation49_spill] sm:$0xff] }
 0x37e   : > { %v3163_v55 = vsel %vm2609_vm0, %v3162_v45, %v3158_v41  ;;  %v13155_v18 = vsub.s32 1, %v13749_v46 }
 0x37f   : > { %v3177_v30 = vsel %vm13301_vm5, %v3163_v55, %v3175_v21  ;;  %vm14021_vm5 = vcmask 326912  }
 0x380   : > { %3179 = vmax.xlane.f32.xlu0 %v3177_v30  ;;  %v13751_v30 = vld [vmem:[#allocation70_spill] sm:$0xff]  ;;  %vm14024_vm13 = vmmov %vm14021_vm5 }
 0x409   : > { %v10570_v40 = vpop.xlane.xlu0 %3179 }
 0x40a   : > { %v10574_v38 = vrot.slane %v10570_v40, %v13744_v27 }
 0x40c   : > { %v3223_v39 = vsub.f32 %v13745_v7, %v10574_v38  ;;  %v3222_v22 = vsub.f32 %v13746_v9, %v10574_v38  ;;  %v3232_v13 = vsub.f32 %v13747_v24, %v10574_v38  ;;  %v3224_v52 = vsub.f32 %v13748_v2, %v10574_v38  ;;  %v13752_v9 = vld [vmem:[#allocation115_spill] sm:$0xff] }
 0x40d   : > { %v3234_v55 = vsub.f32 %v13750_v5, %v10574_v38  ;;  %v3225_v58 = vsub.f32 %v13751_v30, %v10574_v38  ;;  %v10592_v7 = vrot.slane %v10570_v40, %v13155_v18  ;;  %v13755_v30 = vld [vmem:[#allocation80_spill] sm:$0xff] }
 0x40e   : > { %v3352_v28 = vmul.f32 1.442695, %v3223_v39  ;;  %v3350_v45 = vmul.f32 1.442695, %v3222_v22  ;;  %v3370_v41 = vmul.f32 1.442695, %v3232_v13  ;;  %v3236_v22 = vsub.f32 %v13752_v9, %v10574_v38 }
 0x40f   : > { %v3354_v21 = vmul.f32 1.442695, %v3224_v52  ;;  %v3374_v39 = vmul.f32 1.442695, %v3234_v55  ;;  %v3356_v24 = vmul.f32 1.442695, %v3225_v58  ;;  %v3227_v18 = vsub.f32 %v13755_v30, %v10574_v38 }
 0x410   : > { %7250 = vpow2.f32 %v3352_v28  ;;  %v13753_v13 = vld [vmem:[#allocation76_spill] sm:$0xff]  ;;  %v3378_v52 = vmul.f32 1.442695, %v3236_v22  ;;  %v13756_v55 = vld [vmem:[#allocation97_spill] sm:$0xff] }
 0x411   : > { %7252 = vpow2.f32 %v3350_v45  ;;  %v3226_v2 = vsub.f32 %v13753_v13, %v10574_v38  ;;  %v13754_v28 = vld [vmem:[#allocation92_spill] sm:$0xff]  ;;  %v3240_v9 = vsub.f32 %v13756_v55, %v10592_v7  ;;  %v3360_v58 = vmul.f32 1.442695, %v3227_v18  ;;  %v13762_v18 = vld [vmem:[#allocation81_spill] sm:$0xff] }
 0x412   : > { %7254 = vpow2.f32 %v3370_v41  ;;  %v3238_v45 = vsub.f32 %v13754_v28, %v10592_v7 }
 0x413   : > { %7256 = vpow2.f32 %v3354_v21  ;;  %v3358_v5 = vmul.f32 1.442695, %v3226_v2  ;;  %v13760_v2 = vld [vmem:[#allocation43_spill] sm:$0xff] }
 0x414   : > { %7258 = vpow2.f32 %v3374_v39  ;;  %v3382_v41 = vmul.f32 1.442695, %v3238_v45  ;;  %v13758_v39 = vld [vmem:[#allocation86_spill] sm:$0xff] }
 0x415   : > { %7260 = vpow2.f32 %v3356_v24  ;;  %v3228_v22 = vsub.f32 %v13758_v39, %v10574_v38  ;;  %v3386_v24 = vmul.f32 1.442695, %v3240_v9 }
 0x416   : > { %7262 = vpow2.f32 %v3378_v52  ;;  %v3242_v52 = vsub.f32 %v13760_v2, %v10592_v7 }
 0x417   : > { %7264 = vpow2.f32 %v3358_v5  ;;  %v3362_v45 = vmul.f32 1.442695, %v3228_v22  ;;  %v3229_v5 = vsub.f32 %v13762_v18, %v10574_v38 }
 0x418   : > { %7266 = vpow2.f32 %v3382_v41  ;;  %v3390_v55 = vmul.f32 1.442695, %v3242_v52  ;;  %v13764_v41 = vld [vmem:[#allocation24_spill] sm:$0xff] }
 0x419   : > { %7268 = vpow2.f32 %v3360_v58  ;;  %v3244_v9 = vsub.f32 %v13764_v41, %v10592_v7  ;;  %v3364_v2 = vmul.f32 1.442695, %v3229_v5  ;;  %v13766_v58 = vld [vmem:[#allocation23_spill] sm:$0xff] }
 0x41a   : > { %7270 = vpow2.f32 %v3386_v24  ;;  %v3230_v22 = vsub.f32 %v13766_v58, %v10574_v38  ;;  %v13768_v24 = vld [vmem:[#allocation95_spill] sm:$0xff] }
 0x41b   : > { %7272 = vpow2.f32 %v3362_v45  ;;  %v3394_v18 = vmul.f32 1.442695, %v3244_v9  ;;  %v3246_v52 = vsub.f32 %v13768_v24, %v10592_v7  ;;  %v13770_v45 = vld [vmem:[#allocation106_spill] sm:$0xff] }
 0x41c   : > { %7274 = vpow2.f32 %v3390_v55  ;;  %v3366_v41 = vmul.f32 1.442695, %v3230_v22  ;;  %v3231_v5 = vsub.f32 %v13770_v45, %v10574_v38  ;;  %v13772_v55 = vld [vmem:[#allocation28_spill] sm:$0xff]  ;;  %v13165_v45 = vsub.s32 2, %v13749_v46 }
 0x41d   : > { %v10604_v21 = vpop.eup %7250  ;;  %7276 = vpow2.f32 %v3364_v2  ;;  %v3398_v58 = vmul.f32 1.442695, %v3246_v52  ;;  %v3248_v9 = vsub.f32 %v13772_v55, %v10592_v7  ;;  %v13774_v2 = vld [vmem:[#allocation26_spill] sm:$0xff]  ;;  %v13776_v52 = vld [vmem:[#allocation112_spill] sm:$0xff] }
 0x41e   : > { %13757 = vst [vmem:[#allocation119_spill] sm:$0xff] %v10604_v21  ;;  %v10608_v13 = vpop.eup %7252  ;;  %3738 = vperm.xlu0 %7249, %v10604_v21   ;;  %7278 = vpow2.f32 %v3394_v18  ;;  %v3368_v24 = vmul.f32 1.442695, %v3231_v5  ;;  %v3233_v22 = vsub.f32 %v13774_v2, %v10574_v38  ;;  %v3250_v55 = vsub.f32 %v13776_v52, %v10592_v7  ;;  %v13778_v5 = vld [vmem:[#allocation109_spill] sm:$0xff]  ;;  %v13780_v52 = vld [vmem:[#allocation31_spill] sm:$0xff] }
 0x41f   : > { %13759 = vst [vmem:[#allocation121_spill] sm:$0xff] %v10608_v13  ;;  %3735 = vperm.xlu1 %7248, %v10608_v13   ;;  %v10614_v28 = vpop.eup %7254  ;;  %7280 = vpow2.f32 %v3366_v41  ;;  %v3402_v18 = vmul.f32 1.442695, %v3248_v9  ;;  %v3235_v2 = vsub.f32 %v13778_v5, %v10574_v38 }
 0x420   : > { %13761 = vst [vmem:[#allocation69_spill] sm:$0xff] %v10614_v28  ;;  %v10618_v30 = vpop.eup %7256  ;;  %7282 = vpow2.f32 %v3398_v58  ;;  %v3372_v41 = vmul.f32 1.442695, %v3233_v22  ;;  %v10666_v58 = vrot.slane %v10570_v40, %v13165_v45  ;;  %v3406_v9 = vmul.f32 1.442695, %v3250_v55 }
 0x421   : > { %13763 = vst [vmem:[#allocation58_spill] sm:$0xff] %v10618_v30  ;;  %v10624_v39 = vpop.eup %7258  ;;  %7284 = vpow2.f32 %v3368_v24  ;;  %v3252_v24 = vsub.f32 %v13780_v52, %v10592_v7  ;;  %v3376_v5 = vmul.f32 1.442695, %v3235_v2 }
 0x422   : > { %3765 = vperm.xlu0 %7249, %v10614_v28   ;;  %13765 = vst [vmem:[#allocation93_spill] sm:$0xff] %v10624_v39  ;;  %v10628_v21 = vpop.eup %7260  ;;  %7286 = vpow2.f32 %v3402_v18  ;;  %v13783_v18 = vld [vmem:[#allocation45_spill] sm:$0xff] }
 0x423   : > { %3741 = vperm.xlu1 %7248, %v10618_v30   ;;  %13767 = vst [vmem:[#allocation64_spill] sm:$0xff] %v10628_v21  ;;  %v10634_v28 = vpop.eup %7262  ;;  %7288 = vpow2.f32 %v3372_v41  ;;  %v3410_v45 = vmul.f32 1.442695, %v3252_v24  ;;  %v3254_v55 = vsub.f32 %v13783_v18, %v10666_v58  ;;  %v13785_v41 = vld [vmem:[#allocation90_spill] sm:$0xff] }
 0x424   : > { %13769 = vst [vmem:[#allocation49_spill] sm:$0xff] %v10634_v28  ;;  %v10638_v30 = vpop.eup %7264  ;;  %7290 = vpow2.f32 %v3406_v9  ;;  %v3239_v2 = vsub.f32 %v13785_v41, %v10592_v7 }
 0x425   : > { %13771 = vst [vmem:[#allocation70_spill] sm:$0xff] %v10638_v30  ;;  %7292 = vpow2.f32 %v3376_v5 }
 0x426   : > { %3771 = vperm.xlu0 %7249, %v10624_v39   ;;  %v10644_v39 = vpop.eup %7266  ;;  %7294 = vpow2.f32 %v3410_v45  ;;  %v3384_v18 = vmul.f32 1.442695, %v3239_v2  ;;  %v13791_v45 = vld [vmem:[#allocation27_spill] sm:$0xff] }
 0x427   : > { %3744 = vperm.xlu1 %7248, %v10628_v21   ;;  %13773 = vst [vmem:[#allocation115_spill] sm:$0xff] %v10644_v39  ;;  %v10648_v21 = vpop.eup %7268 }
 0x428   : > { %13775 = vst [vmem:[#allocation76_spill] sm:$0xff] %v10648_v21 }
 0x42a   : > { %3777 = vperm.xlu0 %7249, %v10634_v28  }
 0x42b   : > { %3747 = vperm.xlu1 %7248, %v10638_v30   ;;  %v10655_v30 = vpop.eup %7270 }
 0x42c   : > { %13777 = vst [vmem:[#allocation92_spill] sm:$0xff] %v10655_v30  ;;  %v10659_v28 = vpop.eup %7272 }
 0x42d   : > { %13779 = vst [vmem:[#allocation80_spill] sm:$0xff] %v10659_v28  ;;  %v10670_v22 = vpop.eup %7274 }
 0x42e   : > { %3783 = vperm.xlu0 %7249, %v10644_v39   ;;  %13781 = vst [vmem:[#allocation97_spill] sm:$0xff] %v10670_v22 }
 0x42f   : > { %3750 = vperm.xlu1 %7248, %v10648_v21   ;;  %v3237_v21 = vsub.f32 %v9869_v63, %v10574_v38  ;;  %v3414_v63 = vmul.f32 1.442695, %v3254_v55  ;;  %v13787_v38 = vld [vmem:[#allocation47_spill] sm:$0xff]  ;;  %v3258_v55 = vsub.f32 %v13791_v45, %v10666_v58 }
 0x430   : > { %v3256_v9 = vsub.f32 %v13787_v38, %v10666_v58 }
 0x431   : > { %v3380_v52 = vmul.f32 1.442695, %v3237_v21  ;;  %v13789_v21 = vld [vmem:[#allocation83_spill] sm:$0xff] }
 0x432   : > { %3789 = vperm.xlu0 %7249, %v10655_v30   ;;  %v10674_v30 = vpop.eup %7276  ;;  %v3241_v5 = vsub.f32 %v13789_v21, %v10592_v7  ;;  %v3418_v41 = vmul.f32 1.442695, %v3256_v9  ;;  %v3422_v21 = vmul.f32 1.442695, %v3258_v55 }
 0x433   : > { %3753 = vperm.xlu1 %7248, %v10659_v28   ;;  %13782 = vst [vmem:[#allocation86_spill] sm:$0xff] %v10674_v30  ;;  %v10680_v28 = vpop.eup %7278  ;;  %7296 = vpow2.f32 %v3380_v52  ;;  %v13793_v52 = vld [vmem:[#allocation105_spill] sm:$0xff] }
 0x434   : > { %13784 = vst [vmem:[#allocation43_spill] sm:$0xff] %v10680_v28  ;;  %v10684_v39 = vpop.eup %7280  ;;  %7298 = vpow2.f32 %v3414_v63  ;;  %v3388_v38 = vmul.f32 1.442695, %v3241_v5  ;;  %v3243_v2 = vsub.f32 %v13793_v52, %v10592_v7  ;;  %v13795_v63 = vld [vmem:[#allocation108_spill] sm:$0xff] }
 0x435   : > { %13786 = vst [vmem:[#allocation81_spill] sm:$0xff] %v10684_v39  ;;  %v10690_v24 = vpop.eup %7282  ;;  %7300 = vpow2.f32 %v3384_v18  ;;  %v3260_v9 = vsub.f32 %v13795_v63, %v10666_v58  ;;  %v13797_v18 = vld [vmem:[#allocation98_spill] sm:$0xff] }
 0x436   : > { %3795 = vperm.xlu0 %7249, %v10670_v22   ;;  %13788 = vst [vmem:[#allocation24_spill] sm:$0xff] %v10690_v24  ;;  %7302 = vpow2.f32 %v3418_v41  ;;  %v3392_v45 = vmul.f32 1.442695, %v3243_v2  ;;  %v3245_v5 = vsub.f32 %v13797_v18, %v10592_v7  ;;  %v13799_v41 = vld [vmem:[#allocation114_spill] sm:$0xff] }
 0x437   : > { %3756 = vperm.xlu1 %7248, %v10674_v30   ;;  %v10694_v30 = vpop.eup %7284  ;;  %7304 = vpow2.f32 %v3388_v38  ;;  %v3426_v52 = vmul.f32 1.442695, %v3260_v9  ;;  %v3262_v55 = vsub.f32 %v13799_v41, %v10666_v58  ;;  %v13801_v38 = vld [vmem:[#allocation100_spill] sm:$0xff] }
 0x438   : > { %13790 = vst [vmem:[#allocation23_spill] sm:$0xff] %v10694_v30  ;;  %7306 = vpow2.f32 %v3422_v21  ;;  %v3396_v63 = vmul.f32 1.442695, %v3245_v5  ;;  %v3247_v2 = vsub.f32 %v13801_v38, %v10592_v7  ;;  %v13803_v21 = vld [vmem:[#allocation118_spill] sm:$0xff]  ;;  %v13182_v38 = vsub.s32 3, %v13749_v46 }
 0x439   : > { %7308 = vpow2.f32 %v3392_v45  ;;  %v3430_v18 = vmul.f32 1.442695, %v3262_v55  ;;  %v3264_v9 = vsub.f32 %v13803_v21, %v10666_v58  ;;  %v13805_v45 = vld [vmem:[#allocation111_spill] sm:$0xff] }
 0x43a   : > { %3801 = vperm.xlu0 %7249, %v10680_v28   ;;  %v10700_v28 = vpop.eup %7286  ;;  %7310 = vpow2.f32 %v3426_v52  ;;  %v3400_v41 = vmul.f32 1.442695, %v3247_v2  ;;  %v3249_v5 = vsub.f32 %v13805_v45, %v10592_v7  ;;  %v13807_v55 = vld [vmem:[#allocation55_spill] sm:$0xff]  ;;  %v13809_v2 = vld [vmem:[#allocation29_spill] sm:$0xff] }
 0x43b   : > { %3759 = vperm.xlu1 %7248, %v10684_v39   ;;  %13792 = vst [vmem:[#allocation95_spill] sm:$0xff] %v10700_v28  ;;  %v10704_v22 = vpop.eup %7288  ;;  %7312 = vpow2.f32 %v3396_v63  ;;  %v3434_v52 = vmul.f32 1.442695, %v3264_v9  ;;  %v3266_v21 = vsub.f32 %v13807_v55, %v10666_v58  ;;  %v3251_v45 = vsub.f32 %v13809_v2, %v10592_v7  ;;  %v13811_v55 = vld [vmem:[#allocation103_spill] sm:$0xff] }
 0x43c   : > { %13794 = vst [vmem:[#allocation106_spill] sm:$0xff] %v10704_v22  ;;  %7314 = vpow2.f32 %v3430_v18  ;;  %v3404_v63 = vmul.f32 1.442695, %v3249_v5  ;;  %v10752_v18 = vrot.slane %v10570_v40, %v13182_v38 }
 0x43d   : > { %7316 = vpow2.f32 %v3400_v41  ;;  %v3438_v9 = vmul.f32 1.442695, %v3266_v21  ;;  %v3268_v41 = vsub.f32 %v13811_v55, %v10666_v58  ;;  %v3408_v2 = vmul.f32 1.442695, %v3251_v45 }
 0x43e   : > { %3807 = vperm.xlu0 %7249, %v10690_v24   ;;  %7318 = vpow2.f32 %v3434_v52  ;;  %v13815_v52 = vld [vmem:[#allocation46_spill] sm:$0xff] }
 0x43f   : > { %3762 = vperm.xlu1 %7248, %v10694_v30   ;;  %v10710_v30 = vpop.eup %7290  ;;  %7320 = vpow2.f32 %v3404_v63  ;;  %v3442_v38 = vmul.f32 1.442695, %v3268_v41  ;;  %v3270_v21 = vsub.f32 %v13815_v52, %v10752_v18  ;;  %v13817_v63 = vld [vmem:[#allocation91_spill] sm:$0xff] }
 0x440   : > { %13796 = vst [vmem:[#allocation28_spill] sm:$0xff] %v10710_v30  ;;  %v10714_v24 = vpop.eup %7292  ;;  %7322 = vpow2.f32 %v3438_v9  ;;  %v3255_v45 = vsub.f32 %v13817_v63, %v10666_v58 }
 0x441   : > { %13798 = vst [vmem:[#allocation26_spill] sm:$0xff] %v10714_v24  ;;  %7324 = vpow2.f32 %v3408_v2 }
 0x442   : > { %3813 = vperm.xlu0 %7249, %v10700_v28   ;;  %v3416_v52 = vmul.f32 1.442695, %v3255_v45 }
 0x443   : > { %3768 = vperm.xlu1 %7248, %v10704_v22   ;;  %v10720_v22 = vpop.eup %7294  ;;  %7326 = vpow2.f32 %v3442_v38  ;;  %v13823_v38 = vld [vmem:[#allocation65_spill] sm:$0xff] }
 0x444   : > { %13800 = vst [vmem:[#allocation112_spill] sm:$0xff] %v10720_v22  ;;  %v10724_v28 = vpop.eup %7296 }
 0x445   : > { %13802 = vst [vmem:[#allocation109_spill] sm:$0xff] %v10724_v28 }
 0x446   : > { %3819 = vperm.xlu0 %7249, %v10710_v30  }
 0x447   : > { %3774 = vperm.xlu1 %7248, %v10714_v24   ;;  %v10730_v24 = vpop.eup %7298 }
 0x448   : > { %13804 = vst [vmem:[#allocation31_spill] sm:$0xff] %v10730_v24  ;;  %v10734_v30 = vpop.eup %7300 }
 0x449   : > { %13806 = vst [vmem:[#allocation45_spill] sm:$0xff] %v10734_v30 }
 0x44a   : > { %3825 = vperm.xlu0 %7249, %v10720_v22  }
 0x44b   : > { %3780 = vperm.xlu1 %7248, %v10724_v28   ;;  %v10741_v28 = vpop.eup %7302 }
 0x44c   : > { %13808 = vst [vmem:[#allocation90_spill] sm:$0xff] %v10741_v28  ;;  %v10745_v22 = vpop.eup %7304 }
 0x44d   : > { %13810 = vst [vmem:[#allocation47_spill] sm:$0xff] %v10745_v22  ;;  %v10756_v5 = vpop.eup %7306 }
 0x44e   : > { %3831 = vperm.xlu0 %7249, %v10730_v24   ;;  %13812 = vst [vmem:[#allocation83_spill] sm:$0xff] %v10756_v5 }
 0x44f   : > { %3786 = vperm.xlu1 %7248, %v10734_v30   ;;  %v13813_v30 = vld [vmem:[#allocation32_spill] sm:$0xff] }
 0x450   : > { %v3253_v24 = vsub.f32 %v13813_v30, %v10592_v7  ;;  %v3446_v7 = vmul.f32 1.442695, %v3270_v21  ;;  %v13819_v30 = vld [vmem:[#allocation48_spill] sm:$0xff]  ;;  %v3274_v21 = vsub.f32 %v13823_v38, %v10752_v18 }
 0x451   : > { %v3272_v9 = vsub.f32 %v13819_v30, %v10752_v18 }
 0x452   : > { %3837 = vperm.xlu0 %7249, %v10741_v28   ;;  %v10760_v28 = vpop.eup %7308  ;;  %v3412_v55 = vmul.f32 1.442695, %v3253_v24  ;;  %v13821_v24 = vld [vmem:[#allocation25_spill] sm:$0xff] }
 0x453   : > { %3792 = vperm.xlu1 %7248, %v10745_v22   ;;  %13814 = vst [vmem:[#allocation27_spill] sm:$0xff] %v10760_v28  ;;  %v10766_v22 = vpop.eup %7310  ;;  %v3257_v2 = vsub.f32 %v13821_v24, %v10666_v58  ;;  %v3450_v63 = vmul.f32 1.442695, %v3272_v9  ;;  %v3454_v24 = vmul.f32 1.442695, %v3274_v21 }
 0x454   : > { %13816 = vst [vmem:[#allocation105_spill] sm:$0xff] %v10766_v22  ;;  %v10770_v13 = vpop.eup %7312  ;;  %7328 = vpow2.f32 %v3412_v55  ;;  %v13825_v55 = vld [vmem:[#allocation107_spill] sm:$0xff] }
 0x455   : > { %13818 = vst [vmem:[#allocation108_spill] sm:$0xff] %v10770_v13  ;;  %v10776_v41 = vpop.eup %7314  ;;  %7330 = vpow2.f32 %v3446_v7  ;;  %v3420_v30 = vmul.f32 1.442695, %v3257_v2  ;;  %v3259_v45 = vsub.f32 %v13825_v55, %v10666_v58  ;;  %v13827_v7 = vld [vmem:[#allocation52_spill] sm:$0xff] }
 0x456   : > { %3843 = vperm.xlu0 %7249, %v10756_v5   ;;  %13820 = vst [vmem:[#allocation98_spill] sm:$0xff] %v10776_v41  ;;  %7332 = vpow2.f32 %v3416_v52  ;;  %v3276_v9 = vsub.f32 %v13827_v7, %v10752_v18  ;;  %v13829_v52 = vld [vmem:[#allocation113_spill] sm:$0xff] }
 0x457   : > { %3798 = vperm.xlu1 %7248, %v10760_v28   ;;  %v10780_v28 = vpop.eup %7316  ;;  %7334 = vpow2.f32 %v3450_v63  ;;  %v3424_v38 = vmul.f32 1.442695, %v3259_v45  ;;  %v3261_v2 = vsub.f32 %v13829_v52, %v10666_v58  ;;  %v13831_v63 = vld [vmem:[#allocation71_spill] sm:$0xff] }
 0x458   : > { %13822 = vst [vmem:[#allocation114_spill] sm:$0xff] %v10780_v28  ;;  %7336 = vpow2.f32 %v3420_v30  ;;  %v3458_v55 = vmul.f32 1.442695, %v3276_v9  ;;  %v3278_v21 = vsub.f32 %v13831_v63, %v10752_v18  ;;  %v13833_v30 = vld [vmem:[#allocation30_spill] sm:$0xff] }
 0x459   : > { %7338 = vpow2.f32 %v3454_v24  ;;  %v3428_v7 = vmul.f32 1.442695, %v3261_v2  ;;  %v3263_v45 = vsub.f32 %v13833_v30, %v10666_v58  ;;  %v3280_v24 = vsub.f32 %v10138_v47, %v10752_v18 }
 0x45a   : > { %3849 = vperm.xlu0 %7249, %v10766_v22   ;;  %7340 = vpow2.f32 %v3424_v38  ;;  %v3462_v52 = vmul.f32 1.442695, %v3278_v21  ;;  %v13836_v38 = vld [vmem:[#allocation122_spill] sm:$0xff]  ;;  %v13197_v30 = vsub.s32 4, %v13749_v46  ;;  %v13838_v21 = vld [vmem:[#allocation72_spill] sm:$0xff] }
 0x45b   : > { %3804 = vperm.xlu1 %7248, %v10770_v13   ;;  %v10786_v13 = vpop.eup %7318  ;;  %7342 = vpow2.f32 %v3458_v55  ;;  %v3432_v63 = vmul.f32 1.442695, %v3263_v45  ;;  %v3265_v2 = vsub.f32 %v13836_v38, %v10666_v58  ;;  %v3466_v55 = vmul.f32 1.442695, %v3280_v24  ;;  %v13840_v45 = vld [vmem:[#allocation53_spill] sm:$0xff] }
 0x45c   : > { %13824 = vst [vmem:[#allocation100_spill] sm:$0xff] %v10786_v13  ;;  %v10790_v22 = vpop.eup %7320  ;;  %7344 = vpow2.f32 %v3428_v7  ;;  %v3282_v47 = vsub.f32 %v13838_v21, %v10752_v18  ;;  %v3267_v38 = vsub.f32 %v13840_v45, %v10666_v58  ;;  %v13843_v45 = vld [vmem:[#allocation34_spill] sm:$0xff] }
 0x45d   : > { %13826 = vst [vmem:[#allocation118_spill] sm:$0xff] %v10790_v22  ;;  %7346 = vpow2.f32 %v3462_v52  ;;  %v3436_v7 = vmul.f32 1.442695, %v3265_v2  ;;  %v10838_v52 = vrot.slane %v10570_v40, %v13197_v30 }
 0x45e   : > { %3855 = vperm.xlu0 %7249, %v10776_v41   ;;  %7348 = vpow2.f32 %v3432_v63  ;;  %v3470_v24 = vmul.f32 1.442695, %v3282_v47  ;;  %v3284_v63 = vsub.f32 %v10264_v36, %v10752_v18  ;;  %v3440_v21 = vmul.f32 1.442695, %v3267_v38 }
 0x45f   : > { %3810 = vperm.xlu1 %7248, %v10780_v28   ;;  %v10796_v28 = vpop.eup %7322  ;;  %7350 = vpow2.f32 %v3466_v55  ;;  %v13845_v55 = vld [vmem:[#allocation116_spill] sm:$0xff] }
 0x460   : > { %13828 = vst [vmem:[#allocation111_spill] sm:$0xff] %v10796_v28  ;;  %v10800_v41 = vpop.eup %7324  ;;  %7352 = vpow2.f32 %v3436_v7  ;;  %v3474_v30 = vmul.f32 1.442695, %v3284_v63  ;;  %v3286_v47 = vsub.f32 %v13845_v55, %v10838_v52  ;;  %v13847_v7 = vld [vmem:[#allocation63_spill] sm:$0xff] }
 0x461   : > { %13830 = vst [vmem:[#allocation55_spill] sm:$0xff] %v10800_v41  ;;  %7354 = vpow2.f32 %v3470_v24  ;;  %v3271_v38 = vsub.f32 %v13847_v7, %v10752_v18  ;;  %v13849_v24 = vld [vmem:[#allocation117_spill] sm:$0xff] }
 0x462   : > { %3861 = vperm.xlu0 %7249, %v10786_v13   ;;  %7356 = vpow2.f32 %v3440_v21  ;;  %v3288_v63 = vsub.f32 %v13849_v24, %v10838_v52 }
 0x463   : > { %3816 = vperm.xlu1 %7248, %v10790_v22   ;;  %v10806_v22 = vpop.eup %7326  ;;  %7358 = vpow2.f32 %v3474_v30  ;;  %v3448_v55 = vmul.f32 1.442695, %v3271_v38  ;;  %v13853_v30 = vld [vmem:[#allocation123_spill] sm:$0xff] }
 0x464   : > { %13832 = vst [vmem:[#allocation29_spill] sm:$0xff] %v10806_v22  ;;  %v10810_v13 = vpop.eup %7328  ;;  %v3482_v7 = vmul.f32 1.442695, %v3288_v63 }
 0x465   : > { %13834 = vst [vmem:[#allocation103_spill] sm:$0xff] %v10810_v13  ;;  %v10816_v9 = vpop.eup %7330 }
 0x466   : > { %3867 = vperm.xlu0 %7249, %v10796_v28   ;;  %13835 = vst [vmem:[#allocation32_spill] sm:$0xff] %v10816_v9 }
 0x467   : > { %3822 = vperm.xlu1 %7248, %v10800_v41   ;;  %v10820_v41 = vpop.eup %7332 }
 0x468   : > { %13837 = vst [vmem:[#allocation46_spill] sm:$0xff] %v10820_v41 }
 0x46a   : > { %3873 = vperm.xlu0 %7249, %v10806_v22  }
 0x46b   : > { %3828 = vperm.xlu1 %7248, %v10810_v13   ;;  %v10827_v13 = vpop.eup %7334 }
 0x46c   : > { %13839 = vst [vmem:[#allocation91_spill] sm:$0xff] %v10827_v13  ;;  %v10831_v22 = vpop.eup %7336 }
 0x46d   : > { %13841 = vst [vmem:[#allocation48_spill] sm:$0xff] %v10831_v22  ;;  %v10842_v2 = vpop.eup %7338 }
 0x46e   : > { %3879 = vperm.xlu0 %7249, %v10816_v9   ;;  %13842 = vst [vmem:[#allocation25_spill] sm:$0xff] %v10842_v2 }
 0x46f   : > { %3834 = vperm.xlu1 %7248, %v10820_v41   ;;  %v3269_v41 = vsub.f32 %v13843_v45, %v10666_v58  ;;  %v3478_v58 = vmul.f32 1.442695, %v3286_v47  ;;  %v3290_v47 = vsub.f32 %v13853_v30, %v10838_v52 }
 0x471   : > { %v3444_v36 = vmul.f32 1.442695, %v3269_v41  ;;  %v13851_v41 = vld [vmem:[#allocation50_spill] sm:$0xff] }
 0x472   : > { %3885 = vperm.xlu0 %7249, %v10827_v13   ;;  %v10846_v13 = vpop.eup %7340  ;;  %v3273_v21 = vsub.f32 %v13851_v41, %v10752_v18  ;;  %v3486_v41 = vmul.f32 1.442695, %v3290_v47 }
 0x473   : > { %3840 = vperm.xlu1 %7248, %v10831_v22   ;;  %13844 = vst [vmem:[#allocation65_spill] sm:$0xff] %v10846_v13  ;;  %v10852_v22 = vpop.eup %7342  ;;  %7360 = vpow2.f32 %v3444_v36  ;;  %v13855_v36 = vld [vmem:[#allocation67_spill] sm:$0xff] }
 0x474   : > { %13846 = vst [vmem:[#allocation107_spill] sm:$0xff] %v10852_v22  ;;  %v10856_v9 = vpop.eup %7344  ;;  %7362 = vpow2.f32 %v3478_v58  ;;  %v3452_v24 = vmul.f32 1.442695, %v3273_v21  ;;  %v3275_v38 = vsub.f32 %v13855_v36, %v10752_v18  ;;  %v13857_v58 = vld [vmem:[#allocation36_spill] sm:$0xff] }
 0x475   : > { %13848 = vst [vmem:[#allocation52_spill] sm:$0xff] %v10856_v9  ;;  %v10862_v45 = vpop.eup %7346  ;;  %7364 = vpow2.f32 %v3448_v55  ;;  %v3292_v63 = vsub.f32 %v13857_v58, %v10838_v52  ;;  %v13859_v55 = vld [vmem:[#allocation54_spill] sm:$0xff] }
 0x476   : > { %3891 = vperm.xlu0 %7249, %v10842_v2   ;;  %13850 = vst [vmem:[#allocation113_spill] sm:$0xff] %v10862_v45  ;;  %7366 = vpow2.f32 %v3482_v7  ;;  %v3456_v30 = vmul.f32 1.442695, %v3275_v38  ;;  %v3277_v21 = vsub.f32 %v13859_v55, %v10752_v18  ;;  %v13861_v7 = vld [vmem:[#allocation38_spill] sm:$0xff] }
 0x477   : > { %3846 = vperm.xlu1 %7248, %v10846_v13   ;;  %v10866_v13 = vpop.eup %7348  ;;  %7368 = vpow2.f32 %v3452_v24  ;;  %v3490_v36 = vmul.f32 1.442695, %v3292_v63  ;;  %v3294_v47 = vsub.f32 %v13861_v7, %v10838_v52  ;;  %v13863_v24 = vld [vmem:[#allocation73_spill] sm:$0xff] }
 0x478   : > { %13852 = vst [vmem:[#allocation71_spill] sm:$0xff] %v10866_v13  ;;  %7370 = vpow2.f32 %v3486_v41  ;;  %v3460_v58 = vmul.f32 1.442695, %v3277_v21  ;;  %v3279_v38 = vsub.f32 %v13863_v24, %v10752_v18  ;;  %v13865_v41 = vld [vmem:[#allocation57_spill] sm:$0xff]  ;;  %v13212_v24 = vsub.s32 5, %v13749_v46 }
 0x479   : > { %7372 = vpow2.f32 %v3456_v30  ;;  %v3494_v55 = vmul.f32 1.442695, %v3294_v47  ;;  %v3296_v63 = vsub.f32 %v13865_v41, %v10838_v52  ;;  %v13867_v30 = vld [vmem:[#allocation99_spill] sm:$0xff]  ;;  %v13869_v47 = vld [vmem:[#allocation40_spill] sm:$0xff] }
 0x47a   : > { %3897 = vperm.xlu0 %7249, %v10852_v22   ;;  %7374 = vpow2.f32 %v3490_v36  ;;  %v3464_v7 = vmul.f32 1.442695, %v3279_v38  ;;  %v3281_v21 = vsub.f32 %v13867_v30, %v10752_v18  ;;  %v3298_v41 = vsub.f32 %v13869_v47, %v10838_v52  ;;  %v13871_v38 = vld [vmem:[#allocation77_spill] sm:$0xff] }
 0x47b   : > { %3852 = vperm.xlu1 %7248, %v10856_v9   ;;  %v10872_v9 = vpop.eup %7350  ;;  %7376 = vpow2.f32 %v3460_v58  ;;  %v3498_v36 = vmul.f32 1.442695, %v3296_v63  ;;  %v3283_v30 = vsub.f32 %v13871_v38, %v10752_v18  ;;  %v3285_v38 = vsub.f32 %v10293_v42, %v10752_v18 }
 0x47c   : > { %13854 = vst [vmem:[#allocation30_spill] sm:$0xff] %v10872_v9  ;;  %v10876_v22 = vpop.eup %7352  ;;  %7378 = vpow2.f32 %v3494_v55  ;;  %v3468_v58 = vmul.f32 1.442695, %v3281_v21  ;;  %v10924_v55 = vrot.slane %v10570_v40, %v13212_v24  ;;  %v3502_v63 = vmul.f32 1.442695, %v3298_v41 }
 0x47d   : > { %13856 = vst [vmem:[#allocation122_spill] sm:$0xff] %v10876_v22  ;;  %7380 = vpow2.f32 %v3464_v7  ;;  %v3300_v7 = vsub.f32 %v10229_v0, %v10838_v52  ;;  %v3472_v47 = vmul.f32 1.442695, %v3283_v30  ;;  %v13877_v30 = vld [vmem:[#allocation33_spill] sm:$0xff] }
 0x47e   : > { %3903 = vperm.xlu0 %7249, %v10862_v45   ;;  %7382 = vpow2.f32 %v3498_v36  ;;  %v13875_v36 = vld [vmem:[#allocation79_spill] sm:$0xff]  ;;  %v3287_v42 = vsub.f32 %v13877_v30, %v10838_v52  ;;  %v13881_v30 = vld [vmem:[#allocation120_spill] sm:$0xff] }
 0x47f   : > { %3858 = vperm.xlu1 %7248, %v10866_v13   ;;  %v10882_v13 = vpop.eup %7354  ;;  %7384 = vpow2.f32 %v3468_v58  ;;  %v3506_v24 = vmul.f32 1.442695, %v3300_v7  ;;  %v3302_v41 = vsub.f32 %v13875_v36, %v10924_v55  ;;  %v3476_v58 = vmul.f32 1.442695, %v3285_v38  ;;  %v13879_v7 = vld [vmem:[#allocation66_spill] sm:$0xff] }
 0x480   : > { %13858 = vst [vmem:[#allocation72_spill] sm:$0xff] %v10882_v13  ;;  %v10886_v45 = vpop.eup %7356  ;;  %7386 = vpow2.f32 %v3502_v63  ;;  %v3304_v36 = vsub.f32 %v13879_v7, %v10924_v55  ;;  %v3480_v38 = vmul.f32 1.442695, %v3287_v42 }
 0x481   : > { %13860 = vst [vmem:[#allocation53_spill] sm:$0xff] %v10886_v45  ;;  %7388 = vpow2.f32 %v3472_v47  ;;  %v3510_v63 = vmul.f32 1.442695, %v3302_v41  ;;  %v3306_v41 = vsub.f32 %v10211_v57, %v10924_v55  ;;  %v3308_v57 = vsub.f32 %v10268_v32, %v10924_v55 }
 0x482   : > { %3909 = vperm.xlu0 %7249, %v10872_v9   ;;  %v3310_v32 = vsub.f32 %v10307_v14, %v10924_v55  ;;  %v3312_v14 = vsub.f32 %v10376_v34, %v10924_v55 }
 0x483   : > { %3864 = vperm.xlu1 %7248, %v10876_v22   ;;  %v10892_v22 = vpop.eup %7358  ;;  %7390 = vpow2.f32 %v3506_v24  ;;  %v3514_v24 = vmul.f32 1.442695, %v3304_v36 }
 0x484   : > { %13862 = vst [vmem:[#allocation34_spill] sm:$0xff] %v10892_v22  ;;  %v10896_v9 = vpop.eup %7360  ;;  %7392 = vpow2.f32 %v3476_v58  ;;  %v3530_v34 = vmul.f32 1.442695, %v3312_v14 }
 0x485   : > { %13864 = vst [vmem:[#allocation116_spill] sm:$0xff] %v10896_v9 }
 0x486   : > { %3915 = vperm.xlu0 %7249, %v10882_v13  }
 0x487   : > { %3870 = vperm.xlu1 %7248, %v10886_v45   ;;  %v10902_v45 = vpop.eup %7362  ;;  %7394 = vpow2.f32 %v3510_v63  ;;  %v3518_v63 = vmul.f32 1.442695, %v3306_v41 }
 0x488   : > { %13866 = vst [vmem:[#allocation63_spill] sm:$0xff] %v10902_v45  ;;  %v10906_v13 = vpop.eup %7364  ;;  %7396 = vpow2.f32 %v3480_v38 }
 0x489   : > { %13868 = vst [vmem:[#allocation117_spill] sm:$0xff] %v10906_v13 }
 0x48a   : > { %3921 = vperm.xlu0 %7249, %v10892_v22  }
 0x48b   : > { %3876 = vperm.xlu1 %7248, %v10896_v9   ;;  %v10913_v9 = vpop.eup %7366  ;;  %7398 = vpow2.f32 %v3514_v24  ;;  %v3522_v24 = vmul.f32 1.442695, %v3308_v57 }
 0x48c   : > { %13870 = vst [vmem:[#allocation50_spill] sm:$0xff] %v10913_v9  ;;  %v10917_v22 = vpop.eup %7368 }
 0x48d   : > { %13872 = vst [vmem:[#allocation123_spill] sm:$0xff] %v10917_v22  ;;  %v10928_v21 = vpop.eup %7370 }
 0x48e   : > { %3927 = vperm.xlu0 %7249, %v10902_v45   ;;  %13873 = vst [vmem:[#allocation67_spill] sm:$0xff] %v10928_v21 }
 0x48f   : > { %3882 = vperm.xlu1 %7248, %v10906_v13   ;;  %v10932_v13 = vpop.eup %7372 }
 0x490   : > { %13874 = vst [vmem:[#allocation36_spill] sm:$0xff] %v10932_v13 }
 0x492   : > { %3933 = vperm.xlu0 %7249, %v10913_v9  }
 0x493   : > { %3888 = vperm.xlu1 %7248, %v10917_v22   ;;  %v10938_v22 = vpop.eup %7374 }
 0x494   : > { %13876 = vst [vmem:[#allocation54_spill] sm:$0xff] %v10938_v22  ;;  %v10944_v18 = vpop.eup %7376 }
 0x495   : > { %13878 = vst [vmem:[#allocation38_spill] sm:$0xff] %v10944_v18 }
 0x496   : > { %3939 = vperm.xlu0 %7249, %v10928_v21   ;;  %v3289_v21 = vsub.f32 %v13881_v30, %v10838_v52  ;;  %v13885_v30 = vld [vmem:[#allocation35_spill] sm:$0xff] }
 0x497   : > { %3894 = vperm.xlu1 %7248, %v10932_v13   ;;  %v10952_v13 = vpop.eup %7378 }
 0x498   : > { %13880 = vst [vmem:[#allocation73_spill] sm:$0xff] %v10952_v13  ;;  %v10958_v45 = vpop.eup %7380  ;;  %v3484_v42 = vmul.f32 1.442695, %v3289_v21 }
 0x499   : > { %v10940_v0 = vpop.permute.xlu0 %3738  ;;  %13882 = vst [vmem:[#allocation57_spill] sm:$0xff] %v10958_v45  ;;  %v10966_v7 = vpop.eup %7382 }
 0x49a   : > { %v10946_v9 = vpop.permute.xlu1 %3735  ;;  %3945 = vperm.xlu0 %7249, %v10938_v22   ;;  %13883 = vst [vmem:[#allocation99_spill] sm:$0xff] %v10966_v7  ;;  %v10972_v22 = vpop.eup %7384  ;;  %7400 = vpow2.f32 %v3484_v42 }
 0x49b   : > { %3900 = vperm.xlu1 %7248, %v10944_v18   ;;  %v3291_v18 = vsub.f32 %v13885_v30, %v10838_v52  ;;  %13886 = vst [vmem:[#allocation77_spill] sm:$0xff] %v10972_v22  ;;  %v10980_v36 = vpop.eup %7386  ;;  %v13889_v30 = vld [vmem:[#allocation37_spill] sm:$0xff]  ;;  %7402 = vpow2.f32 %v3518_v63  ;;  %v3526_v63 = vmul.f32 1.442695, %v3310_v32  ;;  %v3314_v32 = vsub.f32 %v10420_v62, %v10924_v55 }
 0x49c   : > { %13887 = vst [vmem:[#allocation79_spill] sm:$0xff] %v10980_v36 }
 0x49d   : > { %v10954_v47 = vpop.permute.xlu0 %3765  ;;  %v3488_v21 = vmul.f32 1.442695, %v3291_v18 }
 0x49e   : > { %v10960_v2 = vpop.permute.xlu1 %3741  ;;  %3951 = vperm.xlu0 %7249, %v10952_v13   ;;  %v10986_v13 = vpop.eup %7388 }
 0x49f   : > { %3906 = vperm.xlu1 %7248, %v10958_v45   ;;  %v3293_v45 = vsub.f32 %v13889_v30, %v10838_v52  ;;  %13890 = vst [vmem:[#allocation66_spill] sm:$0xff] %v10986_v13  ;;  %v10994_v41 = vpop.eup %7390  ;;  %7404 = vpow2.f32 %v3488_v21  ;;  %v13892_v30 = vld [vmem:[#allocation39_spill] sm:$0xff] }
 0x4a0   : > { %13891 = vst [vmem:[#allocation120_spill] sm:$0xff] %v10994_v41  ;;  %7406 = vpow2.f32 %v3522_v24  ;;  %v13238_v24 = vsub.s32 6, %v13749_v46 }
 0x4a1   : > { %v10968_v58 = vpop.permute.xlu0 %3771  ;;  %v3492_v18 = vmul.f32 1.442695, %v3293_v45 }
 0x4a2   : > { %13884 = vst [vmem:[#allocation40_spill] sm:$0xff] %v10968_v58  ;;  %v10974_v28 = vpop.permute.xlu1 %3744  ;;  %3957 = vperm.xlu0 %7249, %v10966_v7   ;;  %v11000_v7 = vpop.eup %7392  ;;  %v11038_v62 = vrot.slane %v10570_v40, %v13238_v24 }
 0x4a3   : > { %3912 = vperm.xlu1 %7248, %v10972_v22   ;;  %v3295_v22 = vsub.f32 %v13892_v30, %v10838_v52  ;;  %13893 = vst [vmem:[#allocation35_spill] sm:$0xff] %v11000_v7  ;;  %v11008_v57 = vpop.eup %7394  ;;  %7408 = vpow2.f32 %v3492_v18  ;;  %v13895_v30 = vld [vmem:[#allocation59_spill] sm:$0xff] }
 0x4a4   : > { %13894 = vst [vmem:[#allocation37_spill] sm:$0xff] %v11008_v57  ;;  %7410 = vpow2.f32 %v3526_v63  ;;  %v3534_v63 = vmul.f32 1.442695, %v3314_v32 }
 0x4a5   : > { %v10982_v38 = vpop.permute.xlu0 %3777  ;;  %v3496_v45 = vmul.f32 1.442695, %v3295_v22 }
 0x4a6   : > { %13888 = vst [vmem:[#allocation33_spill] sm:$0xff] %v10982_v38  ;;  %v10988_v5 = vpop.permute.xlu1 %3747  ;;  %3963 = vperm.xlu0 %7249, %v10980_v36   ;;  %v11014_v36 = vpop.eup %7396 }
 0x4a7   : > { %3918 = vperm.xlu1 %7248, %v10986_v13   ;;  %v3297_v13 = vsub.f32 %v13895_v30, %v10838_v52  ;;  %13896 = vst [vmem:[#allocation39_spill] sm:$0xff] %v11014_v36  ;;  %v11023_v18 = vpop.eup %7398  ;;  %7412 = vpow2.f32 %v3496_v45 }
 0x4a8   : > { %13897 = vst [vmem:[#allocation59_spill] sm:$0xff] %v11023_v18  ;;  %v11029_v1 = vpop.eup %7400  ;;  %7414 = vpow2.f32 %v3530_v34 }
 0x4a9   : > { %v10996_v42 = vpop.permute.xlu0 %3783  ;;  %v3500_v30 = vmul.f32 1.442695, %v3297_v13  ;;  %v3316_v13 = vsub.f32 %v10459_v61, %v10924_v55  ;;  %v11042_v14 = vpop.eup %7402  ;;  %v13902_v61 = vld [vmem:[#allocation44_spill] sm:$0xff] }
 0x4aa   : > { %v11002_v39 = vpop.permute.xlu1 %3750  ;;  %3969 = vperm.xlu0 %7249, %v10994_v41   ;;  %13900 = vst [vmem:[#allocation131_spill] sm:$0xff] %v11042_v14  ;;  %v3318_v32 = vsub.f32 %v13902_v61, %v11038_v62 }
 0x4ab   : > { %3924 = vperm.xlu1 %7248, %v11000_v7   ;;  %v13898_v7 = vld [vmem:[#allocation42_spill] sm:$0xff]  ;;  %7416 = vpow2.f32 %v3500_v30  ;;  %v3538_v34 = vmul.f32 1.442695, %v3316_v13 }
 0x4ac   : > { %v3299_v41 = vsub.f32 %v13898_v7, %v10838_v52  ;;  %13899 = vst [vmem:[#allocation42_spill] sm:$0xff] %v11029_v1  ;;  %7418 = vpow2.f32 %v3534_v63  ;;  %v3542_v63 = vmul.f32 1.442695, %v3318_v32  ;;  %v13906_v13 = vld [vmem:[#allocation126_spill] sm:$0xff]  ;;  %v3322_v32 = vsub.f32 %v10289_v50, %v11038_v62 }
 0x4ad   : > { %v11010_v21 = vpop.permute.xlu0 %3789  ;;  %v3320_v61 = vsub.f32 %v13906_v13, %v11038_v62  ;;  %v3324_v50 = vsub.f32 %v10328_v17, %v11038_v62  ;;  %v3326_v17 = vsub.f32 %v10363_v6, %v11038_v62  ;;  %v3328_v6 = vsub.f32 %v10397_v20, %v11038_v62 }
 0x4ae   : > { %v11016_v27 = vpop.permute.xlu1 %3753  ;;  %3975 = vperm.xlu0 %7249, %v11008_v57   ;;  %v3504_v45 = vmul.f32 1.442695, %v3299_v41 }
 0x4af   : > { %3930 = vperm.xlu1 %7248, %v11014_v36   ;;  %v3301_v36 = vsub.f32 %v10225_v12, %v10838_v52  ;;  %v13904_v12 = vld [vmem:[#allocation60_spill] sm:$0xff]  ;;  %v3562_v20 = vmul.f32 1.442695, %v3328_v6  ;;  %v3332_v6 = vsub.f32 %v10478_v35, %v11038_v62 }
 0x4b0   : > { %7420 = vpow2.f32 %v3504_v45  ;;  %v3303_v52 = vsub.f32 %v13904_v12, %v10924_v55  ;;  %v13909_v12 = vld [vmem:[#allocation124_spill] sm:$0xff] }
 0x4b1   : > { %v11025_v22 = vpop.permute.xlu0 %3795  ;;  %v3508_v41 = vmul.f32 1.442695, %v3301_v36  ;;  %7422 = vpow2.f32 %v3538_v34  ;;  %v3546_v34 = vmul.f32 1.442695, %v3320_v61 }
 0x4b2   : > { %v11031_v57 = vpop.permute.xlu1 %3756  ;;  %3981 = vperm.xlu0 %7249, %v11023_v18   ;;  %v3512_v36 = vmul.f32 1.442695, %v3303_v52 }
 0x4b3   : > { %3936 = vperm.xlu1 %7248, %v11029_v1   ;;  %v11048_v1 = vpop.eup %7404  ;;  %7424 = vpow2.f32 %v3508_v41 }
 0x4b4   : > { %13901 = vst [vmem:[#allocation132_spill] sm:$0xff] %v11048_v1  ;;  %v11056_v24 = vpop.eup %7406  ;;  %7426 = vpow2.f32 %v3542_v63  ;;  %v3550_v63 = vmul.f32 1.442695, %v3322_v32 }
 0x4b5   : > { %v11044_v7 = vpop.permute.xlu0 %3801  ;;  %13903 = vst [vmem:[#allocation44_spill] sm:$0xff] %v11056_v24  ;;  %v11062_v38 = vpop.eup %7408  ;;  %7428 = vpow2.f32 %v3512_v36 }
 0x4b6   : > { %v11050_v18 = vpop.permute.xlu1 %3759  ;;  %3987 = vperm.xlu0 %7249, %v11042_v14   ;;  %13905 = vst [vmem:[#allocation60_spill] sm:$0xff] %v11062_v38  ;;  %v3305_v14 = vsub.f32 %v13909_v12, %v10924_v55  ;;  %v13913_v12 = vld [vmem:[#allocation125_spill] sm:$0xff]  ;;  %7430 = vpow2.f32 %v3546_v34  ;;  %v3554_v34 = vmul.f32 1.442695, %v3324_v50 }
 0x4b7   : > { %3942 = vperm.xlu1 %7248, %v11048_v1   ;;  %v11070_v1 = vpop.eup %7410 }
 0x4b8   : > { %13907 = vst [vmem:[#allocation126_spill] sm:$0xff] %v11070_v1  ;;  %v11076_v33 = vpop.eup %7412  ;;  %v3516_v52 = vmul.f32 1.442695, %v3305_v14 }
 0x4b9   : > { %v11058_v30 = vpop.permute.xlu0 %3807  ;;  %13910 = vst [vmem:[#allocation124_spill] sm:$0xff] %v11076_v33  ;;  %v11084_v13 = vpop.eup %7414 }
 0x4ba   : > { %v11064_v31 = vpop.permute.xlu1 %3762  ;;  %3993 = vperm.xlu0 %7249, %v11056_v24   ;;  %13911 = vst [vmem:[#allocation134_spill] sm:$0xff] %v11084_v13  ;;  %v11090_v24 = vpop.eup %7416  ;;  %7432 = vpow2.f32 %v3516_v52 }
 0x4bb   : > { %3948 = vperm.xlu1 %7248, %v11062_v38   ;;  %v3307_v38 = vsub.f32 %v13913_v12, %v10924_v55  ;;  %13914 = vst [vmem:[#allocation125_spill] sm:$0xff] %v11090_v24  ;;  %v11098_v61 = vpop.eup %7418  ;;  %v13917_v12 = vld [vmem:[#allocation88_spill] sm:$0xff]  ;;  %7434 = vpow2.f32 %v3550_v63  ;;  %v3558_v63 = vmul.f32 1.442695, %v3326_v17  ;;  %v3330_v17 = vsub.f32 %v10441_v59, %v11038_v62 }
 0x4bc   : > { %13915 = vst [vmem:[#allocation136_spill] sm:$0xff] %v11098_v61 }
 0x4bd   : > { %v11072_v45 = vpop.permute.xlu0 %3813  ;;  %v3520_v14 = vmul.f32 1.442695, %v3307_v38 }
 0x4be   : > { %13908 = vst [vmem:[#allocation133_spill] sm:$0xff] %v11072_v45  ;;  %v11078_v58 = vpop.permute.xlu1 %3768  ;;  %3999 = vperm.xlu0 %7249, %v11070_v1   ;;  %v11104_v1 = vpop.eup %7420 }
 0x4bf   : > { %3954 = vperm.xlu1 %7248, %v11076_v33   ;;  %v3309_v33 = vsub.f32 %v13917_v12, %v10924_v55  ;;  %13918 = vst [vmem:[#allocation88_spill] sm:$0xff] %v11104_v1  ;;  %v11112_v32 = vpop.eup %7422  ;;  %7436 = vpow2.f32 %v3520_v14  ;;  %v3311_v12 = vsub.f32 %v10334_v10, %v10924_v55  ;;  %v3313_v10 = vsub.f32 %v10406_v19, %v10924_v55 }
 0x4c0   : > { %13920 = vst [vmem:[#allocation139_spill] sm:$0xff] %v11112_v32  ;;  %7438 = vpow2.f32 %v3554_v34  ;;  %v13259_v34 = vsub.s32 7, %v13749_v46 }
 0x4c1   : > { %v11086_v41 = vpop.permute.xlu0 %3819  ;;  %v3524_v38 = vmul.f32 1.442695, %v3309_v33  ;;  %v3528_v33 = vmul.f32 1.442695, %v3311_v12  ;;  %v3532_v19 = vmul.f32 1.442695, %v3313_v10 }
 0x4c2   : > { %13912 = vst [vmem:[#allocation135_spill] sm:$0xff] %v11086_v41  ;;  %v11092_v45 = vpop.permute.xlu1 %3774  ;;  %4005 = vperm.xlu0 %7249, %v11084_v13   ;;  %v11156_v59 = vrot.slane %v10570_v40, %v13259_v34  ;;  %v3570_v40 = vmul.f32 1.442695, %v3332_v6 }
 0x4c3   : > { %3960 = vperm.xlu1 %7248, %v11090_v24   ;;  %v11118_v24 = vpop.eup %7424  ;;  %7440 = vpow2.f32 %v3524_v38 }
 0x4c4   : > { %13921 = vst [vmem:[#allocation140_spill] sm:$0xff] %v11118_v24  ;;  %v11126_v50 = vpop.eup %7426  ;;  %7442 = vpow2.f32 %v3558_v63  ;;  %v3566_v63 = vmul.f32 1.442695, %v3330_v17  ;;  %v3334_v35 = vsub.f32 %v10310_v29, %v11156_v59  ;;  %v13931_v29 = vld [vmem:[#allocation129_spill] sm:$0xff] }
 0x4c5   : > { %v11100_v36 = vpop.permute.xlu0 %3825  ;;  %13922 = vst [vmem:[#allocation141_spill] sm:$0xff] %v11126_v50  ;;  %7444 = vpow2.f32 %v3528_v33  ;;  %v3336_v6 = vsub.f32 %v13931_v29, %v11156_v59 }
 0x4c6   : > { %13916 = vst [vmem:[#allocation137_spill] sm:$0xff] %v11100_v36  ;;  %v11106_v41 = vpop.permute.xlu1 %3780  ;;  %4011 = vperm.xlu0 %7249, %v11098_v61   ;;  %7446 = vpow2.f32 %v3562_v20 }
 0x4c7   : > { %13919 = vst [vmem:[#allocation138_spill] sm:$0xff] %v11106_v41  ;;  %3966 = vperm.xlu1 %7248, %v11104_v1   ;;  %v11132_v1 = vpop.eup %7428  ;;  %7448 = vpow2.f32 %v3532_v19 }
 0x4c8   : > { %13923 = vst [vmem:[#allocation142_spill] sm:$0xff] %v11132_v1  ;;  %v11141_v38 = vpop.eup %7430  ;;  %7450 = vpow2.f32 %v3566_v63  ;;  %v3574_v63 = vmul.f32 1.442695, %v3334_v35  ;;  %v3338_v35 = vsub.f32 %v10380_v56, %v11156_v59  ;;  %v3340_v56 = vsub.f32 %v10416_v43, %v11156_v59 }
 0x4c9   : > { %v11114_v52 = vpop.permute.xlu0 %3831  ;;  %13924 = vst [vmem:[#allocation143_spill] sm:$0xff] %v11141_v38  ;;  %v3342_v43 = vsub.f32 %v10453_v26, %v11156_v59  ;;  %v3344_v26 = vsub.f32 %v10488_v23, %v11156_v59  ;;  %v3346_v23 = vsub.f32 %v10519_v44, %v11156_v59  ;;  %v3348_v44 = vsub.f32 %v10549_v4, %v11156_v59 }
 0x4ca   : > { %v11120_v13 = vpop.permute.xlu1 %3786  ;;  %4017 = vperm.xlu0 %7249, %v11112_v32   ;;  %v11147_v32 = vpop.eup %7432 }
 0x4cb   : > { %3972 = vperm.xlu1 %7248, %v11118_v24   ;;  %v3315_v24 = vsub.f32 %v10449_v25, %v10924_v55  ;;  %13925 = vst [vmem:[#allocation144_spill] sm:$0xff] %v11147_v32  ;;  %v11160_v33 = vpop.eup %7434 }
 0x4cc   : > { %13926 = vst [vmem:[#allocation145_spill] sm:$0xff] %v11160_v33 }
 0x4cd   : > { %v11128_v14 = vpop.permute.xlu0 %3837  ;;  %v3536_v10 = vmul.f32 1.442695, %v3315_v24 }
 0x4ce   : > { %v11134_v61 = vpop.permute.xlu1 %3792  ;;  %4023 = vperm.xlu0 %7249, %v11126_v50  }
 0x4cf   : > { %3978 = vperm.xlu1 %7248, %v11132_v1   ;;  %v3317_v1 = vsub.f32 %v10493_v11, %v10924_v55  ;;  %7452 = vpow2.f32 %v3536_v10  ;;  %v13929_v11 = vld [vmem:[#allocation61_spill] sm:$0xff] }
 0x4d0   : > { %v3319_v55 = vsub.f32 %v13929_v11, %v11038_v62  ;;  %7454 = vpow2.f32 %v3570_v40  ;;  %v13933_v11 = vld [vmem:[#allocation82_spill] sm:$0xff]  ;;  %v3578_v40 = vmul.f32 1.442695, %v3336_v6 }
 0x4d1   : > { %v11143_v12 = vpop.permute.xlu0 %3843  ;;  %v3540_v24 = vmul.f32 1.442695, %v3317_v1 }
 0x4d2   : > { %v11149_v50 = vpop.permute.xlu1 %3798  ;;  %4029 = vperm.xlu0 %7249, %v11141_v38   ;;  %v3544_v1 = vmul.f32 1.442695, %v3319_v55 }
 0x4d3   : > { %3984 = vperm.xlu1 %7248, %v11147_v32   ;;  %v11166_v32 = vpop.eup %7436  ;;  %7456 = vpow2.f32 %v3540_v24 }
 0x4d4   : > { %13927 = vst [vmem:[#allocation146_spill] sm:$0xff] %v11166_v32  ;;  %v11174_v20 = vpop.eup %7438  ;;  %7458 = vpow2.f32 %v3574_v63  ;;  %v3582_v63 = vmul.f32 1.442695, %v3338_v35 }
 0x4d5   : > { %v11162_v25 = vpop.permute.xlu0 %3849  ;;  %13928 = vst [vmem:[#allocation147_spill] sm:$0xff] %v11174_v20  ;;  %v11180_v19 = vpop.eup %7440  ;;  %7460 = vpow2.f32 %v3544_v1 }
 0x4d6   : > { %v11168_v38 = vpop.permute.xlu1 %3804  ;;  %4035 = vperm.xlu0 %7249, %v11160_v33   ;;  %13930 = vst [vmem:[#allocation61_spill] sm:$0xff] %v11180_v19  ;;  %v3321_v33 = vsub.f32 %v13933_v11, %v11038_v62  ;;  %v13936_v11 = vld [vmem:[#allocation127_spill] sm:$0xff]  ;;  %7462 = vpow2.f32 %v3578_v40  ;;  %v3586_v40 = vmul.f32 1.442695, %v3340_v56 }
 0x4d7   : > { %3990 = vperm.xlu1 %7248, %v11166_v32   ;;  %v11188_v32 = vpop.eup %7442 }
 0x4d8   : > { %13932 = vst [vmem:[#allocation129_spill] sm:$0xff] %v11188_v32  ;;  %v11194_v46 = vpop.eup %7444  ;;  %v3548_v55 = vmul.f32 1.442695, %v3321_v33 }
 0x4d9   : > { %v11176_v17 = vpop.permute.xlu0 %3855  ;;  %13934 = vst [vmem:[#allocation82_spill] sm:$0xff] %v11194_v46  ;;  %v11202_v29 = vpop.eup %7446 }
 0x4da   : > { %v11182_v34 = vpop.permute.xlu1 %3810  ;;  %4041 = vperm.xlu0 %7249, %v11174_v20   ;;  %13935 = vst [vmem:[#allocation148_spill] sm:$0xff] %v11202_v29  ;;  %v11208_v20 = vpop.eup %7448  ;;  %7464 = vpow2.f32 %v3548_v55 }
 0x4db   : > { %3996 = vperm.xlu1 %7248, %v11180_v19   ;;  %v3323_v19 = vsub.f32 %v13936_v11, %v11038_v62  ;;  %13937 = vst [vmem:[#allocation127_spill] sm:$0xff] %v11208_v20  ;;  %v11216_v6 = vpop.eup %7450  ;;  %v3325_v11 = vsub.f32 %v10353_v37, %v11038_v62  ;;  %7466 = vpow2.f32 %v3582_v63  ;;  %v3327_v37 = vsub.f32 %v10387_v60, %v11038_v62 }
 0x4dc   : > { %13938 = vst [vmem:[#allocation149_spill] sm:$0xff] %v11216_v6  ;;  %v3590_v63 = vmul.f32 1.442695, %v3342_v43  ;;  %v3329_v60 = vsub.f32 %v10431_v48, %v11038_v62  ;;  %v3331_v48 = vsub.f32 %v10470_v3, %v11038_v62  ;;  %v3333_v3 = vsub.f32 %v10505_v51, %v11038_v62 }
 0x4dd   : > { %v11190_v10 = vpop.permute.xlu0 %3861  ;;  %v3552_v33 = vmul.f32 1.442695, %v3323_v19  ;;  %v3556_v19 = vmul.f32 1.442695, %v3325_v11  ;;  %v3560_v11 = vmul.f32 1.442695, %v3327_v37 }
 0x4de   : > { %v11196_v36 = vpop.permute.xlu1 %3816  ;;  %4047 = vperm.xlu0 %7249, %v11188_v32   ;;  %v3564_v37 = vmul.f32 1.442695, %v3329_v60  ;;  %v3568_v60 = vmul.f32 1.442695, %v3331_v48  ;;  %v13950_v48 = vld [vmem:[#allocation128_spill] sm:$0xff] }
 0x4df   : > { %4002 = vperm.xlu1 %7248, %v11194_v46   ;;  %v11222_v46 = vpop.eup %7452  ;;  %7468 = vpow2.f32 %v3552_v33 }
 0x4e0   : > { %13940 = vst [vmem:[#allocation151_spill] sm:$0xff] %v11222_v46  ;;  %v11230_v35 = vpop.eup %7454  ;;  %7470 = vpow2.f32 %v3586_v40  ;;  %v3594_v40 = vmul.f32 1.442695, %v3344_v26 }
 0x4e1   : > { %v11204_v24 = vpop.permute.xlu0 %3867  ;;  %13941 = vst [vmem:[#allocation152_spill] sm:$0xff] %v11230_v35  ;;  %7472 = vpow2.f32 %v3556_v19 }
 0x4e2   : > { %v11210_v41 = vpop.permute.xlu1 %3822  ;;  %4053 = vperm.xlu0 %7249, %v11202_v29   ;;  %v11236_v29 = vpop.eup %7456  ;;  %7474 = vpow2.f32 %v3590_v63  ;;  %v3598_v63 = vmul.f32 1.442695, %v3346_v23 }
 0x4e3   : > { %4008 = vperm.xlu1 %7248, %v11208_v20   ;;  %13942 = vst [vmem:[#allocation153_spill] sm:$0xff] %v11236_v29  ;;  %v11244_v56 = vpop.eup %7458  ;;  %7476 = vpow2.f32 %v3560_v11 }
 0x4e4   : > { %13943 = vst [vmem:[#allocation154_spill] sm:$0xff] %v11244_v56  ;;  %7478 = vpow2.f32 %v3594_v40  ;;  %v3602_v40 = vmul.f32 1.442695, %v3348_v44 }
 0x4e5   : > { %v11218_v1 = vpop.permute.xlu0 %3873  ;;  %7480 = vpow2.f32 %v3564_v37  ;;  %v3572_v37 = vmul.f32 1.442695, %v3333_v3 }
 0x4e6   : > { %13939 = vst [vmem:[#allocation150_spill] sm:$0xff] %v11218_v1  ;;  %v11224_v32 = vpop.permute.xlu1 %3828  ;;  %4059 = vperm.xlu0 %7249, %v11216_v6   ;;  %v11250_v6 = vpop.eup %7460  ;;  %7482 = vpow2.f32 %v3598_v63  ;;  %v14018_v1 = vld [vmem:[#allocation74_spill] sm:$0xff] }
 0x4e7   : > { %4014 = vperm.xlu1 %7248, %v11222_v46   ;;  %13944 = vst [vmem:[#allocation155_spill] sm:$0xff] %v11250_v6  ;;  %v11258_v43 = vpop.eup %7462  ;;  %7484 = vpow2.f32 %v3568_v60  ;;  %v3337_v60 = vsub.f32 %v10356_v49, %v11156_v59 }
 0x4e8   : > { %13945 = vst [vmem:[#allocation156_spill] sm:$0xff] %v11258_v43  ;;  %7486 = vpow2.f32 %v3602_v40 }
 0x4e9   : > { %v11232_v55 = vpop.permute.xlu0 %3879  ;;  %7488 = vpow2.f32 %v3572_v37 }
 0x4ea   : > { %v11238_v20 = vpop.permute.xlu1 %3834  ;;  %4065 = vperm.xlu0 %7249, %v11230_v35   ;;  %v11264_v35 = vpop.eup %7464 }
 0x4eb   : > { %4020 = vperm.xlu1 %7248, %v11236_v29   ;;  %13946 = vst [vmem:[#allocation157_spill] sm:$0xff] %v11264_v35  ;;  %v11272_v26 = vpop.eup %7466 }
 0x4ec   : > { %13947 = vst [vmem:[#allocation158_spill] sm:$0xff] %v11272_v26 }
 0x4ed   : > { %v11246_v33 = vpop.permute.xlu0 %3885 }
 0x4ee   : > { %v11252_v46 = vpop.permute.xlu1 %3840  ;;  %4071 = vperm.xlu0 %7249, %v11244_v56   ;;  %v11278_v56 = vpop.eup %7468 }
 0x4ef   : > { %4026 = vperm.xlu1 %7248, %v11250_v6   ;;  %13948 = vst [vmem:[#allocation159_spill] sm:$0xff] %v11278_v56  ;;  %v11284_v4 = vpop.eup %7470 }
 0x4f0   : > { %13949 = vst [vmem:[#allocation160_spill] sm:$0xff] %v11284_v4  ;;  %v11290_v51 = vpop.eup %7472 }
 0x4f1   : > { %v11260_v19 = vpop.permute.xlu0 %3891  ;;  %13951 = vst [vmem:[#allocation128_spill] sm:$0xff] %v11290_v51  ;;  %v11296_v63 = vpop.eup %7474 }
 0x4f2   : > { %v11266_v29 = vpop.permute.xlu1 %3846  ;;  %4077 = vperm.xlu0 %7249, %v11258_v43   ;;  %v3335_v43 = vsub.f32 %v13950_v48, %v11156_v59  ;;  %13952 = vst [vmem:[#allocation161_spill] sm:$0xff] %v11296_v63  ;;  %v11302_v3 = vpop.eup %7476 }
 0x4f3   : > { %4032 = vperm.xlu1 %7248, %v11264_v35   ;;  %13954 = vst [vmem:[#allocation163_spill] sm:$0xff] %v11302_v3  ;;  %v3580_v35 = vmul.f32 1.442695, %v3337_v60 }
 0x4f5   : > { %v11274_v11 = vpop.permute.xlu0 %3897 }
 0x4f6   : > { %v11280_v6 = vpop.permute.xlu1 %3852  ;;  %4083 = vperm.xlu0 %7249, %v11272_v26   ;;  %v3576_v26 = vmul.f32 1.442695, %v3335_v43  ;;  %v3339_v43 = vsub.f32 %v10390_v53, %v11156_v59 }
 0x4f7   : > { %4038 = vperm.xlu1 %7248, %v11278_v56  }
 0x4f8   : > { %7490 = vpow2.f32 %v3576_v26  ;;  %v13960_v26 = vld [vmem:[#allocation130_spill] sm:$0xff] }
 0x4f9   : > { %v11286_v23 = vpop.permute.xlu0 %3903  ;;  %7492 = vpow2.f32 %v3580_v35  ;;  %v3341_v60 = vsub.f32 %v13960_v26, %v11156_v59  ;;  %v3343_v35 = vsub.f32 %v10463_v8, %v11156_v59 }
 0x4fa   : > { %v11292_v62 = vpop.permute.xlu1 %3858  ;;  %4089 = vperm.xlu0 %7249, %v11284_v4   ;;  %v11308_v4 = vpop.eup %7478 }
 0x4fb   : > { %4044 = vperm.xlu1 %7248, %v11290_v51   ;;  %13955 = vst [vmem:[#allocation164_spill] sm:$0xff] %v11308_v4  ;;  %v11314_v37 = vpop.eup %7480  ;;  %v3584_v51 = vmul.f32 1.442695, %v3339_v43 }
 0x4fc   : > { %13957 = vst [vmem:[#allocation166_spill] sm:$0xff] %v11314_v37 }
 0x4fd   : > { %v11298_v44 = vpop.permute.xlu0 %3909  ;;  %7494 = vpow2.f32 %v3584_v51 }
 0x4fe   : > { %13953 = vst [vmem:[#allocation162_spill] sm:$0xff] %v11298_v44  ;;  %v11304_v48 = vpop.permute.xlu1 %3864  ;;  %4095 = vperm.xlu0 %7249, %v11296_v63   ;;  %v11320_v63 = vpop.eup %7482 }
 0x4ff   : > { %4050 = vperm.xlu1 %7248, %v11302_v3   ;;  %13958 = vst [vmem:[#allocation167_spill] sm:$0xff] %v11320_v63  ;;  %v11326_v56 = vpop.eup %7484 }
 0x500   : > { %13961 = vst [vmem:[#allocation130_spill] sm:$0xff] %v11326_v56 }
 0x501   : > { %v11310_v40 = vpop.permute.xlu0 %3915 }
 0x502   : > { %13956 = vst [vmem:[#allocation165_spill] sm:$0xff] %v11310_v40  ;;  %v11316_v49 = vpop.permute.xlu1 %3870  ;;  %4101 = vperm.xlu0 %7249, %v11308_v4   ;;  %v11332_v4 = vpop.eup %7486  ;;  %v3588_v40 = vmul.f32 1.442695, %v3341_v60 }
 0x503   : > { %4056 = vperm.xlu1 %7248, %v11314_v37   ;;  %13963 = vst [vmem:[#allocation170_spill] sm:$0xff] %v11332_v4  ;;  %v11338_v43 = vpop.eup %7488 }
 0x504   : > { %13965 = vst [vmem:[#allocation172_spill] sm:$0xff] %v11338_v43  ;;  %7496 = vpow2.f32 %v3588_v40 }
 0x505   : > { %v11322_v3 = vpop.permute.xlu0 %3921  ;;  %v11348_v51 = vpop.eup %7490 }
 0x506   : > { %13959 = vst [vmem:[#allocation168_spill] sm:$0xff] %v11322_v3  ;;  %v11328_v53 = vpop.permute.xlu1 %3876  ;;  %4107 = vperm.xlu0 %7249, %v11320_v63   ;;  %13967 = vst [vmem:[#allocation174_spill] sm:$0xff] %v11348_v51 }
 0x507   : > { %13962 = vst [vmem:[#allocation169_spill] sm:$0xff] %v11328_v53  ;;  %4062 = vperm.xlu1 %7248, %v11326_v56   ;;  %v3592_v56 = vmul.f32 1.442695, %v3343_v35 }
 0x509   : > { %v11334_v37 = vpop.permute.xlu0 %3927  ;;  %7498 = vpow2.f32 %v3592_v56 }
 0x50a   : > { %13964 = vst [vmem:[#allocation171_spill] sm:$0xff] %v11334_v37  ;;  %v11340_v26 = vpop.permute.xlu1 %3882  ;;  %4113 = vperm.xlu0 %7249, %v11332_v4   ;;  %v3345_v37 = vsub.f32 %v10498_v54, %v11156_v59  ;;  %v3347_v4 = vsub.f32 %v10530_v15, %v11156_v59 }
 0x50b   : > { %4068 = vperm.xlu1 %7248, %v11338_v43   ;;  %v11357_v43 = vpop.eup %7492 }
 0x50c   : > { %v3596_v3 = vmul.f32 1.442695, %v3345_v37  ;;  %13969 = vst [vmem:[#allocation176_spill] sm:$0xff] %v11357_v43  ;;  %v3600_v35 = vmul.f32 1.442695, %v3347_v4 }
 0x50d   : > { %v11344_v63 = vpop.permute.xlu0 %3933 }
 0x50e   : > { %13966 = vst [vmem:[#allocation173_spill] sm:$0xff] %v11344_v63  ;;  %v11350_v60 = vpop.permute.xlu1 %3888  ;;  %7500 = vpow2.f32 %v3596_v3  ;;  %v11366_v63 = vpop.eup %7494 }
 0x50f   : > { %4074 = vperm.xlu1 %7248, %v11348_v51   ;;  %v3349_v51 = vsub.f32 %v10554_v16, %v11156_v59  ;;  %13971 = vst [vmem:[#allocation178_spill] sm:$0xff] %v11366_v63  ;;  %7502 = vpow2.f32 %v3600_v35 }
 0x511   : > { %v11353_v8 = vpop.permute.xlu0 %3939  ;;  %v3604_v37 = vmul.f32 1.442695, %v3349_v51 }
 0x512   : > { %13968 = vst [vmem:[#allocation175_spill] sm:$0xff] %v11353_v8  ;;  %v11359_v40 = vpop.permute.xlu1 %3894  ;;  %v11373_v8 = vpop.eup %7496 }
 0x513   : > { %4080 = vperm.xlu1 %7248, %v11357_v43   ;;  %13973 = vst [vmem:[#allocation180_spill] sm:$0xff] %v11373_v8  ;;  %7504 = vpow2.f32 %v3604_v37 }
 0x515   : > { %v11362_v54 = vpop.permute.xlu0 %3945 }
 0x516   : > { %13970 = vst [vmem:[#allocation177_spill] sm:$0xff] %v11362_v54  ;;  %v11368_v56 = vpop.permute.xlu1 %3900  ;;  %v11380_v16 = vpop.eup %7498 }
 0x517   : > { %4086 = vperm.xlu1 %7248, %v11366_v63   ;;  %13975 = vst [vmem:[#allocation182_spill] sm:$0xff] %v11380_v16 }
 0x519   : > { %v11371_v15 = vpop.permute.xlu0 %3951 }
 0x51a   : > { %13972 = vst [vmem:[#allocation179_spill] sm:$0xff] %v11371_v15  ;;  %v11375_v43 = vpop.permute.xlu1 %3906 }
 0x51b   : > { %4092 = vperm.xlu1 %7248, %v11373_v8   ;;  %v11387_v63 = vpop.eup %7500 }
 0x51c   : > { %13978 = vst [vmem:[#allocation185_spill] sm:$0xff] %v11387_v63  ;;  %v11394_v8 = vpop.eup %7502 }
 0x51d   : > { %v11378_v4 = vpop.permute.xlu0 %3957  ;;  %13981 = vst [vmem:[#allocation188_spill] sm:$0xff] %v11394_v8 }
 0x51e   : > { %13974 = vst [vmem:[#allocation181_spill] sm:$0xff] %v11378_v4  ;;  %v11382_v59 = vpop.permute.xlu1 %3912 }
 0x51f   : > { %13976 = vst [vmem:[#allocation183_spill] sm:$0xff] %v11382_v59  ;;  %4098 = vperm.xlu1 %7248, %v11380_v16  }
 0x520   : > { %v11401_v15 = vpop.eup %7504 }
 0x521   : > { %v11385_v3 = vpop.permute.xlu0 %3963  ;;  %13984 = vst [vmem:[#allocation191_spill] sm:$0xff] %v11401_v15 }
 0x522   : > { %13977 = vst [vmem:[#allocation184_spill] sm:$0xff] %v11385_v3  ;;  %v11389_v51 = vpop.permute.xlu1 %3918 }
 0x523   : > { %13979 = vst [vmem:[#allocation186_spill] sm:$0xff] %v11389_v51  ;;  %4104 = vperm.xlu1 %7248, %v11387_v63  }
 0x525   : > { %v11392_v35 = vpop.permute.xlu0 %3969 }
 0x526   : > { %13980 = vst [vmem:[#allocation187_spill] sm:$0xff] %v11392_v35  ;;  %v11396_v4 = vpop.permute.xlu1 %3924 }
 0x527   : > { %13982 = vst [vmem:[#allocation189_spill] sm:$0xff] %v11396_v4  ;;  %4110 = vperm.xlu1 %7248, %v11394_v8  }
 0x529   : > { %v11399_v37 = vpop.permute.xlu0 %3975 }
 0x52a   : > { %13983 = vst [vmem:[#allocation190_spill] sm:$0xff] %v11399_v37  ;;  %v11403_v16 = vpop.permute.xlu1 %3930 }
 0x52b   : > { %13985 = vst [vmem:[#allocation192_spill] sm:$0xff] %v11403_v16  ;;  %4116 = vperm.xlu1 %7248, %v11401_v15  }
 0x52d   : > { %v11406_v3 = vpop.permute.xlu0 %3981 }
 0x52e   : > { %13986 = vst [vmem:[#allocation193_spill] sm:$0xff] %v11406_v3  ;;  %v11408_v51 = vpop.permute.xlu1 %3936 }
 0x52f   : > { %13987 = vst [vmem:[#allocation194_spill] sm:$0xff] %v11408_v51 }
 0x531   : > { %v11410_v63 = vpop.permute.xlu0 %3987 }
 0x532   : > { %13988 = vst [vmem:[#allocation195_spill] sm:$0xff] %v11410_v63  ;;  %v11412_v35 = vpop.permute.xlu1 %3942 }
 0x533   : > { %13989 = vst [vmem:[#allocation196_spill] sm:$0xff] %v11412_v35 }
 0x535   : > { %v11414_v54 = vpop.permute.xlu0 %3993 }
 0x536   : > { %13990 = vst [vmem:[#allocation197_spill] sm:$0xff] %v11414_v54  ;;  %v11416_v4 = vpop.permute.xlu1 %3948 }
 0x537   : > { %13991 = vst [vmem:[#allocation198_spill] sm:$0xff] %v11416_v4 }
 0x539   : > { %v11418_v8 = vpop.permute.xlu0 %3999 }
 0x53a   : > { %13992 = vst [vmem:[#allocation199_spill] sm:$0xff] %v11418_v8  ;;  %v11420_v37 = vpop.permute.xlu1 %3954 }
 0x53b   : > { %13993 = vst [vmem:[#allocation200_spill] sm:$0xff] %v11420_v37 }
 0x53d   : > { %v11422_v59 = vpop.permute.xlu0 %4005 }
 0x53e   : > { %13994 = vst [vmem:[#allocation201_spill] sm:$0xff] %v11422_v59  ;;  %v11424_v16 = vpop.permute.xlu1 %3960 }
 0x53f   : > { %13995 = vst [vmem:[#allocation202_spill] sm:$0xff] %v11424_v16 }
 0x541   : > { %v11426_v15 = vpop.permute.xlu0 %4011 }
 0x542   : > { %13996 = vst [vmem:[#allocation203_spill] sm:$0xff] %v11426_v15  ;;  %v11428_v3 = vpop.permute.xlu1 %3966 }
 0x543   : > { %13997 = vst [vmem:[#allocation204_spill] sm:$0xff] %v11428_v3 }
 0x545   : > { %v11430_v51 = vpop.permute.xlu0 %4017 }
 0x546   : > { %13998 = vst [vmem:[#allocation205_spill] sm:$0xff] %v11430_v51  ;;  %v11432_v63 = vpop.permute.xlu1 %3972 }
 0x547   : > { %13999 = vst [vmem:[#allocation206_spill] sm:$0xff] %v11432_v63 }
 0x549   : > { %v11434_v35 = vpop.permute.xlu0 %4023 }
 0x54a   : > { %14000 = vst [vmem:[#allocation207_spill] sm:$0xff] %v11434_v35  ;;  %v11436_v54 = vpop.permute.xlu1 %3978 }
 0x54b   : > { %14001 = vst [vmem:[#allocation208_spill] sm:$0xff] %v11436_v54  ;;  %v14012_v54 = vld [vmem:[#allocation56_spill] sm:$0xff] }
 0x54d   : > { %v11440_v8 = vpop.permute.xlu0 %4029 }
 0x54e   : > { %v11438_v4 = vpop.permute.xlu1 %3984  ;;  %14003 = vst [vmem:[#allocation210_spill] sm:$0xff] %v11440_v8  ;;  %v14013_v8 = vld [vmem:[#allocation75_spill] sm:$0xff] }
 0x54f   : > { %14002 = vst [vmem:[#allocation209_spill] sm:$0xff] %v11438_v4  ;;  %v4204_v4 = vrot.slane %v11120_v13, %v14012_v54  ;;  %v14016_v13 = vld [vmem:[#allocation68_spill] sm:$0xff] }
 0x550   : > { %v4214_v44 = vrot.slane %v11134_v61, %v14016_v13 }
 0x551   : > { %v11444_v59 = vpop.permute.xlu0 %4035 }
 0x552   : > { %v11442_v37 = vpop.permute.xlu1 %3990  ;;  %14005 = vst [vmem:[#allocation212_spill] sm:$0xff] %v11444_v59  ;;  %v4121_v59 = vrot.slane %v10946_v9, %v14013_v8  ;;  %v4135_v9 = vrot.slane %v10974_v28, %v14016_v13  ;;  %v4293_v28 = vrot.slane %v11252_v46, %v14016_v13  ;;  %v4219_v46 = vrot.slane %v11025_v22, %v14018_v1 }
 0x553   : > { %14004 = vst [vmem:[#allocation211_spill] sm:$0xff] %v11442_v37  ;;  %v4125_v37 = vrot.slane %v10940_v0, %v14012_v54 }
 0x555   : > { %v11450_v3 = vpop.permute.xlu0 %4041 }
 0x556   : > { %v11446_v16 = vpop.permute.xlu1 %3996  ;;  %14008 = vst [vmem:[#allocation215_spill] sm:$0xff] %v11450_v3 }
 0x557   : > { %14006 = vst [vmem:[#allocation213_spill] sm:$0xff] %v11446_v16  ;;  %v14014_v16 = vld [vmem:[#allocation62_spill] sm:$0xff] }
 0x558   : > { %v4130_v3 = vrot.slane %v10960_v2, %v14014_v16  ;;  %v4279_v2 = vrot.slane %v11114_v52, %v14013_v8  ;;  %v4288_v52 = vrot.slane %v11128_v14, %v14014_v16 }
 0x559   : > { %v11454_v63 = vpop.permute.xlu0 %4047 }
 0x55a   : > { %v11448_v15 = vpop.permute.xlu1 %4002  ;;  %14010 = vst [vmem:[#allocation217_spill] sm:$0xff] %v11454_v63 }
 0x55b   : > { %14007 = vst [vmem:[#allocation214_spill] sm:$0xff] %v11448_v15  ;;  %v4200_v15 = vrot.slane %v10996_v42, %v14013_v8  ;;  %v4209_v42 = vrot.slane %v11010_v21, %v14014_v16  ;;  %v14019_v21 = vld [vmem:[#allocation78_spill] sm:$0xff] }
 0x55c   : > { %v4145_v53 = vrot.slane %v11002_v39, %v14019_v21 }
 0x55d   : > { %v11475_v0 = vpop.permute.xlu0 %4053 }
 0x55e   : > { %v11452_v51 = vpop.permute.xlu1 %4008  ;;  %14017 = vst [vmem:[#allocation75_spill] sm:$0xff] %v11475_v0 }
 0x55f   : > { %14009 = vst [vmem:[#allocation216_spill] sm:$0xff] %v11452_v51  ;;  %v4283_v51 = vrot.slane %v11238_v20, %v14012_v54  ;;  %v4126_v20 = vsel %vm2511_vm2, %v4125_v37, %v4121_v59 }
 0x562   : > { %v11456_v35 = vpop.permute.xlu1 %4014 }
 0x563   : > { %14011 = vst [vmem:[#allocation218_spill] sm:$0xff] %v11456_v35  ;;  %v4205_v35 = vsel %vm2511_vm2, %v4204_v4, %v4200_v15  ;;  %v4131_v15 = vsel %vm2518_vm3, %v4130_v3, %v4126_v20  ;;  %v4284_v4 = vsel %vm2511_vm2, %v4283_v51, %v4279_v2  ;;  %v11509_v2 = vpop.permute.xlu0 %4059 }
 0x564   : > { %v4210_v61 = vsel %vm2518_vm3, %v4209_v42, %v4205_v35  ;;  %v4136_v3 = vsel %vm2525_vm4, %v4135_v9, %v4131_v15  ;;  %v14020_v35 = vld [vmem:[#allocation84_spill] sm:$0xff]  ;;  %v14022_v42 = vld [vmem:[#allocation94_spill] sm:$0xff]  ;;  %v4289_v14 = vsel %vm2518_vm3, %v4288_v52, %v4284_v4 }
 0x565   : > { %v4215_v59 = vsel %vm2525_vm4, %v4214_v44, %v4210_v61  ;;  %v4150_v51 = vrot.slane %v11016_v27, %v14020_v35  ;;  %v4155_v39 = vrot.slane %v11031_v57, %v14022_v42  ;;  %v14023_v44 = vld [vmem:[#allocation41_spill] sm:$0xff]  ;;  %v4294_v20 = vsel %vm2525_vm4, %v4293_v28, %v4289_v14  ;;  %v14027_v14 = vld [vmem:[#allocation87_spill] sm:$0xff] }
 0x566   : > { %v11470_v63 = vpop.permute.xlu1 %4020  ;;  %v4220_v9 = vsel %vm14024_vm13, %v4219_v46, %v4215_v59  ;;  %v4303_v27 = vrot.slane %v11266_v29, %v14019_v21  ;;  %v4298_v57 = vrot.slane %v11143_v12, %v14018_v1  ;;  %v4234_v61 = vrot.slane %v11168_v38, %v14022_v42  ;;  %v14025_v28 = vld [vmem:[#allocation85_spill] sm:$0xff]  ;;  %vm14026_vm13 = vmmov %vm14021_vm5 }
 0x567   : > { %14015 = vst [vmem:[#allocation56_spill] sm:$0xff] %v11470_v63  ;;  %v4140_v63 = vrot.slane %v10988_v5, %v14018_v1  ;;  %v4224_v5 = vrot.slane %v11149_v50, %v14019_v21  ;;  %v4160_v50 = vrot.slane %v11050_v18, %v14023_v44  ;;  %v4229_v4 = vrot.slane %v11044_v7, %v14020_v35 }
 0x568   : > { %v4165_v29 = vrot.slane %v11064_v31, %v14025_v28  ;;  %v4362_v12 = vrot.slane %v11340_v26, %v14012_v54  ;;  %v4308_v31 = vrot.slane %v11162_v25, %v14020_v35  ;;  %v4244_v46 = vrot.slane %v11182_v34, %v14025_v28 }
 0x569   : > { %v4141_v37 = vsel %vm14021_vm5, %v4140_v63, %v4136_v3  ;;  %v4225_v15 = vsel %vm2539_vm6, %v4224_v5, %v4220_v9  ;;  %v4313_v3 = vrot.slane %v11280_v6, %v14022_v42  ;;  %v4358_v26 = vrot.slane %v11232_v55, %v14013_v8  ;;  %v14028_v9 = vld [vmem:[#allocation104_spill] sm:$0xff] }
 0x56a   : > { %v11491_v0 = vpop.permute.xlu1 %4026  ;;  %v4146_v63 = vsel %vm2539_vm6, %v4145_v53, %v4141_v37  ;;  %v4299_v53 = vsel %vm14026_vm13, %v4298_v57, %v4294_v20  ;;  %v4230_v5 = vsel %vm2546_vm7, %v4229_v4, %v4225_v15  ;;  %v11548_v37 = vpop.permute.xlu0 %4065  ;;  %v4170_v25 = vrot.slane %v10954_v47, %v14028_v9  ;;  %v14031_v4 = vld [vmem:[#allocation40_spill] sm:$0xff] }
 0x56b   : > { %v4151_v18 = vsel %vm2546_vm7, %v4150_v51, %v4146_v63  ;;  %v4304_v38 = vsel %vm2539_vm6, %v4303_v27, %v4299_v53  ;;  %v4235_v51 = vsel %vm2553_vm8, %v4234_v61, %v4230_v5  ;;  %v4363_v34 = vsel %vm2511_vm2, %v4362_v12, %v4358_v26  ;;  %v14033_v12 = vld [vmem:[#allocation89_spill] sm:$0xff] }
 0x56c   : > { %v4156_v52 = vsel %vm2553_vm8, %v4155_v39, %v4151_v18  ;;  %v4239_v39 = vrot.slane %v11058_v30, %v14023_v44  ;;  %v4309_v20 = vsel %vm2546_vm7, %v4308_v31, %v4304_v38  ;;  %v4372_v55 = vrot.slane %v11350_v60, %v14016_v13  ;;  %v14030_v18 = vld [vmem:[#allocation102_spill] sm:$0xff] }
 0x56d   : > { %v4161_v59 = vsel %vm2560_vm9, %v4160_v50, %v4156_v52  ;;  %v4175_v50 = vrot.slane %v11078_v58, %v14027_v14  ;;  %v4367_v30 = vrot.slane %v11246_v33, %v14014_v16  ;;  %v4314_v63 = vsel %vm2553_vm8, %v4313_v3, %v4309_v20 }
 0x56e   : > { %v11517_v22 = vpop.permute.xlu1 %4032  ;;  %v4166_v6 = vsel %vm2567_vm10, %v4165_v29, %v4161_v59  ;;  %v4240_v27 = vsel %vm2560_vm9, %v4239_v39, %v4235_v51  ;;  %v4323_v58 = vrot.slane %v11292_v62, %v14025_v28  ;;  %vm14029_vm5 = vcmask 720512   ;;  %v14032_v29 = vld [vmem:[#allocation133_spill] sm:$0xff]  ;;  %v11587_v38 = vpop.permute.xlu0 %4071 }
 0x56f   : > { %v4171_v47 = vsel %vm14029_vm5, %v4170_v25, %v4166_v6  ;;  %v4318_v15 = vrot.slane %v11176_v17, %v14023_v44  ;;  %v4245_v61 = vsel %vm2567_vm10, %v4244_v46, %v4240_v27  ;;  %v4254_v60 = vrot.slane %v11196_v36, %v14027_v14  ;;  %vm14034_vm13 = vmmov %vm14029_vm5  ;;  %v14035_v6 = vld [vmem:[#allocation110_spill] sm:$0xff] }
 0x570   : > { %v4180_v33 = vrot.slane %v14031_v4, %v14030_v18  ;;  %v4249_v52 = vrot.slane %v14032_v29, %v14028_v9  ;;  %v4176_v62 = vsel %vm2581_vm12, %v4175_v50, %v4171_v47  ;;  %v4368_v53 = vsel %vm2518_vm3, %v4367_v30, %v4363_v34  ;;  %v14036_v50 = vld [vmem:[#allocation33_spill] sm:$0xff] }
 0x571   : > { %v4185_v59 = vrot.slane %v11092_v45, %v14033_v12  ;;  %v4319_v17 = vsel %vm2560_vm9, %v4318_v15, %v4314_v63  ;;  %v4373_v5 = vsel %vm2525_vm4, %v4372_v55, %v4368_v53  ;;  %v4382_v36 = vrot.slane %v11359_v40, %v14019_v21 }
 0x572   : > { %v11539_v7 = vpop.permute.xlu1 %4038  ;;  %v4250_v3 = vsel %vm14034_vm13, %v4249_v52, %v4245_v61  ;;  %v4377_v31 = vrot.slane %v11260_v19, %v14018_v1  ;;  %v4324_v51 = vsel %vm2567_vm10, %v4323_v58, %v4319_v17  ;;  %v4333_v46 = vrot.slane %v11304_v48, %v14027_v14  ;;  %v14037_v19 = vld [vmem:[#allocation135_spill] sm:$0xff]  ;;  %v11628_v52 = vpop.permute.xlu0 %4077 }
 0x573   : > { %v4328_v26 = vrot.slane %v11190_v10, %v14028_v9  ;;  %v4255_v39 = vsel %vm2581_vm12, %v4254_v60, %v4250_v3  ;;  %v4264_v40 = vrot.slane %v11210_v41, %v14033_v12  ;;  %v4190_v25 = vrot.slane %v14036_v50, %v14035_v6  ;;  %v14042_v61 = vld [vmem:[#allocation51_spill] sm:$0xff]  ;;  %v14043_v60 = vld [vmem:[#allocation138_spill] sm:$0xff]  ;;  %v14046_v3 = vld [vmem:[#allocation169_spill] sm:$0xff] }
 0x574   : > { %v4259_v20 = vrot.slane %v14037_v19, %v14030_v18  ;;  %vm14038_vm5 = vcmask 851712   ;;  %vm14039_vm13 = vcmask 326912   ;;  %v4392_v30 = vrot.slane %v11368_v56, %v14022_v42  ;;  %v14050_v19 = vld [vmem:[#allocation168_spill] sm:$0xff] }
 0x575   : > { %v4181_v34 = vsel %vm14038_vm5, %v4180_v33, %v4176_v62  ;;  %v4378_v48 = vsel %vm14039_vm13, %v4377_v31, %v4373_v5  ;;  %v4329_v27 = vsel %vm14040_vm11, %v4328_v26, %v4324_v51  ;;  %vm14041_vm1 = vmmov %vm14038_vm5  ;;  %v4387_v63 = vrot.slane %v11274_v11, %v14020_v35  ;;  %v14044_v11 = vld [vmem:[#allocation137_spill] sm:$0xff]  ;;  %v14047_v26 = vld [vmem:[#allocation150_spill] sm:$0xff] }
 0x576   : > { %v11567_v57 = vpop.permute.xlu1 %4044  ;;  %v4186_v55 = vsel %vm13305_vm14, %v4185_v59, %v4181_v34  ;;  %v4383_v10 = vsel %vm2539_vm6, %v4382_v36, %v4378_v48  ;;  %v4260_v41 = vsel %vm14041_vm1, %v4259_v20, %v4255_v39  ;;  %v4334_v58 = vsel %vm2581_vm12, %v4333_v46, %v4329_v27  ;;  %vm14045_vm11 = vmmov %vm14041_vm1  ;;  %v14051_v48 = vld [vmem:[#allocation192_spill] sm:$0xff] }
 0x577   : > { %v4343_v47 = vrot.slane %v11316_v49, %v14033_v12  ;;  %v4195_v4 = vrot.slane %v14043_v60, %v14042_v61  ;;  %v4338_v33 = vrot.slane %v11204_v24, %v14030_v18  ;;  %v4265_v56 = vsel %vm13305_vm14, %v4264_v40, %v4260_v41  ;;  %v14048_v40 = vld [vmem:[#allocation162_spill] sm:$0xff] }
 0x578   : > { %v4274_v29 = vrot.slane %v11224_v32, %v14042_v61  ;;  %v4269_v62 = vrot.slane %v14044_v11, %v14035_v6  ;;  %v4388_v49 = vsel %vm2546_vm7, %v4387_v63, %v4383_v10  ;;  %v4191_v53 = vsel %vm2602_vm15, %v4190_v25, %v4186_v55  ;;  %v14053_v63 = vld [vmem:[#allocation208_spill] sm:$0xff] }
 0x579   : > { %v4339_v59 = vsel %vm14045_vm11, %v4338_v33, %v4334_v58  ;;  %v4393_v17 = vsel %vm2553_vm8, %v4392_v30, %v4388_v49  ;;  %v4402_v24 = vrot.slane %v11375_v43, %v14025_v28  ;;  %v4397_v32 = vrot.slane %v11286_v23, %v14023_v44  ;;  %v14049_v23 = vld [vmem:[#allocation165_spill] sm:$0xff]  ;;  %v14052_v30 = vld [vmem:[#allocation183_spill] sm:$0xff]  ;;  %vm14074_vm11 = vmmov %vm14039_vm13 }
 0x57a   : > { %v11595_v45 = vpop.permute.xlu1 %4050  ;;  %v4270_v5 = vsel %vm2602_vm15, %v4269_v62, %v4265_v56  ;;  %v4344_v36 = vsel %vm13305_vm14, %v4343_v47, %v4339_v59  ;;  %v4353_v31 = vrot.slane %v14046_v3, %v14042_v61  ;;  %v11647_v46 = vsel %vm2609_vm0, %v4195_v4, %v4191_v53  ;;  %v11669_v47 = vpop.permute.xlu0 %4083  ;;  %v14054_v4 = vld [vmem:[#allocation171_spill] sm:$0xff]  ;;  %v14055_v56 = vld [vmem:[#allocation173_spill] sm:$0xff] }
 0x57b   : > { %v4348_v39 = vrot.slane %v14047_v26, %v14035_v6  ;;  %v11652_v43 = vsel %vm2609_vm0, %v4274_v29, %v4270_v5  ;;  %v4407_v50 = vrot.slane %v14048_v40, %v14028_v9  ;;  %v4417_v25 = vrot.slane %v14049_v23, %v14030_v18  ;;  %v14056_v49 = vld [vmem:[#allocation175_spill] sm:$0xff]  ;;  %v14057_v59 = vld [vmem:[#allocation177_spill] sm:$0xff] }
 0x57c   : > { %v4427_v20 = vrot.slane %v14050_v19, %v14035_v6  ;;  %v4398_v34 = vsel %vm2560_vm9, %v4397_v32, %v4393_v17  ;;  %v4441_v55 = vrot.slane %v14051_v48, %v14012_v54  ;;  %v4412_v41 = vrot.slane %v14052_v30, %v14027_v14  ;;  %v14059_v32 = vld [vmem:[#allocation190_spill] sm:$0xff]  ;;  %v14063_v23 = vld [vmem:[#allocation181_spill] sm:$0xff] }
 0x57d   : > { %v4349_v27 = vsel %vm2602_vm15, %v4348_v39, %v4344_v36  ;;  %v4403_v10 = vsel %vm2567_vm10, %v4402_v24, %v4398_v34  ;;  %v4520_v58 = vrot.slane %v14053_v63, %v14012_v54  ;;  %v4437_v33 = vrot.slane %v14054_v4, %v14013_v8  ;;  %v14058_v24 = vld [vmem:[#allocation179_spill] sm:$0xff]  ;;  %v14064_v30 = vld [vmem:[#allocation209_spill] sm:$0xff] }
 0x57e   : > { %v11619_v15 = vpop.permute.xlu1 %4056  ;;  %v11672_v60 = vsel %vm2609_vm0, %v4353_v31, %v4349_v27  ;;  %v4446_v29 = vrot.slane %v14055_v56, %v14014_v16  ;;  %v4599_v11 = vrot.slane %v11491_v0, %v14012_v54  ;;  %v4456_v53 = vrot.slane %v14056_v49, %v14018_v1  ;;  %v14061_v0 = vld [vmem:[#allocation194_spill] sm:$0xff]  ;;  %v14062_v39 = vld [vmem:[#allocation207_spill] sm:$0xff] }
 0x57f   : > { %v4466_v17 = vrot.slane %v14057_v59, %v14020_v35  ;;  %v4476_v5 = vrot.slane %v14058_v24, %v14023_v44  ;;  %v4516_v36 = vrot.slane %v14059_v32, %v14013_v8  ;;  %vm14060_vm1 = vcmask 720512   ;;  %v14086_v24 = vld [vmem:[#allocation216_spill] sm:$0xff] }
 0x580   : > { %v4408_v3 = vsel %vm14060_vm1, %v4407_v50, %v4403_v10  ;;  %v4442_v31 = vsel %vm2511_vm2, %v4441_v55, %v4437_v33  ;;  %v4451_v26 = vrot.slane %v14061_v0, %v14016_v13  ;;  %v4595_v40 = vrot.slane %v14062_v39, %v14013_v8  ;;  %v14065_v50 = vld [vmem:[#allocation184_spill] sm:$0xff]  ;;  %v14066_v55 = vld [vmem:[#allocation193_spill] sm:$0xff]  ;;  %vm14076_vm1 = vmmov %vm14074_vm11 }
 0x581   : > { %v4486_v34 = vrot.slane %v14063_v23, %v14028_v9  ;;  %v4413_v48 = vsel %vm2581_vm12, %v4412_v41, %v4408_v3  ;;  %v4521_v27 = vsel %vm2511_vm2, %v4520_v58, %v4516_v36  ;;  %v4530_v63 = vrot.slane %v14064_v30, %v14016_v13  ;;  %v14067_v41 = vld [vmem:[#allocation210_spill] sm:$0xff]  ;;  %v4090_v36 = vpop.permute.xlu0 %4089 }
 0x582   : > { %v11644_v51 = vpop.permute.xlu1 %4062  ;;  %v4496_v10 = vrot.slane %v14065_v50, %v14030_v18  ;;  %v4525_v4 = vrot.slane %v14066_v55, %v14014_v16  ;;  %v4600_v33 = vsel %vm2511_vm2, %v4599_v11, %v4595_v40  ;;  %v4609_v56 = vrot.slane %v11517_v22, %v14016_v13  ;;  %v14068_v11 = vld [vmem:[#allocation196_spill] sm:$0xff]  ;;  %v14092_v23 = vld [vmem:[#allocation218_spill] sm:$0xff] }
 0x583   : > { %v4447_v59 = vsel %vm2518_vm3, %v4446_v29, %v4442_v31  ;;  %v4604_v58 = vrot.slane %v14067_v41, %v14014_v16  ;;  %v4674_v32 = vrot.slane %v11587_v38, %v14013_v8  ;;  %v4418_v0 = vsel %vm14038_vm5, %v4417_v25, %v4413_v48  ;;  %v14069_v31 = vld [vmem:[#allocation211_spill] sm:$0xff]  ;;  %vm14080_vm5 = vmmov %vm14076_vm1  ;;  %v14100_v50 = vld [vmem:[#allocation56_spill] sm:$0xff] }
 0x584   : > { %v4452_v39 = vsel %vm2525_vm4, %v4451_v26, %v4447_v59  ;;  %v4461_v40 = vrot.slane %v14068_v11, %v14019_v21  ;;  %v4526_v22 = vsel %vm2518_vm3, %v4525_v4, %v4521_v27  ;;  %v4540_v30 = vrot.slane %v14069_v31, %v14019_v21  ;;  %v14075_v31 = vld [vmem:[#allocation213_spill] sm:$0xff] }
 0x585   : > { %v4531_v29 = vsel %vm2525_vm4, %v4530_v63, %v4526_v22  ;;  %v4605_v55 = vsel %vm2518_vm3, %v4604_v58, %v4600_v33  ;;  %v4683_v25 = vrot.slane %v11628_v52, %v14014_v16  ;;  %v4619_v48 = vrot.slane %v11539_v7, %v14019_v21  ;;  %v14071_v63 = vld [vmem:[#allocation186_spill] sm:$0xff]  ;;  %v14072_v33 = vld [vmem:[#allocation212_spill] sm:$0xff] }
 0x586   : > { %v11680_v62 = vpop.permute.xlu1 %4068  ;;  %v4610_v26 = vsel %vm2525_vm4, %v4609_v56, %v4605_v55  ;;  %v4422_v4 = vrot.slane %v14071_v63, %v14033_v12  ;;  %v4457_v59 = vsel %vm14039_vm13, %v4456_v53, %v4452_v39  ;;  %v4614_v58 = vrot.slane %v14072_v33, %v14018_v1  ;;  %v14073_v52 = vld [vmem:[#allocation198_spill] sm:$0xff]  ;;  %v4096_v39 = vpop.permute.xlu0 %4095 }
 0x587   : > { %v4471_v11 = vrot.slane %v14073_v52, %v14022_v42  ;;  %v4550_v55 = vrot.slane %v14075_v31, %v14022_v42  ;;  %v4693_v63 = vrot.slane %v11669_v47, %v14018_v1  ;;  %vm14088_vm13 = vcmask 720512  }
 0x588   : > { %v4615_v53 = vsel %vm14076_vm1, %v4614_v58, %v4610_v26  ;;  %v14078_v26 = vld [vmem:[#allocation215_spill] sm:$0xff] }
 0x58a   : > { %v4075_v49 = vpop.permute.xlu1 %4074 }
 0x58b   : > { %v4678_v3 = vrot.slane %v4075_v49, %v14012_v54  ;;  %v14070_v49 = vld [vmem:[#allocation195_spill] sm:$0xff] }
 0x58c   : > { %v4535_v41 = vrot.slane %v14070_v49, %v14018_v1 }
 0x58d   : > { %v4679_v38 = vsel %vm2511_vm2, %v4678_v3, %v4674_v32  ;;  %v4462_v3 = vsel %vm2539_vm6, %v4461_v40, %v4457_v59  ;;  %v4624_v59 = vrot.slane %v14078_v26, %v14020_v35 }
 0x58e   : > { %v4081_v27 = vpop.permute.xlu1 %4080  ;;  %v4536_v56 = vsel %vm14074_vm11, %v4535_v41, %v4531_v29  ;;  %v4684_v7 = vsel %vm2518_vm3, %v4683_v25, %v4679_v38  ;;  %v4620_v29 = vsel %vm2539_vm6, %v4619_v48, %v4615_v53  ;;  %v4629_v38 = vrot.slane %v11567_v57, %v14022_v42  ;;  %vm14091_vm11 = vmmov %vm14088_vm13 }
 0x58f   : > { %v4688_v32 = vrot.slane %v4081_v27, %v14016_v13  ;;  %v4541_v22 = vsel %vm2539_vm6, %v4540_v30, %v4536_v56  ;;  %v14077_v27 = vld [vmem:[#allocation197_spill] sm:$0xff]  ;;  %v4423_v41 = vsel %vm13305_vm14, %v4422_v4, %v4418_v0  ;;  %v4467_v25 = vsel %vm2546_vm7, %v4466_v17, %v4462_v3  ;;  %v14081_v0 = vld [vmem:[#allocation214_spill] sm:$0xff]  ;;  %v14082_v56 = vld [vmem:[#allocation199_spill] sm:$0xff] }
 0x590   : > { %v4545_v40 = vrot.slane %v14077_v27, %v14020_v35  ;;  %v4472_v58 = vsel %vm2553_vm8, %v4471_v11, %v4467_v25  ;;  %v4560_v4 = vrot.slane %v14081_v0, %v14025_v28  ;;  %v4625_v17 = vsel %vm2546_vm7, %v4624_v59, %v4620_v29  ;;  %v4102_v29 = vpop.permute.xlu0 %4101  ;;  %vm14093_vm1 = vmmov %vm14091_vm11 }
 0x591   : > { %v4689_v49 = vsel %vm2525_vm4, %v4688_v32, %v4684_v7  ;;  %v14079_v32 = vld [vmem:[#allocation200_spill] sm:$0xff]  ;;  %v4555_v7 = vrot.slane %v14082_v56, %v14023_v44  ;;  %v4703_v11 = vrot.slane %v4090_v36, %v14020_v35  ;;  %v4630_v31 = vsel %vm2553_vm8, %v4629_v38, %v4625_v17 }
 0x592   : > { %v4087_v30 = vpop.permute.xlu1 %4086  ;;  %v4481_v47 = vrot.slane %v14079_v32, %v14025_v28  ;;  %v4546_v48 = vsel %vm2546_vm7, %v4545_v40, %v4541_v22  ;;  %v4694_v52 = vsel %vm14080_vm5, %v4693_v63, %v4689_v49  ;;  %v4639_v22 = vrot.slane %v11595_v45, %v14025_v28  ;;  %v14084_v40 = vld [vmem:[#allocation217_spill] sm:$0xff] }
 0x593   : > { %v4698_v33 = vrot.slane %v4087_v30, %v14019_v21  ;;  %v4551_v57 = vsel %vm2553_vm8, %v4550_v55, %v4546_v48  ;;  %v14083_v55 = vld [vmem:[#allocation187_spill] sm:$0xff]  ;;  %v4477_v27 = vsel %vm2560_vm9, %v4476_v5, %v4472_v58  ;;  %v4634_v63 = vrot.slane %v14084_v40, %v14023_v44  ;;  %v14085_v30 = vld [vmem:[#allocation202_spill] sm:$0xff]  ;;  %v14087_v32 = vld [vmem:[#allocation201_spill] sm:$0xff] }
 0x594   : > { %v4506_v49 = vrot.slane %v14083_v55, %v14035_v6  ;;  %v4482_v38 = vsel %vm2567_vm10, %v4481_v47, %v4477_v27  ;;  %v4491_v45 = vrot.slane %v14085_v30, %v14027_v14  ;;  %v4556_v25 = vsel %vm2560_vm9, %v4555_v7, %v4551_v57  ;;  %v14094_v55 = vld [vmem:[#allocation203_spill] sm:$0xff]  ;;  %v14095_v30 = vld [vmem:[#allocation189_spill] sm:$0xff] }
 0x595   : > { %v4699_v3 = vsel %vm2539_vm6, %v4698_v33, %v4694_v52  ;;  %v4561_v59 = vsel %vm2567_vm10, %v4560_v4, %v4556_v25  ;;  %v4570_v5 = vrot.slane %v14086_v24, %v14027_v14  ;;  %v4635_v33 = vsel %vm2560_vm9, %v4634_v63, %v4630_v31  ;;  %v14097_v24 = vld [vmem:[#allocation206_spill] sm:$0xff] }
 0x596   : > { %v4093_v53 = vpop.permute.xlu1 %4092  ;;  %v4704_v26 = vsel %vm2546_vm7, %v4703_v11, %v4699_v3  ;;  %v4565_v48 = vrot.slane %v14087_v32, %v14028_v9  ;;  %v4713_v47 = vrot.slane %v4096_v39, %v14023_v44  ;;  %v4640_v52 = vsel %vm2567_vm10, %v4639_v22, %v4635_v33  ;;  %v14089_v3 = vld [vmem:[#allocation75_spill] sm:$0xff]  ;;  %v4108_v22 = vpop.permute.xlu0 %4107 }
 0x597   : > { %v4708_v36 = vrot.slane %v4093_v53, %v14022_v42  ;;  %v4649_v57 = vrot.slane %v11619_v15, %v14027_v14  ;;  %v4428_v4 = vsel %vm2602_vm15, %v4427_v20, %v4423_v41  ;;  %v4487_v17 = vsel %vm14088_vm13, %v4486_v34, %v4482_v38  ;;  %v14090_v15 = vld [vmem:[#allocation204_spill] sm:$0xff] }
 0x598   : > { %v4644_v56 = vrot.slane %v14089_v3, %v14028_v9  ;;  %v4492_v7 = vsel %vm2581_vm12, %v4491_v45, %v4487_v17  ;;  %v4501_v11 = vrot.slane %v14090_v15, %v14033_v12  ;;  %v4566_v31 = vsel %vm14091_vm11, %v4565_v48, %v4561_v59  ;;  %vm14099_vm11 = vmmov %vm14093_vm1  ;;  %v14102_v48 = vld [vmem:[#allocation205_spill] sm:$0xff] }
 0x599   : > { %v4709_v58 = vsel %vm2553_vm8, %v4708_v36, %v4704_v26  ;;  %v4571_v20 = vsel %vm2581_vm12, %v4570_v5, %v4566_v31  ;;  %v4580_v41 = vrot.slane %v14092_v23, %v14033_v12  ;;  %v4575_v27 = vrot.slane %v14094_v55, %v14030_v18 }
 0x59a   : > { %v4099_v0 = vpop.permute.xlu1 %4098  ;;  %v4714_v19 = vsel %vm2560_vm9, %v4713_v47, %v4709_v58  ;;  %v4645_v34 = vsel %vm14093_vm1, %v4644_v56, %v4640_v52  ;;  %v4723_v40 = vrot.slane %v4102_v29, %v14028_v9  ;;  %v4659_v36 = vrot.slane %v11644_v51, %v14033_v12 }
 0x59b   : > { %v4718_v39 = vrot.slane %v4099_v0, %v14025_v28  ;;  %v4650_v63 = vsel %vm2581_vm12, %v4649_v57, %v4645_v34  ;;  %v4432_v45 = vrot.slane %v14095_v30, %v14042_v61  ;;  %vm14096_vm5 = vcmask 851712   ;;  %v14112_v30 = vld [vmem:[#allocation96_spill] sm:$0xff] }
 0x59c   : > { %v4497_v25 = vsel %vm14096_vm5, %v4496_v10, %v4492_v7  ;;  %v4654_v26 = vrot.slane %v11509_v2, %v14030_v18  ;;  %v4511_v5 = vrot.slane %v14097_v24, %v14042_v61  ;;  %vm14098_vm13 = vmmov %vm14096_vm5  ;;  %v4590_v32 = vrot.slane %v14100_v50, %v14042_v61  ;;  %v4114_v7 = vpop.permute.xlu0 %4113  ;;  %v14115_v24 = vld [vmem:[#allocation121_spill] sm:$0xff] }
 0x59d   : > { %v4719_v53 = vsel %vm2567_vm10, %v4718_v39, %v4714_v19  ;;  %v4502_v29 = vsel %vm13305_vm14, %v4501_v11, %v4497_v25  ;;  %v4576_v51 = vsel %vm14098_vm13, %v4575_v27, %v4571_v20  ;;  %vm14101_vm1 = vmmov %vm14096_vm5  ;;  %v4585_v47 = vrot.slane %v14102_v48, %v14035_v6  ;;  %v14119_v48 = vld [vmem:[#allocation58_spill] sm:$0xff] }
 0x59e   : > { %v4105_v38 = vpop.permute.xlu1 %4104  ;;  %v4724_v33 = vsel %vm14099_vm11, %v4723_v40, %v4719_v53  ;;  %v4581_v58 = vsel %vm13305_vm14, %v4580_v41, %v4576_v51  ;;  %v4655_v10 = vsel %vm14101_vm1, %v4654_v26, %v4650_v63  ;;  %v4733_v52 = vrot.slane %v4108_v22, %v14030_v18  ;;  %vm14104_vm13 = vmmov %vm14101_vm1  ;;  %v14116_v51 = vld [vmem:[#allocation49_spill] sm:$0xff] }
 0x59f   : > { %v4728_v59 = vrot.slane %v4105_v38, %v14027_v14  ;;  %v4660_v57 = vsel %vm13305_vm14, %v4659_v36, %v4655_v10  ;;  %v4669_v0 = vrot.slane %v11680_v62, %v14042_v61  ;;  %v4433_v3 = vsel %vm2609_vm0, %v4432_v45, %v4428_v4  ;;  %v14111_v36 = vld [vmem:[#allocation101_spill] sm:$0xff]  ;;  %v14118_v10 = vld [vmem:[#allocation115_spill] sm:$0xff] }
 0x5a0   : > { %v4507_v56 = vsel %vm2602_vm15, %v4506_v49, %v4502_v29  ;;  %v4664_v39 = vrot.slane %v11548_v37, %v14035_v6  ;;  %vm14103_vm5 = vcmask 1041409   ;;  %v4586_v19 = vsel %vm2602_vm15, %v4585_v47, %v4581_v58  ;;  %v14117_v58 = vld [vmem:[#allocation119_spill] sm:$0xff] }
 0x5a1   : > { %v4729_v2 = vsel %vm2581_vm12, %v4728_v59, %v4724_v33  ;;  %v4750_v11 = vsel %vm14103_vm5, %v11652_v43, %v11647_v46  ;;  %v4512_v31 = vsel %vm2609_vm0, %v4511_v5, %v4507_v56  ;;  %vm14105_vm11 = vcmask 1042434   ;;  %v14114_v59 = vld [vmem:[#allocation81_spill] sm:$0xff] }
 0x5a2   : > { %v4111_v17 = vpop.permute.xlu1 %4110  ;;  %v4734_v62 = vsel %vm14104_vm13, %v4733_v52, %v4729_v2  ;;  %v4751_v4 = vsel %vm14105_vm11, %v11672_v60, %v4750_v11  ;;  %v4591_v49 = vsel %vm2609_vm0, %v4590_v32, %v4586_v19  ;;  %v4665_v20 = vsel %vm2602_vm15, %v4664_v39, %v4660_v57  ;;  %v14120_v52 = vld [vmem:[#allocation92_spill] sm:$0xff]  ;;  %v14123_v39 = vld [vmem:[#allocation70_spill] sm:$0xff] }
 0x5a3   : > { %v4738_v15 = vrot.slane %v4111_v17, %v14033_v12  ;;  %vm14106_vm1 = vcmask 1043459   ;;  %v4743_v41 = vrot.slane %v4114_v7, %v14035_v6  ;;  %v4670_v43 = vsel %vm2609_vm0, %v4669_v0, %v4665_v20  ;;  %v14121_v0 = vld [vmem:[#allocation64_spill] sm:$0xff] }
 0x5a4   : > { %v4752_v23 = vsel %vm14106_vm1, %v4433_v3, %v4751_v4  ;;  %vm14107_vm5 = vcmask 1044484   ;;  %vm14108_vm13 = vcmask 1045509   ;;  %vm14109_vm11 = vcmask 1046534   ;;  %v14122_v3 = vld [vmem:[#allocation97_spill] sm:$0xff]  ;;  %v14128_v20 = vld [vmem:[#allocation80_spill] sm:$0xff] }
 0x5a5   : > { %v4739_v37 = vsel %vm13305_vm14, %v4738_v15, %v4734_v62  ;;  %v4753_v22 = vsel %vm14107_vm5, %v4512_v31, %v4752_v23  ;;  %vm14110_vm14 = vcmask 1047559   ;;  %v14113_v45 = vsub.s32 1, %v14112_v30  ;;  %v14125_v31 = vld [vmem:[#allocation43_spill] sm:$0xff]  ;;  %v14126_v62 = vld [vmem:[#allocation76_spill] sm:$0xff] }
 0x5a6   : > { %v4117_v46 = vpop.permute.xlu1 %4116  ;;  %v4744_v53 = vsel %vm2602_vm15, %v4743_v41, %v4739_v37  ;;  %v4754_v60 = vsel %vm14108_vm13, %v4591_v49, %v4753_v22  ;;  %v14124_v15 = vsub.s32 2, %v14112_v30  ;;  %v14127_v49 = vld [vmem:[#allocation24_spill] sm:$0xff]  ;;  %v14129_v41 = vld [vmem:[#allocation95_spill] sm:$0xff]  ;;  %vm14229_vm1 = vcmask 720512  }
 0x5a7   : > { %v4748_v34 = vrot.slane %v4117_v46, %v14042_v61  ;;  %v4755_v27 = vsel %vm14109_vm11, %v4670_v43, %v4754_v60  ;;  %v14130_v43 = vld [vmem:[#allocation86_spill] sm:$0xff]  ;;  %v14131_v22 = vld [vmem:[#allocation28_spill] sm:$0xff]  ;;  %v14132_v60 = vld [vmem:[#allocation23_spill] sm:$0xff]  ;;  %vm14232_vm5 = vcmask 851712   ;;  %vm14235_vm13 = vcmask 917312  }
 0x5a9   : > { %v4749_v55 = vsel %vm2609_vm0, %v4748_v34, %v4744_v53 }
 0x5aa   : > { %v4756_v40 = vsel %vm14110_vm14, %v4749_v55, %v4755_v27  ;;  %v14133_v27 = vld [vmem:[#allocation112_spill] sm:$0xff]  ;;  %vm14220_vm14 = vcmask 326912  }
 0x5ab   : > { %4758 = vadd.xlane.f32.xlu0 %v4756_v40  ;;  %vm14249_vm11 = vmmov %vm14220_vm14 }
 0x634   : > { %v11879_v63 = vpop.xlane.xlu0 %4758 }
 0x635   : > { %v4764_v38 = vrot.slane %v11879_v63, %v14111_v36  ;;  %v4768_v25 = vrot.slane %v11879_v63, %v14113_v45  ;;  %v4772_v11 = vrot.slane %v11879_v63, %v14124_v15  ;;  %v14134_v36 = vld [vmem:[#allocation69_spill] sm:$0xff] }
 0x637   : > { %7506 = vrcp.f32 %v4764_v38 }
 0x638   : > { %7508 = vrcp.f32 %v4768_v25  ;;  %v14135_v25 = vld [vmem:[#allocation31_spill] sm:$0xff] }
 0x639   : > { %7510 = vrcp.f32 %v4772_v11  ;;  %v14146_v11 = vld [vmem:[#allocation100_spill] sm:$0xff] }
 0x644   : > { %v7507_v26 = vpop.eup %7506 }
 0x645   : > { %v4810_v29 = vmul.f32 %v7507_v26, %v14114_v59  ;;  %v4802_v5 = vmul.f32 %v7507_v26, %v14115_v24  ;;  %v4816_v33 = vmul.f32 %v7507_v26, %v14116_v51  ;;  %v4803_v50 = vmul.f32 %v7507_v26, %v14117_v58  ;;  %v11890_v32 = vpop.eup %7508 }
 0x646   : > { %v4819_v2 = vmul.f32 %v11890_v32, %v14118_v10  ;;  %v4804_v47 = vmul.f32 %v7507_v26, %v14119_v48  ;;  %v4821_v57 = vmul.f32 %v11890_v32, %v14120_v52  ;;  %v4805_v17 = vmul.f32 %v7507_v26, %v14121_v0  ;;  %v11919_v45 = vpop.eup %7510 }
 0x647   : > { %4979 = vperm.xlu0 %7249, %v4810_v29   ;;  %4939 = vperm.xlu1 %7248, %v4802_v5   ;;  %v4823_v56 = vmul.f32 %v11890_v32, %v14122_v3  ;;  %v4806_v7 = vmul.f32 %v7507_v26, %v14123_v39  ;;  %v4825_v19 = vmul.f32 %v11890_v32, %v14125_v31  ;;  %v14136_v29 = vld [vmem:[#allocation106_spill] sm:$0xff] }
 0x648   : > { %v4807_v4 = vmul.f32 %v7507_v26, %v14126_v62  ;;  %v4827_v37 = vmul.f32 %v11890_v32, %v14127_v49  ;;  %v4808_v23 = vmul.f32 %v7507_v26, %v14128_v20  ;;  %v4829_v46 = vmul.f32 %v11890_v32, %v14129_v41  ;;  %v14137_v5 = vld [vmem:[#allocation90_spill] sm:$0xff]  ;;  %v14149_v49 = vld [vmem:[#allocation27_spill] sm:$0xff]  ;;  %v14150_v20 = vld [vmem:[#allocation29_spill] sm:$0xff] }
 0x649   : > { %v4809_v34 = vmul.f32 %v7507_v26, %v14130_v43  ;;  %v4831_v53 = vmul.f32 %v11890_v32, %v14131_v22  ;;  %v4811_v55 = vmul.f32 %v7507_v26, %v14132_v60  ;;  %v4833_v40 = vmul.f32 %v11890_v32, %v14133_v27  ;;  %v14151_v41 = vld [vmem:[#allocation108_spill] sm:$0xff] }
 0x64a   : > { %v4812_v38 = vmul.f32 %v7507_v26, %v14134_v36  ;;  %v4836_v59 = vmul.f32 %v11919_v45, %v14135_v25  ;;  %v4813_v24 = vmul.f32 %v7507_v26, %v14136_v29  ;;  %v4838_v51 = vmul.f32 %v11919_v45, %v14137_v5 }
 0x64b   : > { %5009 = vperm.xlu0 %7249, %v4816_v33   ;;  %4944 = vperm.xlu1 %7248, %v4803_v50   ;;  %v14138_v33 = vld [vmem:[#allocation93_spill] sm:$0xff]  ;;  %v14139_v50 = vld [vmem:[#allocation83_spill] sm:$0xff]  ;;  %v4846_v31 = vmul.f32 %v11919_v45, %v14146_v11  ;;  %v14168_v11 = vld [vmem:[#allocation52_spill] sm:$0xff] }
 0x64c   : > { %v4814_v58 = vmul.f32 %v7507_v26, %v14138_v33  ;;  %v4840_v10 = vmul.f32 %v11919_v45, %v14139_v50 }
 0x64f   : > { %5019 = vperm.xlu0 %7249, %v4819_v2   ;;  %4949 = vperm.xlu1 %7248, %v4804_v47   ;;  %v14140_v2 = vld [vmem:[#allocation26_spill] sm:$0xff]  ;;  %v14141_v47 = vsub.s32 3, %v14112_v30 }
 0x650   : > { %v4815_v48 = vmul.f32 %v7507_v26, %v14140_v2 }
 0x651   : > { %v4776_v52 = vrot.slane %v11879_v63, %v14141_v47 }
 0x653   : > { %5029 = vperm.xlu0 %7249, %v4821_v57   ;;  %4954 = vperm.xlu1 %7248, %v4805_v17   ;;  %v14142_v57 = vld [vmem:[#allocation105_spill] sm:$0xff]  ;;  %7512 = vrcp.f32 %v4776_v52  ;;  %v14163_v52 = vld [vmem:[#allocation30_spill] sm:$0xff] }
 0x654   : > { %v4842_v0 = vmul.f32 %v11919_v45, %v14142_v57  ;;  %v14143_v17 = vld [vmem:[#allocation109_spill] sm:$0xff] }
 0x655   : > { %v4817_v3 = vmul.f32 %v7507_v26, %v14143_v17  ;;  %v14148_v26 = vld [vmem:[#allocation111_spill] sm:$0xff] }
 0x657   : > { %5039 = vperm.xlu0 %7249, %v4823_v56   ;;  %4959 = vperm.xlu1 %7248, %v4806_v7   ;;  %v14144_v56 = vld [vmem:[#allocation98_spill] sm:$0xff]  ;;  %v14145_v7 = vld [vmem:[#allocation45_spill] sm:$0xff] }
 0x658   : > { %v4844_v39 = vmul.f32 %v11919_v45, %v14144_v56  ;;  %v4820_v15 = vmul.f32 %v11890_v32, %v14145_v7  ;;  %v14166_v56 = vld [vmem:[#allocation65_spill] sm:$0xff]  ;;  %v14167_v7 = vld [vmem:[#allocation34_spill] sm:$0xff] }
 0x65b   : > { %5049 = vperm.xlu0 %7249, %v4825_v19   ;;  %4964 = vperm.xlu1 %7248, %v4807_v4   ;;  %v14147_v19 = vld [vmem:[#allocation47_spill] sm:$0xff]  ;;  %v4848_v4 = vmul.f32 %v11919_v45, %v14148_v26 }
 0x65c   : > { %v4822_v62 = vmul.f32 %v11890_v32, %v14147_v19 }
 0x65f   : > { %5059 = vperm.xlu0 %7249, %v4827_v37   ;;  %4969 = vperm.xlu1 %7248, %v4808_v23   ;;  %v4824_v37 = vmul.f32 %v11890_v32, %v14149_v49  ;;  %v4850_v23 = vmul.f32 %v11919_v45, %v14150_v20 }
 0x660   : > { %v11952_v43 = vpop.eup %7512 }
 0x661   : > { %v4863_v57 = vmul.f32 %v11952_v43, %v14163_v52  ;;  %v14183_v52 = vld [vmem:[#allocation36_spill] sm:$0xff] }
 0x663   : > { %5069 = vperm.xlu0 %7249, %v4829_v46   ;;  %4974 = vperm.xlu1 %7248, %v4809_v34   ;;  %v4826_v46 = vmul.f32 %v11890_v32, %v14151_v41  ;;  %v14152_v34 = vld [vmem:[#allocation32_spill] sm:$0xff] }
 0x664   : > { %v4853_v22 = vmul.f32 %v11952_v43, %v14152_v34 }
 0x667   : > { %5079 = vperm.xlu0 %7249, %v4831_v53   ;;  %4984 = vperm.xlu1 %7248, %v4811_v55   ;;  %v14153_v53 = vld [vmem:[#allocation114_spill] sm:$0xff]  ;;  %v14154_v55 = vld [vmem:[#allocation91_spill] sm:$0xff] }
 0x668   : > { %v4828_v60 = vmul.f32 %v11890_v32, %v14153_v53  ;;  %v4855_v27 = vmul.f32 %v11952_v43, %v14154_v55 }
 0x66b   : > { %5089 = vperm.xlu0 %7249, %v4833_v40   ;;  %4989 = vperm.xlu1 %7248, %v4812_v38   ;;  %v14155_v40 = vld [vmem:[#allocation118_spill] sm:$0xff]  ;;  %v14156_v38 = vld [vmem:[#allocation25_spill] sm:$0xff] }
 0x66c   : > { %v4830_v36 = vmul.f32 %v11890_v32, %v14155_v40  ;;  %v4857_v25 = vmul.f32 %v11952_v43, %v14156_v38 }
 0x66f   : > { %5099 = vperm.xlu0 %7249, %v4836_v59   ;;  %4994 = vperm.xlu1 %7248, %v4813_v24   ;;  %v14157_v59 = vld [vmem:[#allocation55_spill] sm:$0xff]  ;;  %v14158_v24 = vsub.s32 4, %v14112_v30 }
 0x670   : > { %v4832_v29 = vmul.f32 %v11890_v32, %v14157_v59 }
 0x671   : > { %v4780_v5 = vrot.slane %v11879_v63, %v14158_v24 }
 0x673   : > { %5109 = vperm.xlu0 %7249, %v4838_v51   ;;  %4999 = vperm.xlu1 %7248, %v4814_v58   ;;  %v14159_v51 = vld [vmem:[#allocation107_spill] sm:$0xff]  ;;  %7514 = vrcp.f32 %v4780_v5 }
 0x674   : > { %v4859_v33 = vmul.f32 %v11952_v43, %v14159_v51  ;;  %v14160_v58 = vld [vmem:[#allocation103_spill] sm:$0xff] }
 0x675   : > { %v4834_v50 = vmul.f32 %v11890_v32, %v14160_v58  ;;  %v14165_v32 = vld [vmem:[#allocation72_spill] sm:$0xff]  ;;  %v14180_v5 = vld [vmem:[#allocation99_spill] sm:$0xff] }
 0x677   : > { %5119 = vperm.xlu0 %7249, %v4840_v10   ;;  %5004 = vperm.xlu1 %7248, %v4815_v48   ;;  %v14161_v10 = vld [vmem:[#allocation113_spill] sm:$0xff]  ;;  %v14162_v48 = vld [vmem:[#allocation46_spill] sm:$0xff] }
 0x678   : > { %v4861_v2 = vmul.f32 %v11952_v43, %v14161_v10  ;;  %v4837_v47 = vmul.f32 %v11919_v45, %v14162_v48  ;;  %v14182_v10 = vld [vmem:[#allocation79_spill] sm:$0xff] }
 0x67b   : > { %5129 = vperm.xlu0 %7249, %v4842_v0   ;;  %5014 = vperm.xlu1 %7248, %v4817_v3   ;;  %v14164_v0 = vld [vmem:[#allocation48_spill] sm:$0xff]  ;;  %v4865_v3 = vmul.f32 %v11952_v43, %v14165_v32 }
 0x67c   : > { %v4839_v17 = vmul.f32 %v11919_v45, %v14164_v0  ;;  %v14184_v0 = vld [vmem:[#allocation120_spill] sm:$0xff] }
 0x67f   : > { %5139 = vperm.xlu0 %7249, %v4844_v39   ;;  %5024 = vperm.xlu1 %7248, %v4820_v15   ;;  %v4841_v39 = vmul.f32 %v11919_v45, %v14166_v56  ;;  %v4867_v15 = vmul.f32 %v11952_v43, %v14167_v7 }
 0x680   : > { %v11989_v19 = vpop.eup %7514 }
 0x681   : > { %v4880_v51 = vmul.f32 %v11989_v19, %v14180_v5 }
 0x683   : > { %5149 = vperm.xlu0 %7249, %v4846_v31   ;;  %5034 = vperm.xlu1 %7248, %v4822_v62   ;;  %v4843_v31 = vmul.f32 %v11919_v45, %v14168_v11  ;;  %v14169_v62 = vld [vmem:[#allocation63_spill] sm:$0xff] }
 0x684   : > { %v4870_v26 = vmul.f32 %v11989_v19, %v14169_v62 }
 0x687   : > { %5159 = vperm.xlu0 %7249, %v4848_v4   ;;  %5044 = vperm.xlu1 %7248, %v4824_v37   ;;  %v14170_v4 = vld [vmem:[#allocation71_spill] sm:$0xff]  ;;  %v14171_v37 = vld [vmem:[#allocation50_spill] sm:$0xff] }
 0x688   : > { %v4845_v49 = vmul.f32 %v11919_v45, %v14170_v4  ;;  %v4872_v20 = vmul.f32 %v11989_v19, %v14171_v37 }
 0x68b   : > { %5169 = vperm.xlu0 %7249, %v4850_v23   ;;  %5054 = vperm.xlu1 %7248, %v4826_v46   ;;  %v14172_v23 = vld [vmem:[#allocation122_spill] sm:$0xff]  ;;  %v14173_v46 = vld [vmem:[#allocation67_spill] sm:$0xff] }
 0x68c   : > { %v4847_v41 = vmul.f32 %v11919_v45, %v14172_v23  ;;  %v4874_v34 = vmul.f32 %v11989_v19, %v14173_v46 }
 0x68f   : > { %5179 = vperm.xlu0 %7249, %v4853_v22   ;;  %5064 = vperm.xlu1 %7248, %v4828_v60   ;;  %v14174_v22 = vld [vmem:[#allocation53_spill] sm:$0xff]  ;;  %v14175_v60 = vsub.s32 5, %v14112_v30 }
 0x690   : > { %v4849_v53 = vmul.f32 %v11919_v45, %v14174_v22 }
 0x691   : > { %v4784_v55 = vrot.slane %v11879_v63, %v14175_v60 }
 0x693   : > { %5189 = vperm.xlu0 %7249, %v4855_v27   ;;  %5074 = vperm.xlu1 %7248, %v4830_v36   ;;  %v14176_v27 = vld [vmem:[#allocation54_spill] sm:$0xff]  ;;  %v14177_v36 = vld [vmem:[#allocation116_spill] sm:$0xff]  ;;  %7516 = vrcp.f32 %v4784_v55 }
 0x694   : > { %v4876_v40 = vmul.f32 %v11989_v19, %v14176_v27  ;;  %v4851_v38 = vmul.f32 %v11919_v45, %v14177_v36  ;;  %v14191_v55 = vld [vmem:[#allocation66_spill] sm:$0xff] }
 0x695   : > { %v4866_v27 = vmul.f32 %v11952_v43, %v14191_v55 }
 0x697   : > { %5199 = vperm.xlu0 %7249, %v4857_v25   ;;  %5084 = vperm.xlu1 %7248, %v4832_v29   ;;  %v14178_v25 = vld [vmem:[#allocation73_spill] sm:$0xff] }
 0x698   : > { %v4878_v59 = vmul.f32 %v11989_v19, %v14178_v25  ;;  %v14179_v29 = vld [vmem:[#allocation117_spill] sm:$0xff] }
 0x699   : > { %v4854_v24 = vmul.f32 %v11952_v43, %v14179_v29 }
 0x69b   : > { %5209 = vperm.xlu0 %7249, %v4859_v33   ;;  %5094 = vperm.xlu1 %7248, %v4834_v50   ;;  %v14181_v50 = vld [vmem:[#allocation123_spill] sm:$0xff] }
 0x69c   : > { %v4856_v45 = vmul.f32 %v11952_v43, %v14181_v50 }
 0x69f   : > { %5219 = vperm.xlu0 %7249, %v4861_v2   ;;  %5104 = vperm.xlu1 %7248, %v4837_v47   ;;  %v4882_v2 = vmul.f32 %v11989_v19, %v14182_v10 }
 0x6a0   : > { %v12032_v32 = vpop.eup %7516 }
 0x6a3   : > { %5229 = vperm.xlu0 %7249, %v4863_v57   ;;  %5114 = vperm.xlu1 %7248, %v4839_v17   ;;  %v4858_v57 = vmul.f32 %v11952_v43, %v14183_v52  ;;  %v4884_v17 = vmul.f32 %v11989_v19, %v14184_v0 }
 0x6a7   : > { %5239 = vperm.xlu0 %7249, %v4865_v3   ;;  %5124 = vperm.xlu1 %7248, %v4841_v39   ;;  %v14185_v39 = vld [vmem:[#allocation38_spill] sm:$0xff] }
 0x6a8   : > { %v4860_v7 = vmul.f32 %v11952_v43, %v14185_v39  ;;  %v14198_v39 = vld [vmem:[#allocation42_spill] sm:$0xff] }
 0x6ab   : > { %5249 = vperm.xlu0 %7249, %v4867_v15   ;;  %5134 = vperm.xlu1 %7248, %v4843_v31   ;;  %v14186_v15 = vld [vmem:[#allocation37_spill] sm:$0xff] }
 0x6ac   : > { %v4887_v11 = vmul.f32 %v12032_v32, %v14186_v15  ;;  %v14199_v15 = vsub.s32 7, %v14112_v30 }
 0x6af   : > { %5259 = vperm.xlu0 %7249, %v4870_v26   ;;  %5144 = vperm.xlu1 %7248, %v4845_v49   ;;  %v14187_v26 = vld [vmem:[#allocation57_spill] sm:$0xff]  ;;  %v14188_v49 = vld [vmem:[#allocation59_spill] sm:$0xff] }
 0x6b0   : > { %v4862_v4 = vmul.f32 %v11952_v43, %v14187_v26  ;;  %v4889_v37 = vmul.f32 %v12032_v32, %v14188_v49  ;;  %v14200_v26 = vld [vmem:[#allocation136_spill] sm:$0xff] }
 0x6b3   : > { %5269 = vperm.xlu0 %7249, %v4872_v20   ;;  %5154 = vperm.xlu1 %7248, %v4847_v41   ;;  %v14189_v41 = vld [vmem:[#allocation77_spill] sm:$0xff] }
 0x6b4   : > { %v4864_v46 = vmul.f32 %v11952_v43, %v14189_v41  ;;  %v14201_v41 = vld [vmem:[#allocation132_spill] sm:$0xff] }
 0x6b7   : > { %5279 = vperm.xlu0 %7249, %v4874_v34   ;;  %5164 = vperm.xlu1 %7248, %v4849_v53   ;;  %v14190_v34 = vld [vmem:[#allocation131_spill] sm:$0xff] }
 0x6b8   : > { %v4891_v22 = vmul.f32 %v12032_v32, %v14190_v34  ;;  %v14202_v34 = vld [vmem:[#allocation139_spill] sm:$0xff] }
 0x6bb   : > { %5289 = vperm.xlu0 %7249, %v4876_v40   ;;  %5174 = vperm.xlu1 %7248, %v4851_v38   ;;  %v14192_v40 = vsub.s32 6, %v14112_v30  ;;  %v14193_v38 = vld [vmem:[#allocation44_spill] sm:$0xff] }
 0x6bc   : > { %v4893_v25 = vmul.f32 %v12032_v32, %v14193_v38 }
 0x6bd   : > { %v4788_v36 = vrot.slane %v11879_v63, %v14192_v40 }
 0x6bf   : > { %5299 = vperm.xlu0 %7249, %v4878_v59   ;;  %5184 = vperm.xlu1 %7248, %v4854_v24   ;;  %v14194_v24 = vld [vmem:[#allocation35_spill] sm:$0xff]  ;;  %7518 = vrcp.f32 %v4788_v36  ;;  %v14204_v36 = vld [vmem:[#allocation141_spill] sm:$0xff] }
 0x6c0   : > { %v4868_v5 = vmul.f32 %v11952_v43, %v14194_v24 }
 0x6c2   : > { %v12016_v33 = vpop.permute.xlu0 %4979  ;;  %v12018_v58 = vpop.permute.xlu1 %4939 }
 0x6c3   : > { %5309 = vperm.xlu0 %7249, %v4880_v51   ;;  %5194 = vperm.xlu1 %7248, %v4856_v45   ;;  %v14195_v51 = vld [vmem:[#allocation126_spill] sm:$0xff] }
 0x6c4   : > { %v4895_v50 = vmul.f32 %v12032_v32, %v14195_v51 }
 0x6c6   : > { %v12024_v48 = vpop.permute.xlu0 %5009  ;;  %v12026_v47 = vpop.permute.xlu1 %4944 }
 0x6c7   : > { %5319 = vperm.xlu0 %7249, %v4882_v2   ;;  %5204 = vperm.xlu1 %7248, %v4858_v57   ;;  %v14196_v2 = vld [vmem:[#allocation39_spill] sm:$0xff]  ;;  %v14197_v57 = vld [vmem:[#allocation134_spill] sm:$0xff] }
 0x6c8   : > { %v4871_v52 = vmul.f32 %v11989_v19, %v14196_v2  ;;  %v4897_v0 = vmul.f32 %v12032_v32, %v14197_v57 }
 0x6ca   : > { %v12034_v3 = vpop.permute.xlu0 %5019  ;;  %v12036_v56 = vpop.permute.xlu1 %4949 }
 0x6cb   : > { %5329 = vperm.xlu0 %7249, %v4884_v17   ;;  %5214 = vperm.xlu1 %7248, %v4860_v7   ;;  %v4873_v7 = vmul.f32 %v11989_v19, %v14198_v39 }
 0x6cc   : > { %v12104_v55 = vpop.eup %7518 }
 0x6cd   : > { %v4904_v38 = vmul.f32 %v12104_v55, %v14204_v36  ;;  %v14213_v36 = vld [vmem:[#allocation140_spill] sm:$0xff] }
 0x6ce   : > { %v12042_v31 = vpop.permute.xlu0 %5029  ;;  %v12044_v62 = vpop.permute.xlu1 %4954 }
 0x6cf   : > { %5339 = vperm.xlu0 %7249, %v4887_v11   ;;  %5224 = vperm.xlu1 %7248, %v4862_v4   ;;  %v4792_v11 = vrot.slane %v11879_v63, %v14199_v15  ;;  %v4899_v4 = vmul.f32 %v12032_v32, %v14200_v26 }
 0x6d1   : > { %7520 = vrcp.f32 %v4792_v11 }
 0x6d2   : > { %v12050_v20 = vpop.permute.xlu0 %5039  ;;  %v12052_v23 = vpop.permute.xlu1 %4959 }
 0x6d3   : > { %5349 = vperm.xlu0 %7249, %v4889_v37   ;;  %5234 = vperm.xlu1 %7248, %v4864_v46   ;;  %v4875_v46 = vmul.f32 %v11989_v19, %v14201_v41  ;;  %v14210_v41 = vld [vmem:[#allocation88_spill] sm:$0xff] }
 0x6d6   : > { %v12058_v53 = vpop.permute.xlu0 %5049  ;;  %v12060_v60 = vpop.permute.xlu1 %4964 }
 0x6d7   : > { %5359 = vperm.xlu0 %7249, %v4891_v22   ;;  %5244 = vperm.xlu1 %7248, %v4866_v27   ;;  %v4901_v22 = vmul.f32 %v12032_v32, %v14202_v34  ;;  %v14203_v27 = vld [vmem:[#allocation60_spill] sm:$0xff]  ;;  %v14211_v34 = vld [vmem:[#allocation174_spill] sm:$0xff] }
 0x6d8   : > { %v4877_v40 = vmul.f32 %v11989_v19, %v14203_v27 }
 0x6da   : > { %v12069_v59 = vpop.permute.xlu0 %5059  ;;  %v12071_v29 = vpop.permute.xlu1 %4969 }
 0x6db   : > { %5369 = vperm.xlu0 %7249, %v4893_v25   ;;  %5254 = vperm.xlu1 %7248, %v4868_v5   ;;  %v14205_v5 = vld [vmem:[#allocation124_spill] sm:$0xff] }
 0x6dc   : > { %v4879_v51 = vmul.f32 %v11989_v19, %v14205_v5  ;;  %v7523_v5 = vld [vmem:[%s8111_s27 + $0x80] sm:$0xff] }
 0x6de   : > { %v12077_v45 = vpop.permute.xlu0 %5069  ;;  %v12079_v10 = vpop.permute.xlu1 %4974 }
 0x6df   : > { %5379 = vperm.xlu0 %7249, %v4895_v50   ;;  %5264 = vperm.xlu1 %7248, %v4871_v52   ;;  %v14206_v50 = vld [vmem:[#allocation143_spill] sm:$0xff]  ;;  %v12130_v11 = vpop.eup %7520 }
 0x6e0   : > { %v4906_v2 = vmul.f32 %v12104_v55, %v14206_v50  ;;  %v7524_v50 = vld [vmem:[%s8111_s27 + $0x88] sm:$0xff] }
 0x6e2   : > { %v12085_v17 = vpop.permute.xlu0 %5079  ;;  %v12087_v43 = vpop.permute.xlu1 %4984 }
 0x6e3   : > { %5389 = vperm.xlu0 %7249, %v4897_v0   ;;  %5274 = vperm.xlu1 %7248, %v4873_v7   ;;  %v14207_v0 = vld [vmem:[#allocation125_spill] sm:$0xff] }
 0x6e4   : > { %v4881_v39 = vmul.f32 %v11989_v19, %v14207_v0  ;;  %v14208_v7 = vld [vmem:[#allocation145_spill] sm:$0xff]  ;;  %v5972_v0 = vrot.slane %v12034_v3, %v14013_v8 }
 0x6e5   : > { %v4908_v15 = vmul.f32 %v12104_v55, %v14208_v7  ;;  %v7525_v7 = vld [vmem:[%s8111_s27 + $0x90] sm:$0xff] }
 0x6e6   : > { %v12096_v49 = vpop.permute.xlu0 %5089  ;;  %v12098_v37 = vpop.permute.xlu1 %4989 }
 0x6e7   : > { %5399 = vperm.xlu0 %7249, %v4899_v4   ;;  %5284 = vperm.xlu1 %7248, %v4875_v46   ;;  %v4883_v46 = vmul.f32 %v11989_v19, %v14210_v41 }
 0x6ea   : > { %v12106_v30 = vpop.permute.xlu0 %5099  ;;  %v12108_v63 = vpop.permute.xlu1 %4994 }
 0x6eb   : > { %5409 = vperm.xlu0 %7249, %v4901_v22   ;;  %5294 = vperm.xlu1 %7248, %v4877_v40   ;;  %v4922_v22 = vmul.f32 %v12130_v11, %v14211_v34 }
 0x6ee   : > { %v12114_v25 = vpop.permute.xlu0 %5109  ;;  %v12116_v24 = vpop.permute.xlu1 %4999 }
 0x6ef   : > { %5419 = vperm.xlu0 %7249, %v4904_v38   ;;  %5304 = vperm.xlu1 %7248, %v4879_v51   ;;  %v4885_v38 = vmul.f32 %v11989_v19, %v14213_v36  ;;  %v5593_v51 = vmul.f32 %v7523_v5, %v12034_v3  ;;  %v5981_v3 = vrot.slane %v12042_v31, %v14014_v16 }
 0x6f2   : > { %v12122_v52 = vpop.permute.xlu0 %5119  ;;  %v12124_v57 = vpop.permute.xlu1 %5004 }
 0x6f3   : > { %5429 = vperm.xlu0 %7249, %v4906_v2   ;;  %5314 = vperm.xlu1 %7248, %v4881_v39  }
 0x6f6   : > { %v12132_v26 = vpop.permute.xlu0 %5129  ;;  %v12134_v4 = vpop.permute.xlu1 %5014 }
 0x6f7   : > { %14209 = vst [vmem:[#allocation62_spill] sm:$0xff] %v12134_v4  ;;  %5439 = vperm.xlu0 %7249, %v4908_v15   ;;  %5324 = vperm.xlu1 %7248, %v4883_v46   ;;  %v5595_v15 = vmul.f32 %v7525_v7, %v12042_v31  ;;  %v14214_v46 = vld [vmem:[#allocation176_spill] sm:$0xff] }
 0x6f8   : > { %v4924_v19 = vmul.f32 %v12130_v11, %v14214_v46  ;;  %v7527_v46 = vld [vmem:[%s8111_s27 + $0xa0] sm:$0xff]  ;;  %v7533_v4 = vld [vmem:[%s8111_s27 + $0x18] sm:$0xff] }
 0x6fa   : > { %v12140_v27 = vpop.permute.xlu0 %5139  ;;  %v5025_v40 = vpop.permute.xlu1 %5024 }
 0x6fb   : > { %14212 = vst [vmem:[#allocation68_spill] sm:$0xff] %v12140_v27  ;;  %v5594_v2 = vmul.f32 %v7524_v50, %v5025_v40  ;;  %5504 = vperm.xlu0 %7249, %v4922_v22   ;;  %v5976_v39 = vrot.slane %v5025_v40, %v14012_v54  ;;  %5334 = vperm.xlu1 %7248, %v4885_v38   ;;  %v14216_v22 = vld [vmem:[#allocation142_spill] sm:$0xff]  ;;  %v7526_v38 = vld [vmem:[%s8111_s27 + $0x98] sm:$0xff] }
 0x6fc   : > { %v4888_v50 = vmul.f32 %v12032_v32, %v14216_v22  ;;  %v5597_v22 = vmul.f32 %v7527_v46, %v12050_v20  ;;  %v7531_v46 = vld [vmem:[%s8111_s27 + $0x10] sm:$0xff] }
 0x6fd   : > { %v5726_v41 = vadd.f32 %v5594_v2, %v5593_v51  ;;  %v5977_v34 = vsel %vm2511_vm2, %v5976_v39, %v5972_v0  ;;  %v14217_v0 = vld [vmem:[#allocation159_spill] sm:$0xff] }
 0x6fe   : > { %v12155_v36 = vpop.permute.xlu0 %5149  ;;  %v5035_v5 = vpop.permute.xlu1 %5034  ;;  %v5982_v2 = vsel %vm2518_vm3, %v5981_v3, %v5977_v34  ;;  %v4909_v39 = vmul.f32 %v12104_v55, %v14217_v0  ;;  %v5991_v3 = vrot.slane %v12050_v20, %v14018_v1  ;;  %v7529_v0 = vld [vmem:[%s8111_s27 + $0xa8] sm:$0xff] }
 0x6ff   : > { %14215 = vst [vmem:[#allocation74_spill] sm:$0xff] %v12155_v36  ;;  %v5727_v40 = vadd.f32 %v5726_v41, %v5595_v15  ;;  %5514 = vperm.xlu0 %7249, %v4924_v19   ;;  %v5596_v7 = vmul.f32 %v7526_v38, %v5035_v5  ;;  %v5986_v51 = vrot.slane %v5035_v5, %v14016_v13  ;;  %v14219_v19 = vld [vmem:[#allocation144_spill] sm:$0xff] }
 0x700   : > { %5344 = vperm.xlu1 %7248, %v4888_v50   ;;  %v4890_v5 = vmul.f32 %v12032_v32, %v14219_v19  ;;  %v7528_v50 = vld [vmem:[%s8111_s27 + $0x8] sm:$0xff]  ;;  %v5579_v19 = vmul.f32 %v7531_v46, %v12036_v56 }
 0x701   : > { %v5728_v36 = vadd.f32 %v5727_v40, %v5596_v7  ;;  %v5987_v31 = vsel %vm2525_vm4, %v5986_v51, %v5982_v2  ;;  %v5578_v34 = vmul.f32 %v7528_v50, %v12026_v47  ;;  %v7530_v51 = vld [vmem:[%s8111_s27] sm:$0xff] }
 0x702   : > { %v12169_v15 = vpop.permute.xlu0 %5159  ;;  %v5045_v41 = vpop.permute.xlu1 %5044  ;;  %v5577_v2 = vmul.f32 %v7530_v51, %v12018_v58  ;;  %v5992_v50 = vsel %vm14220_vm14, %v5991_v3, %v5987_v31  ;;  %v14223_v51 = vld [vmem:[#allocation146_spill] sm:$0xff]  ;;  %v5580_v31 = vmul.f32 %v7533_v4, %v12044_v62  ;;  %v7534_v3 = vld [vmem:[%s8111_s27 + $0xb8] sm:$0xff]  ;;  %vm14253_vm14 = vmmov %vm14249_vm11 }
 0x703   : > { %14218 = vst [vmem:[#allocation78_spill] sm:$0xff] %v12169_v15  ;;  %5444 = vperm.xlu0 %7249, %v4909_v39   ;;  %v5729_v38 = vadd.f32 %v5728_v36, %v5597_v22  ;;  %v5598_v40 = vmul.f32 %v7529_v0, %v5045_v41  ;;  %v5996_v7 = vrot.slane %v5045_v41, %v14019_v21  ;;  %v14221_v15 = vld [vmem:[#allocation147_spill] sm:$0xff] }
 0x704   : > { %5354 = vperm.xlu1 %7248, %v4890_v5   ;;  %v4910_v20 = vmul.f32 %v12104_v55, %v14221_v15  ;;  %v7532_v39 = vld [vmem:[%s8111_s27 + $0xb0] sm:$0xff]  ;;  %v4892_v27 = vmul.f32 %v12032_v32, %v14223_v51  ;;  %v5705_v46 = vadd.f32 %v5578_v34, %v5577_v2  ;;  %v6001_v15 = vrot.slane %v12058_v53, %v14020_v35  ;;  %v14224_v2 = vld [vmem:[#allocation128_spill] sm:$0xff] }
 0x705   : > { %v5599_v36 = vmul.f32 %v7532_v39, %v12058_v53  ;;  %v5730_v22 = vadd.f32 %v5729_v38, %v5598_v40  ;;  %v5997_v41 = vsel %vm2539_vm6, %v5996_v7, %v5992_v50  ;;  %v7535_v50 = vld [vmem:[%s8111_s27 + $0x20] sm:$0xff]  ;;  %v4911_v4 = vmul.f32 %v12104_v55, %v14224_v2 }
 0x706   : > { %v12189_v5 = vpop.permute.xlu0 %5169  ;;  %v5055_v0 = vpop.permute.xlu1 %5054  ;;  %v5706_v7 = vadd.f32 %v5705_v46, %v5579_v19  ;;  %v5581_v51 = vmul.f32 %v7535_v50, %v12052_v23  ;;  %v6002_v34 = vsel %vm2546_vm7, %v6001_v15, %v5997_v41  ;;  %v6011_v41 = vrot.slane %v12069_v59, %v14023_v44  ;;  %v7537_v46 = vld [vmem:[%s8111_s27 + $0xc8] sm:$0xff]  ;;  %v14226_v2 = vld [vmem:[#allocation129_spill] sm:$0xff] }
 0x707   : > { %14222 = vst [vmem:[#allocation84_spill] sm:$0xff] %v12189_v5  ;;  %v5600_v39 = vmul.f32 %v7534_v3, %v5055_v0  ;;  %5449 = vperm.xlu0 %7249, %v4910_v20   ;;  %v5731_v38 = vadd.f32 %v5730_v22, %v5599_v36  ;;  %v6006_v40 = vrot.slane %v5055_v0, %v14022_v42  ;;  %v7536_v5 = vld [vmem:[%s8111_s27 + $0xc0] sm:$0xff]  ;;  %v7538_v50 = vld [vmem:[%s8111_s27 + $0x28] sm:$0xff] }
 0x708   : > { %5364 = vperm.xlu1 %7248, %v4892_v27   ;;  %v5601_v53 = vmul.f32 %v7536_v5, %v12069_v59  ;;  %v14225_v27 = vld [vmem:[#allocation61_spill] sm:$0xff]  ;;  %v5707_v0 = vadd.f32 %v5706_v7, %v5580_v31  ;;  %v5582_v5 = vmul.f32 %v7538_v50, %v12060_v60  ;;  %v4912_v31 = vmul.f32 %v12104_v55, %v14226_v2  ;;  %v14227_v7 = vld [vmem:[#allocation82_spill] sm:$0xff]  ;;  %v7542_v2 = vld [vmem:[%s8111_s27 + $0x38] sm:$0xff] }
 0x709   : > { %v5732_v3 = vadd.f32 %v5731_v38, %v5600_v39  ;;  %v6007_v20 = vsel %vm2553_vm8, %v6006_v40, %v6002_v34  ;;  %v4894_v19 = vmul.f32 %v12032_v32, %v14225_v27  ;;  %v4896_v59 = vmul.f32 %v12032_v32, %v14227_v7  ;;  %v7539_v27 = vld [vmem:[%s8111_s27 + $0x30] sm:$0xff] }
 0x70a   : > { %v12207_v36 = vpop.permute.xlu0 %5179  ;;  %v5065_v22 = vpop.permute.xlu1 %5064  ;;  %v5708_v40 = vadd.f32 %v5707_v0, %v5581_v51  ;;  %v6012_v34 = vsel %vm2560_vm9, %v6011_v41, %v6007_v20  ;;  %v6021_v20 = vrot.slane %v12077_v45, %v14028_v9  ;;  %v7541_v0 = vld [vmem:[%s8111_s27 + $0xd8] sm:$0xff]  ;;  %v5584_v7 = vmul.f32 %v7542_v2, %v12079_v10 }
 0x70b   : > { %v5602_v15 = vmul.f32 %v7537_v46, %v5065_v22  ;;  %5454 = vperm.xlu0 %7249, %v4911_v4   ;;  %v5733_v39 = vadd.f32 %v5732_v3, %v5601_v53  ;;  %v6016_v38 = vrot.slane %v5065_v22, %v14025_v28  ;;  %v5583_v4 = vmul.f32 %v7539_v27, %v12071_v29  ;;  %v7540_v46 = vld [vmem:[%s8111_s27 + $0xd0] sm:$0xff]  ;;  %v14233_v2 = vld [vmem:[#allocation148_spill] sm:$0xff] }
 0x70c   : > { %5374 = vperm.xlu1 %7248, %v4894_v19   ;;  %v5603_v53 = vmul.f32 %v7540_v46, %v12077_v45  ;;  %v5709_v50 = vadd.f32 %v5708_v40, %v5582_v5  ;;  %v14231_v46 = vld [vmem:[#allocation127_spill] sm:$0xff] }
 0x70d   : > { %v5734_v3 = vadd.f32 %v5733_v39, %v5602_v15  ;;  %v6017_v22 = vsel %vm2567_vm10, %v6016_v38, %v6012_v34  ;;  %v14230_v38 = vld [vmem:[#allocation163_spill] sm:$0xff]  ;;  %v4898_v45 = vmul.f32 %v12032_v32, %v14231_v46 }
 0x70e   : > { %v12227_v19 = vpop.permute.xlu0 %5189  ;;  %v5075_v51 = vpop.permute.xlu1 %5074  ;;  %v6022_v39 = vsel %vm14229_vm1, %v6021_v20, %v6017_v22  ;;  %v4913_v34 = vmul.f32 %v12104_v55, %v14230_v38  ;;  %v7544_v22 = vld [vmem:[%s8111_s27 + $0xe8] sm:$0xff]  ;;  %v7545_v38 = vld [vmem:[%s8111_s27 + $0x40] sm:$0xff]  ;;  %v7546_v46 = vld [vmem:[%s8111_s27 + $0xf0] sm:$0xff] }
 0x70f   : > { %14228 = vst [vmem:[#allocation94_spill] sm:$0xff] %v12227_v19  ;;  %v5604_v41 = vmul.f32 %v7541_v0, %v5075_v51  ;;  %5459 = vperm.xlu0 %7249, %v4912_v31   ;;  %v5735_v27 = vadd.f32 %v5734_v3, %v5603_v53  ;;  %v6026_v15 = vrot.slane %v5075_v51, %v14027_v14  ;;  %v7543_v0 = vld [vmem:[%s8111_s27 + $0xe0] sm:$0xff] }
 0x710   : > { %5384 = vperm.xlu1 %7248, %v4896_v59   ;;  %v5710_v19 = vadd.f32 %v5709_v50, %v5583_v4  ;;  %v5605_v5 = vmul.f32 %v7543_v0, %v12085_v17  ;;  %v6031_v3 = vrot.slane %v12085_v17, %v14030_v18  ;;  %v5585_v17 = vmul.f32 %v7545_v38, %v12016_v33  ;;  %v14239_v38 = vld [vmem:[#allocation153_spill] sm:$0xff] }
 0x711   : > { %v5736_v40 = vadd.f32 %v5735_v27, %v5604_v41  ;;  %v6027_v31 = vsel %vm2581_vm12, %v6026_v15, %v6022_v39  ;;  %v4914_v27 = vmul.f32 %v12104_v55, %v14233_v2  ;;  %v14234_v15 = vld [vmem:[#allocation151_spill] sm:$0xff] }
 0x712   : > { %v12243_v53 = vpop.permute.xlu0 %5199  ;;  %v5085_v59 = vpop.permute.xlu1 %5084  ;;  %v5711_v20 = vadd.f32 %v5710_v19, %v5584_v7  ;;  %v6032_v41 = vsel %vm14232_vm5, %v6031_v3, %v6027_v31  ;;  %v4900_v39 = vmul.f32 %v12032_v32, %v14234_v15  ;;  %v5607_v19 = vmul.f32 %v7546_v46, %v12096_v49  ;;  %v7548_v3 = vld [vmem:[%s8111_s27 + $0x48] sm:$0xff]  ;;  %v14240_v46 = vld [vmem:[#allocation149_spill] sm:$0xff]  ;;  %vm14257_vm5 = vmmov %vm14229_vm1 }
 0x713   : > { %v5606_v51 = vmul.f32 %v7544_v22, %v5085_v59  ;;  %5464 = vperm.xlu0 %7249, %v4913_v34   ;;  %v5737_v4 = vadd.f32 %v5736_v40, %v5605_v5  ;;  %v6036_v50 = vrot.slane %v5085_v59, %v14033_v12  ;;  %v6041_v5 = vrot.slane %v12096_v49, %v14035_v6  ;;  %v7547_v40 = vld [vmem:[%s8111_s27 + $0xf8] sm:$0xff] }
 0x714   : > { %5394 = vperm.xlu1 %7248, %v4898_v45   ;;  %v5712_v59 = vadd.f32 %v5711_v20, %v5585_v17  ;;  %v5586_v22 = vmul.f32 %v7548_v3, %v12087_v43  ;;  %v4902_v17 = vmul.f32 %v12032_v32, %v14239_v38  ;;  %v6051_v32 = vrot.slane %v12106_v30, %v14013_v8  ;;  %v7552_v38 = vld [vmem:[%s8111_s27 + $0x58] sm:$0xff] }
 0x715   : > { %v5738_v7 = vadd.f32 %v5737_v4, %v5606_v51  ;;  %v6037_v34 = vsel %vm14235_vm13, %v6036_v50, %v6032_v41  ;;  %v14237_v50 = vld [vmem:[#allocation166_spill] sm:$0xff]  ;;  %vm14258_vm13 = vcmask 851712  }
 0x716   : > { %v12259_v0 = vpop.permute.xlu0 %5209  ;;  %v5095_v45 = vpop.permute.xlu1 %5094  ;;  %v6042_v4 = vsel %vm2602_vm15, %v6041_v5, %v6037_v34  ;;  %v4915_v41 = vmul.f32 %v12104_v55, %v14237_v50  ;;  %v7550_v34 = vld [vmem:[%s8111_s27 + $0x100] sm:$0xff]  ;;  %v7551_v5 = vld [vmem:[%s8111_s27 + $0x108] sm:$0xff] }
 0x717   : > { %14236 = vst [vmem:[#allocation41_spill] sm:$0xff] %v12259_v0  ;;  %v5608_v31 = vmul.f32 %v7547_v40, %v5095_v45  ;;  %5469 = vperm.xlu0 %7249, %v4914_v27   ;;  %v5739_v2 = vadd.f32 %v5738_v7, %v5607_v19  ;;  %v6046_v51 = vrot.slane %v5095_v45, %v14042_v61  ;;  %v7549_v19 = vld [vmem:[%s8111_s27 + $0x50] sm:$0xff]  ;;  %v7554_v0 = vld [vmem:[%s8111_s27 + $0x60] sm:$0xff] }
 0x718   : > { %5404 = vperm.xlu1 %7248, %v4900_v39   ;;  %v4916_v39 = vmul.f32 %v12104_v55, %v14240_v46  ;;  %v5587_v7 = vmul.f32 %v7549_v19, %v12098_v37  ;;  %v5609_v45 = vmul.f32 %v7550_v34, %v12106_v30  ;;  %v5588_v46 = vmul.f32 %v7552_v38, %v12108_v63  ;;  %v7553_v19 = vld [vmem:[%s8111_s27 + $0x110] sm:$0xff]  ;;  %v14246_v38 = vld [vmem:[#allocation154_spill] sm:$0xff] }
 0x719   : > { %v12270_v49 = vadd.f32 %v5739_v2, %v5608_v31  ;;  %v12273_v15 = vsel %vm2609_vm0, %v6046_v51, %v6042_v4  ;;  %v14241_v31 = vld [vmem:[#allocation155_spill] sm:$0xff]  ;;  %v5713_v2 = vadd.f32 %v5712_v59, %v5586_v22  ;;  %v14242_v4 = vld [vmem:[#allocation130_spill] sm:$0xff]  ;;  %v6060_v59 = vrot.slane %v12114_v25, %v14014_v16 }
 0x71a   : > { %v12275_v20 = vpop.permute.xlu0 %5219  ;;  %v5105_v27 = vpop.permute.xlu1 %5104  ;;  %v4905_v3 = vmul.f32 %v12104_v55, %v14241_v31  ;;  %v4917_v50 = vmul.f32 %v12104_v55, %v14242_v4  ;;  %v14245_v31 = vld [vmem:[#allocation152_spill] sm:$0xff] }
 0x71b   : > { %14238 = vst [vmem:[#allocation85_spill] sm:$0xff] %v12275_v20  ;;  %v5610_v40 = vmul.f32 %v7551_v5, %v5105_v27  ;;  %5474 = vperm.xlu0 %7249, %v4915_v41   ;;  %v6055_v51 = vrot.slane %v5105_v27, %v14012_v54  ;;  %v5611_v41 = vmul.f32 %v7553_v19, %v12114_v25 }
 0x71c   : > { %5414 = vperm.xlu1 %7248, %v4902_v17   ;;  %v14244_v17 = vld [vmem:[#allocation157_spill] sm:$0xff]  ;;  %v4918_v4 = vmul.f32 %v12104_v55, %v14245_v31  ;;  %v4921_v20 = vmul.f32 %v12130_v11, %v14246_v38  ;;  %v5714_v19 = vadd.f32 %v5713_v2, %v5587_v7  ;;  %v5589_v25 = vmul.f32 %v7554_v0, %v12116_v24  ;;  %v14248_v38 = vld [vmem:[#allocation156_spill] sm:$0xff] }
 0x71d   : > { %v5747_v22 = vadd.f32 %v5610_v40, %v5609_v45  ;;  %v6056_v30 = vsel %vm2511_vm2, %v6055_v51, %v6051_v32  ;;  %v4907_v5 = vmul.f32 %v12104_v55, %v14244_v17  ;;  %v7555_v32 = vld [vmem:[%s8111_s27 + $0x118] sm:$0xff]  ;;  %v12319_v7 = vmul.f32 %v12130_v11, %v14248_v38  ;;  %v7558_v38 = vld [vmem:[%s8111_s27 + $0x128] sm:$0xff] }
 0x71e   : > { %v12300_v34 = vpop.permute.xlu0 %5229  ;;  %v5115_v27 = vpop.permute.xlu1 %5114  ;;  %v6061_v40 = vsel %vm2518_vm3, %v6060_v59, %v6056_v30  ;;  %v5897_v0 = vrot.slane %v12026_v47, %v14012_v54  ;;  %v5715_v2 = vadd.f32 %v5714_v19, %v5588_v46  ;;  %v5902_v46 = vrot.slane %v12036_v56, %v14014_v16  ;;  %v7559_v56 = vld [vmem:[%s8111_s27 + $0x70] sm:$0xff] }
 0x71f   : > { %14243 = vst [vmem:[#allocation87_spill] sm:$0xff] %v12300_v34  ;;  %v5748_v45 = vadd.f32 %v5747_v22, %v5611_v41  ;;  %5479 = vperm.xlu0 %7249, %v4916_v39   ;;  %v5612_v51 = vmul.f32 %v7555_v32, %v5115_v27  ;;  %v6065_v17 = vrot.slane %v5115_v27, %v14016_v13  ;;  %v14247_v34 = vld [vmem:[#allocation172_spill] sm:$0xff]  ;;  %v7556_v41 = vld [vmem:[%s8111_s27 + $0x68] sm:$0xff] }
 0x720   : > { %5424 = vperm.xlu1 %7248, %v4905_v3   ;;  %v12315_v31 = vmul.f32 %v12104_v55, %v14247_v34  ;;  %v6070_v39 = vrot.slane %v12122_v52, %v14018_v1  ;;  %v5590_v59 = vmul.f32 %v7556_v41, %v12124_v57  ;;  %v5893_v3 = vrot.slane %v12018_v58, %v14013_v8  ;;  %v7557_v55 = vld [vmem:[%s8111_s27 + $0x120] sm:$0xff] }
 0x721   : > { %v5613_v22 = vmul.f32 %v7557_v55, %v12122_v52  ;;  %v5749_v30 = vadd.f32 %v5748_v45, %v5612_v51  ;;  %v6066_v34 = vsel %vm2525_vm4, %v6065_v17, %v6061_v40  ;;  %v5716_v19 = vadd.f32 %v5715_v2, %v5589_v25  ;;  %v14250_v40 = vld [vmem:[#allocation158_spill] sm:$0xff] }
 0x722   : > { %v12332_v27 = vpop.permute.xlu0 %5239  ;;  %v5125_v47 = vpop.permute.xlu1 %5124  ;;  %v6071_v32 = vsel %vm14249_vm11, %v6070_v39, %v6066_v34  ;;  %v5907_v58 = vrot.slane %v12044_v62, %v14016_v13  ;;  %v12343_v51 = vmul.f32 %v12130_v11, %v14250_v40  ;;  %v5591_v25 = vmul.f32 %v7559_v56, %v12024_v48  ;;  %v7560_v39 = vld [vmem:[%s8111_s27 + $0x130] sm:$0xff]  ;;  %v14252_v40 = vld [vmem:[#allocation68_spill] sm:$0xff]  ;;  %v7563_v56 = vld [vmem:[%s8111_s27 + $0x140] sm:$0xff] }
 0x723   : > { %v5614_v41 = vmul.f32 %v7558_v38, %v5125_v47  ;;  %5484 = vperm.xlu0 %7249, %v4917_v50   ;;  %v5750_v52 = vadd.f32 %v5749_v30, %v5613_v22  ;;  %v6075_v45 = vrot.slane %v5125_v47, %v14019_v21  ;;  %v5898_v17 = vsel %vm2511_vm2, %v5897_v0, %v5893_v3  ;;  %v7561_v3 = vld [vmem:[%s8111_s27 + $0x138] sm:$0xff]  ;;  %vm14259_vm11 = vmmov %vm14258_vm13 }
 0x724   : > { %5434 = vperm.xlu1 %7248, %v4907_v5   ;;  %v5717_v2 = vadd.f32 %v5716_v19, %v5590_v59  ;;  %v6080_v50 = vrot.slane %v12132_v26, %v14020_v35  ;;  %v5912_v62 = vrot.slane %v12052_v23, %v14018_v1  ;;  %v5615_v5 = vmul.f32 %v7560_v39, %v12132_v26 }
 0x725   : > { %v5751_v55 = vadd.f32 %v5750_v52, %v5614_v41  ;;  %v6076_v22 = vsel %vm2539_vm6, %v6075_v45, %v6071_v32  ;;  %v5903_v47 = vsel %vm2518_vm3, %v5902_v46, %v5898_v17  ;;  %v5917_v0 = vrot.slane %v12060_v60, %v14019_v21  ;;  %v7562_v41 = vld [vmem:[%s8111_s27 + $0x78] sm:$0xff]  ;;  %v14251_v52 = vld [vmem:[#allocation62_spill] sm:$0xff] }
 0x726   : > { %v12355_v30 = vpop.permute.xlu0 %5249  ;;  %v5135_v34 = vpop.permute.xlu1 %5134  ;;  %v6081_v59 = vsel %vm2546_vm7, %v6080_v50, %v6076_v22  ;;  %v5908_v26 = vsel %vm2525_vm4, %v5907_v58, %v5903_v47  ;;  %v5922_v19 = vrot.slane %v12071_v29, %v14020_v35  ;;  %v5927_v46 = vrot.slane %v12079_v10, %v14022_v42 }
 0x727   : > { %v5616_v23 = vmul.f32 %v7561_v3, %v5135_v34  ;;  %5489 = vperm.xlu0 %7249, %v4918_v4   ;;  %v5752_v32 = vadd.f32 %v5751_v55, %v5615_v5  ;;  %v6085_v38 = vrot.slane %v5135_v34, %v14022_v42  ;;  %v5718_v60 = vadd.f32 %v5717_v2, %v5591_v25  ;;  %v7564_v2 = vld [vmem:[%s8111_s27 + $0x148] sm:$0xff] }
 0x728   : > { %5499 = vperm.xlu1 %7248, %v4921_v20   ;;  %v5592_v45 = vmul.f32 %v7562_v41, %v14251_v52  ;;  %v6090_v4 = vrot.slane %v14252_v40, %v14023_v44  ;;  %v5913_v58 = vsel %vm14253_vm14, %v5912_v62, %v5908_v26  ;;  %v5617_v29 = vmul.f32 %v7563_v56, %v14252_v40  ;;  %v14254_v55 = vld [vmem:[#allocation178_spill] sm:$0xff] }
 0x729   : > { %v5753_v17 = vadd.f32 %v5752_v32, %v5616_v23  ;;  %v6086_v50 = vsel %vm2553_vm8, %v6085_v38, %v6081_v59  ;;  %v5918_v10 = vsel %vm2539_vm6, %v5917_v0, %v5913_v58  ;;  %v4926_v62 = vmul.f32 %v12130_v11, %v14254_v55  ;;  %v14255_v23 = vld [vmem:[#allocation74_spill] sm:$0xff]  ;;  %v7565_v32 = vld [vmem:[%s8111_s27 + $0x150] sm:$0xff] }
 0x72a   : > { %v12376_v39 = vpop.permute.xlu0 %5259  ;;  %v5145_v20 = vpop.permute.xlu1 %5144  ;;  %v6091_v25 = vsel %vm2560_vm9, %v6090_v4, %v6086_v50  ;;  %v5932_v22 = vrot.slane %v12016_v33, %v14023_v44  ;;  %v5923_v34 = vsel %vm2546_vm7, %v5922_v19, %v5918_v10  ;;  %v5937_v3 = vrot.slane %v12087_v43, %v14025_v28 }
 0x72b   : > { %v5618_v5 = vmul.f32 %v7564_v2, %v5145_v20  ;;  %5494 = vperm.xlu0 %7249, %v12315_v31   ;;  %v5754_v47 = vadd.f32 %v5753_v17, %v5617_v29  ;;  %v6095_v59 = vrot.slane %v5145_v20, %v14025_v28  ;;  %v5928_v0 = vsel %vm2553_vm8, %v5927_v46, %v5923_v34  ;;  %v14256_v20 = vld [vmem:[#allocation78_spill] sm:$0xff]  ;;  %v7567_v2 = vld [vmem:[%s8111_s27 + $0x160] sm:$0xff] }
 0x72c   : > { %5509 = vperm.xlu1 %7248, %v12319_v7   ;;  %v5719_v31 = vadd.f32 %v5718_v60, %v5592_v45  ;;  %v6100_v26 = vrot.slane %v14255_v23, %v14028_v9  ;;  %v5942_v33 = vrot.slane %v12098_v37, %v14028_v9  ;;  %v5619_v19 = vmul.f32 %v7565_v32, %v14255_v23  ;;  %v7566_v45 = vld [vmem:[%s8111_s27 + $0x158] sm:$0xff] }
 0x72d   : > { %v5755_v38 = vadd.f32 %v5754_v47, %v5618_v5  ;;  %v6096_v41 = vsel %vm2567_vm10, %v6095_v59, %v6091_v25  ;;  %v5947_v43 = vrot.slane %v12108_v63, %v14027_v14  ;;  %v5741_v46 = vrot.slane %v12270_v49, 4  ;;  %v7568_v59 = vld [vmem:[%s8111_s27 + $0x168] sm:$0xff] }
 0x72e   : > { %v12399_v40 = vpop.permute.xlu0 %5269  ;;  %v5155_v7 = vpop.permute.xlu1 %5154  ;;  %v6101_v60 = vsel %vm14229_vm1, %v6100_v26, %v6096_v41  ;;  %v5933_v37 = vsel %vm2560_vm9, %v5932_v22, %v5928_v0  ;;  %v5952_v58 = vrot.slane %v12116_v24, %v14030_v18  ;;  %v5957_v63 = vrot.slane %v12124_v57, %v14033_v12  ;;  %v14262_v41 = vld [vmem:[#allocation84_spill] sm:$0xff] }
 0x72f   : > { %v5620_v4 = vmul.f32 %v7566_v45, %v5155_v7  ;;  %v5756_v56 = vadd.f32 %v5755_v38, %v5619_v19  ;;  %v6105_v29 = vrot.slane %v5155_v7, %v14027_v14  ;;  %v5938_v17 = vsel %vm2567_vm10, %v5937_v3, %v5933_v37 }
 0x730   : > { %5519 = vperm.xlu1 %7248, %v12343_v51   ;;  %v5720_v50 = vrot.slane %v5719_v31, 4  ;;  %v6110_v10 = vrot.slane %v14256_v20, %v14030_v18  ;;  %v5943_v25 = vsel %vm14257_vm5, %v5942_v33, %v5938_v17  ;;  %v5621_v24 = vmul.f32 %v7567_v2, %v14256_v20  ;;  %v14260_v33 = vld [vmem:[#allocation160_spill] sm:$0xff] }
 0x731   : > { %v5757_v5 = vadd.f32 %v5756_v56, %v5620_v4  ;;  %v6106_v55 = vsel %vm2581_vm12, %v6105_v29, %v6101_v60  ;;  %v5948_v34 = vsel %vm2581_vm12, %v5947_v43, %v5943_v25  ;;  %v5742_v57 = vadd.f32 %v5741_v46, %v12270_v49  ;;  %v7569_v46 = vld [vmem:[%s8111_s27 + $0x170] sm:$0xff] }
 0x732   : > { %v12420_v22 = vpop.permute.xlu0 %5279  ;;  %v5165_v51 = vpop.permute.xlu1 %5164  ;;  %v6111_v47 = vsel %vm14258_vm13, %v6110_v10, %v6106_v55  ;;  %v5953_v3 = vsel %vm14259_vm11, %v5952_v58, %v5948_v34  ;;  %v4927_v32 = vmul.f32 %v12130_v11, %v14260_v33  ;;  %vm14261_vm14 = vcmask 917312  }
 0x733   : > { %v5622_v0 = vmul.f32 %v7568_v59, %v5165_v51  ;;  %v5758_v23 = vadd.f32 %v5757_v5, %v5621_v24  ;;  %v6115_v26 = vrot.slane %v5165_v51, %v14033_v12  ;;  %v5958_v19 = vsel %vm14261_vm14, %v5957_v63, %v5953_v3  ;;  %vm14263_vm1 = vmmov %vm14261_vm14  ;;  %v14265_v5 = vld [vmem:[#allocation180_spill] sm:$0xff]  ;;  %v7571_v51 = vld [vmem:[%s8111_s27 + $0x180] sm:$0xff] }
 0x734   : > { %5524 = vperm.xlu1 %7248, %v4926_v62   ;;  %v5721_v38 = vadd.f32 %v5720_v50, %v5719_v31  ;;  %v5967_v49 = vrot.slane %v14251_v52, %v14042_v61  ;;  %v6120_v7 = vrot.slane %v14262_v41, %v14035_v6  ;;  %v5962_v43 = vrot.slane %v12024_v48, %v14035_v6  ;;  %v7570_v52 = vld [vmem:[%s8111_s27 + $0x178] sm:$0xff] }
 0x735   : > { %v5623_v60 = vmul.f32 %v7569_v46, %v14262_v41  ;;  %v5759_v45 = vadd.f32 %v5758_v23, %v5622_v0  ;;  %v6116_v62 = vsel %vm14263_vm1, %v6115_v26, %v6111_v47  ;;  %v5743_v58 = vrot.slane %v5742_v57, 2  ;;  %v7572_v0 = vld [vmem:[%s8111_s27 + $0x188] sm:$0xff] }
 0x736   : > { %v12440_v4 = vpop.permute.xlu0 %5289  ;;  %v5175_v37 = vpop.permute.xlu1 %5174  ;;  %v6121_v31 = vsel %vm2602_vm15, %v6120_v7, %v6116_v62  ;;  %v5963_v29 = vsel %vm2602_vm15, %v5962_v43, %v5958_v19  ;;  %v5722_v63 = vrot.slane %v5721_v38, 2  ;;  %vm14264_vm5 = vcmask 1041409   ;;  %v14267_v19 = vld [vmem:[#allocation94_spill] sm:$0xff] }
 0x737   : > { %v5624_v56 = vmul.f32 %v7570_v52, %v5175_v37  ;;  %v5760_v17 = vadd.f32 %v5759_v45, %v5623_v60  ;;  %v6125_v48 = vrot.slane %v5175_v37, %v14042_v61  ;;  %v5968_v50 = vsel %vm2609_vm0, %v5967_v49, %v5963_v29  ;;  %vm14273_vm14 = vmmov %vm14264_vm5 }
 0x738   : > { %5529 = vperm.xlu1 %7248, %v4927_v32   ;;  %v6522_v20 = vsel %vm14264_vm5, %v12273_v15, %v5968_v50  ;;  %v4928_v55 = vmul.f32 %v12130_v11, %v14265_v5  ;;  %v5625_v34 = vmul.f32 %v7571_v51, %v12207_v36  ;;  %v5744_v47 = vadd.f32 %v5743_v58, %v5742_v57  ;;  %v7573_v32 = vld [vmem:[%s8111_s27 + $0x190] sm:$0xff]  ;;  %v7575_v50 = vld [vmem:[%s8111_s27 + $0x1a0] sm:$0xff] }
 0x739   : > { %v5761_v10 = vadd.f32 %v5760_v17, %v5624_v56  ;;  %v6126_v25 = vsel %vm2609_vm0, %v6125_v48, %v6121_v31  ;;  %vm14266_vm13 = vcmask 1042434   ;;  %v6130_v15 = vrot.slane %v12207_v36, %v14013_v8  ;;  %v14268_v36 = vld [vmem:[#allocation161_spill] sm:$0xff]  ;;  %v7574_v31 = vld [vmem:[%s8111_s27 + $0x198] sm:$0xff]  ;;  %v14269_v48 = vld [vmem:[#allocation182_spill] sm:$0xff] }
 0x73a   : > { %v12450_v2 = vpop.permute.xlu0 %5299  ;;  %v5185_v24 = vpop.permute.xlu1 %5184  ;;  %v12457_v59 = vsel %vm14266_vm13, %v6126_v25, %v6522_v20  ;;  %v5723_v33 = vadd.f32 %v5722_v63, %v5721_v38  ;;  %v5627_v49 = vmul.f32 %v7573_v32, %v14267_v19  ;;  %v6139_v57 = vrot.slane %v14267_v19, %v14014_v16  ;;  %v14271_v32 = vld [vmem:[#allocation41_spill] sm:$0xff]  ;;  %vm14274_vm1 = vmmov %vm14266_vm13 }
 0x73b   : > { %v5626_v3 = vmul.f32 %v7572_v0, %v5185_v24  ;;  %v5762_v23 = vrot.slane %v5761_v10, 4  ;;  %v6134_v26 = vrot.slane %v5185_v24, %v14012_v54  ;;  %v4929_v60 = vmul.f32 %v12130_v11, %v14268_v36 }
 0x73c   : > { %5534 = vperm.xlu1 %7248, %v4928_v55   ;;  %v5745_v45 = vrot.slane %v5744_v47, 1  ;;  %v5724_v29 = vrot.slane %v5723_v33, 1  ;;  %v6149_v17 = vrot.slane %v12243_v53, %v14018_v1  ;;  %v4930_v63 = vmul.f32 %v12130_v11, %v14269_v48 }
 0x73d   : > { %v5768_v41 = vadd.f32 %v5626_v3, %v5625_v34  ;;  %v5763_v7 = vadd.f32 %v5762_v23, %v5761_v10  ;;  %v6135_v43 = vsel %vm2511_vm2, %v6134_v26, %v6130_v15  ;;  %v5629_v20 = vmul.f32 %v7575_v50, %v12243_v53  ;;  %v7576_v15 = vld [vmem:[%s8111_s27 + $0x1a8] sm:$0xff] }
 0x73e   : > { %v12468_v46 = vpop.permute.xlu0 %5309  ;;  %v6140_v38 = vsel %vm2518_vm3, %v6139_v57, %v6135_v43  ;;  %v5195_v37 = vpop.permute.xlu1 %5194  ;;  %v5746_v55 = vadd.f32 %v5745_v45, %v5744_v47  ;;  %vm14270_vm11 = vcmask 326912   ;;  %v5725_v53 = vadd.f32 %v5724_v29, %v5723_v33 }
 0x73f   : > { %v5769_v62 = vadd.f32 %v5768_v41, %v5627_v49  ;;  %v5764_v58 = vrot.slane %v5763_v7, 2  ;;  %v5628_v52 = vmul.f32 %v7574_v31, %v5195_v37  ;;  %v6144_v56 = vrot.slane %v5195_v37, %v14016_v13  ;;  %v14272_v49 = vld [vmem:[#allocation164_spill] sm:$0xff]  ;;  %v7577_v41 = vld [vmem:[%s8111_s27 + $0x1b0] sm:$0xff] }
 0x740   : > { %5539 = vperm.xlu1 %7248, %v4929_v60   ;;  %v6159_v19 = vrot.slane %v14271_v32, %v14020_v35  ;;  %v4931_v57 = vmul.f32 %v12130_v11, %v14272_v49  ;;  %v5631_v47 = vmul.f32 %v7577_v41, %v14271_v32  ;;  %v5881_v45 = vsel %vm14273_vm14, %v5746_v55, %v5725_v53 }
 0x741   : > { %v5765_v10 = vadd.f32 %v5764_v58, %v5763_v7  ;;  %v5770_v25 = vadd.f32 %v5769_v62, %v5628_v52  ;;  %v6145_v24 = vsel %vm2525_vm4, %v6144_v56, %v6140_v38  ;;  %v7578_v58 = vld [vmem:[%s8111_s27 + $0x1b8] sm:$0xff]  ;;  %v14275_v56 = vld [vmem:[#allocation85_spill] sm:$0xff]  ;;  %vm14279_vm5 = vcmask 720512  }
 0x742   : > { %v12482_v5 = vpop.permute.xlu0 %5319  ;;  %v6150_v51 = vsel %vm14270_vm11, %v6149_v17, %v6145_v24  ;;  %v5205_v34 = vpop.permute.xlu1 %5204  ;;  %v6169_v29 = vrot.slane %v14275_v56, %v14023_v44  ;;  %v7579_v17 = vld [vmem:[%s8111_s27 + $0x1c0] sm:$0xff]  ;;  %vm14281_vm13 = vcmask 851712   ;;  %vm14282_vm11 = vcmask 917312  }
 0x743   : > { %v5766_v0 = vrot.slane %v5765_v10, 1  ;;  %v5771_v3 = vadd.f32 %v5770_v25, %v5629_v20  ;;  %v5630_v23 = vmul.f32 %v7576_v15, %v5205_v34  ;;  %v6154_v26 = vrot.slane %v5205_v34, %v14019_v21  ;;  %v7580_v34 = vld [vmem:[%s8111_s27 + $0x1c8] sm:$0xff]  ;;  %v14277_v15 = vld [vmem:[#allocation87_spill] sm:$0xff] }
 0x744   : > { %5544 = vperm.xlu1 %7248, %v4930_v63   ;;  %v5633_v48 = vmul.f32 %v7579_v17, %v14275_v56  ;;  %vm14285_vm14 = vcmask 1043459  }
 0x745   : > { %v5767_v7 = vadd.f32 %v5766_v0, %v5765_v10  ;;  %v5772_v43 = vadd.f32 %v5771_v3, %v5630_v23  ;;  %v6155_v36 = vsel %vm2539_vm6, %v6154_v26, %v6150_v51  ;;  %v14276_v10 = vld [vmem:[#allocation185_spill] sm:$0xff]  ;;  %v6179_v23 = vrot.slane %v14277_v15, %v14028_v9  ;;  %v7581_v26 = vld [vmem:[%s8111_s27 + $0x1d0] sm:$0xff] }
 0x746   : > { %v12494_v60 = vpop.permute.xlu0 %5329  ;;  %v6160_v33 = vsel %vm2546_vm7, %v6159_v19, %v6155_v36  ;;  %v5215_v62 = vpop.permute.xlu1 %5214  ;;  %v4932_v25 = vmul.f32 %v12130_v11, %v14276_v10  ;;  %v5635_v53 = vmul.f32 %v7581_v26, %v14277_v15  ;;  %v7582_v36 = vld [vmem:[%s8111_s27 + $0x1d8] sm:$0xff]  ;;  %v7584_v10 = vld [vmem:[%s8111_s27 + $0x1e8] sm:$0xff] }
 0x747   : > { %v12499_v38 = vsel %vm14274_vm1, %v5767_v7, %v5881_v45  ;;  %v5773_v37 = vadd.f32 %v5772_v43, %v5631_v47  ;;  %v5632_v31 = vmul.f32 %v7578_v58, %v5215_v62  ;;  %v6164_v52 = vrot.slane %v5215_v62, %v14022_v42  ;;  %v14283_v15 = vld [vmem:[#allocation170_spill] sm:$0xff] }
 0x748   : > { %5549 = vperm.xlu1 %7248, %v4931_v57   ;;  %v14278_v57 = vld [vmem:[#allocation167_spill] sm:$0xff]  ;;  %v6189_v62 = vrot.slane %v12332_v27, %v14030_v18  ;;  %vm14286_vm1 = vcmask 326912  }
 0x749   : > { %v5774_v63 = vadd.f32 %v5773_v37, %v5632_v31  ;;  %v6165_v50 = vsel %vm2553_vm8, %v6164_v52, %v6160_v33  ;;  %v4933_v41 = vmul.f32 %v12130_v11, %v14278_v57  ;;  %v7583_v37 = vld [vmem:[%s8111_s27 + $0x1e0] sm:$0xff] }
 0x74a   : > { %v12508_v20 = vpop.permute.xlu0 %5339  ;;  %v6170_v24 = vsel %vm2560_vm9, %v6169_v29, %v6165_v50  ;;  %v5225_v55 = vpop.permute.xlu1 %5224  ;;  %v5637_v58 = vmul.f32 %v7583_v37, %v12332_v27  ;;  %v14280_v29 = vld [vmem:[#allocation188_spill] sm:$0xff]  ;;  %v6199_v27 = vrot.slane %v12355_v30, %v14035_v6 }
 0x74b   : > { %v5775_v51 = vadd.f32 %v5774_v63, %v5633_v48  ;;  %v5634_v0 = vmul.f32 %v7580_v34, %v5225_v55  ;;  %v6174_v3 = vrot.slane %v5225_v55, %v14025_v28  ;;  %v4934_v17 = vmul.f32 %v12130_v11, %v14280_v29  ;;  %v7585_v55 = vld [vmem:[%s8111_s27 + $0x1f0] sm:$0xff] }
 0x74c   : > { %5554 = vperm.xlu1 %7248, %v4932_v25  }
 0x74d   : > { %v5776_v32 = vadd.f32 %v5775_v51, %v5634_v0  ;;  %v6175_v19 = vsel %vm2567_vm10, %v6174_v3, %v6170_v24  ;;  %v5639_v51 = vmul.f32 %v7585_v55, %v12355_v30 }
 0x74e   : > { %v12520_v49 = vpop.permute.xlu0 %5349  ;;  %v6180_v47 = vsel %vm14279_vm5, %v6179_v23, %v6175_v19  ;;  %v5235_v7 = vpop.permute.xlu1 %5234  ;;  %v4935_v23 = vmul.f32 %v12130_v11, %v14283_v15  ;;  %v7586_v19 = vld [vmem:[%s8111_s27 + $0x1f8] sm:$0xff]  ;;  %v7591_v15 = vld [vmem:[%s8111_s27 + $0x220] sm:$0xff]  ;;  %vm14287_vm5 = vmmov %vm14285_vm14 }
 0x74f   : > { %v5777_v43 = vadd.f32 %v5776_v32, %v5635_v53  ;;  %v5636_v45 = vmul.f32 %v7582_v36, %v5235_v7  ;;  %v6184_v33 = vrot.slane %v5235_v7, %v14027_v14 }
 0x750   : > { %5559 = vperm.xlu1 %7248, %v4933_v41  }
 0x751   : > { %v5778_v31 = vadd.f32 %v5777_v43, %v5636_v45  ;;  %v6185_v52 = vsel %vm2581_vm12, %v6184_v33, %v6180_v47  ;;  %v14284_v43 = vld [vmem:[#allocation191_spill] sm:$0xff]  ;;  %v7587_v45 = vld [vmem:[%s8111_s27 + $0x200] sm:$0xff] }
 0x752   : > { %v12532_v56 = vpop.permute.xlu0 %5359  ;;  %v6190_v48 = vsel %vm14281_vm13, %v6189_v62, %v6185_v52  ;;  %v5245_v63 = vpop.permute.xlu1 %5244  ;;  %v4936_v36 = vmul.f32 %v12130_v11, %v14284_v43  ;;  %v5641_v33 = vmul.f32 %v7587_v45, %v12376_v39  ;;  %v7588_v52 = vld [vmem:[%s8111_s27 + $0x208] sm:$0xff]  ;;  %v6218_v11 = vrot.slane %v12399_v40, %v14014_v16 }
 0x753   : > { %v5779_v50 = vadd.f32 %v5778_v31, %v5637_v58  ;;  %v5638_v25 = vmul.f32 %v7584_v10, %v5245_v63  ;;  %v6194_v24 = vrot.slane %v5245_v63, %v14033_v12  ;;  %v6209_v58 = vrot.slane %v12376_v39, %v14013_v8  ;;  %v7592_v43 = vld [vmem:[%s8111_s27 + $0x228] sm:$0xff] }
 0x754   : > { %5564 = vperm.xlu1 %7248, %v4934_v17   ;;  %vm14288_vm13 = vcmask 720512  }
 0x755   : > { %v5780_v34 = vadd.f32 %v5779_v50, %v5638_v25  ;;  %v6195_v0 = vsel %vm14282_vm11, %v6194_v24, %v6190_v48  ;;  %v7589_v48 = vld [vmem:[%s8111_s27 + $0x210] sm:$0xff]  ;;  %vm14289_vm11 = vcmask 851712  }
 0x756   : > { %v12544_v3 = vpop.permute.xlu0 %5369  ;;  %v6200_v26 = vsel %vm2602_vm15, %v6199_v27, %v6195_v0  ;;  %v5255_v53 = vpop.permute.xlu1 %5254  ;;  %v5643_v63 = vmul.f32 %v7589_v48, %v12399_v40  ;;  %v6228_v40 = vrot.slane %v12420_v22, %v14018_v1 }
 0x757   : > { %v5781_v32 = vadd.f32 %v5780_v34, %v5639_v51  ;;  %v5640_v57 = vmul.f32 %v7586_v19, %v5255_v53  ;;  %v6204_v41 = vrot.slane %v5255_v53, %v14042_v61  ;;  %v7590_v51 = vld [vmem:[%s8111_s27 + $0x218] sm:$0xff] }
 0x758   : > { %5569 = vperm.xlu1 %7248, %v4935_v23   ;;  %v5645_v23 = vmul.f32 %v7591_v15, %v12420_v22  ;;  %v6238_v22 = vrot.slane %v12440_v4, %v14020_v35 }
 0x759   : > { %v5782_v30 = vadd.f32 %v5781_v32, %v5640_v57  ;;  %v6205_v47 = vsel %vm2609_vm0, %v6204_v41, %v6200_v26 }
 0x75a   : > { %v12552_v7 = vpop.permute.xlu0 %5379  ;;  %v12560_v62 = vsel %vm14285_vm14, %v6205_v47, %v12457_v59  ;;  %v5265_v37 = vpop.permute.xlu1 %5264  ;;  %vm14290_vm14 = vcmask 917312  }
 0x75b   : > { %v5783_v31 = vrot.slane %v5782_v30, 4  ;;  %v5642_v29 = vmul.f32 %v7588_v52, %v5265_v37  ;;  %v6213_v17 = vrot.slane %v5265_v37, %v14012_v54 }
 0x75c   : > { %5574 = vperm.xlu1 %7248, %v4936_v36  }
 0x75d   : > { %v5784_v59 = vadd.f32 %v5783_v31, %v5782_v30  ;;  %v5789_v50 = vadd.f32 %v5642_v29, %v5641_v33  ;;  %v6214_v10 = vsel %vm2511_vm2, %v6213_v17, %v6209_v58  ;;  %v7593_v33 = vld [vmem:[%s8111_s27 + $0x230] sm:$0xff] }
 0x75e   : > { %v12571_v25 = vpop.permute.xlu0 %5389  ;;  %v6219_v39 = vsel %vm2518_vm3, %v6218_v11, %v6214_v10  ;;  %v5275_v24 = vpop.permute.xlu1 %5274  ;;  %v5647_v37 = vmul.f32 %v7593_v33, %v12440_v4  ;;  %v6248_v10 = vrot.slane %v12450_v2, %v14023_v44  ;;  %v7599_v33 = vld [vmem:[%s8111_s27 + $0x260] sm:$0xff] }
 0x75f   : > { %v5785_v27 = vrot.slane %v5784_v59, 2  ;;  %v5790_v55 = vadd.f32 %v5789_v50, %v5643_v63  ;;  %v5644_v34 = vmul.f32 %v7590_v51, %v5275_v24  ;;  %v6223_v0 = vrot.slane %v5275_v24, %v14016_v13 }
 0x761   : > { %v5786_v26 = vadd.f32 %v5785_v27, %v5784_v59  ;;  %v5791_v53 = vadd.f32 %v5790_v55, %v5644_v34  ;;  %v6224_v32 = vsel %vm2525_vm4, %v6223_v0, %v6219_v39  ;;  %v7594_v59 = vld [vmem:[%s8111_s27 + $0x238] sm:$0xff]  ;;  %v7595_v39 = vld [vmem:[%s8111_s27 + $0x240] sm:$0xff] }
 0x762   : > { %v12581_v19 = vpop.permute.xlu0 %5399  ;;  %v6229_v57 = vsel %vm14286_vm1, %v6228_v40, %v6224_v32  ;;  %v5285_v41 = vpop.permute.xlu1 %5284  ;;  %v5649_v24 = vmul.f32 %v7595_v39, %v12450_v2  ;;  %v7596_v40 = vld [vmem:[%s8111_s27 + $0x248] sm:$0xff]  ;;  %vm14291_vm1 = vcmask 1044484  }
 0x763   : > { %v5787_v30 = vrot.slane %v5786_v26, 1  ;;  %v5792_v47 = vadd.f32 %v5791_v53, %v5645_v23  ;;  %v5646_v36 = vmul.f32 %v7592_v43, %v5285_v41  ;;  %v6233_v45 = vrot.slane %v5285_v41, %v14019_v21  ;;  %v7597_v53 = vld [vmem:[%s8111_s27 + $0x250] sm:$0xff]  ;;  %v7598_v43 = vld [vmem:[%s8111_s27 + $0x258] sm:$0xff] }
 0x764   : > { %v5651_v2 = vmul.f32 %v7597_v53, %v12468_v46 }
 0x765   : > { %v5788_v58 = vadd.f32 %v5787_v30, %v5786_v26  ;;  %v5793_v31 = vadd.f32 %v5792_v47, %v5646_v36  ;;  %v6234_v52 = vsel %vm2539_vm6, %v6233_v45, %v6229_v57  ;;  %v6258_v26 = vrot.slane %v12468_v46, %v14028_v9 }
 0x766   : > { %v12591_v29 = vpop.permute.xlu0 %5409  ;;  %v6239_v17 = vsel %vm2546_vm7, %v6238_v22, %v6234_v52  ;;  %v5295_v11 = vpop.permute.xlu1 %5294  ;;  %v6268_v22 = vrot.slane %v12482_v5, %v14030_v18 }
 0x767   : > { %v12596_v48 = vsel %vm14287_vm5, %v5788_v58, %v12499_v38  ;;  %v5794_v63 = vadd.f32 %v5793_v31, %v5647_v37  ;;  %v5648_v50 = vmul.f32 %v7594_v59, %v5295_v11  ;;  %v6243_v4 = vrot.slane %v5295_v11, %v14022_v42 }
 0x768   : > { %v5653_v37 = vmul.f32 %v7599_v33, %v12482_v5  ;;  %v6307_v33 = vrot.slane %v12532_v56, %v14018_v1  ;;  %vm14292_vm5 = vcmask 326912  }
 0x769   : > { %v5795_v27 = vadd.f32 %v5794_v63, %v5648_v50  ;;  %v6244_v55 = vsel %vm2553_vm8, %v6243_v4, %v6239_v17  ;;  %v7600_v63 = vld [vmem:[%s8111_s27 + $0x268] sm:$0xff]  ;;  %v6278_v4 = vrot.slane %v12494_v60, %v14035_v6 }
 0x76a   : > { %v6249_v51 = vsel %vm2560_vm9, %v6248_v10, %v6244_v55  ;;  %v5305_v38 = vpop.permute.xlu1 %5304  ;;  %v12606_v34 = vpop.permute.xlu0 %5419  ;;  %v7601_v10 = vld [vmem:[%s8111_s27 + $0x270] sm:$0xff] }
 0x76b   : > { %v5796_v0 = vadd.f32 %v5795_v27, %v5649_v24  ;;  %v5650_v15 = vmul.f32 %v7596_v40, %v5305_v38  ;;  %v6253_v23 = vrot.slane %v5305_v38, %v14025_v28  ;;  %v5655_v5 = vmul.f32 %v7601_v10, %v12494_v60 }
 0x76d   : > { %v5797_v32 = vadd.f32 %v5796_v0, %v5650_v15  ;;  %v6254_v57 = vsel %vm2567_vm10, %v6253_v23, %v6249_v51  ;;  %v7602_v0 = vld [vmem:[%s8111_s27 + $0x278] sm:$0xff] }
 0x76e   : > { %v6259_v41 = vsel %vm14288_vm13, %v6258_v26, %v6254_v57  ;;  %v5315_v30 = vpop.permute.xlu1 %5314  ;;  %v12622_v46 = vpop.permute.xlu0 %5429  ;;  %vm14293_vm13 = vmmov %vm14291_vm1 }
 0x76f   : > { %v5798_v47 = vadd.f32 %v5797_v32, %v5651_v2  ;;  %v5652_v36 = vmul.f32 %v7598_v43, %v5315_v30  ;;  %v6263_v45 = vrot.slane %v5315_v30, %v14027_v14  ;;  %v6288_v2 = vrot.slane %v12508_v20, %v14013_v8 }
 0x771   : > { %v5799_v58 = vadd.f32 %v5798_v47, %v5652_v36  ;;  %v6264_v31 = vsel %vm2581_vm12, %v6263_v45, %v6259_v41  ;;  %v6297_v41 = vrot.slane %v12520_v49, %v14014_v16 }
 0x772   : > { %v6269_v52 = vsel %vm14289_vm11, %v6268_v22, %v6264_v31  ;;  %v5325_v17 = vpop.permute.xlu1 %5324  ;;  %v12634_v51 = vpop.permute.xlu0 %5439  ;;  %vm14294_vm11 = vcmask 720512  }
 0x773   : > { %v5800_v11 = vadd.f32 %v5799_v58, %v5653_v37  ;;  %v5654_v59 = vmul.f32 %v7600_v63, %v5325_v17  ;;  %v6273_v50 = vrot.slane %v5325_v17, %v14033_v12 }
 0x775   : > { %v5801_v39 = vadd.f32 %v5800_v11, %v5654_v59  ;;  %v6274_v24 = vsel %vm14290_vm14, %v6273_v50, %v6269_v52  ;;  %v6317_v59 = vrot.slane %v12544_v3, %v14020_v35  ;;  %vm14295_vm14 = vcmask 851712  }
 0x776   : > { %v6279_v27 = vsel %vm2602_vm15, %v6278_v4, %v6274_v24  ;;  %v5335_v55 = vpop.permute.xlu1 %5334  ;;  %v12648_v30 = vpop.permute.xlu0 %5504 }
 0x777   : > { %v5802_v38 = vadd.f32 %v5801_v39, %v5655_v5  ;;  %v5656_v40 = vmul.f32 %v7602_v0, %v5335_v55  ;;  %v6283_v15 = vrot.slane %v5335_v55, %v14042_v61 }
 0x779   : > { %v5803_v23 = vadd.f32 %v5802_v38, %v5656_v40  ;;  %v6284_v26 = vsel %vm2609_vm0, %v6283_v15, %v6279_v27  ;;  %v6327_v27 = vrot.slane %v12552_v7, %v14023_v44 }
 0x77a   : > { %v12641_v53 = vsel %vm14291_vm1, %v6284_v26, %v12560_v62  ;;  %v12657_v11 = vpop.permute.xlu0 %5514  ;;  %vm14296_vm1 = vcmask 917312  }
 0x77b   : > { %v5345_v60 = vpop.permute.xlu1 %5344  ;;  %v5804_v32 = vrot.slane %v5803_v23, 4 }
 0x77c   : > { %v6292_v57 = vrot.slane %v5345_v60, %v14012_v54 }
 0x77d   : > { %v5805_v47 = vadd.f32 %v5804_v32, %v5803_v23  ;;  %v7603_v23 = vld [vmem:[%s8111_s27 + $0x288] sm:$0xff]  ;;  %v7604_v32 = vld [vmem:[%s8111_s27 + $0x280] sm:$0xff] }
 0x77e   : > { %v6293_v43 = vsel %vm2511_vm2, %v6292_v57, %v6288_v2  ;;  %v12674_v55 = vpop.permute.xlu0 %5444  ;;  %v5658_v26 = vmul.f32 %v7603_v23, %v5345_v60  ;;  %v5657_v57 = vmul.f32 %v7604_v32, %v12508_v20 }
 0x77f   : > { %v6298_v36 = vsel %vm2518_vm3, %v6297_v41, %v6293_v43  ;;  %v5355_v45 = vpop.permute.xlu1 %5354  ;;  %v5806_v62 = vrot.slane %v5805_v47, 2 }
 0x780   : > { %v6302_v22 = vrot.slane %v5355_v45, %v14016_v13 }
 0x781   : > { %v5807_v37 = vadd.f32 %v5806_v62, %v5805_v47  ;;  %v6347_v62 = vrot.slane %v12581_v19, %v14030_v18 }
 0x782   : > { %v6303_v58 = vsel %vm2525_vm4, %v6302_v22, %v6298_v36  ;;  %v12691_v43 = vpop.permute.xlu0 %5449  ;;  %v5810_v22 = vadd.f32 %v5658_v26, %v5657_v57  ;;  %v7608_v26 = vld [vmem:[%s8111_s27 + $0x300] sm:$0xff]  ;;  %v7609_v57 = vld [vmem:[%s8111_s27 + $0x308] sm:$0xff] }
 0x783   : > { %v6308_v31 = vsel %vm14292_vm5, %v6307_v33, %v6303_v58  ;;  %v5365_v52 = vpop.permute.xlu1 %5364  ;;  %v5808_v17 = vrot.slane %v5807_v37, 1  ;;  %v7605_v33 = vld [vmem:[%s8111_s27 + $0x290] sm:$0xff]  ;;  %vm14297_vm5 = vcmask 1045509  }
 0x784   : > { %v6312_v63 = vrot.slane %v5365_v52, %v14019_v21 }
 0x785   : > { %v5809_v50 = vadd.f32 %v5808_v17, %v5807_v37  ;;  %v5659_v37 = vmul.f32 %v7605_v33, %v12520_v49 }
 0x786   : > { %v6313_v4 = vsel %vm2539_vm6, %v6312_v63, %v6308_v31  ;;  %v7606_v63 = vld [vmem:[%s8111_s27 + $0x298] sm:$0xff] }
 0x787   : > { %v6318_v10 = vsel %vm2546_vm7, %v6317_v59, %v6313_v4  ;;  %v12664_v5 = vpop.permute.xlu1 %5374  ;;  %v12668_v39 = vsel %vm14293_vm13, %v5809_v50, %v12596_v48  ;;  %v6337_v48 = vrot.slane %v12571_v25, %v14028_v9  ;;  %v5811_v17 = vadd.f32 %v5810_v22, %v5659_v37  ;;  %v12706_v50 = vpop.permute.xlu0 %5454 }
 0x788   : > { %v6322_v24 = vrot.slane %v12664_v5, %v14022_v42  ;;  %v5660_v59 = vmul.f32 %v7606_v63, %v5355_v45  ;;  %v7613_v63 = vld [vmem:[%s8111_s27 + $0x320] sm:$0xff]  ;;  %vm14298_vm13 = vcmask 326912  }
 0x78a   : > { %v6323_v38 = vsel %vm2553_vm8, %v6322_v24, %v6318_v10  ;;  %v6357_v10 = vrot.slane %v12591_v29, %v14035_v6 }
 0x78b   : > { %v6328_v0 = vsel %vm2560_vm9, %v6327_v27, %v6323_v38  ;;  %v12678_v40 = vpop.permute.xlu1 %5384  ;;  %v5812_v27 = vadd.f32 %v5811_v17, %v5660_v59  ;;  %v12725_v32 = vpop.permute.xlu0 %5459  ;;  %v5677_v59 = vmul.f32 %v7613_v63, %v12634_v51 }
 0x78c   : > { %v6332_v15 = vrot.slane %v12678_v40, %v14025_v28 }
 0x78e   : > { %v6333_v2 = vsel %vm2567_vm10, %v6332_v15, %v6328_v0  ;;  %v7607_v0 = vld [vmem:[%s8111_s27 + $0x2a0] sm:$0xff] }
 0x78f   : > { %v6338_v41 = vsel %vm14294_vm11, %v6337_v48, %v6333_v2  ;;  %v12689_v47 = vpop.permute.xlu1 %5394  ;;  %v5661_v15 = vmul.f32 %v7607_v0, %v12532_v56  ;;  %v5673_v2 = vmul.f32 %v7608_v26, %v12606_v34  ;;  %v7611_v56 = vld [vmem:[%s8111_s27 + $0x310] sm:$0xff]  ;;  %v7616_v26 = vld [vmem:[%s8111_s27 + $0x2b8] sm:$0xff] }
 0x790   : > { %v6342_v36 = vrot.slane %v12689_v47, %v14027_v14 }
 0x792   : > { %v6343_v60 = vsel %vm2581_vm12, %v6342_v36, %v6338_v41  ;;  %v5813_v36 = vadd.f32 %v5812_v27, %v5661_v15 }
 0x793   : > { %v6348_v20 = vsel %vm14295_vm14, %v6347_v62, %v6343_v60  ;;  %v12701_v58 = vpop.permute.xlu1 %5404  ;;  %v7610_v62 = vld [vmem:[%s8111_s27 + $0x2a8] sm:$0xff]  ;;  %v5675_v60 = vmul.f32 %v7611_v56, %v12622_v46  ;;  %v7618_v56 = vld [vmem:[%s8111_s27 + $0x338] sm:$0xff] }
 0x794   : > { %v6352_v31 = vrot.slane %v12701_v58, %v14033_v12  ;;  %v5662_v22 = vmul.f32 %v7610_v62, %v5365_v52  ;;  %v7614_v52 = vld [vmem:[%s8111_s27 + $0x2b0] sm:$0xff] }
 0x796   : > { %v6353_v4 = vsel %vm14296_vm1, %v6352_v31, %v6348_v20  ;;  %v7612_v20 = vld [vmem:[%s8111_s27 + $0x318] sm:$0xff]  ;;  %v5814_v17 = vadd.f32 %v5813_v36, %v5662_v22 }
 0x797   : > { %v12711_v49 = vpop.permute.xlu1 %5414  ;;  %v6358_v38 = vsel %vm2602_vm15, %v6357_v10, %v6353_v4  ;;  %v12734_v4 = vpop.permute.xlu0 %5464 }
 0x798   : > { %v6362_v24 = vrot.slane %v12711_v49, %v14042_v61 }
 0x79a   : > { %v6363_v45 = vsel %vm2609_vm0, %v6362_v24, %v6358_v38  ;;  %v5663_v24 = vmul.f32 %v7614_v52, %v12544_v3  ;;  %v7615_v38 = vld [vmem:[%s8111_s27 + $0x328] sm:$0xff] }
 0x79b   : > { %v12721_v48 = vsel %vm14297_vm5, %v6363_v45, %v12641_v53  ;;  %v5425_v23 = vpop.permute.xlu1 %5424  ;;  %v5678_v45 = vmul.f32 %v7615_v38, %v12674_v55  ;;  %v12748_v3 = vpop.permute.xlu0 %5469 }
 0x79c   : > { %v5674_v41 = vmul.f32 %v7609_v57, %v5425_v23  ;;  %v5815_v15 = vadd.f32 %v5814_v17, %v5663_v24  ;;  %v7617_v57 = vld [vmem:[%s8111_s27 + $0x330] sm:$0xff]  ;;  %v7621_v24 = vld [vmem:[%s8111_s27 + $0x2c8] sm:$0xff] }
 0x79d   : > { %v5666_v38 = vmul.f32 %v7621_v24, %v12678_v40 }
 0x79e   : > { %v5831_v33 = vadd.f32 %v5674_v41, %v5673_v2  ;;  %v5664_v2 = vmul.f32 %v7616_v26, %v12664_v5  ;;  %v5679_v41 = vmul.f32 %v7617_v57, %v12691_v43  ;;  %v7622_v57 = vld [vmem:[%s8111_s27 + $0x348] sm:$0xff] }
 0x79f   : > { %v5435_v53 = vpop.permute.xlu1 %5434  ;;  %v5682_v40 = vmul.f32 %v7622_v57, %v12734_v4 }
 0x7a0   : > { %v5832_v37 = vadd.f32 %v5831_v33, %v5675_v60  ;;  %v5676_v31 = vmul.f32 %v7612_v20, %v5435_v53  ;;  %v5680_v60 = vmul.f32 %v7618_v56, %v12706_v50  ;;  %v5816_v33 = vadd.f32 %v5815_v15, %v5664_v2  ;;  %v7619_v20 = vld [vmem:[%s8111_s27 + $0x2c0] sm:$0xff] }
 0x7a1   : > { %v5665_v5 = vmul.f32 %v7619_v20, %v12552_v7  ;;  %v6376_v7 = vrot.slane %v12622_v46, %v14014_v16  ;;  %v7623_v46 = vld [vmem:[%s8111_s27 + $0x2d0] sm:$0xff] }
 0x7a2   : > { %v5833_v10 = vadd.f32 %v5832_v37, %v5676_v31  ;;  %v6371_v37 = vrot.slane %v5425_v23, %v14012_v54  ;;  %v6367_v31 = vrot.slane %v12606_v34, %v14013_v8  ;;  %v12767_v34 = vpop.permute.xlu0 %5474 }
 0x7a3   : > { %v12738_v27 = vpop.permute.xlu1 %5499  ;;  %v5817_v52 = vadd.f32 %v5816_v33, %v5665_v5  ;;  %v7624_v5 = vld [vmem:[%s8111_s27 + $0x2d8] sm:$0xff] }
 0x7a4   : > { %v5834_v0 = vadd.f32 %v5833_v10, %v5677_v59  ;;  %v7620_v59 = vld [vmem:[%s8111_s27 + $0x340] sm:$0xff]  ;;  %v6372_v23 = vsel %vm2511_vm2, %v6371_v37, %v6367_v31  ;;  %v6391_v37 = vrot.slane %v12674_v55, %v14019_v21  ;;  %v7625_v31 = vld [vmem:[%s8111_s27 + $0x350] sm:$0xff] }
 0x7a5   : > { %v5681_v10 = vmul.f32 %v7620_v59, %v12725_v32  ;;  %v6377_v26 = vsel %vm2518_vm3, %v6376_v7, %v6372_v23  ;;  %v5818_v2 = vadd.f32 %v5817_v52, %v5666_v38  ;;  %v7627_v38 = vld [vmem:[%s8111_s27 + $0x388] sm:$0xff]  ;;  %v6396_v23 = vrot.slane %v12691_v43, %v14020_v35 }
 0x7a6   : > { %v5835_v36 = vadd.f32 %v5834_v0, %v5678_v45  ;;  %v6381_v45 = vrot.slane %v5435_v53, %v14016_v13  ;;  %v6386_v53 = vrot.slane %v12634_v51, %v14018_v1  ;;  %v5668_v51 = vmul.f32 %v7624_v5, %v12689_v47  ;;  %v7628_v47 = vld [vmem:[%s8111_s27 + $0x390] sm:$0xff]  ;;  %v7632_v5 = vld [vmem:[%s8111_s27 + $0x360] sm:$0xff] }
 0x7a7   : > { %v12746_v62 = vpop.permute.xlu1 %5509  ;;  %v5690_v55 = vmul.f32 %v7627_v38, %v12648_v30  ;;  %v6401_v43 = vrot.slane %v12706_v50, %v14022_v42  ;;  %v7634_v38 = vld [vmem:[%s8111_s27 + $0x3a0] sm:$0xff] }
 0x7a8   : > { %v5836_v22 = vadd.f32 %v5835_v36, %v5679_v41  ;;  %v6382_v41 = vsel %vm2525_vm4, %v6381_v45, %v6377_v26  ;;  %v5667_v36 = vmul.f32 %v7623_v46, %v12571_v25  ;;  %v5683_v25 = vmul.f32 %v7625_v31, %v12748_v3 }
 0x7a9   : > { %v6387_v33 = vsel %vm14298_vm13, %v6386_v53, %v6382_v41  ;;  %v5691_v45 = vmul.f32 %v7628_v47, %v12746_v62  ;;  %v7630_v41 = vld [vmem:[%s8111_s27 + $0x2e0] sm:$0xff] }
 0x7aa   : > { %v5837_v17 = vadd.f32 %v5836_v22, %v5680_v60  ;;  %v12781_v60 = vpop.permute.xlu0 %5479  ;;  %v5819_v20 = vadd.f32 %v5818_v2, %v5667_v36  ;;  %v5669_v53 = vmul.f32 %v7630_v41, %v12581_v19  ;;  %v7633_v19 = vld [vmem:[%s8111_s27 + $0x398] sm:$0xff] }
 0x7ab   : > { %v12757_v63 = vpop.permute.xlu1 %5519  ;;  %v5692_v50 = vmul.f32 %v7633_v19, %v12657_v11 }
 0x7ac   : > { %v5838_v0 = vadd.f32 %v5837_v17, %v5681_v10  ;;  %v7626_v17 = vld [vmem:[%s8111_s27 + $0x380] sm:$0xff]  ;;  %v6392_v10 = vsel %vm2539_vm6, %v6391_v37, %v6387_v33  ;;  %v5820_v7 = vadd.f32 %v5819_v20, %v5668_v51  ;;  %v7631_v37 = vld [vmem:[%s8111_s27 + $0x2e8] sm:$0xff]  ;;  %v5685_v51 = vmul.f32 %v7632_v5, %v12781_v60  ;;  %v7640_v5 = vld [vmem:[%s8111_s27 + $0x370] sm:$0xff] }
 0x7ad   : > { %v5689_v59 = vmul.f32 %v7626_v17, %v12738_v27  ;;  %v6397_v57 = vsel %vm2546_vm7, %v6396_v23, %v6392_v10  ;;  %v5670_v20 = vmul.f32 %v7631_v37, %v12701_v58  ;;  %v6411_v23 = vrot.slane %v12734_v4, %v14025_v28  ;;  %v7639_v37 = vld [vmem:[%s8111_s27 + $0x2f8] sm:$0xff] }
 0x7ae   : > { %v5839_v22 = vadd.f32 %v5838_v0, %v5682_v40  ;;  %v7629_v0 = vld [vmem:[%s8111_s27 + $0x358] sm:$0xff]  ;;  %v12803_v2 = vpop.permute.xlu0 %5484  ;;  %v5821_v33 = vadd.f32 %v5820_v7, %v5669_v53  ;;  %v6402_v31 = vsel %vm2553_vm8, %v6401_v43, %v6397_v57  ;;  %v7636_v7 = vld [vmem:[%s8111_s27 + $0x3a8] sm:$0xff]  ;;  %v6416_v4 = vrot.slane %v12748_v3, %v14028_v9 }
 0x7af   : > { %v12769_v15 = vpop.permute.xlu1 %5524  ;;  %v5684_v26 = vmul.f32 %v7629_v0, %v12767_v34  ;;  %v5852_v40 = vadd.f32 %v5690_v55, %v5689_v59  ;;  %v5693_v55 = vmul.f32 %v7634_v38, %v12757_v63  ;;  %v6450_v38 = vrot.slane %v12648_v30, %v14012_v54 }
 0x7b0   : > { %v5840_v52 = vadd.f32 %v5839_v22, %v5683_v25  ;;  %v6406_v25 = vrot.slane %v12725_v32, %v14023_v44  ;;  %v5822_v47 = vadd.f32 %v5821_v33, %v5670_v20  ;;  %v5694_v0 = vmul.f32 %v7636_v7, %v12769_v15  ;;  %v7644_v7 = vld [vmem:[%s8111_s27 + $0x3c8] sm:$0xff] }
 0x7b1   : > { %v5853_v22 = vadd.f32 %v5852_v40, %v5691_v45  ;;  %v7635_v45 = vld [vmem:[%s8111_s27 + $0x368] sm:$0xff]  ;;  %v5672_v20 = vmul.f32 %v7639_v37, %v12711_v49  ;;  %v6460_v30 = vrot.slane %v12657_v11, %v14016_v13  ;;  %v6431_v13 = vrot.slane %v12803_v2, %v14033_v12  ;;  %v7646_v37 = vld [vmem:[%s8111_s27 + $0x3d8] sm:$0xff] }
 0x7b2   : > { %v5841_v46 = vadd.f32 %v5840_v52, %v5684_v26  ;;  %v6407_v10 = vsel %vm2560_vm9, %v6406_v25, %v6402_v31  ;;  %v12824_v58 = vpop.permute.xlu0 %5489  ;;  %v5686_v32 = vmul.f32 %v7635_v45, %v12803_v2  ;;  %v7637_v26 = vld [vmem:[%s8111_s27 + $0x2f0] sm:$0xff]  ;;  %v6446_v31 = vrot.slane %v12738_v27, %v14013_v8  ;;  %v7642_v27 = vld [vmem:[%s8111_s27 + $0x3c0] sm:$0xff]  ;;  %v7643_v45 = vld [vmem:[%s8111_s27 + $0x378] sm:$0xff] }
 0x7b3   : > { %v12779_v56 = vpop.permute.xlu1 %5529  ;;  %v5854_v52 = vadd.f32 %v5853_v22, %v5692_v50  ;;  %v5671_v57 = vmul.f32 %v7637_v26, %v12591_v29  ;;  %v6412_v41 = vsel %vm2567_vm10, %v6411_v23, %v6407_v10  ;;  %v5687_v29 = vmul.f32 %v7640_v5, %v12824_v58  ;;  %v7641_v50 = vld [vmem:[%s8111_s27 + $0x3b8] sm:$0xff] }
 0x7b4   : > { %v5842_v17 = vadd.f32 %v5841_v46, %v5685_v51  ;;  %v7638_v46 = vld [vmem:[%s8111_s27 + $0x3b0] sm:$0xff]  ;;  %v6417_v51 = vsel %vm14294_vm11, %v6416_v4, %v6412_v41  ;;  %v6455_v10 = vrot.slane %v12746_v62, %v14014_v16  ;;  %v6451_v16 = vsel %vm2511_vm2, %v6450_v38, %v6446_v31  ;;  %vm14299_vm2 = vmmov %vm14296_vm1 }
 0x7b5   : > { %v5855_v43 = vadd.f32 %v5854_v52, %v5693_v55  ;;  %v5695_v22 = vmul.f32 %v7638_v46, %v12779_v56  ;;  %v5823_v33 = vadd.f32 %v5822_v47, %v5671_v57  ;;  %v6465_v57 = vrot.slane %v12757_v63, %v14018_v1 }
 0x7b6   : > { %v5843_v40 = vadd.f32 %v5842_v17, %v5686_v32  ;;  %v12850_v19 = vpop.permute.xlu0 %5494  ;;  %v6421_v17 = vrot.slane %v12767_v34, %v14027_v14  ;;  %v6426_v32 = vrot.slane %v12781_v60, %v14030_v18  ;;  %v6456_v26 = vsel %vm2518_vm3, %v6455_v10, %v6451_v16  ;;  %vm14300_vm3 = vmmov %vm14298_vm13 }
 0x7b7   : > { %v12793_v24 = vpop.permute.xlu1 %5534  ;;  %v5856_v3 = vadd.f32 %v5855_v43, %v5694_v0  ;;  %v5824_v23 = vadd.f32 %v5823_v33, %v5672_v20  ;;  %v5688_v34 = vmul.f32 %v7643_v45, %v12850_v19  ;;  %v6470_v60 = vrot.slane %v12769_v15, %v14019_v21  ;;  %v7645_v43 = vld [vmem:[%s8111_s27 + $0x3d0] sm:$0xff] }
 0x7b8   : > { %v5696_v25 = vmul.f32 %v7641_v50, %v12793_v24  ;;  %v5844_v49 = vadd.f32 %v5843_v40, %v5687_v29  ;;  %v6422_v47 = vsel %vm2581_vm12, %v6421_v17, %v6417_v51  ;;  %v6475_v11 = vrot.slane %v12779_v56, %v14020_v35 }
 0x7b9   : > { %v5857_v8 = vadd.f32 %v5856_v3, %v5695_v22  ;;  %v6427_v41 = vsel %vm14295_vm14, %v6426_v32, %v6422_v47  ;;  %v5825_v22 = vrot.slane %v5824_v23, 4  ;;  %v6461_v1 = vsel %vm2525_vm4, %v6460_v30, %v6456_v26  ;;  %vm14301_vm4 = vmmov %vm14294_vm11 }
 0x7ba   : > { %v5845_v0 = vadd.f32 %v5844_v49, %v5688_v34  ;;  %v6480_v63 = vrot.slane %v12793_v24, %v14022_v42  ;;  %v6432_v15 = vsel %vm14299_vm2, %v6431_v13, %v6427_v41  ;;  %v6466_v5 = vsel %vm14300_vm3, %v6465_v57, %v6461_v1  ;;  %v7647_v24 = vld [vmem:[%s8111_s27 + $0x3e0] sm:$0xff] }
 0x7bb   : > { %v12810_v36 = vpop.permute.xlu1 %5539  ;;  %v5858_v62 = vadd.f32 %v5857_v8, %v5696_v25  ;;  %v6471_v35 = vsel %vm2539_vm6, %v6470_v60, %v6466_v5  ;;  %v5826_v31 = vadd.f32 %v5825_v22, %v5824_v23  ;;  %v6436_v3 = vrot.slane %v12824_v58, %v14035_v6  ;;  %vm14302_vm6 = vmmov %vm14295_vm14 }
 0x7bc   : > { %v5697_v55 = vmul.f32 %v7642_v27, %v12810_v36  ;;  %v5846_v20 = vrot.slane %v5845_v0, 4  ;;  %v6485_v2 = vrot.slane %v12810_v36, %v14023_v44  ;;  %v6476_v50 = vsel %vm2546_vm7, %v6475_v11, %v6471_v35  ;;  %vm14303_vm7 = vmmov %vm14296_vm1 }
 0x7bd   : > { %v6481_v44 = vsel %vm2553_vm8, %v6480_v63, %v6476_v50  ;;  %v6437_v49 = vsel %vm2602_vm15, %v6436_v3, %v6432_v15  ;;  %v5827_v45 = vrot.slane %v5826_v31, 2  ;;  %vm14304_vm8 = vcmask 1046534  }
 0x7be   : > { %v5859_v4 = vadd.f32 %v5858_v62, %v5697_v55  ;;  %v5847_v10 = vadd.f32 %v5846_v20, %v5845_v0  ;;  %v6486_v38 = vsel %vm2560_vm9, %v6485_v2, %v6481_v44  ;;  %v7649_v55 = vld [vmem:[%s8111_s27 + $0x3f0] sm:$0xff]  ;;  %vm14305_vm9 = vcmask 1047559  }
 0x7bf   : > { %v12821_v59 = vpop.permute.xlu1 %5544  ;;  %v5828_v26 = vadd.f32 %v5827_v45, %v5826_v31 }
 0x7c0   : > { %v5698_v54 = vmul.f32 %v7644_v7, %v12821_v59  ;;  %v6490_v56 = vrot.slane %v12821_v59, %v14025_v28  ;;  %v7648_v28 = vld [vmem:[%s8111_s27 + $0x3e8] sm:$0xff]  ;;  %v5848_v32 = vrot.slane %v5847_v10, 2 }
 0x7c2   : > { %v5860_v33 = vadd.f32 %v5859_v4, %v5698_v54  ;;  %v6491_v27 = vsel %vm2567_vm10, %v6490_v56, %v6486_v38  ;;  %v7650_v54 = vld [vmem:[%s8111_s27 + $0x3f8] sm:$0xff]  ;;  %s6537_s27 = scalar_lea.sflag [#allocation13], %s8107_s15 }
 0x7c3   : > { %v12837_v53 = vpop.permute.xlu1 %5549 }
 0x7c4   : > { %v5699_v46 = vmul.f32 %v7645_v43, %v12837_v53  ;;  %v6495_v25 = vrot.slane %v12837_v53, %v14028_v9 }
 0x7c6   : > { %v5861_v42 = vadd.f32 %v5860_v33, %v5699_v46 }
 0x7c7   : > { %v12858_v52 = vpop.permute.xlu1 %5554 }
 0x7c8   : > { %v5700_v21 = vmul.f32 %v7646_v37, %v12858_v52  ;;  %v6500_v17 = vrot.slane %v12858_v52, %v14027_v14  ;;  %v6441_v14 = vrot.slane %v12850_v19, %v14042_v61  ;;  %v6496_v52 = vsel %vm14301_vm4, %v6495_v25, %v6491_v27 }
 0x7ca   : > { %v5862_v36 = vadd.f32 %v5861_v42, %v5700_v21  ;;  %v6442_v16 = vsel %vm2609_vm0, %v6441_v14, %v6437_v49 }
 0x7cb   : > { %v5560_v40 = vpop.permute.xlu1 %5559  ;;  %v6527_v57 = vsel %vm14304_vm8, %v6442_v16, %v12721_v48 }
 0x7cc   : > { %v5701_v51 = vmul.f32 %v7647_v24, %v5560_v40  ;;  %v6505_v58 = vrot.slane %v5560_v40, %v14030_v18  ;;  %v6501_v18 = vsel %vm2581_vm12, %v6500_v17, %v6496_v52 }
 0x7ce   : > { %v5863_v9 = vadd.f32 %v5862_v36, %v5701_v51 }
 0x7cf   : > { %v5565_v29 = vpop.permute.xlu1 %5564 }
 0x7d0   : > { %v5702_v59 = vmul.f32 %v7648_v28, %v5565_v29  ;;  %v6510_v53 = vrot.slane %v5565_v29, %v14033_v12  ;;  %v6506_v12 = vsel %vm14302_vm6, %v6505_v58, %v6501_v18 }
 0x7d2   : > { %v5864_v34 = vadd.f32 %v5863_v9, %v5702_v59  ;;  %v6511_v19 = vsel %vm14303_vm7, %v6510_v53, %v6506_v12 }
 0x7d3   : > { %v5570_v8 = vpop.permute.xlu1 %5569 }
 0x7d4   : > { %v5703_v23 = vmul.f32 %v7649_v55, %v5570_v8  ;;  %v6515_v47 = vrot.slane %v5570_v8, %v14035_v6 }
 0x7d6   : > { %v5865_v7 = vadd.f32 %v5864_v34, %v5703_v23  ;;  %v6516_v0 = vsel %vm2602_vm15, %v6515_v47, %v6511_v19 }
 0x7d7   : > { %v5575_v62 = vpop.permute.xlu1 %5574 }
 0x7d8   : > { %v5704_v6 = vmul.f32 %v7650_v54, %v5575_v62  ;;  %v6520_v30 = vrot.slane %v5575_v62, %v14042_v61  ;;  %v5849_v61 = vadd.f32 %v5848_v32, %v5847_v10 }
 0x7da   : > { %v5866_v40 = vadd.f32 %v5865_v7, %v5704_v6  ;;  %v6521_v41 = vsel %vm2609_vm0, %v6520_v30, %v6516_v0 }
 0x7db   : > { %v6528_v60 = vsel %vm14305_vm9, %v6521_v41, %v6527_v57 }
 0x7dc   : > { %v5867_v4 = vrot.slane %v5866_v40, 4  ;;  %6530 = vst [vmem:[%s429_s10] sm:$0xff] %v6528_v60 }
 0x7dd   : > { %7772 = shalt.err (!%p7769_p4)
}
 0x7de   : > { %s7773_s30 = scalar_lea.hbm %s12935_s18, 128  ;;  %s7777_s24 = scalar_lea.hbm %s13017_s9, 256 }
 0x7df   : > { %p7774_p6 = scmp.ne.s32.totalorder %s12935_s18, %s7773_s30  ;;  %p7778_p2 = scmp.lt.s32.totalorder %s12935_s18, %s13017_s9 }
 0x7e0   : > { %p7779_p5 = scmp.lt.s32.totalorder %s7777_s24, %s7773_s30 }
 0x7e1   : > { %p7775_p7 = pnand %p7774_p6, %p14306_p10 }
 0x7e2   : > { %p7780_p12 = por %p7779_p5, %p7778_p2 }
 0x7e3   : > { %p7776_p8 = pneg %p7775_p7 }
 0x7e5   : > { %p7781_p0 = pnand %p7780_p12, %p7776_p8 }
 0x7e7   : > { %7784 = shalt.err (!%p7781_p0)
}
 0x7e8   : > { %7178 = dma.vmem_to_hbm [thread:$0]  (%p14306_p10), %s12937_s25, 128, %s12935_s18, %s6537_s27   ;;  %v5829_v48 = vrot.slane %v5828_v26, 1  ;;  %v5868_v43 = vadd.f32 %v5867_v4, %v5866_v40  ;;  %v5850_v46 = vrot.slane %v5849_v61, 1  ;;  %vm14307_vm10 = vmmov %vm14297_vm5 }
 0x7e9   : > { %s422_s10 = scalar_lea.vmem [#allocation11], %s8119_s13  ;;  %vm14308_vm12 = vmmov %vm14304_vm8  ;;  %s12970_s18 = scalar_lea.hbm %s13016_s8, %s6731_s29 }
 0x7ea   : > { %v5869_v22 = vrot.slane %v5868_v43, 2  ;;  %v5830_v13 = vadd.f32 %v5829_v48, %v5828_v26  ;;  %v5851_v1 = vadd.f32 %v5850_v46, %v5849_v61  ;;  %s6550_s23 = sshll.u32 %s422_s10, 4  ;;  %vm14309_vm15 = vmmov %vm14305_vm9  ;;  %s6532_s27 = scalar_lea.sflag [#allocation5], %s8107_s15  ;;  %s6551_s23 = int_to_ptr.vmem [resolvable:$true] %s6550_s23 }
 0x7eb   : > { %s7785_s19 = scalar_lea.vmem %s6551_s23, 128  ;;  %s7878_s13 = smov [#allocation11]  }
 0x7ec   : > { %v5870_v11 = vadd.f32 %v5869_v22, %v5868_v43  ;;  %v5885_v37 = vsel %vm14307_vm10, %v5830_v13, %v12668_v39  ;;  %p7786_p3 = scmp.ne.s32.totalorder %s6551_s23, %s7785_s19  ;;  %s7789_s16 = sshll.u32 %s7878_s13, 4  ;;  %s7790_s16 = int_to_ptr.vmem [resolvable:$false] %s7789_s16 }
 0x7ed   : > { %v5886_v21 = vsel %vm14308_vm12, %v5851_v1, %v5885_v37  ;;  %s7791_s26 = scalar_lea.vmem %s7790_s16, 256  ;;  %p7792_p13 = scmp.lt.s32.totalorder %s6551_s23, %s7790_s16 }
 0x7ee   : > { %v5871_v63 = vrot.slane %v5870_v11, 1  ;;  %p7787_p11 = pnand %p7786_p3, %p14306_p10  ;;  %p7793_p1 = scmp.lt.s32.totalorder %s7791_s26, %s7785_s19 }
 0x7f0   : > { %v5872_v33 = vadd.f32 %v5871_v63, %v5870_v11  ;;  %p7788_p9 = pneg %p7787_p11  ;;  %p7794_p4 = por %p7793_p1, %p7792_p13 }
 0x7f2   : > { %v5887_v15 = vsel %vm14309_vm15, %v5872_v33, %v5886_v21  ;;  %p7795_p6 = pnand %p7794_p4, %p7788_p9 }
 0x7f3   : > { %5889 = vst [vmem:[%s422_s10] sm:$0xff] %v5887_v15 }
 0x7f4   : > { %7798 = shalt.err (!%p7795_p6)
}
 0x7f5   : > { %s7799_s7 = scalar_lea.hbm %s12970_s18, 128  ;;  %s7803_s2 = scalar_lea.hbm %s13016_s8, 256 }
 0x7f6   : > { %p7800_p7 = scmp.ne.s32.totalorder %s12970_s18, %s7799_s7  ;;  %p7804_p5 = scmp.lt.s32.totalorder %s12970_s18, %s13016_s8 }
 0x7f7   : > { %p7805_p12 = scmp.lt.s32.totalorder %s7803_s2, %s7799_s7 }
 0x7f8   : > { %p7801_p8 = pnand %p7800_p7, %p14306_p10 }
 0x7f9   : > { %p7806_p0 = por %p7805_p12, %p7804_p5 }
 0x7fa   : > { %p7802_p2 = pneg %p7801_p8 }
 0x7fc   : > { %p7807_p3 = pnand %p7806_p0, %p7802_p2 }
 0x7fe   : > { %7810 = shalt.err (!%p7807_p3)
}
 0x7ff   : > { %7177 = dma.vmem_to_hbm [thread:$0]  (%p14306_p10), %s6551_s23, 128, %s12970_s18, %s6532_s27  }
 0x800 PF: > { %s6575_s4 = sand.u32 1, %s7853_s11   ;;  %p14310_p11 = scmp.ne.s32.totalorder %s13320_s17, 0 }
 0x801   : > { %p14311_p9 = scmp.ge.s32.totalorder %s7865_s14, 2  ;;  %s6576_s24 = scalar_lea.sflag [#allocation5], %s6575_s4 }
 0x803   : > { %p7196_p13 = pnand %p14311_p9, %p14310_p11 }
 0x805   : > { %p7197_p1 = pneg %p7196_p13 }
 0x807   : > { %7844 = dma.done.wait (%p7197_p1), %s6576_s24, 128  }
 0x808   : > { %7846 = vsyncadd (%p7197_p1), %s6576_s24, 4294967168  ;;  %s6585_s28 = scalar_lea.sflag [#allocation13], %s6575_s4 }
 0x809   : > { %7848 = dma.done.wait (%p7197_p1), %s6585_s28, 128  }
 0x80a   : > { %7850 = vsyncadd (%p7197_p1), %s6585_s28, 4294967168  ;;  %s14312_s14 = sld [smem:[#allocation21_spill]]  ;;  %s14315_s11 = smov %s7857_s12 }
 0x80b   : > { %s14313_s21 = sld [smem:[#allocation20_spill]] }
 0x80c   : > { %s14314_s13 = sld [smem:[#allocation22_spill]] }
 0x810   : > { %p31_p10 = scmp.ge.s32.totalorder %s14312_s14, 4  }
 0x811   : > { %s14316_s12 = smov %s14313_s21 }
 0x812   :  { %33 = sbr.rel (!%p31_p10) target bundleno = 15 (0xf), region = 135 }
 0x817   :  { %6590 = vsyncpa [#allocation4], 1 }
 0x818   :  { %6592 = vsyncpa [#allocation4 + $0x1], 1 }
 0x819   :  { %6593 = vsyncpa [#allocation7], 1 }
 0x81a   :  { %6595 = vsyncpa [#allocation7 + $0x1], 1 }
 0x81b   :  { %6596 = vsyncpa [#allocation10], 1 }
 0x81c   :  { %6597 = vsyncpa [#allocation5], 1 }
 0x81d   :  { %6599 = vsyncpa [#allocation5 + $0x1], 1 }
 0x81e   :  { %6600 = vsyncpa [#allocation13], 1 }
 0x81f   :  { %6602 = vsyncpa [#allocation13 + $0x1], 1 }

</bundles_post_ra>
